<compile_context>
chip_gen: v6e
topology: v6e:2x2x1
jax: 0.10.0
libtpu: 0.0.40
codegen_flags: <defaults>
</compile_context>

<pallas_src>
import functools

import jax
import jax.numpy as jnp
from jax.experimental import pallas as pl
from jax.experimental.pallas import tpu as pltpu

HIDDEN_DIMS = [32, 64, 128, 256, 512]
BN_EPS = 1e-5
LRELU_SLOPE = 0.01


# ---------------------------------------------------------------------------
# Fused kernel: 5 x (conv-as-matmul + BN(train) + LeakyReLU) + fc_mu|fc_var + z
# ---------------------------------------------------------------------------
def fused_encoder_kernel(*refs, num_layers, latent_dim):
    # refs layout:
    #   [0]                      x:       (N, 4*Cin0)   NCHW-flattened input
    #   [1+3l .. 3+3l]           layer l: W (4*Cin, 4*Cout), gamma (1,C), beta (1,C)
    #   [1+3L], [2+3L], [3+3L]   w_head (2048, 2*latent), b_head (1, 2*latent), eps (N, latent)
    #   last three               outputs: mu, logvar, z  (N, latent)
    x_ref = refs[0]
    w_head_ref, b_head_ref, eps_ref = refs[1 + 3 * num_layers: 4 + 3 * num_layers]
    mu_ref, logvar_ref, z_ref = refs[4 + 3 * num_layers:]

    act = x_ref[...]
    n = act.shape[0]
    inv_cnt = 1.0 / (4.0 * n)   # BN statistics are over N * H * W = 4N values

    for l in range(num_layers):
        w_ref = refs[1 + 3 * l]
        gamma_ref = refs[2 + 3 * l]
        beta_ref = refs[3 + 3 * l]
        c = gamma_ref.shape[-1]

        # Conv2d(3x3, s=1, p=1) on the fixed 2x2 grid == one matmul with a
        # (4*Cin, 4*Cout) weight expanded at init time.  The conv bias is
        # omitted: it cancels exactly under training-mode BatchNorm.
        y = jnp.dot(act, w_ref[...], preferred_element_type=jnp.float32)  # (N, 4*C)

        # BatchNorm2d (training-mode batch stats), single pass.
        # Column order is (spatial, channel): channel c lives at s*C + c.
        s1 = jnp.sum(y, axis=0, keepdims=True)        # (1, 4*C)
        s2 = jnp.sum(y * y, axis=0, keepdims=True)    # (1, 4*C)
        cs1 = s1[:, 0:c] + s1[:, c:2 * c] + s1[:, 2 * c:3 * c] + s1[:, 3 * c:4 * c]
        cs2 = s2[:, 0:c] + s2[:, c:2 * c] + s2[:, 2 * c:3 * c] + s2[:, 3 * c:4 * c]
        mean = cs1 * inv_cnt
        var = cs2 * inv_cnt - mean * mean
        scale = gamma_ref[...] * jax.lax.rsqrt(var + BN_EPS)   # (1, C)
        shift = beta_ref[...] - mean * scale                   # (1, C)
        scale4 = jnp.concatenate([scale, scale, scale, scale], axis=1)  # (1, 4*C)
        shift4 = jnp.concatenate([shift, shift, shift, shift], axis=1)
        y = y * scale4 + shift4

        # LeakyReLU (default negative_slope = 0.01)
        act = jnp.where(y >= 0, y, LRELU_SLOPE * y)

    # Fused fc_mu | fc_var heads + reparameterize.
    logits = jnp.dot(act, w_head_ref[...], preferred_element_type=jnp.float32)
    logits = logits + b_head_ref[...]
    mu = logits[:, :latent_dim]
    logvar = logits[:, latent_dim:2 * latent_dim]
    z = eps_ref[...] * jnp.exp(0.5 * logvar) + mu
    mu_ref[...] = mu
    logvar_ref[...] = logvar
    z_ref[...] = z


def smooth_mlp_mixer_forward(kparams, x_nchw, eps):
    """x_nchw: (N, C, H, W) like PyTorch.  Returns (mu, log_var, z)."""
    n = x_nchw.shape[0]
    latent_dim = kparams["b_head"].shape[-1] // 2
    # NCHW flatten (pure reshape, no transpose): the first layer's expanded
    # weight already accepts the (c, h, w) column order.
    x_flat = x_nchw.reshape(n, -1).astype(jnp.float32)

    inputs = [x_flat]
    for (w, g, b) in kparams["layers"]:
        inputs += [w, g, b]
    inputs += [kparams["w_head"], kparams["b_head"], eps]

    vmem = pl.BlockSpec(memory_space=pltpu.MemorySpace.VMEM)
    out = jax.ShapeDtypeStruct((n, latent_dim), jnp.float32)
    kernel = functools.partial(
        fused_encoder_kernel,
        num_layers=len(kparams["layers"]),
        latent_dim=latent_dim,
    )
    return pl.pallas_call(
        kernel,
        out_shape=(out, out, out),
        in_specs=[vmem] * len(inputs),
        out_specs=(vmem, vmem, vmem),
        compiler_params=pltpu.CompilerParams(vmem_limit_bytes=32 * 1024 * 1024),
    )(*inputs)


# ---------------------------------------------------------------------------
# Parameter setup (deterministic, synthetic) and trace-time weight expansion
# ---------------------------------------------------------------------------
def init_params(key, in_channels, latent_dim):
    params = {"conv": []}
    c_in = in_channels
    for h in HIDDEN_DIMS:
        key, k1, k2, k3, k4 = jax.random.split(key, 5)
        w = 0.05 * jax.random.normal(k1, (9, c_in, h), jnp.float32)   # (3*3, Cin, Cout)
        b = 0.01 * jax.random.normal(k2, (h,), jnp.float32)
        gamma = 1.0 + 0.1 * jax.random.normal(k3, (h,), jnp.float32)
        beta = 0.1 * jax.random.normal(k4, (h,), jnp.float32)
        params["conv"].append((w, b, gamma, beta))
        c_in = h
    feat = HIDDEN_DIMS[-1] * 4
    key, k1, k2, k3, k4 = jax.random.split(key, 5)
    params["wmu"] = 0.02 * jax.random.normal(k1, (feat, latent_dim), jnp.float32)
    params["bmu"] = 0.01 * jax.random.normal(k2, (latent_dim,), jnp.float32)
    params["wvar"] = 0.02 * jax.random.normal(k3, (feat, latent_dim), jnp.float32)
    params["bvar"] = 0.01 * jax.random.normal(k4, (latent_dim,), jnp.float32)
    return params


def expand_conv_weight(w_tap, input_order):
    """(9, Cin, Cout) 3x3 taps -> exact (4*Cin, 4*Cout) linear map on a 2x2 grid.

    Output column order is (ho, wo, co).  Input row order is (hi, wi, ci) for
    "hwc" (inter-layer activations) or (ci, hi, wi) for "chw" (the NCHW-flattened
    network input).
    """
    cin, cout = w_tap.shape[1], w_tap.shape[2]
    if input_order == "hwc":
        w6 = jnp.zeros((2, 2, cin, 2, 2, cout), jnp.float32)   # [hi,wi,ci, ho,wo,co]
    else:  # "chw"
        w6 = jnp.zeros((cin, 2, 2, 2, 2, cout), jnp.float32)   # [ci,hi,wi, ho,wo,co]
    for ho in range(2):
        for wo in range(2):
            for ky in range(3):
                for kx in range(3):
                    hi, wi = ho + ky - 1, wo + kx - 1
                    if 0 <= hi < 2 and 0 <= wi < 2:
                        blk = w_tap[ky * 3 + kx]   # (Cin, Cout)
                        if input_order == "hwc":
                            w6 = w6.at[hi, wi, :, ho, wo, :].set(blk)
                        else:
                            w6 = w6.at[:, hi, wi, ho, wo, :].set(blk)
    return w6.reshape(4 * cin, 4 * cout)


def prepare_kernel_params(params, latent_dim):
    layers = []
    for i, (w, b, gamma, beta) in enumerate(params["conv"]):
        order = "chw" if i == 0 else "hwc"
        w_big = expand_conv_weight(w, order)
        # conv bias `b` is intentionally dropped: training-mode BN mean
        # subtraction cancels it exactly.
        layers.append((w_big, gamma.reshape(1, -1), beta.reshape(1, -1)))
    c_last = params["conv"][-1][0].shape[-1]

    # Permute fc rows from the PyTorch NCHW flatten order (c, h, w) to the
    # kernel's (h, w, c) activation order, and fuse fc_mu|fc_var.
    def permute(wh):
        return wh.reshape(c_last, 4, latent_dim).transpose(1, 0, 2).reshape(4 * c_last, latent_dim)

    w_head = jnp.concatenate([permute(params["wmu"]), permute(params["wvar"])], axis=1)
    b_head = jnp.concatenate([params["bmu"], params["bvar"]]).reshape(1, -1)
    return {"layers": layers, "w_head": w_head, "b_head": b_head}


# ---------------------------------------------------------------------------
# Pure-JAX reference (faithful to the PyTorch module) for correctness check
# ---------------------------------------------------------------------------
def reference_forward(params, x_nchw, eps):
    x = jnp.transpose(x_nchw, (0, 2, 3, 1)).astype(jnp.float32)   # NHWC
    for (w, b, gamma, beta) in params["conv"]:
        N, H, W, Cin = x.shape
        Cout = w.shape[-1]
        xp = jnp.pad(x, ((0, 0), (1, 1), (1, 1), (0, 0)))
        acc = jnp.zeros((N, H, W, Cout), jnp.float32)
        for ky in range(3):
            for kx in range(3):
                acc += jnp.einsum("nhwc,cd->nhwd",
                                  xp[:, ky:ky + H, kx:kx + W, :], w[ky * 3 + kx])
        acc += b
        a2 = acc.reshape(-1, Cout)
        mean = a2.mean(0)
        var = ((a2 - mean) ** 2).mean(0)
        y = (acc - mean) * jax.lax.rsqrt(var + BN_EPS) * gamma + beta
        x = jnp.where(y >= 0, y, LRELU_SLOPE * y)
    N = x.shape[0]
    flat = jnp.transpose(x, (0, 3, 1, 2)).reshape(N, -1)   # NCHW flatten
    mu = flat @ params["wmu"] + params["bmu"]
    log_var = flat @ params["wvar"] + params["bvar"]
    z = eps * jnp.exp(0.5 * log_var) + mu
    return mu, log_var, z


if __name__ == "__main__":
    key = jax.random.PRNGKey(0)
    k_param, k_x, k_eps = jax.random.split(key, 3)

    batch, in_channels, latent_dim = 2, 3, 16
    # spatial must be 2x2: stride-1 convs preserve H,W and fc_mu expects 512*4 features.
    H = W = 2
    x = jax.random.normal(k_x, (batch, in_channels, H, W), jnp.float32)
    eps = jax.random.normal(k_eps, (batch, latent_dim), jnp.float32)

    params = init_params(k_param, in_channels, latent_dim)
    kparams = prepare_kernel_params(params, latent_dim)

    forward = jax.jit(smooth_mlp_mixer_forward)
    mu, log_var, z = forward(kparams, x, eps)
    jax.block_until_ready((mu, log_var, z))

    mu_r, lv_r, z_r = reference_forward(params, x, eps)
    # Slightly looser tolerance than before: one-pass BN stats, fused conv
    # matmul summation order, and dropped (mathematically cancelled) conv bias.
    assert jnp.allclose(mu, mu_r, atol=1e-3, rtol=1e-3)
    assert jnp.allclose(log_var, lv_r, atol=1e-3, rtol=1e-3)
    assert jnp.allclose(z, z_r, atol=1e-3, rtol=1e-3)

    print("KERNEL_OK")
</pallas_src>

<mosaic_0001>
module attributes {stable_mosaic.version = 11 : i64} {
  func.func @fused_encoder_kernel(%arg0: memref<2x12xf32, #tpu.memory_space<vmem>>, %arg1: memref<12x128xf32, #tpu.memory_space<vmem>>, %arg2: memref<1x32xf32, #tpu.memory_space<vmem>>, %arg3: memref<1x32xf32, #tpu.memory_space<vmem>>, %arg4: memref<128x256xf32, #tpu.memory_space<vmem>>, %arg5: memref<1x64xf32, #tpu.memory_space<vmem>>, %arg6: memref<1x64xf32, #tpu.memory_space<vmem>>, %arg7: memref<256x512xf32, #tpu.memory_space<vmem>>, %arg8: memref<1x128xf32, #tpu.memory_space<vmem>>, %arg9: memref<1x128xf32, #tpu.memory_space<vmem>>, %arg10: memref<512x1024xf32, #tpu.memory_space<vmem>>, %arg11: memref<1x256xf32, #tpu.memory_space<vmem>>, %arg12: memref<1x256xf32, #tpu.memory_space<vmem>>, %arg13: memref<1024x2048xf32, #tpu.memory_space<vmem>>, %arg14: memref<1x512xf32, #tpu.memory_space<vmem>>, %arg15: memref<1x512xf32, #tpu.memory_space<vmem>>, %arg16: memref<2048x32xf32, #tpu.memory_space<vmem>>, %arg17: memref<1x32xf32, #tpu.memory_space<vmem>>, %arg18: memref<2x16xf32, #tpu.memory_space<vmem>>, %arg19: memref<2x16xf32, #tpu.memory_space<vmem>>, %arg20: memref<2x16xf32, #tpu.memory_space<vmem>>, %arg21: memref<2x16xf32, #tpu.memory_space<vmem>>) attributes {dimension_semantics = [], scalar_prefetch = 0 : i64, scratch_operands = 0 : i64, tpu.core_type = #tpu.core_type<tc>} {
    %c0 = arith.constant 0 : index
    %c0_0 = arith.constant 0 : index
    %0 = vector.load %arg0[%c0, %c0_0] : memref<2x12xf32, #tpu.memory_space<vmem>>, vector<2x12xf32>
    %c0_1 = arith.constant 0 : index
    %c0_2 = arith.constant 0 : index
    %1 = vector.load %arg1[%c0_1, %c0_2] : memref<12x128xf32, #tpu.memory_space<vmem>>, vector<12x128xf32>
    %cst = arith.constant dense<0.000000e+00> : vector<2x128xf32>
    %2 = tpu.matmul %0, %1, %cst {dimension_numbers = #tpu.dot_dimension_numbers<[1], [0], [0], [1], [0, 0, 1, 1], [], []>} : vector<2x12xf32>, vector<12x128xf32>, vector<2x128xf32> -> vector<2x128xf32>
    %cst_3 = arith.constant dense<0.000000e+00> : vector<128xf32>
    %3 = vector.multi_reduction <add>, %2, %cst_3 [0] : vector<2x128xf32> to vector<128xf32>
    %4 = vector.shape_cast %3 : vector<128xf32> to vector<1x128xf32>
    %5 = arith.mulf %2, %2 : vector<2x128xf32>
    %cst_4 = arith.constant dense<0.000000e+00> : vector<128xf32>
    %6 = vector.multi_reduction <add>, %5, %cst_4 [0] : vector<2x128xf32> to vector<128xf32>
    %7 = vector.shape_cast %6 : vector<128xf32> to vector<1x128xf32>
    %8 = vector.extract_strided_slice %4 {offsets = [0, 0], sizes = [1, 32], strides = [1, 1]} : vector<1x128xf32> to vector<1x32xf32>
    %9 = vector.extract_strided_slice %4 {offsets = [0, 32], sizes = [1, 32], strides = [1, 1]} : vector<1x128xf32> to vector<1x32xf32>
    %10 = arith.addf %8, %9 : vector<1x32xf32>
    %11 = vector.extract_strided_slice %4 {offsets = [0, 64], sizes = [1, 32], strides = [1, 1]} : vector<1x128xf32> to vector<1x32xf32>
    %12 = arith.addf %10, %11 : vector<1x32xf32>
    %13 = vector.extract_strided_slice %4 {offsets = [0, 96], sizes = [1, 32], strides = [1, 1]} : vector<1x128xf32> to vector<1x32xf32>
    %14 = arith.addf %12, %13 : vector<1x32xf32>
    %15 = vector.extract_strided_slice %7 {offsets = [0, 0], sizes = [1, 32], strides = [1, 1]} : vector<1x128xf32> to vector<1x32xf32>
    %16 = vector.extract_strided_slice %7 {offsets = [0, 32], sizes = [1, 32], strides = [1, 1]} : vector<1x128xf32> to vector<1x32xf32>
    %17 = arith.addf %15, %16 : vector<1x32xf32>
    %18 = vector.extract_strided_slice %7 {offsets = [0, 64], sizes = [1, 32], strides = [1, 1]} : vector<1x128xf32> to vector<1x32xf32>
    %19 = arith.addf %17, %18 : vector<1x32xf32>
    %20 = vector.extract_strided_slice %7 {offsets = [0, 96], sizes = [1, 32], strides = [1, 1]} : vector<1x128xf32> to vector<1x32xf32>
    %21 = arith.addf %19, %20 : vector<1x32xf32>
    %cst_5 = arith.constant 1.250000e-01 : f32
    %22 = vector.broadcast %cst_5 : f32 to vector<1x32xf32>
    %23 = arith.mulf %14, %22 : vector<1x32xf32>
    %cst_6 = arith.constant 1.250000e-01 : f32
    %24 = vector.broadcast %cst_6 : f32 to vector<1x32xf32>
    %25 = arith.mulf %21, %24 : vector<1x32xf32>
    %26 = arith.mulf %23, %23 : vector<1x32xf32>
    %27 = arith.subf %25, %26 : vector<1x32xf32>
    %c0_7 = arith.constant 0 : index
    %c0_8 = arith.constant 0 : index
    %28 = vector.load %arg2[%c0_7, %c0_8] : memref<1x32xf32, #tpu.memory_space<vmem>>, vector<1x32xf32>
    %cst_9 = arith.constant 9.99999974E-6 : f32
    %29 = vector.broadcast %cst_9 : f32 to vector<1x32xf32>
    %30 = arith.addf %27, %29 : vector<1x32xf32>
    %31 = math.rsqrt %30 : vector<1x32xf32>
    %32 = arith.mulf %28, %31 : vector<1x32xf32>
    %c0_10 = arith.constant 0 : index
    %c0_11 = arith.constant 0 : index
    %33 = vector.load %arg3[%c0_10, %c0_11] : memref<1x32xf32, #tpu.memory_space<vmem>>, vector<1x32xf32>
    %34 = arith.mulf %23, %32 : vector<1x32xf32>
    %35 = arith.subf %33, %34 : vector<1x32xf32>
    %36 = tpu.concatenate %32, %32, %32, %32 in 1 : vector<1x32xf32>, vector<1x32xf32>, vector<1x32xf32>, vector<1x32xf32> -> vector<1x128xf32>
    %37 = tpu.concatenate %35, %35, %35, %35 in 1 : vector<1x32xf32>, vector<1x32xf32>, vector<1x32xf32>, vector<1x32xf32> -> vector<1x128xf32>
    %38 = vector.broadcast %36 : vector<1x128xf32> to vector<2x128xf32>
    %39 = arith.mulf %2, %38 : vector<2x128xf32>
    %40 = vector.broadcast %37 : vector<1x128xf32> to vector<2x128xf32>
    %41 = arith.addf %39, %40 : vector<2x128xf32>
    %cst_12 = arith.constant 0.000000e+00 : f32
    %42 = vector.broadcast %cst_12 : f32 to vector<2x128xf32>
    %43 = arith.cmpf oge, %41, %42 : vector<2x128xf32>
    %cst_13 = arith.constant 0.00999999977 : f32
    %44 = vector.broadcast %cst_13 : f32 to vector<2x128xf32>
    %45 = arith.mulf %44, %41 : vector<2x128xf32>
    %46 = arith.select %43, %41, %45 : vector<2x128xi1>, vector<2x128xf32>
    %c0_14 = arith.constant 0 : index
    %c0_15 = arith.constant 0 : index
    %47 = vector.load %arg4[%c0_14, %c0_15] : memref<128x256xf32, #tpu.memory_space<vmem>>, vector<128x256xf32>
    %cst_16 = arith.constant dense<0.000000e+00> : vector<2x256xf32>
    %48 = tpu.matmul %46, %47, %cst_16 {dimension_numbers = #tpu.dot_dimension_numbers<[1], [0], [0], [1], [0, 0, 1, 1], [], []>} : vector<2x128xf32>, vector<128x256xf32>, vector<2x256xf32> -> vector<2x256xf32>
    %cst_17 = arith.constant dense<0.000000e+00> : vector<256xf32>
    %49 = vector.multi_reduction <add>, %48, %cst_17 [0] : vector<2x256xf32> to vector<256xf32>
    %50 = vector.shape_cast %49 : vector<256xf32> to vector<1x256xf32>
    %51 = arith.mulf %48, %48 : vector<2x256xf32>
    %cst_18 = arith.constant dense<0.000000e+00> : vector<256xf32>
    %52 = vector.multi_reduction <add>, %51, %cst_18 [0] : vector<2x256xf32> to vector<256xf32>
    %53 = vector.shape_cast %52 : vector<256xf32> to vector<1x256xf32>
    %54 = vector.extract_strided_slice %50 {offsets = [0, 0], sizes = [1, 64], strides = [1, 1]} : vector<1x256xf32> to vector<1x64xf32>
    %55 = vector.extract_strided_slice %50 {offsets = [0, 64], sizes = [1, 64], strides = [1, 1]} : vector<1x256xf32> to vector<1x64xf32>
    %56 = arith.addf %54, %55 : vector<1x64xf32>
    %57 = vector.extract_strided_slice %50 {offsets = [0, 128], sizes = [1, 64], strides = [1, 1]} : vector<1x256xf32> to vector<1x64xf32>
    %58 = arith.addf %56, %57 : vector<1x64xf32>
    %59 = vector.extract_strided_slice %50 {offsets = [0, 192], sizes = [1, 64], strides = [1, 1]} : vector<1x256xf32> to vector<1x64xf32>
    %60 = arith.addf %58, %59 : vector<1x64xf32>
    %61 = vector.extract_strided_slice %53 {offsets = [0, 0], sizes = [1, 64], strides = [1, 1]} : vector<1x256xf32> to vector<1x64xf32>
    %62 = vector.extract_strided_slice %53 {offsets = [0, 64], sizes = [1, 64], strides = [1, 1]} : vector<1x256xf32> to vector<1x64xf32>
    %63 = arith.addf %61, %62 : vector<1x64xf32>
    %64 = vector.extract_strided_slice %53 {offsets = [0, 128], sizes = [1, 64], strides = [1, 1]} : vector<1x256xf32> to vector<1x64xf32>
    %65 = arith.addf %63, %64 : vector<1x64xf32>
    %66 = vector.extract_strided_slice %53 {offsets = [0, 192], sizes = [1, 64], strides = [1, 1]} : vector<1x256xf32> to vector<1x64xf32>
    %67 = arith.addf %65, %66 : vector<1x64xf32>
    %cst_19 = arith.constant 1.250000e-01 : f32
    %68 = vector.broadcast %cst_19 : f32 to vector<1x64xf32>
    %69 = arith.mulf %60, %68 : vector<1x64xf32>
    %cst_20 = arith.constant 1.250000e-01 : f32
    %70 = vector.broadcast %cst_20 : f32 to vector<1x64xf32>
    %71 = arith.mulf %67, %70 : vector<1x64xf32>
    %72 = arith.mulf %69, %69 : vector<1x64xf32>
    %73 = arith.subf %71, %72 : vector<1x64xf32>
    %c0_21 = arith.constant 0 : index
    %c0_22 = arith.constant 0 : index
    %74 = vector.load %arg5[%c0_21, %c0_22] : memref<1x64xf32, #tpu.memory_space<vmem>>, vector<1x64xf32>
    %cst_23 = arith.constant 9.99999974E-6 : f32
    %75 = vector.broadcast %cst_23 : f32 to vector<1x64xf32>
    %76 = arith.addf %73, %75 : vector<1x64xf32>
    %77 = math.rsqrt %76 : vector<1x64xf32>
    %78 = arith.mulf %74, %77 : vector<1x64xf32>
    %c0_24 = arith.constant 0 : index
    %c0_25 = arith.constant 0 : index
    %79 = vector.load %arg6[%c0_24, %c0_25] : memref<1x64xf32, #tpu.memory_space<vmem>>, vector<1x64xf32>
    %80 = arith.mulf %69, %78 : vector<1x64xf32>
    %81 = arith.subf %79, %80 : vector<1x64xf32>
    %82 = tpu.concatenate %78, %78, %78, %78 in 1 : vector<1x64xf32>, vector<1x64xf32>, vector<1x64xf32>, vector<1x64xf32> -> vector<1x256xf32>
    %83 = tpu.concatenate %81, %81, %81, %81 in 1 : vector<1x64xf32>, vector<1x64xf32>, vector<1x64xf32>, vector<1x64xf32> -> vector<1x256xf32>
    %84 = vector.broadcast %82 : vector<1x256xf32> to vector<2x256xf32>
    %85 = arith.mulf %48, %84 : vector<2x256xf32>
    %86 = vector.broadcast %83 : vector<1x256xf32> to vector<2x256xf32>
    %87 = arith.addf %85, %86 : vector<2x256xf32>
    %cst_26 = arith.constant 0.000000e+00 : f32
    %88 = vector.broadcast %cst_26 : f32 to vector<2x256xf32>
    %89 = arith.cmpf oge, %87, %88 : vector<2x256xf32>
    %cst_27 = arith.constant 0.00999999977 : f32
    %90 = vector.broadcast %cst_27 : f32 to vector<2x256xf32>
    %91 = arith.mulf %90, %87 : vector<2x256xf32>
    %92 = arith.select %89, %87, %91 : vector<2x256xi1>, vector<2x256xf32>
    %c0_28 = arith.constant 0 : index
    %c0_29 = arith.constant 0 : index
    %93 = vector.load %arg7[%c0_28, %c0_29] : memref<256x512xf32, #tpu.memory_space<vmem>>, vector<256x512xf32>
    %cst_30 = arith.constant dense<0.000000e+00> : vector<2x512xf32>
    %94 = tpu.matmul %92, %93, %cst_30 {dimension_numbers = #tpu.dot_dimension_numbers<[1], [0], [0], [1], [0, 0, 1, 1], [], []>} : vector<2x256xf32>, vector<256x512xf32>, vector<2x512xf32> -> vector<2x512xf32>
    %cst_31 = arith.constant dense<0.000000e+00> : vector<512xf32>
    %95 = vector.multi_reduction <add>, %94, %cst_31 [0] : vector<2x512xf32> to vector<512xf32>
    %96 = vector.shape_cast %95 : vector<512xf32> to vector<1x512xf32>
    %97 = arith.mulf %94, %94 : vector<2x512xf32>
    %cst_32 = arith.constant dense<0.000000e+00> : vector<512xf32>
    %98 = vector.multi_reduction <add>, %97, %cst_32 [0] : vector<2x512xf32> to vector<512xf32>
    %99 = vector.shape_cast %98 : vector<512xf32> to vector<1x512xf32>
    %100 = vector.extract_strided_slice %96 {offsets = [0, 0], sizes = [1, 128], strides = [1, 1]} : vector<1x512xf32> to vector<1x128xf32>
    %101 = vector.extract_strided_slice %96 {offsets = [0, 128], sizes = [1, 128], strides = [1, 1]} : vector<1x512xf32> to vector<1x128xf32>
    %102 = arith.addf %100, %101 : vector<1x128xf32>
    %103 = vector.extract_strided_slice %96 {offsets = [0, 256], sizes = [1, 128], strides = [1, 1]} : vector<1x512xf32> to vector<1x128xf32>
    %104 = arith.addf %102, %103 : vector<1x128xf32>
    %105 = vector.extract_strided_slice %96 {offsets = [0, 384], sizes = [1, 128], strides = [1, 1]} : vector<1x512xf32> to vector<1x128xf32>
    %106 = arith.addf %104, %105 : vector<1x128xf32>
    %107 = vector.extract_strided_slice %99 {offsets = [0, 0], sizes = [1, 128], strides = [1, 1]} : vector<1x512xf32> to vector<1x128xf32>
    %108 = vector.extract_strided_slice %99 {offsets = [0, 128], sizes = [1, 128], strides = [1, 1]} : vector<1x512xf32> to vector<1x128xf32>
    %109 = arith.addf %107, %108 : vector<1x128xf32>
    %110 = vector.extract_strided_slice %99 {offsets = [0, 256], sizes = [1, 128], strides = [1, 1]} : vector<1x512xf32> to vector<1x128xf32>
    %111 = arith.addf %109, %110 : vector<1x128xf32>
    %112 = vector.extract_strided_slice %99 {offsets = [0, 384], sizes = [1, 128], strides = [1, 1]} : vector<1x512xf32> to vector<1x128xf32>
    %113 = arith.addf %111, %112 : vector<1x128xf32>
    %cst_33 = arith.constant 1.250000e-01 : f32
    %114 = vector.broadcast %cst_33 : f32 to vector<1x128xf32>
    %115 = arith.mulf %106, %114 : vector<1x128xf32>
    %cst_34 = arith.constant 1.250000e-01 : f32
    %116 = vector.broadcast %cst_34 : f32 to vector<1x128xf32>
    %117 = arith.mulf %113, %116 : vector<1x128xf32>
    %118 = arith.mulf %115, %115 : vector<1x128xf32>
    %119 = arith.subf %117, %118 : vector<1x128xf32>
    %c0_35 = arith.constant 0 : index
    %c0_36 = arith.constant 0 : index
    %120 = vector.load %arg8[%c0_35, %c0_36] : memref<1x128xf32, #tpu.memory_space<vmem>>, vector<1x128xf32>
    %cst_37 = arith.constant 9.99999974E-6 : f32
    %121 = vector.broadcast %cst_37 : f32 to vector<1x128xf32>
    %122 = arith.addf %119, %121 : vector<1x128xf32>
    %123 = math.rsqrt %122 : vector<1x128xf32>
    %124 = arith.mulf %120, %123 : vector<1x128xf32>
    %c0_38 = arith.constant 0 : index
    %c0_39 = arith.constant 0 : index
    %125 = vector.load %arg9[%c0_38, %c0_39] : memref<1x128xf32, #tpu.memory_space<vmem>>, vector<1x128xf32>
    %126 = arith.mulf %115, %124 : vector<1x128xf32>
    %127 = arith.subf %125, %126 : vector<1x128xf32>
    %128 = tpu.concatenate %124, %124, %124, %124 in 1 : vector<1x128xf32>, vector<1x128xf32>, vector<1x128xf32>, vector<1x128xf32> -> vector<1x512xf32>
    %129 = tpu.concatenate %127, %127, %127, %127 in 1 : vector<1x128xf32>, vector<1x128xf32>, vector<1x128xf32>, vector<1x128xf32> -> vector<1x512xf32>
    %130 = vector.broadcast %128 : vector<1x512xf32> to vector<2x512xf32>
    %131 = arith.mulf %94, %130 : vector<2x512xf32>
    %132 = vector.broadcast %129 : vector<1x512xf32> to vector<2x512xf32>
    %133 = arith.addf %131, %132 : vector<2x512xf32>
    %cst_40 = arith.constant 0.000000e+00 : f32
    %134 = vector.broadcast %cst_40 : f32 to vector<2x512xf32>
    %135 = arith.cmpf oge, %133, %134 : vector<2x512xf32>
    %cst_41 = arith.constant 0.00999999977 : f32
    %136 = vector.broadcast %cst_41 : f32 to vector<2x512xf32>
    %137 = arith.mulf %136, %133 : vector<2x512xf32>
    %138 = arith.select %135, %133, %137 : vector<2x512xi1>, vector<2x512xf32>
    %c0_42 = arith.constant 0 : index
    %c0_43 = arith.constant 0 : index
    %139 = vector.load %arg10[%c0_42, %c0_43] : memref<512x1024xf32, #tpu.memory_space<vmem>>, vector<512x1024xf32>
    %cst_44 = arith.constant dense<0.000000e+00> : vector<2x1024xf32>
    %140 = tpu.matmul %138, %139, %cst_44 {dimension_numbers = #tpu.dot_dimension_numbers<[1], [0], [0], [1], [0, 0, 1, 1], [], []>} : vector<2x512xf32>, vector<512x1024xf32>, vector<2x1024xf32> -> vector<2x1024xf32>
    %cst_45 = arith.constant dense<0.000000e+00> : vector<1024xf32>
    %141 = vector.multi_reduction <add>, %140, %cst_45 [0] : vector<2x1024xf32> to vector<1024xf32>
    %142 = vector.shape_cast %141 : vector<1024xf32> to vector<1x1024xf32>
    %143 = arith.mulf %140, %140 : vector<2x1024xf32>
    %cst_46 = arith.constant dense<0.000000e+00> : vector<1024xf32>
    %144 = vector.multi_reduction <add>, %143, %cst_46 [0] : vector<2x1024xf32> to vector<1024xf32>
    %145 = vector.shape_cast %144 : vector<1024xf32> to vector<1x1024xf32>
    %146 = vector.extract_strided_slice %142 {offsets = [0, 0], sizes = [1, 256], strides = [1, 1]} : vector<1x1024xf32> to vector<1x256xf32>
    %147 = vector.extract_strided_slice %142 {offsets = [0, 256], sizes = [1, 256], strides = [1, 1]} : vector<1x1024xf32> to vector<1x256xf32>
    %148 = arith.addf %146, %147 : vector<1x256xf32>
    %149 = vector.extract_strided_slice %142 {offsets = [0, 512], sizes = [1, 256], strides = [1, 1]} : vector<1x1024xf32> to vector<1x256xf32>
    %150 = arith.addf %148, %149 : vector<1x256xf32>
    %151 = vector.extract_strided_slice %142 {offsets = [0, 768], sizes = [1, 256], strides = [1, 1]} : vector<1x1024xf32> to vector<1x256xf32>
    %152 = arith.addf %150, %151 : vector<1x256xf32>
    %153 = vector.extract_strided_slice %145 {offsets = [0, 0], sizes = [1, 256], strides = [1, 1]} : vector<1x1024xf32> to vector<1x256xf32>
    %154 = vector.extract_strided_slice %145 {offsets = [0, 256], sizes = [1, 256], strides = [1, 1]} : vector<1x1024xf32> to vector<1x256xf32>
    %155 = arith.addf %153, %154 : vector<1x256xf32>
    %156 = vector.extract_strided_slice %145 {offsets = [0, 512], sizes = [1, 256], strides = [1, 1]} : vector<1x1024xf32> to vector<1x256xf32>
    %157 = arith.addf %155, %156 : vector<1x256xf32>
    %158 = vector.extract_strided_slice %145 {offsets = [0, 768], sizes = [1, 256], strides = [1, 1]} : vector<1x1024xf32> to vector<1x256xf32>
    %159 = arith.addf %157, %158 : vector<1x256xf32>
    %cst_47 = arith.constant 1.250000e-01 : f32
    %160 = vector.broadcast %cst_47 : f32 to vector<1x256xf32>
    %161 = arith.mulf %152, %160 : vector<1x256xf32>
    %cst_48 = arith.constant 1.250000e-01 : f32
    %162 = vector.broadcast %cst_48 : f32 to vector<1x256xf32>
    %163 = arith.mulf %159, %162 : vector<1x256xf32>
    %164 = arith.mulf %161, %161 : vector<1x256xf32>
    %165 = arith.subf %163, %164 : vector<1x256xf32>
    %c0_49 = arith.constant 0 : index
    %c0_50 = arith.constant 0 : index
    %166 = vector.load %arg11[%c0_49, %c0_50] : memref<1x256xf32, #tpu.memory_space<vmem>>, vector<1x256xf32>
    %cst_51 = arith.constant 9.99999974E-6 : f32
    %167 = vector.broadcast %cst_51 : f32 to vector<1x256xf32>
    %168 = arith.addf %165, %167 : vector<1x256xf32>
    %169 = math.rsqrt %168 : vector<1x256xf32>
    %170 = arith.mulf %166, %169 : vector<1x256xf32>
    %c0_52 = arith.constant 0 : index
    %c0_53 = arith.constant 0 : index
    %171 = vector.load %arg12[%c0_52, %c0_53] : memref<1x256xf32, #tpu.memory_space<vmem>>, vector<1x256xf32>
    %172 = arith.mulf %161, %170 : vector<1x256xf32>
    %173 = arith.subf %171, %172 : vector<1x256xf32>
    %174 = tpu.concatenate %170, %170, %170, %170 in 1 : vector<1x256xf32>, vector<1x256xf32>, vector<1x256xf32>, vector<1x256xf32> -> vector<1x1024xf32>
    %175 = tpu.concatenate %173, %173, %173, %173 in 1 : vector<1x256xf32>, vector<1x256xf32>, vector<1x256xf32>, vector<1x256xf32> -> vector<1x1024xf32>
    %176 = vector.broadcast %174 : vector<1x1024xf32> to vector<2x1024xf32>
    %177 = arith.mulf %140, %176 : vector<2x1024xf32>
    %178 = vector.broadcast %175 : vector<1x1024xf32> to vector<2x1024xf32>
    %179 = arith.addf %177, %178 : vector<2x1024xf32>
    %cst_54 = arith.constant 0.000000e+00 : f32
    %180 = vector.broadcast %cst_54 : f32 to vector<2x1024xf32>
    %181 = arith.cmpf oge, %179, %180 : vector<2x1024xf32>
    %cst_55 = arith.constant 0.00999999977 : f32
    %182 = vector.broadcast %cst_55 : f32 to vector<2x1024xf32>
    %183 = arith.mulf %182, %179 : vector<2x1024xf32>
    %184 = arith.select %181, %179, %183 : vector<2x1024xi1>, vector<2x1024xf32>
    %c0_56 = arith.constant 0 : index
    %c0_57 = arith.constant 0 : index
    %185 = vector.load %arg13[%c0_56, %c0_57] : memref<1024x2048xf32, #tpu.memory_space<vmem>>, vector<1024x2048xf32>
    %cst_58 = arith.constant dense<0.000000e+00> : vector<2x2048xf32>
    %186 = tpu.matmul %184, %185, %cst_58 {dimension_numbers = #tpu.dot_dimension_numbers<[1], [0], [0], [1], [0, 0, 1, 1], [], []>} : vector<2x1024xf32>, vector<1024x2048xf32>, vector<2x2048xf32> -> vector<2x2048xf32>
    %cst_59 = arith.constant dense<0.000000e+00> : vector<2048xf32>
    %187 = vector.multi_reduction <add>, %186, %cst_59 [0] : vector<2x2048xf32> to vector<2048xf32>
    %188 = vector.shape_cast %187 : vector<2048xf32> to vector<1x2048xf32>
    %189 = arith.mulf %186, %186 : vector<2x2048xf32>
    %cst_60 = arith.constant dense<0.000000e+00> : vector<2048xf32>
    %190 = vector.multi_reduction <add>, %189, %cst_60 [0] : vector<2x2048xf32> to vector<2048xf32>
    %191 = vector.shape_cast %190 : vector<2048xf32> to vector<1x2048xf32>
    %192 = vector.extract_strided_slice %188 {offsets = [0, 0], sizes = [1, 512], strides = [1, 1]} : vector<1x2048xf32> to vector<1x512xf32>
    %193 = vector.extract_strided_slice %188 {offsets = [0, 512], sizes = [1, 512], strides = [1, 1]} : vector<1x2048xf32> to vector<1x512xf32>
    %194 = arith.addf %192, %193 : vector<1x512xf32>
    %195 = vector.extract_strided_slice %188 {offsets = [0, 1024], sizes = [1, 512], strides = [1, 1]} : vector<1x2048xf32> to vector<1x512xf32>
    %196 = arith.addf %194, %195 : vector<1x512xf32>
    %197 = vector.extract_strided_slice %188 {offsets = [0, 1536], sizes = [1, 512], strides = [1, 1]} : vector<1x2048xf32> to vector<1x512xf32>
    %198 = arith.addf %196, %197 : vector<1x512xf32>
    %199 = vector.extract_strided_slice %191 {offsets = [0, 0], sizes = [1, 512], strides = [1, 1]} : vector<1x2048xf32> to vector<1x512xf32>
    %200 = vector.extract_strided_slice %191 {offsets = [0, 512], sizes = [1, 512], strides = [1, 1]} : vector<1x2048xf32> to vector<1x512xf32>
    %201 = arith.addf %199, %200 : vector<1x512xf32>
    %202 = vector.extract_strided_slice %191 {offsets = [0, 1024], sizes = [1, 512], strides = [1, 1]} : vector<1x2048xf32> to vector<1x512xf32>
    %203 = arith.addf %201, %202 : vector<1x512xf32>
    %204 = vector.extract_strided_slice %191 {offsets = [0, 1536], sizes = [1, 512], strides = [1, 1]} : vector<1x2048xf32> to vector<1x512xf32>
    %205 = arith.addf %203, %204 : vector<1x512xf32>
    %cst_61 = arith.constant 1.250000e-01 : f32
    %206 = vector.broadcast %cst_61 : f32 to vector<1x512xf32>
    %207 = arith.mulf %198, %206 : vector<1x512xf32>
    %cst_62 = arith.constant 1.250000e-01 : f32
    %208 = vector.broadcast %cst_62 : f32 to vector<1x512xf32>
    %209 = arith.mulf %205, %208 : vector<1x512xf32>
    %210 = arith.mulf %207, %207 : vector<1x512xf32>
    %211 = arith.subf %209, %210 : vector<1x512xf32>
    %c0_63 = arith.constant 0 : index
    %c0_64 = arith.constant 0 : index
    %212 = vector.load %arg14[%c0_63, %c0_64] : memref<1x512xf32, #tpu.memory_space<vmem>>, vector<1x512xf32>
    %cst_65 = arith.constant 9.99999974E-6 : f32
    %213 = vector.broadcast %cst_65 : f32 to vector<1x512xf32>
    %214 = arith.addf %211, %213 : vector<1x512xf32>
    %215 = math.rsqrt %214 : vector<1x512xf32>
    %216 = arith.mulf %212, %215 : vector<1x512xf32>
    %c0_66 = arith.constant 0 : index
    %c0_67 = arith.constant 0 : index
    %217 = vector.load %arg15[%c0_66, %c0_67] : memref<1x512xf32, #tpu.memory_space<vmem>>, vector<1x512xf32>
    %218 = arith.mulf %207, %216 : vector<1x512xf32>
    %219 = arith.subf %217, %218 : vector<1x512xf32>
    %220 = tpu.concatenate %216, %216, %216, %216 in 1 : vector<1x512xf32>, vector<1x512xf32>, vector<1x512xf32>, vector<1x512xf32> -> vector<1x2048xf32>
    %221 = tpu.concatenate %219, %219, %219, %219 in 1 : vector<1x512xf32>, vector<1x512xf32>, vector<1x512xf32>, vector<1x512xf32> -> vector<1x2048xf32>
    %222 = vector.broadcast %220 : vector<1x2048xf32> to vector<2x2048xf32>
    %223 = arith.mulf %186, %222 : vector<2x2048xf32>
    %224 = vector.broadcast %221 : vector<1x2048xf32> to vector<2x2048xf32>
    %225 = arith.addf %223, %224 : vector<2x2048xf32>
    %cst_68 = arith.constant 0.000000e+00 : f32
    %226 = vector.broadcast %cst_68 : f32 to vector<2x2048xf32>
    %227 = arith.cmpf oge, %225, %226 : vector<2x2048xf32>
    %cst_69 = arith.constant 0.00999999977 : f32
    %228 = vector.broadcast %cst_69 : f32 to vector<2x2048xf32>
    %229 = arith.mulf %228, %225 : vector<2x2048xf32>
    %230 = arith.select %227, %225, %229 : vector<2x2048xi1>, vector<2x2048xf32>
    %c0_70 = arith.constant 0 : index
    %c0_71 = arith.constant 0 : index
    %231 = vector.load %arg16[%c0_70, %c0_71] : memref<2048x32xf32, #tpu.memory_space<vmem>>, vector<2048x32xf32>
    %cst_72 = arith.constant dense<0.000000e+00> : vector<2x32xf32>
    %232 = tpu.matmul %230, %231, %cst_72 {dimension_numbers = #tpu.dot_dimension_numbers<[1], [0], [0], [1], [0, 0, 1, 1], [], []>} : vector<2x2048xf32>, vector<2048x32xf32>, vector<2x32xf32> -> vector<2x32xf32>
    %c0_73 = arith.constant 0 : index
    %c0_74 = arith.constant 0 : index
    %233 = vector.load %arg17[%c0_73, %c0_74] : memref<1x32xf32, #tpu.memory_space<vmem>>, vector<1x32xf32>
    %234 = vector.broadcast %233 : vector<1x32xf32> to vector<2x32xf32>
    %235 = arith.addf %232, %234 : vector<2x32xf32>
    %236 = vector.extract_strided_slice %235 {offsets = [0, 0], sizes = [2, 16], strides = [1, 1]} : vector<2x32xf32> to vector<2x16xf32>
    %237 = vector.extract_strided_slice %235 {offsets = [0, 16], sizes = [2, 16], strides = [1, 1]} : vector<2x32xf32> to vector<2x16xf32>
    %c0_75 = arith.constant 0 : index
    %c0_76 = arith.constant 0 : index
    %238 = vector.load %arg18[%c0_75, %c0_76] : memref<2x16xf32, #tpu.memory_space<vmem>>, vector<2x16xf32>
    %cst_77 = arith.constant 5.000000e-01 : f32
    %239 = vector.broadcast %cst_77 : f32 to vector<2x16xf32>
    %240 = arith.mulf %239, %237 : vector<2x16xf32>
    %241 = math.exp %240 : vector<2x16xf32>
    %242 = arith.mulf %238, %241 : vector<2x16xf32>
    %243 = arith.addf %242, %236 : vector<2x16xf32>
    %c0_78 = arith.constant 0 : index
    %c0_79 = arith.constant 0 : index
    %244 = vector.load %arg19[%c0_78, %c0_79] : memref<2x16xf32, #tpu.memory_space<vmem>>, vector<2x16xf32>
    tpu.vector_store %arg19[%c0_78, %c0_79], %236 {strides = array<i32>} : memref<2x16xf32, #tpu.memory_space<vmem>>, vector<2x16xf32>,
    %c0_80 = arith.constant 0 : index
    %c0_81 = arith.constant 0 : index
    %245 = vector.load %arg20[%c0_80, %c0_81] : memref<2x16xf32, #tpu.memory_space<vmem>>, vector<2x16xf32>
    tpu.vector_store %arg20[%c0_80, %c0_81], %237 {strides = array<i32>} : memref<2x16xf32, #tpu.memory_space<vmem>>, vector<2x16xf32>,
    %c0_82 = arith.constant 0 : index
    %c0_83 = arith.constant 0 : index
    %246 = vector.load %arg21[%c0_82, %c0_83] : memref<2x16xf32, #tpu.memory_space<vmem>>, vector<2x16xf32>
    tpu.vector_store %arg21[%c0_82, %c0_83], %243 {strides = array<i32>} : memref<2x16xf32, #tpu.memory_space<vmem>>, vector<2x16xf32>,
    return
  }
}

</mosaic_0001>

<bundles_post_ra>
// kernel: smooth_mlp_mixer_forward.1
= control target key start
LH: loop header
LB: loop body
LE: loop exit
PB: predicated region body
PF: predicated region fallthrough
CT: control target
= control target key end

     0   :  { %s10577_s0 = inlined_call_operand.vmem [shape: f32[2,12], index: 0, kind: input, shape index: {}]   ;;  %s10578_s1 = inlined_call_operand.hbm [shape: f32[12,128], index: 1, kind: input, shape index: {}]   ;;  %s10579_s2 = inlined_call_operand.hbm [shape: f32[1,32], index: 2, kind: input, shape index: {}]   ;;  %s10580_s3 = inlined_call_operand.hbm [shape: f32[1,32], index: 3, kind: input, shape index: {}]   ;;  %s10581_s4 = inlined_call_operand.hbm [shape: f32[128,256], index: 4, kind: input, shape index: {}]   ;;  %s10582_s5 = inlined_call_operand.hbm [shape: f32[1,64], index: 5, kind: input, shape index: {}]   ;;  %s10583_s6 = inlined_call_operand.hbm [shape: f32[1,64], index: 6, kind: input, shape index: {}]   ;;  %s10584_s7 = inlined_call_operand.hbm [shape: f32[256,512], index: 7, kind: input, shape index: {}]   ;;  %s10585_s8 = inlined_call_operand.hbm [shape: f32[1,128], index: 8, kind: input, shape index: {}]   ;;  %s10586_s9 = inlined_call_operand.hbm [shape: f32[1,128], index: 9, kind: input, shape index: {}]   ;;  %s10587_s10 = inlined_call_operand.hbm [shape: f32[512,1024], index: 10, kind: input, shape index: {}]   ;;  %s10588_s11 = inlined_call_operand.hbm [shape: f32[1,256], index: 11, kind: input, shape index: {}]   ;;  %s10589_s12 = inlined_call_operand.hbm [shape: f32[1,256], index: 12, kind: input, shape index: {}]   ;;  %s10590_s13 = inlined_call_operand.hbm [shape: f32[1024,2048], index: 13, kind: input, shape index: {}]   ;;  %s10591_s14 = inlined_call_operand.hbm [shape: f32[1,512], index: 14, kind: input, shape index: {}]   ;;  %s10592_s15 = inlined_call_operand.hbm [shape: f32[1,512], index: 15, kind: input, shape index: {}]   ;;  %s10593_s16 = inlined_call_operand.vmem [shape: f32[2048,32], index: 16, kind: input, shape index: {}]   ;;  %s10594_s17 = inlined_call_operand.hbm [shape: f32[1,32], index: 17, kind: input, shape index: {}]   ;;  %s10595_s18 = inlined_call_operand.hbm [shape: f32[2,16], index: 18, kind: input, shape index: {}]   ;;  %s10596_s19 = inlined_call_operand.hbm [shape: f32[2,16], index: 19, kind: output, shape index: {0}]   ;;  %s10597_s20 = inlined_call_operand.hbm [shape: f32[2,16], index: 20, kind: output, shape index: {1}]   ;;  %s10598_s21 = inlined_call_operand.hbm [shape: f32[2,16], index: 21, kind: output, shape index: {2}]  }
   0x1   :  { %10605 = sst [smem:[#allocation50_spill]] %s10577_s0 }
   0x2   :  { %10606 = sst [smem:[#allocation51_spill]] %s10578_s1 }
   0x3   :  { %10607 = sst [smem:[#allocation52_spill]] %s10579_s2 }
   0x4   :  { %10608 = sst [smem:[#allocation53_spill]] %s10580_s3 }
   0x5   :  { %10609 = sst [smem:[#allocation54_spill]] %s10581_s4 }
   0x6   :  { %10610 = sst [smem:[#allocation55_spill]] %s10582_s5 }
   0x7   :  { %27 = vsyncpa [#allocation3], 0 }
   0x8   :  { %28 = vsyncpa [#allocation6], 0 }
   0x9   :  { %29 = vsyncpa [#allocation9], 0 }
   0xa   :  { %30 = vsyncpa [#allocation12], 0 }
   0xb   :  { %31 = vsyncpa [#allocation15], 0 }
   0xc   :  { %32 = vsyncpa [#allocation18], 0 }
   0xd   :  { %33 = vsyncpa [#allocation21], 0 }
   0xe   :  { %34 = vsyncpa [#allocation24], 0 }
   0xf   :  { %35 = vsyncpa [#allocation27], 0 }
  0x10   :  { %36 = vsyncpa [#allocation4], 0 }
  0x11   :  { %37 = vsyncpa [#allocation31], 0  ;;  %s8866_s2 = smov [#allocation5]   ;;  %s8867_s26 = smov [#allocation8]  }
  0x12   :  { %s58_s25 = sshll.u32 %s8866_s2, 4  ;;  %s77_s27 = sshll.u32 %s8867_s26, 4  ;;  %s59_s25 = int_to_ptr.vmem [resolvable:$true] %s58_s25  ;;  %s78_s27 = int_to_ptr.vmem [resolvable:$true] %s77_s27 }
  0x13   :  { %s8452_s3 = scalar_lea.vmem %s59_s25, 16  ;;  %s8456_s28 = scalar_lea.vmem %s59_s25, 32 }
  0x14   :  { %p8453_p0 = scmp.ne.s32.totalorder %s59_s25, %s8452_s3  ;;  %p8457_p1 = scmp.lt.s32.totalorder %s59_s25, %s59_s25 }
  0x15   :  { %p8458_p2 = scmp.lt.s32.totalorder %s8456_s28, %s8452_s3 }
  0x17   :  { %p8459_p3 = por %p8458_p2, %p8457_p1 }
  0x19   :  { %p8460_p4 = pnand %p8459_p3, %p8453_p0 }
  0x1b   :  { %8463 = shalt.err (!%p8460_p4)
}
  0x1c   :  { %s10611_s4 = sld [smem:[#allocation52_spill]]  ;;  %s8472_s30 = scalar_lea.vmem %s78_s27, 4096 }
  0x1d   :  { %p8473_p5 = scmp.ne.s32.totalorder %s78_s27, %s8472_s30  ;;  %p8477_p6 = scmp.lt.s32.totalorder %s78_s27, %s78_s27 }
  0x1e   :  { %p8478_p7 = scmp.lt.s32.totalorder %s8472_s30, %s8472_s30 }
  0x20   :  { %p8479_p8 = por %p8478_p7, %p8477_p6 }
  0x22   :  { %61 = dma.hbm_to_vmem [thread:$0]  %s10611_s4, 16, %s59_s25, [#allocation6]  }
  0x23   :  { %p8480_p9 = pnand %p8479_p8, %p8473_p5 }
  0x25   :  { %8483 = shalt.err (!%p8480_p9)
}
  0x26   :  { %s8868_s5 = smov 256   ;;  %s8869_s22 = smov 16  }
  0x27   :  { %s10612_s24 = sld [smem:[#allocation54_spill]]  ;;  %s8870_s2 = smov [#allocation11]  }
  0x28   :  { %s100_s26 = sshll.u32 %s8870_s2, 4  ;;  %s8871_s3 = smov [#allocation14]   ;;  %s101_s26 = int_to_ptr.vmem [resolvable:$true] %s100_s26 }
  0x29   :  { %s122_s28 = sshll.u32 %s8871_s3, 4  ;;  %s8492_s25 = scalar_lea.vmem %s101_s26, 16  ;;  %s123_s28 = int_to_ptr.vmem [resolvable:$true] %s122_s28 }
  0x2a   :  { %p8493_p10 = scmp.ne.s32.totalorder %s101_s26, %s8492_s25  ;;  %s8496_s29 = scalar_lea.vmem %s101_s26, 32 }
  0x2b   :  { %p8497_p11 = scmp.lt.s32.totalorder %s101_s26, %s101_s26  ;;  %p8498_p12 = scmp.lt.s32.totalorder %s8496_s29, %s8492_s25 }
  0x2d   :  { %83 = dma.hbm_to_vmem [thread:$0]  %s10612_s24, 4096, %s78_s27, [#allocation9], %s8868_s5, %s8868_s5, %s8869_s22  }
  0x2e   :  { %p8499_p13 = por %p8498_p12, %p8497_p11 }
  0x30   :  { %p8500_p0 = pnand %p8499_p13, %p8493_p10 }
  0x32   :  { %8503 = shalt.err (!%p8500_p0)
}
  0x33   :  { %103 = dma.hbm_to_vmem [thread:$0]  %s10583_s6, 16, %s101_s26, [#allocation12]  }
  0x34   :  { %s8512_s30 = scalar_lea.vmem %s123_s28, 16  ;;  %s8516_s27 = scalar_lea.vmem %s123_s28, 32 }
  0x35   :  { %p8513_p1 = scmp.ne.s32.totalorder %s123_s28, %s8512_s30  ;;  %p8517_p2 = scmp.lt.s32.totalorder %s123_s28, %s123_s28 }
  0x36   :  { %p8518_p3 = scmp.lt.s32.totalorder %s8516_s27, %s8512_s30 }
  0x38   :  { %p8519_p4 = por %p8518_p3, %p8517_p2 }
  0x3a   :  { %p8520_p5 = pnand %p8519_p4, %p8513_p1 }
  0x3c   :  { %8523 = shalt.err (!%p8520_p5)
}
  0x3d   :  { %125 = dma.hbm_to_vmem [thread:$0]  %s10585_s8, 16, %s123_s28, [#allocation15]  }
  0x3e   :  { %s8872_s23 = smov [#allocation17]  }
  0x3f   :  { %s141_s1 = sshll.u32 %s8872_s23, 4  ;;  %s142_s1 = int_to_ptr.vmem [resolvable:$true] %s141_s1 }
  0x40   :  { %s8532_s24 = scalar_lea.vmem %s142_s1, 65536  ;;  %p8537_p7 = scmp.lt.s32.totalorder %s142_s1, %s142_s1 }
  0x41   :  { %p8533_p6 = scmp.ne.s32.totalorder %s142_s1, %s8532_s24  ;;  %p8538_p8 = scmp.lt.s32.totalorder %s8532_s24, %s8532_s24 }
  0x43   :  { %p8539_p9 = por %p8538_p8, %p8537_p7 }
  0x45   :  { %p8540_p10 = pnand %p8539_p9, %p8533_p6 }
  0x47   :  { %8543 = shalt.err (!%p8540_p10)
}
  0x48   :  { %s8873_s6 = smov 1024   ;;  %s8874_s2 = smov 64  }
  0x49   :  { %147 = dma.hbm_to_vmem [thread:$0]  %s10587_s10, 65536, %s142_s1, [#allocation18], %s8873_s6, %s8873_s6, %s8874_s2  }
  0x4a   :  { %s8875_s25 = smov [#allocation20]   ;;  %s8876_s8 = smov [#allocation23]  }
  0x4b   :  { %s164_s29 = sshll.u32 %s8875_s25, 4  ;;  %s186_s28 = sshll.u32 %s8876_s8, 4  ;;  %s165_s29 = int_to_ptr.vmem [resolvable:$true] %s164_s29  ;;  %s187_s28 = int_to_ptr.vmem [resolvable:$true] %s186_s28 }
  0x4c   :  { %s8552_s0 = scalar_lea.vmem %s165_s29, 32  ;;  %p8557_p12 = scmp.lt.s32.totalorder %s165_s29, %s165_s29 }
  0x4d   :  { %p8553_p11 = scmp.ne.s32.totalorder %s165_s29, %s8552_s0  ;;  %p8558_p13 = scmp.lt.s32.totalorder %s8552_s0, %s8552_s0 }
  0x4f   :  { %p8559_p0 = por %p8558_p13, %p8557_p12 }
  0x51   :  { %p8560_p1 = pnand %p8559_p0, %p8553_p11 }
  0x53   :  { %8563 = shalt.err (!%p8560_p1)
}
  0x54   :  { %167 = dma.hbm_to_vmem [thread:$0]  %s10589_s12, 32, %s165_s29, [#allocation21]  }
  0x55   :  { %s8572_s27 = scalar_lea.vmem %s187_s28, 64  ;;  %p8577_p3 = scmp.lt.s32.totalorder %s187_s28, %s187_s28 }
  0x56   :  { %p8573_p2 = scmp.ne.s32.totalorder %s187_s28, %s8572_s27  ;;  %p8578_p4 = scmp.lt.s32.totalorder %s8572_s27, %s8572_s27 }
  0x58   :  { %p8579_p5 = por %p8578_p4, %p8577_p3 }
  0x5a   :  { %p8580_p6 = pnand %p8579_p5, %p8573_p2 }
  0x5c   :  { %8583 = shalt.err (!%p8580_p6)
}
  0x5d   :  { %189 = dma.hbm_to_vmem [thread:$0]  %s10591_s14, 64, %s187_s28, [#allocation24]  }
  0x5e   :  { %s8877_s22 = smov [#allocation26]   ;;  %s8878_s1 = smov [#allocation2]  }
  0x5f   :  { %s208_s23 = sshll.u32 %s8877_s22, 4  ;;  %s45_s24 = sshll.u32 %s8878_s1, 4  ;;  %s209_s23 = int_to_ptr.vmem [resolvable:$true] %s208_s23  ;;  %s46_s24 = int_to_ptr.vmem [resolvable:$true] %s45_s24 }
  0x60   :  { %s8592_s6 = scalar_lea.vmem %s209_s23, 16  ;;  %s8596_s12 = scalar_lea.vmem %s209_s23, 32 }
  0x61   :  { %p8593_p7 = scmp.ne.s32.totalorder %s209_s23, %s8592_s6  ;;  %p8597_p8 = scmp.lt.s32.totalorder %s209_s23, %s209_s23 }
  0x62   :  { %p8598_p9 = scmp.lt.s32.totalorder %s8596_s12, %s8592_s6 }
  0x64   :  { %p8599_p10 = por %p8598_p9, %p8597_p8 }
  0x66   :  { %p8600_p11 = pnand %p8599_p10, %p8593_p7 }
  0x68   :  { %8603 = shalt.err (!%p8600_p11)
}
  0x69   :  { %211 = dma.hbm_to_vmem [thread:$0]  %s10594_s17, 16, %s209_s23, [#allocation27]  }
  0x6a   :  { %s8612_s25 = scalar_lea.vmem %s46_s24, 256  ;;  %p8617_p13 = scmp.lt.s32.totalorder %s46_s24, %s46_s24 }
  0x6b   :  { %p8613_p12 = scmp.ne.s32.totalorder %s46_s24, %s8612_s25  ;;  %p8618_p0 = scmp.lt.s32.totalorder %s8612_s25, %s8612_s25 }
  0x6d   :  { %p8619_p1 = por %p8618_p0, %p8617_p13 }
  0x6f   :  { %p8620_p2 = pnand %p8619_p1, %p8613_p12 }
  0x71   :  { %8623 = shalt.err (!%p8620_p2)
}
  0x72   :  { %s8879_s14 = smov 128   ;;  %s8880_s29 = smov 8  }
  0x73   :  { %s10613_s0 = sld [smem:[#allocation51_spill]]  ;;  %s8881_s4 = smov [#allocation7]  }
  0x74   :  { %s68_s30 = sshll.u32 %s8881_s4, 4  ;;  %s8882_s17 = smov [#allocation10]   ;;  %s69_s30 = int_to_ptr.vmem [resolvable:$true] %s68_s30 }
  0x75   :  { %s90_s27 = sshll.u32 %s8882_s17, 4  ;;  %s8632_s10 = scalar_lea.vmem %s69_s30, 16  ;;  %s91_s27 = int_to_ptr.vmem [resolvable:$true] %s90_s27 }
  0x76   :  { %p8633_p3 = scmp.ne.s32.totalorder %s69_s30, %s8632_s10  ;;  %s8636_s5 = scalar_lea.vmem %s69_s30, 32 }
  0x77   :  { %p8637_p4 = scmp.lt.s32.totalorder %s69_s30, %s69_s30  ;;  %p8638_p5 = scmp.lt.s32.totalorder %s8636_s5, %s8632_s10 }
  0x79   :  { %51 = dma.hbm_to_vmem [thread:$0]  %s10613_s0, 256, %s46_s24, [#allocation3], %s8879_s14, %s8879_s14, %s8880_s29  }
  0x7a   :  { %p8639_p6 = por %p8638_p5, %p8637_p4 }
  0x7c   :  { %p8640_p7 = pnand %p8639_p6, %p8633_p3 }
  0x7e   :  { %8643 = shalt.err (!%p8640_p7)
}
  0x7f   :  { %s10614_s1 = sld [smem:[#allocation53_spill]]  ;;  %s8652_s6 = scalar_lea.vmem %s91_s27, 16 }
  0x80   :  { %p8653_p8 = scmp.ne.s32.totalorder %s91_s27, %s8652_s6  ;;  %s8656_s24 = scalar_lea.vmem %s91_s27, 32 }
  0x81   :  { %p8657_p9 = scmp.lt.s32.totalorder %s91_s27, %s91_s27  ;;  %p8658_p10 = scmp.lt.s32.totalorder %s8656_s24, %s8652_s6 }
  0x83   :  { %p8659_p11 = por %p8658_p10, %p8657_p9 }
  0x85   :  { %71 = dma.hbm_to_vmem [thread:$0]  %s10614_s1, 16, %s69_s30, [#allocation6]  }
  0x86   :  { %p8660_p12 = pnand %p8659_p11, %p8653_p8 }
  0x88   :  { %8663 = shalt.err (!%p8660_p12)
}
  0x89   :  { %s10615_s3 = sld [smem:[#allocation55_spill]]  ;;  %s8883_s25 = smov [#allocation13]  }
  0x8a   :  { %s109_s29 = sshll.u32 %s8883_s25, 4  ;;  %s110_s29 = int_to_ptr.vmem [resolvable:$true] %s109_s29 }
  0x8b   :  { %s8672_s8 = scalar_lea.vmem %s110_s29, 16384  ;;  %p8677_p0 = scmp.lt.s32.totalorder %s110_s29, %s110_s29 }
  0x8c   :  { %p8673_p13 = scmp.ne.s32.totalorder %s110_s29, %s8672_s8  ;;  %p8678_p1 = scmp.lt.s32.totalorder %s8672_s8, %s8672_s8 }
  0x8e   :  { %p8679_p2 = por %p8678_p1, %p8677_p0 }
  0x8f   :  { %93 = dma.hbm_to_vmem [thread:$0]  %s10615_s3, 16, %s91_s27, [#allocation9]  }
  0x90   :  { %p8680_p3 = pnand %p8679_p2, %p8673_p13 }
  0x92   :  { %8683 = shalt.err (!%p8680_p3)
}
  0x93   :  { %s8884_s28 = smov 512   ;;  %s8885_s0 = smov 32  }
  0x94   :  { %115 = dma.hbm_to_vmem [thread:$0]  %s10584_s7, 16384, %s110_s29, [#allocation12], %s8884_s28, %s8884_s28, %s8885_s0  }
  0x95   :  { %s8886_s17 = smov [#allocation16]   ;;  %s8887_s27 = smov [#allocation19]  }
  0x96   :  { %s132_s10 = sshll.u32 %s8886_s17, 4  ;;  %s154_s5 = sshll.u32 %s8887_s27, 4  ;;  %s133_s10 = int_to_ptr.vmem [resolvable:$true] %s132_s10  ;;  %s155_s5 = int_to_ptr.vmem [resolvable:$true] %s154_s5 }
  0x97   :  { %s8692_s22 = scalar_lea.vmem %s133_s10, 16  ;;  %s8696_s23 = scalar_lea.vmem %s133_s10, 32 }
  0x98   :  { %p8693_p4 = scmp.ne.s32.totalorder %s133_s10, %s8692_s22  ;;  %p8697_p5 = scmp.lt.s32.totalorder %s133_s10, %s133_s10 }
  0x99   :  { %p8698_p6 = scmp.lt.s32.totalorder %s8696_s23, %s8692_s22 }
  0x9b   :  { %p8699_p7 = por %p8698_p6, %p8697_p5 }
  0x9d   :  { %p8700_p8 = pnand %p8699_p7, %p8693_p4 }
  0x9f   :  { %8703 = shalt.err (!%p8700_p8)
}
  0xa0   :  { %135 = dma.hbm_to_vmem [thread:$0]  %s10586_s9, 16, %s133_s10, [#allocation15]  }
  0xa1   :  { %s8712_s24 = scalar_lea.vmem %s155_s5, 32  ;;  %p8717_p10 = scmp.lt.s32.totalorder %s155_s5, %s155_s5 }
  0xa2   :  { %p8713_p9 = scmp.ne.s32.totalorder %s155_s5, %s8712_s24  ;;  %p8718_p11 = scmp.lt.s32.totalorder %s8712_s24, %s8712_s24 }
  0xa4   :  { %p8719_p12 = por %p8718_p11, %p8717_p10 }
  0xa6   :  { %p8720_p13 = pnand %p8719_p12, %p8713_p9 }
  0xa8   :  { %8723 = shalt.err (!%p8720_p13)
}
  0xa9   :  { %157 = dma.hbm_to_vmem [thread:$0]  %s10588_s11, 32, %s155_s5, [#allocation18]  }
  0xaa   :  { %s8888_s26 = smov [#allocation22]   ;;  %s8889_s25 = smov [#allocation25]  }
  0xab   :  { %s173_s3 = sshll.u32 %s8888_s26, 4  ;;  %s196_s29 = sshll.u32 %s8889_s25, 4  ;;  %s174_s3 = int_to_ptr.vmem [resolvable:$true] %s173_s3  ;;  %s197_s29 = int_to_ptr.vmem [resolvable:$true] %s196_s29 }
  0xac   :  { %s8732_s8 = scalar_lea.vmem %s174_s3, 262144  ;;  %p8737_p1 = scmp.lt.s32.totalorder %s174_s3, %s174_s3 }
  0xad   :  { %p8733_p0 = scmp.ne.s32.totalorder %s174_s3, %s8732_s8  ;;  %p8738_p2 = scmp.lt.s32.totalorder %s8732_s8, %s8732_s8 }
  0xaf   :  { %p8739_p3 = por %p8738_p2, %p8737_p1 }
  0xb1   :  { %p8740_p4 = pnand %p8739_p3, %p8733_p0 }
  0xb3   :  { %8743 = shalt.err (!%p8740_p4)
}
  0xb4   :  { %s8890_s9 = smov 2048   ;;  %s8752_s11 = scalar_lea.vmem %s197_s29, 64 }
  0xb5   :  { %179 = dma.hbm_to_vmem [thread:$0]  %s10590_s13, 262144, %s174_s3, [#allocation21], %s8890_s9, %s8890_s9, %s8879_s14  }
  0xb6   :  { %p8753_p5 = scmp.ne.s32.totalorder %s197_s29, %s8752_s11  ;;  %p8757_p6 = scmp.lt.s32.totalorder %s197_s29, %s197_s29 }
  0xb7   :  { %p8758_p7 = scmp.lt.s32.totalorder %s8752_s11, %s8752_s11 }
  0xb9   :  { %p8759_p8 = por %p8758_p7, %p8757_p6 }
  0xbb   :  { %p8760_p9 = pnand %p8759_p8, %p8753_p5 }
  0xbd   :  { %8763 = shalt.err (!%p8760_p9)
}
  0xbe   :  { %199 = dma.hbm_to_vmem [thread:$0]  %s10592_s15, 64, %s197_s29, [#allocation24]  }
  0xbf   :  { %s8891_s10 = smov [#allocation28]  }
  0xc0   :  { %s218_s27 = sshll.u32 %s8891_s10, 4  ;;  %s219_s27 = int_to_ptr.vmem [resolvable:$true] %s218_s27 }
  0xc1   :  { %s8772_s5 = scalar_lea.vmem %s219_s27, 32  ;;  %p8777_p11 = scmp.lt.s32.totalorder %s219_s27, %s219_s27 }
  0xc2   :  { %p8773_p10 = scmp.ne.s32.totalorder %s219_s27, %s8772_s5  ;;  %p8778_p12 = scmp.lt.s32.totalorder %s8772_s5, %s8772_s5 }
  0xc4   :  { %p8779_p13 = por %p8778_p12, %p8777_p11 }
  0xc6   :  { %p8780_p0 = pnand %p8779_p13, %p8773_p10 }
  0xc8   :  { %8783 = shalt.err (!%p8780_p0)
}
  0xc9   :  { %221 = dma.hbm_to_vmem [thread:$0]  %s10595_s18, 32, %s219_s27, [#allocation27]  }
  0xca   :  { %8844 = dma.done.wait [#allocation3], 256  }
  0xcb   :  { %8845 = vsyncadd [#allocation3], 4294967040 }
  0xcc   :  { %8846 = dma.done.wait [#allocation6], 32  }
  0xcd   :  { %8847 = vsyncadd [#allocation6], 4294967264 }
  0xce   :  { %8848 = dma.done.wait [#allocation9], 4112  }
  0xcf   :  { %8849 = vsyncadd [#allocation9], 4294963184 }
  0xd0   :  { %8850 = dma.done.wait [#allocation12], 16400  }
  0xd1   :  { %8851 = vsyncadd [#allocation12], 4294950896 }
  0xd2   :  { %8852 = dma.done.wait [#allocation15], 32  }
  0xd3   :  { %8853 = vsyncadd [#allocation15], 4294967264 }
  0xd4   :  { %8854 = dma.done.wait [#allocation18], 65568  }
  0xd5   :  { %8855 = vsyncadd [#allocation18], 4294901728 }
  0xd6   :  { %8856 = dma.done.wait [#allocation21], 262176  }
  0xd7   :  { %8857 = vsyncadd [#allocation21], 4294705120 }
  0xd8   :  { %8858 = dma.done.wait [#allocation24], 128  }
  0xd9   :  { %8859 = vsyncadd [#allocation24], 4294967168 }
  0xda   :  { %8860 = dma.done.wait [#allocation27], 48  }
  0xdb   :  { %8861 = vsyncadd [#allocation27], 4294967248  ;;  %v8892_v0 = vmov 0.0   ;;  %vm8893_vm0 = vmmov 0   ;;  %vm280_vm1 = vcmask 1043456   ;;  %v274_v2 = vld [vmem:[#allocation2] sm:$0xff]  ;;  %v408_v53 = vlaneseq }
  0xdc   :  { %8383 = vmatprep.subr.mxu0 %v8892_v0  ;;  %8387 = vmatprep.mubr.msk.f32.mxu0 %vm8893_vm0, %v8892_v0  ;;  %v275_v1 = vld [vmem:[#allocation2 + $0x8] sm:$0xf]  ;;  %s10616_s22 = sld [smem:[#allocation50_spill]]  ;;  %vm276_vm2 = vcmask 97280   ;;  %vm354_vm3 = vcmask 1041408   ;;  %s8894_s23 = smov 96  }
  0xdd   :  { %553 = vmatprep.mubr.f32.mxu1 %v8892_v0  ;;  %8384 = vmatpush3.msk.msra.mxu0 %vm280_vm1, %v275_v1  ;;  %v488_v21 = vld [vmem:[#allocation8 + $0xf8] sm:$0xff]  ;;  %v487_v22 = vld [vmem:[#allocation8 + $0xf0] sm:$0xff]  ;;  %v486_v23 = vld [vmem:[#allocation8 + $0xe8] sm:$0xff]  ;;  %v9082_v58 = vshrl.u32 %v408_v53, 7  ;;  %vm421_vm4 = vcmask 261120   ;;  %vm423_vm5 = vcmask 523264  }
  0xde   :  { %8385 = vmatprep.subr.mxu0 %v8892_v0  ;;  %489 = vmatprep.subr.mxu1 %v488_v21  ;;  %v485_v24 = vld [vmem:[#allocation8 + $0xe0] sm:$0xff]  ;;  %v484_v25 = vld [vmem:[#allocation8 + $0xd8] sm:$0xff]  ;;  %v483_v26 = vld [vmem:[#allocation8 + $0xd0] sm:$0xff]  ;;  %vm425_vm6 = vcmask 785408  }
  0xdf   :  { %8386 = vmatpush3.msra.mxu0 %v274_v2  ;;  %490 = vmatpush1.msra.mxu1 %v487_v22  ;;  %v482_v27 = vld [vmem:[#allocation8 + $0xc8] sm:$0xff]  ;;  %v481_v28 = vld [vmem:[#allocation8 + $0xc0] sm:$0xff]  ;;  %v480_v29 = vld [vmem:[#allocation8 + $0xb8] sm:$0xff]  ;;  %v9085_v0 = vsub.s32 0, %v9082_v58 }
  0xe0   :  { %491 = vmatprep.subr.mxu1 %v486_v23  ;;  %v479_v30 = vld [vmem:[#allocation8 + $0xb0] sm:$0xff]  ;;  %v478_v31 = vld [vmem:[#allocation8 + $0xa8] sm:$0xff]  ;;  %v477_v32 = vld [vmem:[#allocation8 + $0xa0] sm:$0xff] }
  0xe1   :  { %492 = vmatpush1.msra.mxu1 %v485_v24  ;;  %v476_v33 = vld [vmem:[#allocation8 + $0x98] sm:$0xff]  ;;  %v475_v34 = vld [vmem:[#allocation8 + $0x90] sm:$0xff]  ;;  %v474_v35 = vld [vmem:[#allocation8 + $0x88] sm:$0xff] }
  0xe2   :  { %v273_v3 = vld [vmem:[%s10616_s22] sm:$0x3]  ;;  %493 = vmatprep.subr.mxu1 %v484_v25  ;;  %v473_v54 = vld [vmem:[#allocation8 + $0x80] sm:$0xff]  ;;  %v472_v55 = vld [vmem:[#allocation8 + $0x78] sm:$0xff] }
  0xe3   :  { %8388 = vmatmul.mubr.msk.f32.vlgmr.msra.gmra.mxu0 %vm276_vm2, %v273_v3  ;;  %494 = vmatpush1.msra.mxu1 %v483_v26  ;;  %v471_v56 = vld [vmem:[#allocation8 + $0x70] sm:$0xff]  ;;  %v470_v57 = vld [vmem:[#allocation8 + $0x68] sm:$0xff]  ;;  %v469_v59 = vld [vmem:[#allocation8 + $0x60] sm:$0xff] }
  0xe4   :  { %495 = vmatprep.subr.mxu1 %v482_v27  ;;  %v468_v60 = vld [vmem:[#allocation8 + $0x58] sm:$0xff]  ;;  %v467_v61 = vld [vmem:[#allocation8 + $0x50] sm:$0xff]  ;;  %v466_v63 = vld [vmem:[#allocation8 + $0x48] sm:$0xff] }
  0xe5   :  { %496 = vmatpush1.msra.mxu1 %v481_v28  ;;  %v400_v62 = vld [vmem:[#allocation5] sm:$0x1]  ;;  %v465_v1 = vld [vmem:[#allocation8 + $0x40] sm:$0xff] }
  0xe6   :  { %497 = vmatprep.subr.mxu1 %v480_v29  ;;  %v464_v3 = vld [vmem:[#allocation8 + $0x38] sm:$0xff] }
  0xe7   :  { %498 = vmatpush1.msra.mxu1 %v479_v30 }
  0xe8   :  { %499 = vmatprep.subr.mxu1 %v478_v31 }
  0xe9   :  { %500 = vmatpush1.msra.mxu1 %v477_v32 }
  0xea   :  { %501 = vmatprep.subr.mxu1 %v476_v33 }
  0xeb   :  { %502 = vmatpush1.msra.mxu1 %v475_v34 }
  0xec   :  { %503 = vmatprep.subr.mxu1 %v474_v35 }
  0xed   :  { %504 = vmatpush1.msra.mxu1 %v473_v54 }
  0xee   :  { %505 = vmatprep.subr.mxu1 %v472_v55 }
  0xef   :  { %506 = vmatpush1.msra.mxu1 %v471_v56 }
  0xf0   :  { %507 = vmatprep.subr.mxu1 %v470_v57 }
  0xf1   :  { %508 = vmatpush1.msra.mxu1 %v469_v59 }
  0xf2   :  { %509 = vmatprep.subr.mxu1 %v468_v60 }
  0xf3   :  { %510 = vmatpush1.msra.mxu1 %v467_v61 }
  0xf4   :  { %511 = vmatprep.subr.mxu1 %v466_v63 }
  0xf5   :  { %512 = vmatpush1.msra.mxu1 %v465_v1 }
  0xf6   :  { %513 = vmatprep.subr.mxu1 %v464_v3 }
 0x1a3   :  { %v9069_v4 = vpop.f32.mrf.mxu0 }
 0x1a4   :  { %v355_v5 = vsel %vm354_vm3, %v9069_v4, 0.0  ;;  %v362_v6 = vmul.f32 %v9069_v4, %v9069_v4 }
 0x1a5   :  { %v356_v7 = vrot.slane %v355_v5, 4  ;;  %v8389_v8 = vpop.f32.mrf.mxu0 }
 0x1a6   :  { %v363_v9 = vsel %vm354_vm3, %v362_v6, 0.0  ;;  %v463_v6 = vld [vmem:[#allocation8 + $0x30] sm:$0xff]  ;;  %v462_v8 = vld [vmem:[#allocation8 + $0x28] sm:$0xff] }
 0x1a7   :  { %v357_v10 = vadd.f32 %v356_v7, %v355_v5  ;;  %v364_v11 = vrot.slane %v363_v9, 4  ;;  %v404_v7 = vld [vmem:[#allocation7] sm:$0x1]  ;;  %514 = vmatpush1.msra.mxu1 %v463_v6  ;;  %v720_v6 = vld [vmem:[#allocation13 + $0x1e8] sm:$0xff] }
 0x1a8   :  { %515 = vmatprep.subr.mxu1 %v462_v8  ;;  %v719_v8 = vld [vmem:[#allocation13 + $0x1e0] sm:$0xff]  ;;  %787 = vmatprep.subr.mxu0 %v720_v6  ;;  %v664_v6 = vld [vmem:[#allocation13 + $0x28] sm:$0xff] }
 0x1a9   :  { %v358_v12 = vrot.slane %v357_v10, 2  ;;  %v365_v13 = vadd.f32 %v364_v11, %v363_v9  ;;  %v461_v11 = vld [vmem:[#allocation8 + $0x20] sm:$0xff]  ;;  %788 = vmatpush1.msra.mxu0 %v719_v8 }
 0x1aa   :  { %516 = vmatpush1.msra.mxu1 %v461_v11  ;;  %v718_v11 = vld [vmem:[#allocation13 + $0x1d8] sm:$0xff]  ;;  %v663_v8 = vld [vmem:[#allocation13 + $0x20] sm:$0xff] }
 0x1ab   :  { %v359_v14 = vadd.f32 %v358_v12, %v357_v10  ;;  %v366_v15 = vrot.slane %v365_v13, 2  ;;  %v460_v12 = vld [vmem:[#allocation8 + $0x18] sm:$0xff] }
 0x1ac   :  { %517 = vmatprep.subr.mxu1 %v460_v12  ;;  %v715_v12 = vld [vmem:[#allocation13 + $0x1c0] sm:$0xff] }
 0x1ad   :  { %v360_v16 = vrot.slane %v359_v14, 1  ;;  %v367_v17 = vadd.f32 %v366_v15, %v365_v13  ;;  %v459_v13 = vld [vmem:[#allocation8 + $0x10] sm:$0xff]  ;;  %v458_v15 = vld [vmem:[#allocation8 + $0x8] sm:$0xff] }
 0x1ae   :  { %518 = vmatpush1.msra.mxu1 %v459_v13  ;;  %v717_v13 = vld [vmem:[#allocation13 + $0x1d0] sm:$0xff] }
 0x1af   :  { %v361_v18 = vadd.f32 %v360_v16, %v359_v14  ;;  %v368_v19 = vrot.slane %v367_v17, 1  ;;  %519 = vmatprep.subr.mxu1 %v458_v15  ;;  %v714_v15 = vld [vmem:[#allocation13 + $0x1b8] sm:$0xff] }
 0x1b1   :  { %379 = vrot.lane.b32.xlu1 %v361_v18, %s8885_s0  ;;  %371 = vrot.lane.b32.xlu0 %v361_v18, %s8894_s23  ;;  %v369_v20 = vadd.f32 %v368_v19, %v367_v17  ;;  %v457_v17 = vld [vmem:[#allocation8] sm:$0xff] }
 0x1b2   :  { %520 = vmatpush1.msra.mxu1 %v457_v17  ;;  %v713_v17 = vld [vmem:[#allocation13 + $0x1b0] sm:$0xff] }
 0x1b5   :  { %384 = vrot.lane.b32.xlu1 %v369_v20, %s8894_s23  ;;  %375 = vrot.lane.b32.xlu0 %v361_v18, %s8874_s2 }
 0x1b9   :  { %392 = vrot.lane.b32.xlu1 %v369_v20, %s8885_s0  ;;  %388 = vrot.lane.b32.xlu0 %v369_v20, %s8874_s2 }
 0x223   :  { %v380_v36 = vpop.permute.xlu1 %379  ;;  %v372_v37 = vpop.permute.xlu0 %371 }
 0x224   :  { %v374_v38 = vadd.f32 %v372_v37, %v361_v18 }
 0x227   :  { %v385_v39 = vpop.permute.xlu1 %384  ;;  %v376_v40 = vpop.permute.xlu0 %375 }
 0x228   :  { %v378_v41 = vadd.f32 %v376_v40, %v374_v38  ;;  %v387_v42 = vadd.f32 %v385_v39, %v369_v20 }
 0x22a   :  { %v382_v43 = vadd.f32 %v380_v36, %v378_v41 }
 0x22b   :  { %v389_v44 = vpop.permute.xlu0 %388  ;;  %v393_v47 = vpop.permute.xlu1 %392 }
 0x22c   :  { %v396_v45 = vmul.f32 0.125, %v382_v43  ;;  %v391_v46 = vadd.f32 %v389_v44, %v387_v42 }
 0x22e   :  { %v395_v48 = vadd.f32 %v393_v47, %v391_v46  ;;  %v398_v49 = vmul.f32 %v396_v45, %v396_v45 }
 0x230   :  { %v397_v50 = vmul.f32 0.125, %v395_v48 }
 0x232   :  { %v399_v51 = vsub.f32 %v397_v50, %v398_v49 }
 0x234   :  { %v401_v52 = vadd.f32 1e-05, %v399_v51 }
 0x236   :  { %8424 = vrsqrt.f32 %v401_v52 }
 0x243   :  { %v8425_v2 = vpop.eup %8424 }
 0x244   :  { %v403_v5 = vmul.f32 %v8425_v2, %v400_v62 }
 0x246   :  { %v411_v9 = vrot.slane %v403_v5, %v9085_v0  ;;  %v405_v10 = vmul.f32 %v403_v5, %v396_v45 }
 0x248   :  { %415 = vrot.lane.b32.xlu1 %v411_v9, %s8874_s2  ;;  %412 = vrot.lane.b32.xlu0 %v411_v9, %s8885_s0  ;;  %v406_v14 = vsub.f32 %v404_v7, %v405_v10  ;;  %v722_v7 = vld [vmem:[#allocation13 + $0x1f8] sm:$0xff]  ;;  %v716_v10 = vld [vmem:[#allocation13 + $0x1c8] sm:$0xff] }
 0x249   :  { %858 = vmatprep.subr.mxu1 %v722_v7  ;;  %789 = vmatprep.subr.mxu0 %v716_v10  ;;  %v666_v7 = vld [vmem:[#allocation13 + $0x38] sm:$0xff]  ;;  %v660_v10 = vld [vmem:[#allocation13 + $0x8] sm:$0xff] }
 0x24a   :  { %v431_v16 = vrot.slane %v406_v14, %v9085_v0  ;;  %790 = vmatpush1.msra.mxu0 %v715_v12  ;;  %v659_v12 = vld [vmem:[#allocation13] sm:$0xff] }
 0x24c   :  { %418 = vrot.lane.b32.xlu0 %v411_v9, %s8894_s23  ;;  %432 = vrot.lane.b32.xlu1 %v431_v16, %s8885_s0  ;;  %v721_v9 = vld [vmem:[#allocation13 + $0x1f0] sm:$0xff] }
 0x250   :  { %435 = vrot.lane.b32.xlu0 %v431_v16, %s8874_s2  ;;  %438 = vrot.lane.b32.xlu1 %v431_v16, %s8894_s23  ;;  %v711_v16 = vld [vmem:[#allocation13 + $0x1a0] sm:$0xff]  ;;  %s8897_s23 = smov [#allocation29]  }
 0x2ba   :  { %v416_v18 = vpop.permute.xlu1 %415  ;;  %v413_v19 = vpop.permute.xlu0 %412 }
 0x2bb   :  { %v422_v20 = vsel %vm421_vm4, %v403_v5, %v413_v19  ;;  %v710_v19 = vld [vmem:[#allocation13 + $0x198] sm:$0xff] }
 0x2bc   :  { %v424_v21 = vsel %vm423_vm5, %v422_v20, %v416_v18  ;;  %v708_v18 = vld [vmem:[#allocation13 + $0x188] sm:$0xff]  ;;  %v707_v20 = vld [vmem:[#allocation13 + $0x180] sm:$0xff] }
 0x2be   :  { %v419_v22 = vpop.permute.xlu0 %418  ;;  %v433_v23 = vpop.permute.xlu1 %432 }
 0x2bf   :  { %v426_v24 = vsel %vm425_vm6, %v424_v21, %v419_v22  ;;  %v441_v26 = vsel %vm421_vm4, %v406_v14, %v433_v23  ;;  %v712_v14 = vld [vmem:[#allocation13 + $0x1a8] sm:$0xff]  ;;  %v709_v21 = vld [vmem:[#allocation13 + $0x190] sm:$0xff]  ;;  %v706_v23 = vld [vmem:[#allocation13 + $0x178] sm:$0xff] }
 0x2c0   :  { %v447_v25 = vrot.slane %v426_v24, %v9085_v0  ;;  %791 = vmatprep.subr.mxu0 %v712_v14  ;;  %v704_v22 = vld [vmem:[#allocation13 + $0x168] sm:$0xff]  ;;  %v703_v24 = vld [vmem:[#allocation13 + $0x160] sm:$0xff] }
 0x2c1   :  { %792 = vmatpush1.msra.mxu0 %v711_v16  ;;  %v784_v14 = vld [vmem:[#allocation13 + $0x3e8] sm:$0xff]  ;;  %v783_v16 = vld [vmem:[#allocation13 + $0x3e0] sm:$0xff] }
 0x2c2   :  { %v436_v27 = vpop.permute.xlu0 %435  ;;  %v439_v28 = vpop.permute.xlu1 %438  ;;  %v448_v31 = vmul.f32 %v447_v25, %v9069_v4  ;;  %793 = vmatprep.subr.mxu0 %v708_v18  ;;  %v705_v25 = vld [vmem:[#allocation13 + $0x170] sm:$0xff]  ;;  %v780_v18 = vld [vmem:[#allocation13 + $0x3c8] sm:$0xff] }
 0x2c3   :  { %v442_v29 = vsel %vm423_vm5, %v441_v26, %v436_v27  ;;  %794 = vmatpush1.msra.mxu0 %v707_v20  ;;  %v700_v26 = vld [vmem:[#allocation13 + $0x148] sm:$0xff]  ;;  %v702_v27 = vld [vmem:[#allocation13 + $0x158] sm:$0xff]  ;;  %v779_v20 = vld [vmem:[#allocation13 + $0x3c0] sm:$0xff] }
 0x2c4   :  { %v443_v30 = vsel %vm425_vm6, %v442_v29, %v439_v28  ;;  %795 = vmatprep.subr.mxu0 %v704_v22  ;;  %v699_v28 = vld [vmem:[#allocation13 + $0x140] sm:$0xff]  ;;  %v701_v29 = vld [vmem:[#allocation13 + $0x150] sm:$0xff]  ;;  %v776_v22 = vld [vmem:[#allocation13 + $0x3a8] sm:$0xff] }
 0x2c5   :  { %v452_v32 = vrot.slane %v443_v30, %v9085_v0  ;;  %796 = vmatpush1.msra.mxu0 %v703_v24  ;;  %v696_v30 = vld [vmem:[#allocation13 + $0x128] sm:$0xff]  ;;  %v775_v24 = vld [vmem:[#allocation13 + $0x3a0] sm:$0xff] }
 0x2c6   :  { %797 = vmatprep.subr.mxu0 %v700_v26  ;;  %v772_v26 = vld [vmem:[#allocation13 + $0x388] sm:$0xff] }
 0x2c7   :  { %v453_v33 = vadd.f32 %v452_v32, %v448_v31  ;;  %v698_v31 = vld [vmem:[#allocation13 + $0x138] sm:$0xff]  ;;  %v695_v32 = vld [vmem:[#allocation13 + $0x120] sm:$0xff]  ;;  %798 = vmatpush1.msra.mxu0 %v699_v28 }
 0x2c8   :  { %799 = vmatprep.subr.mxu0 %v696_v30  ;;  %v771_v28 = vld [vmem:[#allocation13 + $0x380] sm:$0xff]  ;;  %v768_v30 = vld [vmem:[#allocation13 + $0x368] sm:$0xff] }
 0x2c9   :  { %vm454_vm7 = vcmp.ge.f32.partialorder %v453_v33, 0.0  ;;  %v455_v34 = vmul.f32 0.01, %v453_v33  ;;  %800 = vmatpush1.msra.mxu0 %v695_v32  ;;  %v767_v32 = vld [vmem:[#allocation13 + $0x360] sm:$0xff] }
 0x2cb   :  { %v456_v35 = vsel %vm454_vm7, %v453_v33, %v455_v34  ;;  %v697_v33 = vld [vmem:[#allocation13 + $0x130] sm:$0xff]  ;;  %v692_v34 = vld [vmem:[#allocation13 + $0x108] sm:$0xff] }
 0x2cc   :  { %554 = vmatmul.mubr.f32.vlgmr.msra.gmra.mxu1 %v456_v35  ;;  %v694_v35 = vld [vmem:[#allocation13 + $0x118] sm:$0xff]  ;;  %801 = vmatprep.subr.mxu0 %v692_v34  ;;  %v764_v34 = vld [vmem:[#allocation13 + $0x348] sm:$0xff] }
 0x2cd   :  { %859 = vmatpush1.msra.mxu1 %v721_v9  ;;  %v665_v9 = vld [vmem:[#allocation13 + $0x30] sm:$0xff] }
 0x2ce   :  { %860 = vmatprep.subr.mxu1 %v718_v11  ;;  %v662_v11 = vld [vmem:[#allocation13 + $0x18] sm:$0xff] }
 0x2cf   :  { %861 = vmatpush1.msra.mxu1 %v717_v13  ;;  %v661_v13 = vld [vmem:[#allocation13 + $0x10] sm:$0xff] }
 0x2d0   :  { %862 = vmatprep.subr.mxu1 %v714_v15  ;;  %v786_v15 = vld [vmem:[#allocation13 + $0x3f8] sm:$0xff] }
 0x2d1   :  { %863 = vmatpush1.msra.mxu1 %v713_v17  ;;  %v785_v17 = vld [vmem:[#allocation13 + $0x3f0] sm:$0xff] }
 0x2d2   :  { %864 = vmatprep.subr.mxu1 %v710_v19  ;;  %v782_v19 = vld [vmem:[#allocation13 + $0x3d8] sm:$0xff] }
 0x2d3   :  { %865 = vmatpush1.msra.mxu1 %v709_v21  ;;  %v781_v21 = vld [vmem:[#allocation13 + $0x3d0] sm:$0xff] }
 0x2d4   :  { %866 = vmatprep.subr.mxu1 %v706_v23  ;;  %v778_v23 = vld [vmem:[#allocation13 + $0x3b8] sm:$0xff] }
 0x2d5   :  { %867 = vmatpush1.msra.mxu1 %v705_v25  ;;  %v777_v25 = vld [vmem:[#allocation13 + $0x3b0] sm:$0xff] }
 0x2d6   :  { %868 = vmatprep.subr.mxu1 %v702_v27  ;;  %v774_v27 = vld [vmem:[#allocation13 + $0x398] sm:$0xff] }
 0x2d7   :  { %869 = vmatpush1.msra.mxu1 %v701_v29  ;;  %v773_v29 = vld [vmem:[#allocation13 + $0x390] sm:$0xff] }
 0x2d8   :  { %870 = vmatprep.subr.mxu1 %v698_v31  ;;  %v770_v31 = vld [vmem:[#allocation13 + $0x378] sm:$0xff] }
 0x2d9   :  { %871 = vmatpush1.msra.mxu1 %v697_v33  ;;  %v769_v33 = vld [vmem:[#allocation13 + $0x370] sm:$0xff] }
 0x2da   :  { %872 = vmatprep.subr.mxu1 %v694_v35  ;;  %v766_v35 = vld [vmem:[#allocation13 + $0x358] sm:$0xff] }
 0x38c   :  { %v9100_v36 = vpop.f32.mrf.mxu1 }
 0x38d   :  { %v560_v37 = vsel %vm354_vm3, %v9100_v36, 0.0  ;;  %v574_v38 = vmul.f32 %v9100_v36, %v9100_v36 }
 0x38e   :  { %v561_v39 = vrot.slane %v560_v37, 4  ;;  %v9106_v40 = vpop.f32.mrf.mxu1 }
 0x38f   :  { %v576_v4 = vsel %vm354_vm3, %v574_v38, 0.0  ;;  %v567_v41 = vsel %vm354_vm3, %v9106_v40, 0.0  ;;  %v575_v42 = vmul.f32 %v9106_v40, %v9106_v40  ;;  %v693_v38 = vld [vmem:[#allocation13 + $0x110] sm:$0xff] }
 0x390   :  { %v562_v43 = vadd.f32 %v561_v39, %v560_v37  ;;  %v577_v44 = vrot.slane %v576_v4, 4  ;;  %v568_v45 = vrot.slane %v567_v41, 4  ;;  %v691_v37 = vld [vmem:[#allocation13 + $0x100] sm:$0xff]  ;;  %v688_v39 = vld [vmem:[#allocation13 + $0xe8] sm:$0xff]  ;;  %873 = vmatpush1.msra.mxu1 %v693_v38  ;;  %v765_v38 = vld [vmem:[#allocation13 + $0x350] sm:$0xff] }
 0x391   :  { %v583_v46 = vsel %vm354_vm3, %v575_v42, 0.0  ;;  %v689_v42 = vld [vmem:[#allocation13 + $0xf0] sm:$0xff]  ;;  %802 = vmatpush1.msra.mxu0 %v691_v37  ;;  %v763_v37 = vld [vmem:[#allocation13 + $0x340] sm:$0xff] }
 0x392   :  { %v569_v47 = vadd.f32 %v568_v45, %v567_v41  ;;  %v584_v48 = vrot.slane %v583_v46, 4  ;;  %v563_v49 = vrot.slane %v562_v43, 2  ;;  %v578_v50 = vadd.f32 %v577_v44, %v576_v4  ;;  %v690_v4 = vld [vmem:[#allocation13 + $0xf8] sm:$0xff]  ;;  %v687_v41 = vld [vmem:[#allocation13 + $0xe0] sm:$0xff]  ;;  %803 = vmatprep.subr.mxu0 %v688_v39  ;;  %v760_v39 = vld [vmem:[#allocation13 + $0x328] sm:$0xff] }
 0x393   :  { %v686_v44 = vld [vmem:[#allocation13 + $0xd8] sm:$0xff]  ;;  %874 = vmatprep.subr.mxu1 %v690_v4  ;;  %v683_v45 = vld [vmem:[#allocation13 + $0xc0] sm:$0xff]  ;;  %804 = vmatpush1.msra.mxu0 %v687_v41 }
 0x394   :  { %v564_v51 = vadd.f32 %v563_v49, %v562_v43  ;;  %v579_v52 = vrot.slane %v578_v50, 2  ;;  %v570_v53 = vrot.slane %v569_v47, 2  ;;  %v585_v54 = vadd.f32 %v584_v48, %v583_v46  ;;  %v684_v43 = vld [vmem:[#allocation13 + $0xc8] sm:$0xff]  ;;  %v685_v46 = vld [vmem:[#allocation13 + $0xd0] sm:$0xff]  ;;  %875 = vmatpush1.msra.mxu1 %v689_v42  ;;  %v682_v48 = vld [vmem:[#allocation13 + $0xb8] sm:$0xff] }
 0x395   :  { %805 = vmatprep.subr.mxu0 %v684_v43  ;;  %876 = vmatprep.subr.mxu1 %v686_v44  ;;  %v679_v49 = vld [vmem:[#allocation13 + $0xa0] sm:$0xff]  ;;  %v762_v4 = vld [vmem:[#allocation13 + $0x338] sm:$0xff]  ;;  %v761_v42 = vld [vmem:[#allocation13 + $0x330] sm:$0xff] }
 0x396   :  { %v565_v55 = vrot.slane %v564_v51, 1  ;;  %v580_v56 = vadd.f32 %v579_v52, %v578_v50  ;;  %v571_v57 = vadd.f32 %v570_v53, %v569_v47  ;;  %v586_v59 = vrot.slane %v585_v54, 2  ;;  %v680_v47 = vld [vmem:[#allocation13 + $0xa8] sm:$0xff]  ;;  %v681_v50 = vld [vmem:[#allocation13 + $0xb0] sm:$0xff]  ;;  %806 = vmatpush1.msra.mxu0 %v683_v45  ;;  %877 = vmatpush1.msra.mxu1 %v685_v46  ;;  %v678_v52 = vld [vmem:[#allocation13 + $0x98] sm:$0xff] }
 0x397   :  { %807 = vmatprep.subr.mxu0 %v680_v47  ;;  %878 = vmatprep.subr.mxu1 %v682_v48  ;;  %v675_v53 = vld [vmem:[#allocation13 + $0x80] sm:$0xff]  ;;  %v756_v43 = vld [vmem:[#allocation13 + $0x308] sm:$0xff]  ;;  %v758_v44 = vld [vmem:[#allocation13 + $0x318] sm:$0xff] }
 0x398   :  { %v9114_v60 = vadd.f32 %v565_v55, %v564_v51  ;;  %v581_v61 = vrot.slane %v580_v56, 1  ;;  %v572_v62 = vrot.slane %v571_v57, 1  ;;  %v587_v63 = vadd.f32 %v586_v59, %v585_v54  ;;  %v676_v51 = vld [vmem:[#allocation13 + $0x88] sm:$0xff]  ;;  %v677_v54 = vld [vmem:[#allocation13 + $0x90] sm:$0xff]  ;;  %808 = vmatpush1.msra.mxu0 %v679_v49  ;;  %879 = vmatpush1.msra.mxu1 %v681_v50  ;;  %v759_v41 = vld [vmem:[#allocation13 + $0x320] sm:$0xff] }
 0x399   :  { %v672_v55 = vld [vmem:[#allocation13 + $0x68] sm:$0xff]  ;;  %809 = vmatprep.subr.mxu0 %v676_v51  ;;  %880 = vmatprep.subr.mxu1 %v678_v52  ;;  %v673_v59 = vld [vmem:[#allocation13 + $0x70] sm:$0xff]  ;;  %v755_v45 = vld [vmem:[#allocation13 + $0x300] sm:$0xff] }
 0x39a   :  { %591 = vrot.lane.b32.xlu0 %v9114_v60, %s8874_s2  ;;  %v9118_v1 = vadd.f32 %v581_v61, %v580_v56  ;;  %v588_v2 = vrot.slane %v587_v63, 1  ;;  %v9122_v3 = vadd.f32 %v572_v62, %v571_v57  ;;  %v674_v56 = vld [vmem:[#allocation13 + $0x78] sm:$0xff]  ;;  %v671_v57 = vld [vmem:[#allocation13 + $0x60] sm:$0xff]  ;;  %810 = vmatpush1.msra.mxu0 %v675_v53  ;;  %v668_v61 = vld [vmem:[#allocation13 + $0x48] sm:$0xff] }
 0x39b   :  { %881 = vmatpush1.msra.mxu1 %v677_v54  ;;  %v670_v62 = vld [vmem:[#allocation13 + $0x58] sm:$0xff]  ;;  %811 = vmatprep.subr.mxu0 %v672_v55  ;;  %v757_v46 = vld [vmem:[#allocation13 + $0x310] sm:$0xff]  ;;  %v752_v47 = vld [vmem:[#allocation13 + $0x2e8] sm:$0xff] }
 0x39c   :  { %602 = vrot.lane.b32.xlu1 %v9118_v1, %s8874_s2  ;;  %v9126_v5 = vadd.f32 %v588_v2, %v587_v63  ;;  %882 = vmatprep.subr.mxu1 %v674_v56  ;;  %v667_v63 = vld [vmem:[#allocation13 + $0x40] sm:$0xff]  ;;  %v669_v2 = vld [vmem:[#allocation13 + $0x50] sm:$0xff]  ;;  %v754_v48 = vld [vmem:[#allocation13 + $0x2f8] sm:$0xff] }
 0x39d   :  { %812 = vmatpush1.msra.mxu0 %v671_v57  ;;  %883 = vmatpush1.msra.mxu1 %v673_v59  ;;  %v751_v49 = vld [vmem:[#allocation13 + $0x2e0] sm:$0xff]  ;;  %v753_v50 = vld [vmem:[#allocation13 + $0x2f0] sm:$0xff]  ;;  %v748_v51 = vld [vmem:[#allocation13 + $0x2c8] sm:$0xff] }
 0x39e   :  { %597 = vrot.lane.b32.xlu0 %v9122_v3, %s8874_s2  ;;  %813 = vmatprep.subr.mxu0 %v668_v61  ;;  %v750_v52 = vld [vmem:[#allocation13 + $0x2d8] sm:$0xff] }
 0x39f   :  { %884 = vmatprep.subr.mxu1 %v670_v62  ;;  %814 = vmatpush1.msra.mxu0 %v667_v63 }
 0x3a0   :  { %608 = vrot.lane.b32.xlu1 %v9126_v5, %s8874_s2  ;;  %885 = vmatpush1.msra.mxu1 %v669_v2 }
 0x3a1   :  { %815 = vmatprep.subr.mxu0 %v664_v6  ;;  %886 = vmatprep.subr.mxu1 %v666_v7 }
 0x3a2   :  { %816 = vmatpush1.msra.mxu0 %v663_v8  ;;  %887 = vmatpush1.msra.mxu1 %v665_v9 }
 0x3a3   :  { %817 = vmatprep.subr.mxu0 %v660_v10  ;;  %888 = vmatprep.subr.mxu1 %v662_v11  ;;  %v747_v11 = vld [vmem:[#allocation13 + $0x2c0] sm:$0xff] }
 0x3a4   :  { %818 = vmatpush1.msra.mxu0 %v659_v12  ;;  %889 = vmatpush1.msra.mxu1 %v661_v13  ;;  %v749_v12 = vld [vmem:[#allocation13 + $0x2d0] sm:$0xff] }
 0x3a5   :  { %819 = vmatprep.subr.mxu0 %v784_v14  ;;  %890 = vmatprep.subr.mxu1 %v786_v15  ;;  %v745_v13 = vld [vmem:[#allocation13 + $0x2b0] sm:$0xff]  ;;  %v742_v14 = vld [vmem:[#allocation13 + $0x298] sm:$0xff]  ;;  %v739_v15 = vld [vmem:[#allocation13 + $0x280] sm:$0xff] }
 0x3a6   :  { %820 = vmatpush2.msra.mxu0 %v783_v16  ;;  %891 = vmatpush2.msra.mxu1 %v785_v17  ;;  %v741_v16 = vld [vmem:[#allocation13 + $0x290] sm:$0xff]  ;;  %v736_v17 = vld [vmem:[#allocation13 + $0x268] sm:$0xff] }
 0x3a7   :  { %821 = vmatprep.subr.mxu0 %v780_v18  ;;  %892 = vmatprep.subr.mxu1 %v782_v19  ;;  %v738_v18 = vld [vmem:[#allocation13 + $0x278] sm:$0xff]  ;;  %v735_v19 = vld [vmem:[#allocation13 + $0x260] sm:$0xff] }
 0x3a8   :  { %822 = vmatpush2.msra.mxu0 %v779_v20  ;;  %893 = vmatpush2.msra.mxu1 %v781_v21  ;;  %v737_v20 = vld [vmem:[#allocation13 + $0x270] sm:$0xff]  ;;  %v616_v21 = vld [vmem:[#allocation10] sm:$0x1] }
 0x3a9   :  { %823 = vmatprep.subr.mxu0 %v776_v22  ;;  %894 = vmatprep.subr.mxu1 %v778_v23  ;;  %v732_v22 = vld [vmem:[#allocation13 + $0x248] sm:$0xff]  ;;  %v734_v23 = vld [vmem:[#allocation13 + $0x258] sm:$0xff] }
 0x3aa   :  { %824 = vmatpush2.msra.mxu0 %v775_v24  ;;  %895 = vmatpush2.msra.mxu1 %v777_v25  ;;  %v731_v24 = vld [vmem:[#allocation13 + $0x240] sm:$0xff]  ;;  %v733_v25 = vld [vmem:[#allocation13 + $0x250] sm:$0xff] }
 0x3ab   :  { %825 = vmatprep.subr.mxu0 %v772_v26  ;;  %896 = vmatprep.subr.mxu1 %v774_v27  ;;  %v728_v26 = vld [vmem:[#allocation13 + $0x228] sm:$0xff] }
 0x3ac   :  { %826 = vmatpush2.msra.mxu0 %v771_v28  ;;  %897 = vmatpush2.msra.mxu1 %v773_v29  ;;  %v730_v28 = vld [vmem:[#allocation13 + $0x238] sm:$0xff]  ;;  %v727_v29 = vld [vmem:[#allocation13 + $0x220] sm:$0xff] }
 0x3ad   :  { %827 = vmatprep.subr.mxu0 %v768_v30  ;;  %898 = vmatprep.subr.mxu1 %v770_v31  ;;  %v729_v30 = vld [vmem:[#allocation13 + $0x230] sm:$0xff] }
 0x3ae   :  { %828 = vmatpush2.msra.mxu0 %v767_v32  ;;  %899 = vmatpush2.msra.mxu1 %v769_v33  ;;  %v724_v32 = vld [vmem:[#allocation13 + $0x208] sm:$0xff]  ;;  %v726_v33 = vld [vmem:[#allocation13 + $0x218] sm:$0xff] }
 0x3af   :  { %829 = vmatprep.subr.mxu0 %v764_v34  ;;  %900 = vmatprep.subr.mxu1 %v766_v35  ;;  %v723_v34 = vld [vmem:[#allocation13 + $0x200] sm:$0xff]  ;;  %v620_v35 = vld [vmem:[#allocation11] sm:$0x1] }
 0x3b0   :  { %830 = vmatpush2.msra.mxu0 %v763_v37  ;;  %901 = vmatpush2.msra.mxu1 %v765_v38 }
 0x3b1   :  { %831 = vmatprep.subr.mxu0 %v760_v39  ;;  %902 = vmatprep.subr.mxu1 %v762_v4  ;;  %v725_v39 = vld [vmem:[#allocation13 + $0x210] sm:$0xff] }
 0x3b2   :  { %832 = vmatpush2.msra.mxu0 %v759_v41  ;;  %903 = vmatpush2.msra.mxu1 %v761_v42  ;;  %v1155_v41 = vld [vmem:[#allocation17 + $0x3c8] sm:$0xff] }
 0x3b3   :  { %833 = vmatprep.subr.mxu0 %v756_v43  ;;  %904 = vmatprep.subr.mxu1 %v758_v44  ;;  %v1411_v42 = vld [vmem:[#allocation17 + $0xbc8] sm:$0xff] }
 0x3b4   :  { %834 = vmatpush2.msra.mxu0 %v755_v45  ;;  %905 = vmatpush2.msra.mxu1 %v757_v46 }
 0x3b5   :  { %835 = vmatprep.subr.mxu0 %v752_v47  ;;  %906 = vmatprep.subr.mxu1 %v754_v48 }
 0x3b6   :  { %836 = vmatpush2.msra.mxu0 %v751_v49  ;;  %907 = vmatpush2.msra.mxu1 %v753_v50 }
 0x3b7   :  { %837 = vmatprep.subr.mxu0 %v748_v51  ;;  %908 = vmatprep.subr.mxu1 %v750_v52 }
 0x3b8   :  { %838 = vmatpush2.msra.mxu0 %v747_v11  ;;  %909 = vmatpush2.msra.mxu1 %v749_v12  ;;  %v1130_v11 = vld [vmem:[#allocation17 + $0x300] sm:$0xff] }
 0x3b9   :  { %v1386_v12 = vld [vmem:[#allocation17 + $0xb00] sm:$0xff] }
 0x40c   :  { %v592_v53 = vpop.permute.xlu0 %591 }
 0x40d   :  { %v594_v54 = vadd.f32 %v592_v53, %v9114_v60  ;;  %v744_v60 = vld [vmem:[#allocation13 + $0x2a8] sm:$0xff] }
 0x40e   :  { %v603_v55 = vpop.permute.xlu1 %602  ;;  %839 = vmatprep.subr.mxu0 %v744_v60  ;;  %v1123_v60 = vld [vmem:[#allocation17 + $0x2c8] sm:$0xff] }
 0x40f   :  { %v605_v56 = vadd.f32 %v603_v55, %v9118_v1  ;;  %v595_v57 = vadd.f32 %v594_v54, %v9122_v3  ;;  %v746_v1 = vld [vmem:[#allocation13 + $0x2b8] sm:$0xff]  ;;  %v743_v3 = vld [vmem:[#allocation13 + $0x2a0] sm:$0xff] }
 0x410   :  { %v598_v59 = vpop.permute.xlu0 %597  ;;  %910 = vmatprep.subr.mxu1 %v746_v1  ;;  %840 = vmatpush2.msra.mxu0 %v743_v3  ;;  %v1379_v1 = vld [vmem:[#allocation17 + $0xac8] sm:$0xff]  ;;  %v1122_v3 = vld [vmem:[#allocation17 + $0x2c0] sm:$0xff] }
 0x411   :  { %v600_v61 = vadd.f32 %v598_v59, %v595_v57  ;;  %v606_v62 = vadd.f32 %v605_v56, %v9126_v5  ;;  %911 = vmatpush2.msra.mxu1 %v745_v13  ;;  %v740_v5 = vld [vmem:[#allocation13 + $0x288] sm:$0xff] }
 0x412   :  { %v609_v63 = vpop.permute.xlu1 %608  ;;  %841 = vmatprep.subr.mxu0 %v740_v5  ;;  %912 = vmatprep.subr.mxu1 %v742_v14  ;;  %v1154_v59 = vld [vmem:[#allocation17 + $0x3c0] sm:$0xff]  ;;  %v1115_v5 = vld [vmem:[#allocation17 + $0x288] sm:$0xff] }
 0x413   :  { %v612_v2 = vmul.f32 0.125, %v600_v61  ;;  %v611_v6 = vadd.f32 %v609_v63, %v606_v62  ;;  %842 = vmatpush2.msra.mxu0 %v739_v15  ;;  %913 = vmatpush2.msra.mxu1 %v741_v16  ;;  %v1410_v61 = vld [vmem:[#allocation17 + $0xbc0] sm:$0xff]  ;;  %v1147_v62 = vld [vmem:[#allocation17 + $0x388] sm:$0xff] }
 0x414   :  { %843 = vmatprep.subr.mxu0 %v736_v17  ;;  %914 = vmatprep.subr.mxu1 %v738_v18  ;;  %v1403_v63 = vld [vmem:[#allocation17 + $0xb88] sm:$0xff]  ;;  %v1378_v13 = vld [vmem:[#allocation17 + $0xac0] sm:$0xff] }
 0x415   :  { %v614_v7 = vmul.f32 %v612_v2, %v612_v2  ;;  %v613_v8 = vmul.f32 0.125, %v611_v6  ;;  %844 = vmatpush2.msra.mxu0 %v735_v19  ;;  %915 = vmatpush2.msra.mxu1 %v737_v20  ;;  %v1395_v6 = vld [vmem:[#allocation17 + $0xb48] sm:$0xff]  ;;  %v1114_v15 = vld [vmem:[#allocation17 + $0x280] sm:$0xff] }
 0x416   :  { %845 = vmatprep.subr.mxu0 %v732_v22  ;;  %916 = vmatprep.subr.mxu1 %v734_v23  ;;  %v1371_v14 = vld [vmem:[#allocation17 + $0xa88] sm:$0xff]  ;;  %v1370_v16 = vld [vmem:[#allocation17 + $0xa80] sm:$0xff] }
 0x417   :  { %v615_v9 = vsub.f32 %v613_v8, %v614_v7  ;;  %846 = vmatpush2.msra.mxu0 %v731_v24  ;;  %917 = vmatpush2.msra.mxu1 %v733_v25  ;;  %v1138_v7 = vld [vmem:[#allocation17 + $0x340] sm:$0xff]  ;;  %v1107_v17 = vld [vmem:[#allocation17 + $0x248] sm:$0xff] }
 0x418   :  { %847 = vmatprep.subr.mxu0 %v728_v26  ;;  %918 = vmatprep.subr.mxu1 %v730_v28  ;;  %v1394_v8 = vld [vmem:[#allocation17 + $0xb40] sm:$0xff]  ;;  %v1363_v18 = vld [vmem:[#allocation17 + $0xa48] sm:$0xff] }
 0x419   :  { %v617_v10 = vadd.f32 1e-05, %v615_v9  ;;  %848 = vmatpush2.msra.mxu0 %v727_v29  ;;  %919 = vmatpush2.msra.mxu1 %v729_v30  ;;  %v1131_v9 = vld [vmem:[#allocation17 + $0x308] sm:$0xff]  ;;  %v1106_v19 = vld [vmem:[#allocation17 + $0x240] sm:$0xff] }
 0x41a   :  { %849 = vmatprep.subr.mxu0 %v724_v32  ;;  %920 = vmatprep.subr.mxu1 %v726_v33  ;;  %v1362_v20 = vld [vmem:[#allocation17 + $0xa40] sm:$0xff]  ;;  %v1355_v22 = vld [vmem:[#allocation17 + $0xa08] sm:$0xff] }
 0x41b   :  { %8426 = vrsqrt.f32 %v617_v10  ;;  %850 = vmatpush2.msra.mxu0 %v723_v34  ;;  %921 = vmatpush2.msra.mxu1 %v725_v39  ;;  %v1387_v10 = vld [vmem:[#allocation17 + $0xb08] sm:$0xff]  ;;  %v1098_v23 = vld [vmem:[#allocation17 + $0x200] sm:$0xff] }
 0x41c   :  { %1546 = vmatprep.subr.mxu0 %v1155_v41  ;;  %1617 = vmatprep.subr.mxu1 %v1411_v42  ;;  %v1354_v24 = vld [vmem:[#allocation17 + $0xa00] sm:$0xff]  ;;  %v1091_v25 = vld [vmem:[#allocation17 + $0x1c8] sm:$0xff] }
 0x41d   :  { %v1347_v26 = vld [vmem:[#allocation17 + $0x9c8] sm:$0xff]  ;;  %v1346_v28 = vld [vmem:[#allocation17 + $0x9c0] sm:$0xff] }
 0x41e   :  { %v1083_v29 = vld [vmem:[#allocation17 + $0x188] sm:$0xff]  ;;  %v1338_v32 = vld [vmem:[#allocation17 + $0x980] sm:$0xff] }
 0x41f   :  { %v1339_v30 = vld [vmem:[#allocation17 + $0x988] sm:$0xff]  ;;  %v1322_v41 = vld [vmem:[#allocation17 + $0x900] sm:$0xff] }
 0x420   :  { %v1075_v33 = vld [vmem:[#allocation17 + $0x148] sm:$0xff] }
 0x421   :  { %v1331_v34 = vld [vmem:[#allocation17 + $0x948] sm:$0xff] }
 0x422   :  { %v1323_v39 = vld [vmem:[#allocation17 + $0x908] sm:$0xff] }
 0x423   :  { %v1059_v42 = vld [vmem:[#allocation17 + $0xc8] sm:$0xff] }
 0x428   :  { %v8427_v27 = vpop.eup %8426 }
 0x429   :  { %v619_v31 = vmul.f32 %v8427_v27, %v616_v21  ;;  %v1099_v21 = vld [vmem:[#allocation17 + $0x208] sm:$0xff]  ;;  %v1090_v27 = vld [vmem:[#allocation17 + $0x1c0] sm:$0xff] }
 0x42b   :  { %v627_v37 = vrot.slane %v619_v31, %v9085_v0  ;;  %v621_v38 = vmul.f32 %v619_v31, %v612_v2  ;;  %v1139_v2 = vld [vmem:[#allocation17 + $0x348] sm:$0xff] }
 0x42d   :  { %628 = vrot.lane.b32.xlu0 %v627_v37, %s8874_s2  ;;  %v622_v4 = vsub.f32 %v620_v35, %v621_v38  ;;  %v1074_v35 = vld [vmem:[#allocation17 + $0x140] sm:$0xff]  ;;  %v1067_v38 = vld [vmem:[#allocation17 + $0x108] sm:$0xff] }
 0x42e   :  { %v1330_v37 = vld [vmem:[#allocation17 + $0x940] sm:$0xff] }
 0x42f   :  { %v636_v43 = vrot.slane %v622_v4, %v9085_v0 }
 0x431   :  { %637 = vrot.lane.b32.xlu1 %v636_v43, %s8874_s2  ;;  %v1315_v43 = vld [vmem:[#allocation17 + $0x8c8] sm:$0xff]  ;;  %s8053_s2 = sshll.u32 %s8897_s23, 4  ;;  %s8054_s2 = int_to_ptr.vmem [resolvable:$true] %s8053_s2 }
 0x432   :  { %s8784_s0 = scalar_lea.vmem %s8054_s2, 32  ;;  %p8789_p2 = scmp.lt.s32.totalorder %s8054_s2, %s8054_s2 }
 0x433   :  { %p8785_p1 = scmp.ne.s32.totalorder %s8054_s2, %s8784_s0  ;;  %p8790_p3 = scmp.lt.s32.totalorder %s8784_s0, %s8784_s0 }
 0x435   :  { %p8791_p4 = por %p8790_p3, %p8789_p2 }
 0x437   :  { %p8792_p5 = pnand %p8791_p4, %p8785_p1 }
 0x49f   :  { %v629_v44 = vpop.permute.xlu0 %628 }
 0x4a0   :  { %v631_v45 = vsel %vm423_vm5, %v619_v31, %v629_v44  ;;  %v1082_v31 = vld [vmem:[#allocation17 + $0x180] sm:$0xff] }
 0x4a1   :  { %v644_v46 = vrot.slane %v631_v45, %v9085_v0  ;;  %v1058_v44 = vld [vmem:[#allocation17 + $0xc0] sm:$0xff] }
 0x4a2   :  { %v1314_v45 = vld [vmem:[#allocation17 + $0x8c0] sm:$0xff] }
 0x4a3   :  { %v638_v47 = vpop.permute.xlu1 %637  ;;  %v645_v49 = vmul.f32 %v644_v46, %v9100_v36  ;;  %v646_v50 = vmul.f32 %v644_v46, %v9106_v40  ;;  %v1146_v36 = vld [vmem:[#allocation17 + $0x380] sm:$0xff]  ;;  %v1051_v46 = vld [vmem:[#allocation17 + $0x88] sm:$0xff] }
 0x4a4   :  { %v640_v48 = vsel %vm423_vm5, %v622_v4, %v638_v47  ;;  %v1402_v40 = vld [vmem:[#allocation17 + $0xb80] sm:$0xff]  ;;  %v1307_v47 = vld [vmem:[#allocation17 + $0x888] sm:$0xff] }
 0x4a5   :  { %v650_v51 = vrot.slane %v640_v48, %v9085_v0  ;;  %v1066_v4 = vld [vmem:[#allocation17 + $0x100] sm:$0xff] }
 0x4a6   :  { %v1050_v48 = vld [vmem:[#allocation17 + $0x80] sm:$0xff] }
 0x4a7   :  { %v651_v52 = vadd.f32 %v650_v51, %v645_v49  ;;  %v652_v53 = vadd.f32 %v650_v51, %v646_v50  ;;  %v1306_v49 = vld [vmem:[#allocation17 + $0x880] sm:$0xff]  ;;  %v1043_v50 = vld [vmem:[#allocation17 + $0x48] sm:$0xff] }
 0x4a8   :  { %v1299_v51 = vld [vmem:[#allocation17 + $0x848] sm:$0xff] }
 0x4a9   :  { %vm654_vm8 = vcmp.ge.f32.partialorder %v652_v53, 0.0  ;;  %v656_v54 = vmul.f32 0.01, %v652_v53  ;;  %vm653_vm9 = vcmp.ge.f32.partialorder %v651_v52, 0.0  ;;  %v655_v55 = vmul.f32 0.01, %v651_v52 }
 0x4ab   :  { %v658_v56 = vsel %vm654_vm8, %v652_v53, %v656_v54  ;;  %v657_v57 = vsel %vm653_vm9, %v651_v52, %v655_v55  ;;  %v1042_v52 = vld [vmem:[#allocation17 + $0x40] sm:$0xff]  ;;  %v1035_v54 = vld [vmem:[#allocation17 + $0x8] sm:$0xff] }
 0x4ac   :  { %851 = vmatprep.mubr.f32.mxu0 %v658_v56  ;;  %922 = vmatprep.mubr.f32.mxu1 %v658_v56  ;;  %v1298_v53 = vld [vmem:[#allocation17 + $0x840] sm:$0xff]  ;;  %v1291_v55 = vld [vmem:[#allocation17 + $0x808] sm:$0xff] }
 0x4ad   :  { %852 = vmatmul.mubr.f32.vlgmr.msra.gmra.mxu0 %v657_v57  ;;  %923 = vmatmul.mubr.f32.vlgmr.msra.gmra.mxu1 %v657_v57  ;;  %v1034_v56 = vld [vmem:[#allocation17] sm:$0xff] }
 0x4ae   :  { %1547 = vmatpush1.msra.mxu0 %v1154_v59  ;;  %1618 = vmatpush1.msra.mxu1 %v1410_v61  ;;  %v1290_v57 = vld [vmem:[#allocation17 + $0x800] sm:$0xff]  ;;  %v1283_v59 = vld [vmem:[#allocation17 + $0x7c8] sm:$0xff] }
 0x4af   :  { %1548 = vmatprep.subr.mxu0 %v1147_v62  ;;  %1619 = vmatprep.subr.mxu1 %v1403_v63  ;;  %v1539_v61 = vld [vmem:[#allocation17 + $0xfc8] sm:$0xff]  ;;  %v1282_v62 = vld [vmem:[#allocation17 + $0x7c0] sm:$0xff] }
 0x4b0   :  { %1549 = vmatpush1.msra.mxu0 %v1146_v36  ;;  %1620 = vmatpush1.msra.mxu1 %v1402_v40  ;;  %v1538_v63 = vld [vmem:[#allocation17 + $0xfc0] sm:$0xff]  ;;  %v1275_v36 = vld [vmem:[#allocation17 + $0x788] sm:$0xff] }
 0x4b1   :  { %1550 = vmatprep.subr.mxu0 %v1139_v2  ;;  %1621 = vmatprep.subr.mxu1 %v1395_v6  ;;  %v1531_v40 = vld [vmem:[#allocation17 + $0xf88] sm:$0xff]  ;;  %v1274_v2 = vld [vmem:[#allocation17 + $0x780] sm:$0xff] }
 0x4b2   :  { %1551 = vmatpush1.msra.mxu0 %v1138_v7  ;;  %1622 = vmatpush1.msra.mxu1 %v1394_v8  ;;  %v1530_v6 = vld [vmem:[#allocation17 + $0xf80] sm:$0xff]  ;;  %v1267_v7 = vld [vmem:[#allocation17 + $0x748] sm:$0xff] }
 0x4b3   :  { %1552 = vmatprep.subr.mxu0 %v1131_v9  ;;  %1623 = vmatprep.subr.mxu1 %v1387_v10  ;;  %v1523_v8 = vld [vmem:[#allocation17 + $0xf48] sm:$0xff]  ;;  %v1266_v9 = vld [vmem:[#allocation17 + $0x740] sm:$0xff] }
 0x4b4   :  { %1553 = vmatpush1.msra.mxu0 %v1130_v11  ;;  %1624 = vmatpush1.msra.mxu1 %v1386_v12  ;;  %v1522_v10 = vld [vmem:[#allocation17 + $0xf40] sm:$0xff]  ;;  %v1259_v11 = vld [vmem:[#allocation17 + $0x708] sm:$0xff] }
 0x4b5   :  { %1554 = vmatprep.subr.mxu0 %v1123_v60  ;;  %1625 = vmatprep.subr.mxu1 %v1379_v1  ;;  %v1515_v12 = vld [vmem:[#allocation17 + $0xf08] sm:$0xff]  ;;  %v1258_v60 = vld [vmem:[#allocation17 + $0x700] sm:$0xff] }
 0x4b6   :  { %1555 = vmatpush1.msra.mxu0 %v1122_v3  ;;  %1626 = vmatpush1.msra.mxu1 %v1378_v13  ;;  %v1514_v1 = vld [vmem:[#allocation17 + $0xf00] sm:$0xff]  ;;  %v1251_v3 = vld [vmem:[#allocation17 + $0x6c8] sm:$0xff] }
 0x4b7   :  { %1556 = vmatprep.subr.mxu0 %v1115_v5  ;;  %1627 = vmatprep.subr.mxu1 %v1371_v14  ;;  %v1507_v13 = vld [vmem:[#allocation17 + $0xec8] sm:$0xff]  ;;  %v1250_v5 = vld [vmem:[#allocation17 + $0x6c0] sm:$0xff] }
 0x4b8   :  { %1557 = vmatpush1.msra.mxu0 %v1114_v15  ;;  %1628 = vmatpush1.msra.mxu1 %v1370_v16  ;;  %v1506_v14 = vld [vmem:[#allocation17 + $0xec0] sm:$0xff]  ;;  %v1243_v15 = vld [vmem:[#allocation17 + $0x688] sm:$0xff] }
 0x4b9   :  { %1558 = vmatprep.subr.mxu0 %v1107_v17  ;;  %1629 = vmatprep.subr.mxu1 %v1363_v18  ;;  %v1499_v16 = vld [vmem:[#allocation17 + $0xe88] sm:$0xff]  ;;  %v1242_v17 = vld [vmem:[#allocation17 + $0x680] sm:$0xff] }
 0x4ba   :  { %1559 = vmatpush1.msra.mxu0 %v1106_v19  ;;  %1630 = vmatpush1.msra.mxu1 %v1362_v20  ;;  %v1498_v18 = vld [vmem:[#allocation17 + $0xe80] sm:$0xff]  ;;  %v1235_v19 = vld [vmem:[#allocation17 + $0x648] sm:$0xff] }
 0x4bb   :  { %1560 = vmatprep.subr.mxu0 %v1099_v21  ;;  %1631 = vmatprep.subr.mxu1 %v1355_v22  ;;  %v1491_v20 = vld [vmem:[#allocation17 + $0xe48] sm:$0xff]  ;;  %v1234_v21 = vld [vmem:[#allocation17 + $0x640] sm:$0xff] }
 0x4bc   :  { %1561 = vmatpush1.msra.mxu0 %v1098_v23  ;;  %1632 = vmatpush1.msra.mxu1 %v1354_v24  ;;  %v1490_v22 = vld [vmem:[#allocation17 + $0xe40] sm:$0xff]  ;;  %v1227_v23 = vld [vmem:[#allocation17 + $0x608] sm:$0xff] }
 0x4bd   :  { %1562 = vmatprep.subr.mxu0 %v1091_v25  ;;  %1633 = vmatprep.subr.mxu1 %v1347_v26  ;;  %v1483_v24 = vld [vmem:[#allocation17 + $0xe08] sm:$0xff]  ;;  %v1226_v25 = vld [vmem:[#allocation17 + $0x600] sm:$0xff] }
 0x4be   :  { %1563 = vmatpush1.msra.mxu0 %v1090_v27  ;;  %1634 = vmatpush1.msra.mxu1 %v1346_v28  ;;  %v1482_v26 = vld [vmem:[#allocation17 + $0xe00] sm:$0xff]  ;;  %v1219_v27 = vld [vmem:[#allocation17 + $0x5c8] sm:$0xff] }
 0x4bf   :  { %1564 = vmatprep.subr.mxu0 %v1083_v29  ;;  %1635 = vmatprep.subr.mxu1 %v1339_v30  ;;  %v1475_v28 = vld [vmem:[#allocation17 + $0xdc8] sm:$0xff]  ;;  %v1218_v29 = vld [vmem:[#allocation17 + $0x5c0] sm:$0xff] }
 0x4c0   :  { %1565 = vmatpush1.msra.mxu0 %v1082_v31  ;;  %1636 = vmatpush1.msra.mxu1 %v1338_v32  ;;  %v1474_v30 = vld [vmem:[#allocation17 + $0xdc0] sm:$0xff]  ;;  %v1211_v31 = vld [vmem:[#allocation17 + $0x588] sm:$0xff] }
 0x4c1   :  { %1566 = vmatprep.subr.mxu0 %v1075_v33  ;;  %1637 = vmatprep.subr.mxu1 %v1331_v34  ;;  %v1467_v32 = vld [vmem:[#allocation17 + $0xd88] sm:$0xff]  ;;  %v1210_v33 = vld [vmem:[#allocation17 + $0x580] sm:$0xff] }
 0x4c2   :  { %1567 = vmatpush1.msra.mxu0 %v1074_v35  ;;  %1638 = vmatpush1.msra.mxu1 %v1330_v37  ;;  %v1466_v34 = vld [vmem:[#allocation17 + $0xd80] sm:$0xff]  ;;  %v1203_v35 = vld [vmem:[#allocation17 + $0x548] sm:$0xff] }
 0x4c3   :  { %1568 = vmatprep.subr.mxu0 %v1067_v38  ;;  %1639 = vmatprep.subr.mxu1 %v1323_v39  ;;  %v1459_v37 = vld [vmem:[#allocation17 + $0xd48] sm:$0xff]  ;;  %v1202_v38 = vld [vmem:[#allocation17 + $0x540] sm:$0xff] }
 0x4c4   :  { %1569 = vmatpush1.msra.mxu0 %v1066_v4  ;;  %1640 = vmatpush1.msra.mxu1 %v1322_v41  ;;  %v1458_v39 = vld [vmem:[#allocation17 + $0xd40] sm:$0xff]  ;;  %v1195_v4 = vld [vmem:[#allocation17 + $0x508] sm:$0xff] }
 0x4c5   :  { %1570 = vmatprep.subr.mxu0 %v1059_v42  ;;  %1641 = vmatprep.subr.mxu1 %v1315_v43  ;;  %v1451_v41 = vld [vmem:[#allocation17 + $0xd08] sm:$0xff]  ;;  %v1194_v42 = vld [vmem:[#allocation17 + $0x500] sm:$0xff] }
 0x4c6   :  { %1571 = vmatpush1.msra.mxu0 %v1058_v44  ;;  %1642 = vmatpush1.msra.mxu1 %v1314_v45  ;;  %v1450_v43 = vld [vmem:[#allocation17 + $0xd00] sm:$0xff]  ;;  %v1187_v44 = vld [vmem:[#allocation17 + $0x4c8] sm:$0xff] }
 0x4c7   :  { %1572 = vmatprep.subr.mxu0 %v1051_v46  ;;  %1643 = vmatprep.subr.mxu1 %v1307_v47  ;;  %v1443_v45 = vld [vmem:[#allocation17 + $0xcc8] sm:$0xff]  ;;  %v1186_v46 = vld [vmem:[#allocation17 + $0x4c0] sm:$0xff] }
 0x4c8   :  { %1573 = vmatpush1.msra.mxu0 %v1050_v48  ;;  %1644 = vmatpush1.msra.mxu1 %v1306_v49  ;;  %v1442_v47 = vld [vmem:[#allocation17 + $0xcc0] sm:$0xff]  ;;  %v1179_v48 = vld [vmem:[#allocation17 + $0x488] sm:$0xff] }
 0x4c9   :  { %1574 = vmatprep.subr.mxu0 %v1043_v50  ;;  %1645 = vmatprep.subr.mxu1 %v1299_v51  ;;  %v1435_v49 = vld [vmem:[#allocation17 + $0xc88] sm:$0xff]  ;;  %v1178_v50 = vld [vmem:[#allocation17 + $0x480] sm:$0xff] }
 0x4ca   :  { %1575 = vmatpush1.msra.mxu0 %v1042_v52  ;;  %1646 = vmatpush1.msra.mxu1 %v1298_v53  ;;  %v1434_v51 = vld [vmem:[#allocation17 + $0xc80] sm:$0xff]  ;;  %v1171_v52 = vld [vmem:[#allocation17 + $0x448] sm:$0xff] }
 0x4cb   :  { %1576 = vmatprep.subr.mxu0 %v1035_v54  ;;  %1647 = vmatprep.subr.mxu1 %v1291_v55  ;;  %v1427_v53 = vld [vmem:[#allocation17 + $0xc48] sm:$0xff]  ;;  %v1170_v54 = vld [vmem:[#allocation17 + $0x440] sm:$0xff] }
 0x4cc   :  { %1577 = vmatpush1.msra.mxu0 %v1034_v56  ;;  %1648 = vmatpush1.msra.mxu1 %v1290_v57  ;;  %v1426_v55 = vld [vmem:[#allocation17 + $0xc40] sm:$0xff]  ;;  %v1163_v56 = vld [vmem:[#allocation17 + $0x408] sm:$0xff] }
 0x4cd   :  { %1578 = vmatprep.subr.mxu0 %v1283_v59  ;;  %1649 = vmatprep.subr.mxu1 %v1539_v61  ;;  %v1419_v57 = vld [vmem:[#allocation17 + $0xc08] sm:$0xff]  ;;  %v1162_v59 = vld [vmem:[#allocation17 + $0x400] sm:$0xff] }
 0x4ce   :  { %1579 = vmatpush2.msra.mxu0 %v1282_v62  ;;  %1650 = vmatpush2.msra.mxu1 %v1538_v63  ;;  %v1418_v61 = vld [vmem:[#allocation17 + $0xc00] sm:$0xff]  ;;  %v1157_v62 = vld [vmem:[#allocation17 + $0x3d8] sm:$0xff] }
 0x4cf   :  { %1580 = vmatprep.subr.mxu0 %v1275_v36  ;;  %1651 = vmatprep.subr.mxu1 %v1531_v40  ;;  %v1413_v63 = vld [vmem:[#allocation17 + $0xbd8] sm:$0xff] }
 0x4d0   :  { %1581 = vmatpush2.msra.mxu0 %v1274_v2  ;;  %1652 = vmatpush2.msra.mxu1 %v1530_v6 }
 0x4d1   :  { %1582 = vmatprep.subr.mxu0 %v1267_v7  ;;  %1653 = vmatprep.subr.mxu1 %v1523_v8 }
 0x4d2   :  { %1583 = vmatpush2.msra.mxu0 %v1266_v9  ;;  %1654 = vmatpush2.msra.mxu1 %v1522_v10 }
 0x4d3   :  { %1584 = vmatprep.subr.mxu0 %v1259_v11  ;;  %1655 = vmatprep.subr.mxu1 %v1515_v12 }
 0x4d4   :  { %1585 = vmatpush2.msra.mxu0 %v1258_v60  ;;  %1656 = vmatpush2.msra.mxu1 %v1514_v1 }
 0x4d5   :  { %1586 = vmatprep.subr.mxu0 %v1251_v3  ;;  %1657 = vmatprep.subr.mxu1 %v1507_v13 }
 0x4d6   :  { %1587 = vmatpush2.msra.mxu0 %v1250_v5  ;;  %1658 = vmatpush2.msra.mxu1 %v1506_v14 }
 0x4d7   :  { %1588 = vmatprep.subr.mxu0 %v1243_v15  ;;  %1659 = vmatprep.subr.mxu1 %v1499_v16 }
 0x4d8   :  { %1589 = vmatpush2.msra.mxu0 %v1242_v17  ;;  %1660 = vmatpush2.msra.mxu1 %v1498_v18 }
 0x4d9   :  { %1590 = vmatprep.subr.mxu0 %v1235_v19  ;;  %1661 = vmatprep.subr.mxu1 %v1491_v20 }
 0x4da   :  { %1591 = vmatpush2.msra.mxu0 %v1234_v21  ;;  %1662 = vmatpush2.msra.mxu1 %v1490_v22 }
 0x4db   :  { %1592 = vmatprep.subr.mxu0 %v1227_v23  ;;  %1663 = vmatprep.subr.mxu1 %v1483_v24 }
 0x4dc   :  { %1593 = vmatpush2.msra.mxu0 %v1226_v25  ;;  %1664 = vmatpush2.msra.mxu1 %v1482_v26 }
 0x4dd   :  { %1594 = vmatprep.subr.mxu0 %v1219_v27  ;;  %1665 = vmatprep.subr.mxu1 %v1475_v28 }
 0x4de   :  { %1595 = vmatpush2.msra.mxu0 %v1218_v29  ;;  %1666 = vmatpush2.msra.mxu1 %v1474_v30 }
 0x4df   :  { %1596 = vmatprep.subr.mxu0 %v1211_v31  ;;  %1667 = vmatprep.subr.mxu1 %v1467_v32 }
 0x4e0   :  { %1597 = vmatpush2.msra.mxu0 %v1210_v33  ;;  %1668 = vmatpush2.msra.mxu1 %v1466_v34 }
 0x4e1   :  { %1598 = vmatprep.subr.mxu0 %v1203_v35  ;;  %1669 = vmatprep.subr.mxu1 %v1459_v37 }
 0x4e2   :  { %1599 = vmatpush2.msra.mxu0 %v1202_v38  ;;  %1670 = vmatpush2.msra.mxu1 %v1458_v39 }
 0x4e3   :  { %1600 = vmatprep.subr.mxu0 %v1195_v4  ;;  %1671 = vmatprep.subr.mxu1 %v1451_v41 }
 0x4e4   :  { %1601 = vmatpush2.msra.mxu0 %v1194_v42  ;;  %1672 = vmatpush2.msra.mxu1 %v1450_v43 }
 0x4e5   :  { %1602 = vmatprep.subr.mxu0 %v1187_v44  ;;  %1673 = vmatprep.subr.mxu1 %v1443_v45 }
 0x4e6   :  { %1603 = vmatpush2.msra.mxu0 %v1186_v46  ;;  %1674 = vmatpush2.msra.mxu1 %v1442_v47 }
 0x4e7   :  { %1604 = vmatprep.subr.mxu0 %v1179_v48  ;;  %1675 = vmatprep.subr.mxu1 %v1435_v49 }
 0x4e8   :  { %1605 = vmatpush2.msra.mxu0 %v1178_v50  ;;  %1676 = vmatpush2.msra.mxu1 %v1434_v51 }
 0x4e9   :  { %1606 = vmatprep.subr.mxu0 %v1171_v52  ;;  %1677 = vmatprep.subr.mxu1 %v1427_v53 }
 0x4ea   :  { %1607 = vmatpush2.msra.mxu0 %v1170_v54  ;;  %1678 = vmatpush2.msra.mxu1 %v1426_v55 }
 0x4eb   :  { %1608 = vmatprep.subr.mxu0 %v1163_v56  ;;  %1679 = vmatprep.subr.mxu1 %v1419_v57 }
 0x4ec   :  { %1609 = vmatpush2.msra.mxu0 %v1162_v59  ;;  %1680 = vmatpush2.msra.mxu1 %v1418_v61 }
 0x4ed   :  { %1688 = vmatprep.subr.mxu0 %v1157_v62  ;;  %1759 = vmatprep.subr.mxu1 %v1413_v63 }
 0x56d   :  { %v9144_v36 = vpop.f32.mrf.mxu0  ;;  %v9146_v40 = vpop.f32.mrf.mxu1 }
 0x56e   :  { %v929_v2 = vsel %vm354_vm3, %v9144_v36, 0.0  ;;  %v957_v6 = vmul.f32 %v9144_v36, %v9144_v36  ;;  %v943_v7 = vsel %vm354_vm3, %v9146_v40, 0.0  ;;  %v959_v8 = vmul.f32 %v9146_v40, %v9146_v40 }
 0x56f   :  { %v930_v9 = vrot.slane %v929_v2, 4  ;;  %v944_v10 = vrot.slane %v943_v7, 4  ;;  %v9156_v11 = vpop.f32.mrf.mxu0  ;;  %v9158_v12 = vpop.f32.mrf.mxu1 }
 0x570   :  { %v961_v60 = vsel %vm354_vm3, %v957_v6, 0.0  ;;  %v975_v1 = vsel %vm354_vm3, %v959_v8, 0.0  ;;  %v936_v3 = vsel %vm354_vm3, %v9156_v11, 0.0  ;;  %v958_v13 = vmul.f32 %v9156_v11, %v9156_v11 }
 0x571   :  { %v931_v5 = vadd.f32 %v930_v9, %v929_v2  ;;  %v962_v14 = vrot.slane %v961_v60, 4  ;;  %v945_v15 = vadd.f32 %v944_v10, %v943_v7  ;;  %v976_v16 = vrot.slane %v975_v1, 4 }
 0x572   :  { %v937_v17 = vrot.slane %v936_v3, 4  ;;  %v968_v18 = vsel %vm354_vm3, %v958_v13, 0.0  ;;  %v950_v19 = vsel %vm354_vm3, %v9158_v12, 0.0  ;;  %v960_v20 = vmul.f32 %v9158_v12, %v9158_v12 }
 0x573   :  { %v932_v21 = vrot.slane %v931_v5, 2  ;;  %v963_v22 = vadd.f32 %v962_v14, %v961_v60  ;;  %v946_v23 = vrot.slane %v945_v15, 2  ;;  %v977_v24 = vadd.f32 %v976_v16, %v975_v1  ;;  %v999_v16 = vld [vmem:[#allocation14] sm:$0x1] }
 0x574   :  { %v938_v25 = vadd.f32 %v937_v17, %v936_v3  ;;  %v969_v26 = vrot.slane %v968_v18, 4  ;;  %v951_v27 = vrot.slane %v950_v19, 4  ;;  %v982_v28 = vsel %vm354_vm3, %v960_v20, 0.0 }
 0x575   :  { %v933_v29 = vadd.f32 %v932_v21, %v931_v5  ;;  %v964_v30 = vrot.slane %v963_v22, 2  ;;  %v947_v31 = vadd.f32 %v946_v23, %v945_v15  ;;  %v978_v32 = vrot.slane %v977_v24, 2 }
 0x576   :  { %v939_v33 = vrot.slane %v938_v25, 2  ;;  %v970_v34 = vadd.f32 %v969_v26, %v968_v18  ;;  %v952_v35 = vadd.f32 %v951_v27, %v950_v19  ;;  %v983_v37 = vrot.slane %v982_v28, 4  ;;  %v1003_v19 = vld [vmem:[#allocation16] sm:$0x1] }
 0x577   :  { %v934_v38 = vrot.slane %v933_v29, 1  ;;  %v965_v39 = vadd.f32 %v964_v30, %v963_v22  ;;  %v979_v4 = vadd.f32 %v978_v32, %v977_v24  ;;  %v948_v46 = vrot.slane %v947_v31, 1 }
 0x578   :  { %v940_v41 = vadd.f32 %v939_v33, %v938_v25  ;;  %v971_v42 = vrot.slane %v970_v34, 2  ;;  %v953_v43 = vrot.slane %v952_v35, 2  ;;  %v984_v44 = vadd.f32 %v983_v37, %v982_v28 }
 0x579   :  { %v966_v45 = vrot.slane %v965_v39, 1  ;;  %v935_v51 = vadd.f32 %v934_v38, %v933_v29  ;;  %v980_v52 = vrot.slane %v979_v4, 1  ;;  %v949_v57 = vadd.f32 %v948_v46, %v947_v31  ;;  %v1396_v46 = vld [vmem:[#allocation17 + $0xb50] sm:$0xff] }
 0x57a   :  { %v941_v47 = vrot.slane %v940_v41, 1  ;;  %v972_v48 = vadd.f32 %v971_v42, %v970_v34  ;;  %v954_v49 = vadd.f32 %v953_v43, %v952_v35  ;;  %v985_v50 = vrot.slane %v984_v44, 2  ;;  %v1404_v42 = vld [vmem:[#allocation17 + $0xb90] sm:$0xff]  ;;  %v1141_v43 = vld [vmem:[#allocation17 + $0x358] sm:$0xff] }
 0x57b   :  { %v967_v59 = vadd.f32 %v966_v45, %v965_v39  ;;  %v981_v2 = vadd.f32 %v980_v52, %v979_v4  ;;  %v1149_v39 = vld [vmem:[#allocation17 + $0x398] sm:$0xff]  ;;  %v1140_v45 = vld [vmem:[#allocation17 + $0x350] sm:$0xff] }
 0x57c   :  { %v942_v53 = vadd.f32 %v941_v47, %v940_v41  ;;  %v973_v54 = vrot.slane %v972_v48, 1  ;;  %v955_v55 = vrot.slane %v954_v49, 1  ;;  %v986_v56 = vadd.f32 %v985_v50, %v984_v44  ;;  %v1405_v4 = vld [vmem:[#allocation17 + $0xb98] sm:$0xff]  ;;  %v1148_v41 = vld [vmem:[#allocation17 + $0x390] sm:$0xff] }
 0x57d   :  { %v1397_v44 = vld [vmem:[#allocation17 + $0xb58] sm:$0xff]  ;;  %v1388_v50 = vld [vmem:[#allocation17 + $0xb10] sm:$0xff] }
 0x57e   :  { %v974_v61 = vadd.f32 %v973_v54, %v972_v48  ;;  %v989_v62 = vadd.f32 %v942_v53, %v935_v51  ;;  %v987_v63 = vrot.slane %v986_v56, 1  ;;  %v956_v7 = vadd.f32 %v955_v55, %v954_v49  ;;  %v1133_v47 = vld [vmem:[#allocation17 + $0x318] sm:$0xff]  ;;  %v1132_v49 = vld [vmem:[#allocation17 + $0x310] sm:$0xff] }
 0x57f   :  { %v1389_v48 = vld [vmem:[#allocation17 + $0xb18] sm:$0xff]  ;;  %v1124_v53 = vld [vmem:[#allocation17 + $0x2d0] sm:$0xff] }
 0x580   :  { %v992_v6 = vadd.f32 %v974_v61, %v967_v59  ;;  %v990_v8 = vadd.f32 %v989_v62, %v949_v57  ;;  %v988_v9 = vadd.f32 %v987_v63, %v986_v56  ;;  %v1125_v51 = vld [vmem:[#allocation17 + $0x2d8] sm:$0xff]  ;;  %v1380_v54 = vld [vmem:[#allocation17 + $0xad0] sm:$0xff] }
 0x581   :  { %v1381_v52 = vld [vmem:[#allocation17 + $0xad8] sm:$0xff]  ;;  %v1116_v57 = vld [vmem:[#allocation17 + $0x290] sm:$0xff] }
 0x582   :  { %v991_v10 = vadd.f32 %v990_v8, %v956_v7  ;;  %v993_v60 = vadd.f32 %v992_v6, %v981_v2  ;;  %v1117_v55 = vld [vmem:[#allocation17 + $0x298] sm:$0xff]  ;;  %v1372_v59 = vld [vmem:[#allocation17 + $0xa90] sm:$0xff] }
 0x583   :  { %v1373_v56 = vld [vmem:[#allocation17 + $0xa98] sm:$0xff]  ;;  %v1108_v63 = vld [vmem:[#allocation17 + $0x250] sm:$0xff] }
 0x584   :  { %v994_v1 = vadd.f32 %v993_v60, %v988_v9  ;;  %v995_v3 = vmul.f32 0.125, %v991_v10  ;;  %v1109_v61 = vld [vmem:[#allocation17 + $0x258] sm:$0xff]  ;;  %v1364_v2 = vld [vmem:[#allocation17 + $0xa50] sm:$0xff] }
 0x585   :  { %v1365_v62 = vld [vmem:[#allocation17 + $0xa58] sm:$0xff]  ;;  %v1100_v8 = vld [vmem:[#allocation17 + $0x210] sm:$0xff] }
 0x586   :  { %v996_v13 = vmul.f32 0.125, %v994_v1  ;;  %v997_v5 = vmul.f32 %v995_v3, %v995_v3  ;;  %v1101_v6 = vld [vmem:[#allocation17 + $0x218] sm:$0xff]  ;;  %v1356_v9 = vld [vmem:[#allocation17 + $0xa10] sm:$0xff] }
 0x587   :  { %v1357_v7 = vld [vmem:[#allocation17 + $0xa18] sm:$0xff]  ;;  %v1092_v1 = vld [vmem:[#allocation17 + $0x1d0] sm:$0xff] }
 0x588   :  { %v998_v14 = vsub.f32 %v996_v13, %v997_v5  ;;  %v1093_v10 = vld [vmem:[#allocation17 + $0x1d8] sm:$0xff] }
 0x589   :  { %v1349_v60 = vld [vmem:[#allocation17 + $0x9d8] sm:$0xff] }
 0x58a   :  { %v1000_v15 = vadd.f32 1e-05, %v998_v14  ;;  %v1085_v13 = vld [vmem:[#allocation17 + $0x198] sm:$0xff]  ;;  %v1084_v14 = vld [vmem:[#allocation17 + $0x190] sm:$0xff] }
 0x58b   :  { %v1341_v5 = vld [vmem:[#allocation17 + $0x998] sm:$0xff] }
 0x58c   :  { %8428 = vrsqrt.f32 %v1000_v15  ;;  %v1340_v15 = vld [vmem:[#allocation17 + $0x990] sm:$0xff] }
 0x599   :  { %v8429_v17 = vpop.eup %8428 }
 0x59a   :  { %v1002_v18 = vmul.f32 %v8429_v17, %v999_v16  ;;  %v1077_v16 = vld [vmem:[#allocation17 + $0x158] sm:$0xff] }
 0x59b   :  { %v1333_v17 = vld [vmem:[#allocation17 + $0x958] sm:$0xff] }
 0x59c   :  { %v1004_v20 = vmul.f32 %v1002_v18, %v995_v3  ;;  %v1009_v21 = vrot.slane %v1002_v18, %v9085_v0  ;;  %v1348_v3 = vld [vmem:[#allocation17 + $0x9d0] sm:$0xff] }
 0x59d   :  { %v1076_v18 = vld [vmem:[#allocation17 + $0x150] sm:$0xff] }
 0x59e   :  { %v1005_v22 = vsub.f32 %v1003_v19, %v1004_v20  ;;  %v1013_v23 = vmul.f32 %v1009_v21, %v9158_v12  ;;  %v1011_v25 = vmul.f32 %v1009_v21, %v9156_v11  ;;  %v1010_v26 = vmul.f32 %v1009_v21, %v9144_v36  ;;  %v1156_v11 = vld [vmem:[#allocation17 + $0x3d0] sm:$0xff]  ;;  %v1069_v20 = vld [vmem:[#allocation17 + $0x118] sm:$0xff] }
 0x59f   :  { %v1012_v27 = vmul.f32 %v1009_v21, %v9146_v40  ;;  %v1412_v36 = vld [vmem:[#allocation17 + $0xbd0] sm:$0xff]  ;;  %v1325_v21 = vld [vmem:[#allocation17 + $0x918] sm:$0xff] }
 0x5a0   :  { %v1017_v24 = vrot.slane %v1005_v22, %v9085_v0  ;;  %v1332_v19 = vld [vmem:[#allocation17 + $0x950] sm:$0xff] }
 0x5a1   :  { %v1068_v22 = vld [vmem:[#allocation17 + $0x110] sm:$0xff] }
 0x5a2   :  { %v1021_v28 = vadd.f32 %v1017_v24, %v1013_v23  ;;  %v1019_v29 = vadd.f32 %v1017_v24, %v1011_v25  ;;  %v1018_v30 = vadd.f32 %v1017_v24, %v1010_v26  ;;  %v1020_v31 = vadd.f32 %v1017_v24, %v1012_v27  ;;  %v1324_v23 = vld [vmem:[#allocation17 + $0x910] sm:$0xff]  ;;  %v1061_v24 = vld [vmem:[#allocation17 + $0xd8] sm:$0xff] }
 0x5a3   :  { %v1317_v25 = vld [vmem:[#allocation17 + $0x8d8] sm:$0xff]  ;;  %v1060_v26 = vld [vmem:[#allocation17 + $0xd0] sm:$0xff] }
 0x5a4   :  { %vm1023_vm10 = vcmp.ge.f32.partialorder %v1019_v29, 0.0  ;;  %v1027_v32 = vmul.f32 0.01, %v1019_v29  ;;  %vm1025_vm11 = vcmp.ge.f32.partialorder %v1021_v28, 0.0  ;;  %v1029_v33 = vmul.f32 0.01, %v1021_v28 }
 0x5a5   :  { %vm1022_vm12 = vcmp.ge.f32.partialorder %v1018_v30, 0.0  ;;  %v1026_v34 = vmul.f32 0.01, %v1018_v30  ;;  %vm1024_vm13 = vcmp.ge.f32.partialorder %v1020_v31, 0.0  ;;  %v1028_v12 = vmul.f32 0.01, %v1020_v31 }
 0x5a6   :  { %v9178_v35 = vsel %vm1023_vm10, %v1019_v29, %v1027_v32  ;;  %v9180_v37 = vsel %vm1025_vm11, %v1021_v28, %v1029_v33  ;;  %v1316_v27 = vld [vmem:[#allocation17 + $0x8d0] sm:$0xff]  ;;  %v1053_v28 = vld [vmem:[#allocation17 + $0x98] sm:$0xff] }
 0x5a7   :  { %1610 = vmatprep.mubr.f32.mxu0 %v9178_v35  ;;  %1681 = vmatprep.mubr.f32.mxu1 %v9180_v37  ;;  %v9184_v40 = vsel %vm1022_vm12, %v1018_v30, %v1026_v34  ;;  %v9186_v38 = vsel %vm1024_vm13, %v1020_v31, %v1028_v12  ;;  %v1309_v29 = vld [vmem:[#allocation17 + $0x898] sm:$0xff]  ;;  %v1052_v30 = vld [vmem:[#allocation17 + $0x90] sm:$0xff] }
 0x5a8   :  { %1611 = vmatmul.mubr.f32.vlgmr.msra.gmra.mxu0 %v9184_v40  ;;  %1682 = vmatmul.mubr.f32.vlgmr.msra.gmra.mxu1 %v9186_v38  ;;  %v1308_v31 = vld [vmem:[#allocation17 + $0x890] sm:$0xff]  ;;  %v1045_v32 = vld [vmem:[#allocation17 + $0x58] sm:$0xff] }
 0x5a9   :  { %1689 = vmatpush1.msra.mxu0 %v1156_v11  ;;  %1760 = vmatpush1.msra.mxu1 %v1412_v36  ;;  %v1301_v33 = vld [vmem:[#allocation17 + $0x858] sm:$0xff]  ;;  %v1044_v34 = vld [vmem:[#allocation17 + $0x50] sm:$0xff] }
 0x5aa   :  { %1690 = vmatprep.subr.mxu0 %v1149_v39  ;;  %1752 = vmatprep.mubr.f32.mxu0 %v9178_v35  ;;  %v1300_v12 = vld [vmem:[#allocation17 + $0x850] sm:$0xff]  ;;  %v1037_v11 = vld [vmem:[#allocation17 + $0x18] sm:$0xff] }
 0x5ab   :  { %1761 = vmatprep.subr.mxu1 %v1405_v4  ;;  %1823 = vmatprep.mubr.f32.mxu1 %v9180_v37  ;;  %v1293_v36 = vld [vmem:[#allocation17 + $0x818] sm:$0xff]  ;;  %v1036_v39 = vld [vmem:[#allocation17 + $0x10] sm:$0xff] }
 0x5ac   :  { %1691 = vmatpush1.msra.mxu0 %v1148_v41  ;;  %1762 = vmatpush1.msra.mxu1 %v1404_v42  ;;  %v1292_v4 = vld [vmem:[#allocation17 + $0x810] sm:$0xff]  ;;  %v1285_v41 = vld [vmem:[#allocation17 + $0x7d8] sm:$0xff] }
 0x5ad   :  { %1692 = vmatprep.subr.mxu0 %v1141_v43  ;;  %1763 = vmatprep.subr.mxu1 %v1397_v44  ;;  %v1541_v42 = vld [vmem:[#allocation17 + $0xfd8] sm:$0xff]  ;;  %v1284_v43 = vld [vmem:[#allocation17 + $0x7d0] sm:$0xff] }
 0x5ae   :  { %1693 = vmatpush1.msra.mxu0 %v1140_v45  ;;  %1764 = vmatpush1.msra.mxu1 %v1396_v46  ;;  %v1540_v44 = vld [vmem:[#allocation17 + $0xfd0] sm:$0xff]  ;;  %v1277_v45 = vld [vmem:[#allocation17 + $0x798] sm:$0xff] }
 0x5af   :  { %1694 = vmatprep.subr.mxu0 %v1133_v47  ;;  %1765 = vmatprep.subr.mxu1 %v1389_v48  ;;  %v1533_v46 = vld [vmem:[#allocation17 + $0xf98] sm:$0xff]  ;;  %v1276_v47 = vld [vmem:[#allocation17 + $0x790] sm:$0xff] }
 0x5b0   :  { %1695 = vmatpush1.msra.mxu0 %v1132_v49  ;;  %1766 = vmatpush1.msra.mxu1 %v1388_v50  ;;  %v1532_v48 = vld [vmem:[#allocation17 + $0xf90] sm:$0xff]  ;;  %v1269_v49 = vld [vmem:[#allocation17 + $0x758] sm:$0xff] }
 0x5b1   :  { %1696 = vmatprep.subr.mxu0 %v1125_v51  ;;  %1767 = vmatprep.subr.mxu1 %v1381_v52  ;;  %v1525_v50 = vld [vmem:[#allocation17 + $0xf58] sm:$0xff]  ;;  %v1268_v51 = vld [vmem:[#allocation17 + $0x750] sm:$0xff] }
 0x5b2   :  { %1697 = vmatpush1.msra.mxu0 %v1124_v53  ;;  %1768 = vmatpush1.msra.mxu1 %v1380_v54  ;;  %v1524_v52 = vld [vmem:[#allocation17 + $0xf50] sm:$0xff]  ;;  %v1261_v53 = vld [vmem:[#allocation17 + $0x718] sm:$0xff] }
 0x5b3   :  { %1698 = vmatprep.subr.mxu0 %v1117_v55  ;;  %1769 = vmatprep.subr.mxu1 %v1373_v56  ;;  %v1517_v54 = vld [vmem:[#allocation17 + $0xf18] sm:$0xff]  ;;  %v1260_v55 = vld [vmem:[#allocation17 + $0x710] sm:$0xff] }
 0x5b4   :  { %1699 = vmatpush1.msra.mxu0 %v1116_v57  ;;  %1770 = vmatpush1.msra.mxu1 %v1372_v59  ;;  %v1516_v56 = vld [vmem:[#allocation17 + $0xf10] sm:$0xff]  ;;  %v1253_v57 = vld [vmem:[#allocation17 + $0x6d8] sm:$0xff] }
 0x5b5   :  { %1700 = vmatprep.subr.mxu0 %v1109_v61  ;;  %1771 = vmatprep.subr.mxu1 %v1365_v62  ;;  %v1509_v59 = vld [vmem:[#allocation17 + $0xed8] sm:$0xff]  ;;  %v1252_v61 = vld [vmem:[#allocation17 + $0x6d0] sm:$0xff] }
 0x5b6   :  { %1701 = vmatpush1.msra.mxu0 %v1108_v63  ;;  %1772 = vmatpush1.msra.mxu1 %v1364_v2  ;;  %v1508_v62 = vld [vmem:[#allocation17 + $0xed0] sm:$0xff]  ;;  %v1245_v63 = vld [vmem:[#allocation17 + $0x698] sm:$0xff] }
 0x5b7   :  { %1702 = vmatprep.subr.mxu0 %v1101_v6  ;;  %1773 = vmatprep.subr.mxu1 %v1357_v7  ;;  %v1501_v2 = vld [vmem:[#allocation17 + $0xe98] sm:$0xff]  ;;  %v1244_v6 = vld [vmem:[#allocation17 + $0x690] sm:$0xff] }
 0x5b8   :  { %1703 = vmatpush1.msra.mxu0 %v1100_v8  ;;  %1774 = vmatpush1.msra.mxu1 %v1356_v9  ;;  %v1500_v7 = vld [vmem:[#allocation17 + $0xe90] sm:$0xff]  ;;  %v1237_v8 = vld [vmem:[#allocation17 + $0x658] sm:$0xff] }
 0x5b9   :  { %1704 = vmatprep.subr.mxu0 %v1093_v10  ;;  %1775 = vmatprep.subr.mxu1 %v1349_v60  ;;  %v1493_v9 = vld [vmem:[#allocation17 + $0xe58] sm:$0xff]  ;;  %v1236_v10 = vld [vmem:[#allocation17 + $0x650] sm:$0xff] }
 0x5ba   :  { %1705 = vmatpush1.msra.mxu0 %v1092_v1  ;;  %1776 = vmatpush1.msra.mxu1 %v1348_v3  ;;  %v1492_v60 = vld [vmem:[#allocation17 + $0xe50] sm:$0xff]  ;;  %v1229_v1 = vld [vmem:[#allocation17 + $0x618] sm:$0xff] }
 0x5bb   :  { %1706 = vmatprep.subr.mxu0 %v1085_v13  ;;  %1777 = vmatprep.subr.mxu1 %v1341_v5  ;;  %v1485_v3 = vld [vmem:[#allocation17 + $0xe18] sm:$0xff]  ;;  %v1228_v13 = vld [vmem:[#allocation17 + $0x610] sm:$0xff] }
 0x5bc   :  { %1707 = vmatpush1.msra.mxu0 %v1084_v14  ;;  %1778 = vmatpush1.msra.mxu1 %v1340_v15  ;;  %v1484_v5 = vld [vmem:[#allocation17 + $0xe10] sm:$0xff]  ;;  %v1221_v14 = vld [vmem:[#allocation17 + $0x5d8] sm:$0xff] }
 0x5bd   :  { %1708 = vmatprep.subr.mxu0 %v1077_v16  ;;  %1779 = vmatprep.subr.mxu1 %v1333_v17  ;;  %v1477_v15 = vld [vmem:[#allocation17 + $0xdd8] sm:$0xff]  ;;  %v1220_v16 = vld [vmem:[#allocation17 + $0x5d0] sm:$0xff] }
 0x5be   :  { %1709 = vmatpush1.msra.mxu0 %v1076_v18  ;;  %1780 = vmatpush1.msra.mxu1 %v1332_v19  ;;  %v1476_v17 = vld [vmem:[#allocation17 + $0xdd0] sm:$0xff]  ;;  %v1213_v18 = vld [vmem:[#allocation17 + $0x598] sm:$0xff] }
 0x5bf   :  { %1710 = vmatprep.subr.mxu0 %v1069_v20  ;;  %1781 = vmatprep.subr.mxu1 %v1325_v21  ;;  %v1469_v19 = vld [vmem:[#allocation17 + $0xd98] sm:$0xff]  ;;  %v1212_v20 = vld [vmem:[#allocation17 + $0x590] sm:$0xff] }
 0x5c0   :  { %1711 = vmatpush1.msra.mxu0 %v1068_v22  ;;  %1782 = vmatpush1.msra.mxu1 %v1324_v23  ;;  %v1468_v21 = vld [vmem:[#allocation17 + $0xd90] sm:$0xff]  ;;  %v1205_v22 = vld [vmem:[#allocation17 + $0x558] sm:$0xff] }
 0x5c1   :  { %1712 = vmatprep.subr.mxu0 %v1061_v24  ;;  %1783 = vmatprep.subr.mxu1 %v1317_v25  ;;  %v1461_v23 = vld [vmem:[#allocation17 + $0xd58] sm:$0xff]  ;;  %v1204_v24 = vld [vmem:[#allocation17 + $0x550] sm:$0xff] }
 0x5c2   :  { %1713 = vmatpush1.msra.mxu0 %v1060_v26  ;;  %1784 = vmatpush1.msra.mxu1 %v1316_v27  ;;  %v1460_v25 = vld [vmem:[#allocation17 + $0xd50] sm:$0xff]  ;;  %v1197_v26 = vld [vmem:[#allocation17 + $0x518] sm:$0xff] }
 0x5c3   :  { %1714 = vmatprep.subr.mxu0 %v1053_v28  ;;  %1785 = vmatprep.subr.mxu1 %v1309_v29  ;;  %v1453_v27 = vld [vmem:[#allocation17 + $0xd18] sm:$0xff]  ;;  %v1196_v28 = vld [vmem:[#allocation17 + $0x510] sm:$0xff] }
 0x5c4   :  { %1715 = vmatpush1.msra.mxu0 %v1052_v30  ;;  %1786 = vmatpush1.msra.mxu1 %v1308_v31  ;;  %v1452_v29 = vld [vmem:[#allocation17 + $0xd10] sm:$0xff]  ;;  %v1189_v30 = vld [vmem:[#allocation17 + $0x4d8] sm:$0xff] }
 0x5c5   :  { %1716 = vmatprep.subr.mxu0 %v1045_v32  ;;  %1787 = vmatprep.subr.mxu1 %v1301_v33  ;;  %v1445_v31 = vld [vmem:[#allocation17 + $0xcd8] sm:$0xff]  ;;  %v1188_v32 = vld [vmem:[#allocation17 + $0x4d0] sm:$0xff] }
 0x5c6   :  { %1717 = vmatpush1.msra.mxu0 %v1044_v34  ;;  %1788 = vmatpush1.msra.mxu1 %v1300_v12  ;;  %v1444_v33 = vld [vmem:[#allocation17 + $0xcd0] sm:$0xff]  ;;  %v1181_v34 = vld [vmem:[#allocation17 + $0x498] sm:$0xff] }
 0x5c7   :  { %1718 = vmatprep.subr.mxu0 %v1037_v11  ;;  %1789 = vmatprep.subr.mxu1 %v1293_v36  ;;  %v1437_v12 = vld [vmem:[#allocation17 + $0xc98] sm:$0xff]  ;;  %v1180_v11 = vld [vmem:[#allocation17 + $0x490] sm:$0xff] }
 0x5c8   :  { %1719 = vmatpush1.msra.mxu0 %v1036_v39  ;;  %1790 = vmatpush1.msra.mxu1 %v1292_v4  ;;  %v1436_v36 = vld [vmem:[#allocation17 + $0xc90] sm:$0xff]  ;;  %v1173_v39 = vld [vmem:[#allocation17 + $0x458] sm:$0xff] }
 0x5c9   :  { %1720 = vmatprep.subr.mxu0 %v1285_v41  ;;  %1791 = vmatprep.subr.mxu1 %v1541_v42  ;;  %v1429_v4 = vld [vmem:[#allocation17 + $0xc58] sm:$0xff]  ;;  %v1172_v41 = vld [vmem:[#allocation17 + $0x450] sm:$0xff] }
 0x5ca   :  { %1721 = vmatpush2.msra.mxu0 %v1284_v43  ;;  %1792 = vmatpush2.msra.mxu1 %v1540_v44  ;;  %v1428_v42 = vld [vmem:[#allocation17 + $0xc50] sm:$0xff]  ;;  %v1165_v43 = vld [vmem:[#allocation17 + $0x418] sm:$0xff] }
 0x5cb   :  { %1722 = vmatprep.subr.mxu0 %v1277_v45  ;;  %1793 = vmatprep.subr.mxu1 %v1533_v46  ;;  %v1421_v44 = vld [vmem:[#allocation17 + $0xc18] sm:$0xff]  ;;  %v1164_v45 = vld [vmem:[#allocation17 + $0x410] sm:$0xff] }
 0x5cc   :  { %1723 = vmatpush2.msra.mxu0 %v1276_v47  ;;  %1794 = vmatpush2.msra.mxu1 %v1532_v48  ;;  %v1420_v46 = vld [vmem:[#allocation17 + $0xc10] sm:$0xff]  ;;  %v1159_v47 = vld [vmem:[#allocation17 + $0x3e8] sm:$0xff] }
 0x5cd   :  { %1724 = vmatprep.subr.mxu0 %v1269_v49  ;;  %1795 = vmatprep.subr.mxu1 %v1525_v50  ;;  %v1415_v48 = vld [vmem:[#allocation17 + $0xbe8] sm:$0xff]  ;;  %v1158_v49 = vld [vmem:[#allocation17 + $0x3e0] sm:$0xff] }
 0x5ce   :  { %1725 = vmatpush2.msra.mxu0 %v1268_v51  ;;  %1796 = vmatpush2.msra.mxu1 %v1524_v52  ;;  %v1414_v50 = vld [vmem:[#allocation17 + $0xbe0] sm:$0xff]  ;;  %v1151_v51 = vld [vmem:[#allocation17 + $0x3a8] sm:$0xff] }
 0x5cf   :  { %1726 = vmatprep.subr.mxu0 %v1261_v53  ;;  %1797 = vmatprep.subr.mxu1 %v1517_v54  ;;  %v1407_v52 = vld [vmem:[#allocation17 + $0xba8] sm:$0xff]  ;;  %v1150_v53 = vld [vmem:[#allocation17 + $0x3a0] sm:$0xff] }
 0x5d0   :  { %1727 = vmatpush2.msra.mxu0 %v1260_v55  ;;  %1798 = vmatpush2.msra.mxu1 %v1516_v56  ;;  %v1406_v54 = vld [vmem:[#allocation17 + $0xba0] sm:$0xff]  ;;  %v1143_v55 = vld [vmem:[#allocation17 + $0x368] sm:$0xff] }
 0x5d1   :  { %1728 = vmatprep.subr.mxu0 %v1253_v57  ;;  %1799 = vmatprep.subr.mxu1 %v1509_v59  ;;  %v1399_v56 = vld [vmem:[#allocation17 + $0xb68] sm:$0xff]  ;;  %v1142_v57 = vld [vmem:[#allocation17 + $0x360] sm:$0xff] }
 0x5d2   :  { %1729 = vmatpush2.msra.mxu0 %v1252_v61  ;;  %1800 = vmatpush2.msra.mxu1 %v1508_v62  ;;  %v1398_v59 = vld [vmem:[#allocation17 + $0xb60] sm:$0xff]  ;;  %v1135_v61 = vld [vmem:[#allocation17 + $0x328] sm:$0xff] }
 0x5d3   :  { %1730 = vmatprep.subr.mxu0 %v1245_v63  ;;  %1801 = vmatprep.subr.mxu1 %v1501_v2  ;;  %v1391_v62 = vld [vmem:[#allocation17 + $0xb28] sm:$0xff]  ;;  %v1134_v63 = vld [vmem:[#allocation17 + $0x320] sm:$0xff] }
 0x5d4   :  { %1731 = vmatpush2.msra.mxu0 %v1244_v6  ;;  %1802 = vmatpush2.msra.mxu1 %v1500_v7  ;;  %v1390_v2 = vld [vmem:[#allocation17 + $0xb20] sm:$0xff]  ;;  %v1127_v6 = vld [vmem:[#allocation17 + $0x2e8] sm:$0xff] }
 0x5d5   :  { %1732 = vmatprep.subr.mxu0 %v1237_v8  ;;  %1803 = vmatprep.subr.mxu1 %v1493_v9  ;;  %v1383_v7 = vld [vmem:[#allocation17 + $0xae8] sm:$0xff]  ;;  %v1126_v8 = vld [vmem:[#allocation17 + $0x2e0] sm:$0xff] }
 0x5d6   :  { %1733 = vmatpush2.msra.mxu0 %v1236_v10  ;;  %1804 = vmatpush2.msra.mxu1 %v1492_v60  ;;  %v1382_v9 = vld [vmem:[#allocation17 + $0xae0] sm:$0xff]  ;;  %v1119_v10 = vld [vmem:[#allocation17 + $0x2a8] sm:$0xff] }
 0x5d7   :  { %1734 = vmatprep.subr.mxu0 %v1229_v1  ;;  %1805 = vmatprep.subr.mxu1 %v1485_v3  ;;  %v1375_v60 = vld [vmem:[#allocation17 + $0xaa8] sm:$0xff]  ;;  %v1118_v1 = vld [vmem:[#allocation17 + $0x2a0] sm:$0xff] }
 0x5d8   :  { %1735 = vmatpush2.msra.mxu0 %v1228_v13  ;;  %1806 = vmatpush2.msra.mxu1 %v1484_v5  ;;  %v1374_v3 = vld [vmem:[#allocation17 + $0xaa0] sm:$0xff]  ;;  %v1111_v13 = vld [vmem:[#allocation17 + $0x268] sm:$0xff] }
 0x5d9   :  { %1736 = vmatprep.subr.mxu0 %v1221_v14  ;;  %1807 = vmatprep.subr.mxu1 %v1477_v15  ;;  %v1367_v5 = vld [vmem:[#allocation17 + $0xa68] sm:$0xff]  ;;  %v1110_v14 = vld [vmem:[#allocation17 + $0x260] sm:$0xff] }
 0x5da   :  { %1737 = vmatpush2.msra.mxu0 %v1220_v16  ;;  %1808 = vmatpush2.msra.mxu1 %v1476_v17  ;;  %v1366_v15 = vld [vmem:[#allocation17 + $0xa60] sm:$0xff]  ;;  %v1103_v16 = vld [vmem:[#allocation17 + $0x228] sm:$0xff] }
 0x5db   :  { %1738 = vmatprep.subr.mxu0 %v1213_v18  ;;  %1809 = vmatprep.subr.mxu1 %v1469_v19  ;;  %v1359_v17 = vld [vmem:[#allocation17 + $0xa28] sm:$0xff]  ;;  %v1102_v18 = vld [vmem:[#allocation17 + $0x220] sm:$0xff] }
 0x5dc   :  { %1739 = vmatpush2.msra.mxu0 %v1212_v20  ;;  %1810 = vmatpush2.msra.mxu1 %v1468_v21  ;;  %v1358_v19 = vld [vmem:[#allocation17 + $0xa20] sm:$0xff]  ;;  %v1095_v20 = vld [vmem:[#allocation17 + $0x1e8] sm:$0xff] }
 0x5dd   :  { %1740 = vmatprep.subr.mxu0 %v1205_v22  ;;  %1811 = vmatprep.subr.mxu1 %v1461_v23  ;;  %v1351_v21 = vld [vmem:[#allocation17 + $0x9e8] sm:$0xff]  ;;  %v1094_v22 = vld [vmem:[#allocation17 + $0x1e0] sm:$0xff] }
 0x5de   :  { %1741 = vmatpush2.msra.mxu0 %v1204_v24  ;;  %1812 = vmatpush2.msra.mxu1 %v1460_v25  ;;  %v1350_v23 = vld [vmem:[#allocation17 + $0x9e0] sm:$0xff]  ;;  %v1087_v24 = vld [vmem:[#allocation17 + $0x1a8] sm:$0xff] }
 0x5df   :  { %1742 = vmatprep.subr.mxu0 %v1197_v26  ;;  %1813 = vmatprep.subr.mxu1 %v1453_v27  ;;  %v1343_v25 = vld [vmem:[#allocation17 + $0x9a8] sm:$0xff]  ;;  %v1086_v26 = vld [vmem:[#allocation17 + $0x1a0] sm:$0xff] }
 0x5e0   :  { %1743 = vmatpush2.msra.mxu0 %v1196_v28  ;;  %1814 = vmatpush2.msra.mxu1 %v1452_v29  ;;  %v1342_v27 = vld [vmem:[#allocation17 + $0x9a0] sm:$0xff]  ;;  %v1079_v28 = vld [vmem:[#allocation17 + $0x168] sm:$0xff] }
 0x5e1   :  { %1744 = vmatprep.subr.mxu0 %v1189_v30  ;;  %1815 = vmatprep.subr.mxu1 %v1445_v31  ;;  %v1335_v29 = vld [vmem:[#allocation17 + $0x968] sm:$0xff]  ;;  %v1078_v30 = vld [vmem:[#allocation17 + $0x160] sm:$0xff] }
 0x5e2   :  { %1745 = vmatpush2.msra.mxu0 %v1188_v32  ;;  %1816 = vmatpush2.msra.mxu1 %v1444_v33  ;;  %v1334_v31 = vld [vmem:[#allocation17 + $0x960] sm:$0xff]  ;;  %v1071_v32 = vld [vmem:[#allocation17 + $0x128] sm:$0xff] }
 0x5e3   :  { %1746 = vmatprep.subr.mxu0 %v1181_v34  ;;  %1817 = vmatprep.subr.mxu1 %v1437_v12  ;;  %v1327_v33 = vld [vmem:[#allocation17 + $0x928] sm:$0xff]  ;;  %v1070_v34 = vld [vmem:[#allocation17 + $0x120] sm:$0xff] }
 0x5e4   :  { %1747 = vmatpush2.msra.mxu0 %v1180_v11  ;;  %1818 = vmatpush2.msra.mxu1 %v1436_v36  ;;  %v1326_v12 = vld [vmem:[#allocation17 + $0x920] sm:$0xff]  ;;  %v1063_v11 = vld [vmem:[#allocation17 + $0xe8] sm:$0xff] }
 0x5e5   :  { %1748 = vmatprep.subr.mxu0 %v1173_v39  ;;  %1819 = vmatprep.subr.mxu1 %v1429_v4  ;;  %v1319_v36 = vld [vmem:[#allocation17 + $0x8e8] sm:$0xff]  ;;  %v1062_v39 = vld [vmem:[#allocation17 + $0xe0] sm:$0xff] }
 0x5e6   :  { %1749 = vmatpush2.msra.mxu0 %v1172_v41  ;;  %1820 = vmatpush2.msra.mxu1 %v1428_v42  ;;  %v1318_v4 = vld [vmem:[#allocation17 + $0x8e0] sm:$0xff]  ;;  %v1055_v41 = vld [vmem:[#allocation17 + $0xa8] sm:$0xff] }
 0x5e7   :  { %1750 = vmatprep.subr.mxu0 %v1165_v43  ;;  %1821 = vmatprep.subr.mxu1 %v1421_v44  ;;  %v1311_v42 = vld [vmem:[#allocation17 + $0x8a8] sm:$0xff]  ;;  %v1054_v43 = vld [vmem:[#allocation17 + $0xa0] sm:$0xff] }
 0x5e8   :  { %1751 = vmatpush2.msra.mxu0 %v1164_v45  ;;  %1822 = vmatpush2.msra.mxu1 %v1420_v46  ;;  %v1310_v44 = vld [vmem:[#allocation17 + $0x8a0] sm:$0xff]  ;;  %v1047_v45 = vld [vmem:[#allocation17 + $0x68] sm:$0xff] }
 0x5e9   :  { %1753 = vmatmul.mubr.f32.vlgmr.msra.gmra.mxu0 %v9184_v40  ;;  %1824 = vmatmul.mubr.f32.vlgmr.msra.gmra.mxu1 %v9186_v38  ;;  %v1303_v46 = vld [vmem:[#allocation17 + $0x868] sm:$0xff] }
 0x5ea   :  { %1830 = vmatprep.subr.mxu0 %v1159_v47  ;;  %1901 = vmatprep.subr.mxu1 %v1415_v48  ;;  %v1046_v47 = vld [vmem:[#allocation17 + $0x60] sm:$0xff] }
 0x5eb   :  { %1831 = vmatpush1.msra.mxu0 %v1158_v49  ;;  %1894 = vmatprep.mubr.f32.mxu0 %v9178_v35  ;;  %v1302_v48 = vld [vmem:[#allocation17 + $0x860] sm:$0xff]  ;;  %v1039_v49 = vld [vmem:[#allocation17 + $0x28] sm:$0xff] }
 0x5ec   :  { %1902 = vmatpush1.msra.mxu1 %v1414_v50  ;;  %1965 = vmatprep.mubr.f32.mxu1 %v9180_v37  ;;  %v1295_v50 = vld [vmem:[#allocation17 + $0x828] sm:$0xff] }
 0x5ed   :  { %1832 = vmatprep.subr.mxu0 %v1151_v51  ;;  %1903 = vmatprep.subr.mxu1 %v1407_v52  ;;  %v1038_v51 = vld [vmem:[#allocation17 + $0x20] sm:$0xff] }
 0x5ee   :  { %1833 = vmatpush1.msra.mxu0 %v1150_v53  ;;  %1904 = vmatpush1.msra.mxu1 %v1406_v54  ;;  %v1294_v52 = vld [vmem:[#allocation17 + $0x820] sm:$0xff]  ;;  %v1287_v53 = vld [vmem:[#allocation17 + $0x7e8] sm:$0xff] }
 0x5ef   :  { %1834 = vmatprep.subr.mxu0 %v1143_v55  ;;  %1905 = vmatprep.subr.mxu1 %v1399_v56  ;;  %v1543_v54 = vld [vmem:[#allocation17 + $0xfe8] sm:$0xff]  ;;  %v1286_v55 = vld [vmem:[#allocation17 + $0x7e0] sm:$0xff] }
 0x5f0   :  { %1835 = vmatpush1.msra.mxu0 %v1142_v57  ;;  %1906 = vmatpush1.msra.mxu1 %v1398_v59  ;;  %v1542_v56 = vld [vmem:[#allocation17 + $0xfe0] sm:$0xff]  ;;  %v1279_v57 = vld [vmem:[#allocation17 + $0x7a8] sm:$0xff] }
 0x5f1   :  { %1836 = vmatprep.subr.mxu0 %v1135_v61  ;;  %1907 = vmatprep.subr.mxu1 %v1391_v62  ;;  %v1535_v59 = vld [vmem:[#allocation17 + $0xfa8] sm:$0xff]  ;;  %v1278_v61 = vld [vmem:[#allocation17 + $0x7a0] sm:$0xff] }
 0x5f2   :  { %1837 = vmatpush1.msra.mxu0 %v1134_v63  ;;  %1908 = vmatpush1.msra.mxu1 %v1390_v2  ;;  %v1534_v62 = vld [vmem:[#allocation17 + $0xfa0] sm:$0xff]  ;;  %v1271_v63 = vld [vmem:[#allocation17 + $0x768] sm:$0xff] }
 0x5f3   :  { %1838 = vmatprep.subr.mxu0 %v1127_v6  ;;  %1909 = vmatprep.subr.mxu1 %v1383_v7  ;;  %v1527_v2 = vld [vmem:[#allocation17 + $0xf68] sm:$0xff]  ;;  %v1270_v6 = vld [vmem:[#allocation17 + $0x760] sm:$0xff] }
 0x5f4   :  { %1839 = vmatpush1.msra.mxu0 %v1126_v8  ;;  %1910 = vmatpush1.msra.mxu1 %v1382_v9  ;;  %v1526_v7 = vld [vmem:[#allocation17 + $0xf60] sm:$0xff]  ;;  %v1263_v8 = vld [vmem:[#allocation17 + $0x728] sm:$0xff] }
 0x5f5   :  { %1840 = vmatprep.subr.mxu0 %v1119_v10  ;;  %1911 = vmatprep.subr.mxu1 %v1375_v60  ;;  %v1519_v9 = vld [vmem:[#allocation17 + $0xf28] sm:$0xff]  ;;  %v1262_v10 = vld [vmem:[#allocation17 + $0x720] sm:$0xff] }
 0x5f6   :  { %1841 = vmatpush1.msra.mxu0 %v1118_v1  ;;  %1912 = vmatpush1.msra.mxu1 %v1374_v3  ;;  %v1518_v60 = vld [vmem:[#allocation17 + $0xf20] sm:$0xff]  ;;  %v1255_v1 = vld [vmem:[#allocation17 + $0x6e8] sm:$0xff] }
 0x5f7   :  { %1842 = vmatprep.subr.mxu0 %v1111_v13  ;;  %1913 = vmatprep.subr.mxu1 %v1367_v5  ;;  %v1511_v3 = vld [vmem:[#allocation17 + $0xee8] sm:$0xff]  ;;  %v1254_v13 = vld [vmem:[#allocation17 + $0x6e0] sm:$0xff] }
 0x5f8   :  { %1843 = vmatpush1.msra.mxu0 %v1110_v14  ;;  %1914 = vmatpush1.msra.mxu1 %v1366_v15  ;;  %v1510_v5 = vld [vmem:[#allocation17 + $0xee0] sm:$0xff]  ;;  %v1247_v14 = vld [vmem:[#allocation17 + $0x6a8] sm:$0xff] }
 0x5f9   :  { %1844 = vmatprep.subr.mxu0 %v1103_v16  ;;  %1915 = vmatprep.subr.mxu1 %v1359_v17  ;;  %v1503_v15 = vld [vmem:[#allocation17 + $0xea8] sm:$0xff]  ;;  %v1246_v16 = vld [vmem:[#allocation17 + $0x6a0] sm:$0xff] }
 0x5fa   :  { %1845 = vmatpush1.msra.mxu0 %v1102_v18  ;;  %1916 = vmatpush1.msra.mxu1 %v1358_v19  ;;  %v1502_v17 = vld [vmem:[#allocation17 + $0xea0] sm:$0xff]  ;;  %v1239_v18 = vld [vmem:[#allocation17 + $0x668] sm:$0xff] }
 0x5fb   :  { %1846 = vmatprep.subr.mxu0 %v1095_v20  ;;  %1917 = vmatprep.subr.mxu1 %v1351_v21  ;;  %v1495_v19 = vld [vmem:[#allocation17 + $0xe68] sm:$0xff]  ;;  %v1238_v20 = vld [vmem:[#allocation17 + $0x660] sm:$0xff] }
 0x5fc   :  { %1847 = vmatpush1.msra.mxu0 %v1094_v22  ;;  %1918 = vmatpush1.msra.mxu1 %v1350_v23  ;;  %v1494_v21 = vld [vmem:[#allocation17 + $0xe60] sm:$0xff]  ;;  %v1231_v22 = vld [vmem:[#allocation17 + $0x628] sm:$0xff] }
 0x5fd   :  { %1848 = vmatprep.subr.mxu0 %v1087_v24  ;;  %1919 = vmatprep.subr.mxu1 %v1343_v25  ;;  %v1487_v23 = vld [vmem:[#allocation17 + $0xe28] sm:$0xff]  ;;  %v1230_v24 = vld [vmem:[#allocation17 + $0x620] sm:$0xff] }
 0x5fe   :  { %1849 = vmatpush1.msra.mxu0 %v1086_v26  ;;  %1920 = vmatpush1.msra.mxu1 %v1342_v27  ;;  %v1486_v25 = vld [vmem:[#allocation17 + $0xe20] sm:$0xff]  ;;  %v1223_v26 = vld [vmem:[#allocation17 + $0x5e8] sm:$0xff] }
 0x5ff   :  { %1850 = vmatprep.subr.mxu0 %v1079_v28  ;;  %1921 = vmatprep.subr.mxu1 %v1335_v29  ;;  %v1479_v27 = vld [vmem:[#allocation17 + $0xde8] sm:$0xff]  ;;  %v1222_v28 = vld [vmem:[#allocation17 + $0x5e0] sm:$0xff] }
 0x600   :  { %1851 = vmatpush1.msra.mxu0 %v1078_v30  ;;  %1922 = vmatpush1.msra.mxu1 %v1334_v31  ;;  %v1478_v29 = vld [vmem:[#allocation17 + $0xde0] sm:$0xff]  ;;  %v1215_v30 = vld [vmem:[#allocation17 + $0x5a8] sm:$0xff] }
 0x601   :  { %1852 = vmatprep.subr.mxu0 %v1071_v32  ;;  %1923 = vmatprep.subr.mxu1 %v1327_v33  ;;  %v1471_v31 = vld [vmem:[#allocation17 + $0xda8] sm:$0xff]  ;;  %v1214_v32 = vld [vmem:[#allocation17 + $0x5a0] sm:$0xff] }
 0x602   :  { %1853 = vmatpush1.msra.mxu0 %v1070_v34  ;;  %1924 = vmatpush1.msra.mxu1 %v1326_v12  ;;  %v1470_v33 = vld [vmem:[#allocation17 + $0xda0] sm:$0xff]  ;;  %v1207_v34 = vld [vmem:[#allocation17 + $0x568] sm:$0xff] }
 0x603   :  { %1854 = vmatprep.subr.mxu0 %v1063_v11  ;;  %1925 = vmatprep.subr.mxu1 %v1319_v36  ;;  %v1463_v12 = vld [vmem:[#allocation17 + $0xd68] sm:$0xff]  ;;  %v1206_v11 = vld [vmem:[#allocation17 + $0x560] sm:$0xff] }
 0x604   :  { %1855 = vmatpush1.msra.mxu0 %v1062_v39  ;;  %1926 = vmatpush1.msra.mxu1 %v1318_v4  ;;  %v1462_v36 = vld [vmem:[#allocation17 + $0xd60] sm:$0xff]  ;;  %v1199_v39 = vld [vmem:[#allocation17 + $0x528] sm:$0xff] }
 0x605   :  { %1856 = vmatprep.subr.mxu0 %v1055_v41  ;;  %1927 = vmatprep.subr.mxu1 %v1311_v42  ;;  %v1455_v4 = vld [vmem:[#allocation17 + $0xd28] sm:$0xff]  ;;  %v1198_v41 = vld [vmem:[#allocation17 + $0x520] sm:$0xff] }
 0x606   :  { %1857 = vmatpush1.msra.mxu0 %v1054_v43  ;;  %1928 = vmatpush1.msra.mxu1 %v1310_v44  ;;  %v1454_v42 = vld [vmem:[#allocation17 + $0xd20] sm:$0xff]  ;;  %v1191_v43 = vld [vmem:[#allocation17 + $0x4e8] sm:$0xff] }
 0x607   :  { %1858 = vmatprep.subr.mxu0 %v1047_v45  ;;  %1929 = vmatprep.subr.mxu1 %v1303_v46  ;;  %v1447_v44 = vld [vmem:[#allocation17 + $0xce8] sm:$0xff]  ;;  %v1190_v45 = vld [vmem:[#allocation17 + $0x4e0] sm:$0xff] }
 0x608   :  { %1859 = vmatpush1.msra.mxu0 %v1046_v47  ;;  %1930 = vmatpush1.msra.mxu1 %v1302_v48  ;;  %v1446_v46 = vld [vmem:[#allocation17 + $0xce0] sm:$0xff]  ;;  %v1183_v47 = vld [vmem:[#allocation17 + $0x4a8] sm:$0xff] }
 0x609   :  { %1860 = vmatprep.subr.mxu0 %v1039_v49  ;;  %1931 = vmatprep.subr.mxu1 %v1295_v50  ;;  %v1439_v48 = vld [vmem:[#allocation17 + $0xca8] sm:$0xff]  ;;  %v1182_v49 = vld [vmem:[#allocation17 + $0x4a0] sm:$0xff] }
 0x60a   :  { %1861 = vmatpush1.msra.mxu0 %v1038_v51  ;;  %1932 = vmatpush1.msra.mxu1 %v1294_v52  ;;  %v1438_v50 = vld [vmem:[#allocation17 + $0xca0] sm:$0xff]  ;;  %v1175_v51 = vld [vmem:[#allocation17 + $0x468] sm:$0xff] }
 0x60b   :  { %1862 = vmatprep.subr.mxu0 %v1287_v53  ;;  %1933 = vmatprep.subr.mxu1 %v1543_v54  ;;  %v1431_v52 = vld [vmem:[#allocation17 + $0xc68] sm:$0xff]  ;;  %v1174_v53 = vld [vmem:[#allocation17 + $0x460] sm:$0xff] }
 0x60c   :  { %1863 = vmatpush2.msra.mxu0 %v1286_v55  ;;  %1934 = vmatpush2.msra.mxu1 %v1542_v56  ;;  %v1430_v54 = vld [vmem:[#allocation17 + $0xc60] sm:$0xff]  ;;  %v1167_v55 = vld [vmem:[#allocation17 + $0x428] sm:$0xff] }
 0x60d   :  { %1864 = vmatprep.subr.mxu0 %v1279_v57  ;;  %1935 = vmatprep.subr.mxu1 %v1535_v59  ;;  %v1423_v56 = vld [vmem:[#allocation17 + $0xc28] sm:$0xff]  ;;  %v1166_v57 = vld [vmem:[#allocation17 + $0x420] sm:$0xff] }
 0x60e   :  { %1865 = vmatpush2.msra.mxu0 %v1278_v61  ;;  %1936 = vmatpush2.msra.mxu1 %v1534_v62  ;;  %v1422_v59 = vld [vmem:[#allocation17 + $0xc20] sm:$0xff]  ;;  %v1161_v61 = vld [vmem:[#allocation17 + $0x3f8] sm:$0xff] }
 0x60f   :  { %1866 = vmatprep.subr.mxu0 %v1271_v63  ;;  %1937 = vmatprep.subr.mxu1 %v1527_v2  ;;  %v1417_v62 = vld [vmem:[#allocation17 + $0xbf8] sm:$0xff]  ;;  %v1160_v63 = vld [vmem:[#allocation17 + $0x3f0] sm:$0xff] }
 0x610   :  { %1867 = vmatpush2.msra.mxu0 %v1270_v6  ;;  %1938 = vmatpush2.msra.mxu1 %v1526_v7  ;;  %v1416_v2 = vld [vmem:[#allocation17 + $0xbf0] sm:$0xff]  ;;  %v1153_v6 = vld [vmem:[#allocation17 + $0x3b8] sm:$0xff] }
 0x611   :  { %1868 = vmatprep.subr.mxu0 %v1263_v8  ;;  %1939 = vmatprep.subr.mxu1 %v1519_v9  ;;  %v1409_v7 = vld [vmem:[#allocation17 + $0xbb8] sm:$0xff]  ;;  %v1152_v8 = vld [vmem:[#allocation17 + $0x3b0] sm:$0xff] }
 0x612   :  { %1869 = vmatpush2.msra.mxu0 %v1262_v10  ;;  %1940 = vmatpush2.msra.mxu1 %v1518_v60  ;;  %v1408_v9 = vld [vmem:[#allocation17 + $0xbb0] sm:$0xff]  ;;  %v1145_v10 = vld [vmem:[#allocation17 + $0x378] sm:$0xff] }
 0x613   :  { %1870 = vmatprep.subr.mxu0 %v1255_v1  ;;  %1941 = vmatprep.subr.mxu1 %v1511_v3  ;;  %v1401_v60 = vld [vmem:[#allocation17 + $0xb78] sm:$0xff]  ;;  %v1144_v1 = vld [vmem:[#allocation17 + $0x370] sm:$0xff] }
 0x614   :  { %1871 = vmatpush2.msra.mxu0 %v1254_v13  ;;  %1942 = vmatpush2.msra.mxu1 %v1510_v5  ;;  %v1400_v3 = vld [vmem:[#allocation17 + $0xb70] sm:$0xff]  ;;  %v1137_v13 = vld [vmem:[#allocation17 + $0x338] sm:$0xff] }
 0x615   :  { %1872 = vmatprep.subr.mxu0 %v1247_v14  ;;  %1943 = vmatprep.subr.mxu1 %v1503_v15  ;;  %v1393_v5 = vld [vmem:[#allocation17 + $0xb38] sm:$0xff]  ;;  %v1136_v14 = vld [vmem:[#allocation17 + $0x330] sm:$0xff] }
 0x616   :  { %1873 = vmatpush2.msra.mxu0 %v1246_v16  ;;  %1944 = vmatpush2.msra.mxu1 %v1502_v17  ;;  %v1392_v15 = vld [vmem:[#allocation17 + $0xb30] sm:$0xff]  ;;  %v1385_v16 = vld [vmem:[#allocation17 + $0xaf8] sm:$0xff] }
 0x617   :  { %1874 = vmatprep.subr.mxu0 %v1239_v18  ;;  %1945 = vmatprep.subr.mxu1 %v1495_v19  ;;  %v1384_v17 = vld [vmem:[#allocation17 + $0xaf0] sm:$0xff]  ;;  %v1121_v18 = vld [vmem:[#allocation17 + $0x2b8] sm:$0xff] }
 0x618   :  { %1875 = vmatpush2.msra.mxu0 %v1238_v20  ;;  %1946 = vmatpush2.msra.mxu1 %v1494_v21  ;;  %v1377_v19 = vld [vmem:[#allocation17 + $0xab8] sm:$0xff]  ;;  %v1120_v20 = vld [vmem:[#allocation17 + $0x2b0] sm:$0xff] }
 0x619   :  { %1876 = vmatprep.subr.mxu0 %v1231_v22  ;;  %1947 = vmatprep.subr.mxu1 %v1487_v23  ;;  %v1376_v21 = vld [vmem:[#allocation17 + $0xab0] sm:$0xff]  ;;  %v1113_v22 = vld [vmem:[#allocation17 + $0x278] sm:$0xff] }
 0x61a   :  { %1877 = vmatpush2.msra.mxu0 %v1230_v24  ;;  %1948 = vmatpush2.msra.mxu1 %v1486_v25  ;;  %v1369_v23 = vld [vmem:[#allocation17 + $0xa78] sm:$0xff]  ;;  %v1112_v24 = vld [vmem:[#allocation17 + $0x270] sm:$0xff] }
 0x61b   :  { %1878 = vmatprep.subr.mxu0 %v1223_v26  ;;  %1949 = vmatprep.subr.mxu1 %v1479_v27  ;;  %v1368_v25 = vld [vmem:[#allocation17 + $0xa70] sm:$0xff]  ;;  %v1105_v26 = vld [vmem:[#allocation17 + $0x238] sm:$0xff] }
 0x61c   :  { %1879 = vmatpush2.msra.mxu0 %v1222_v28  ;;  %1950 = vmatpush2.msra.mxu1 %v1478_v29  ;;  %v1361_v27 = vld [vmem:[#allocation17 + $0xa38] sm:$0xff]  ;;  %v1104_v28 = vld [vmem:[#allocation17 + $0x230] sm:$0xff] }
 0x61d   :  { %1880 = vmatprep.subr.mxu0 %v1215_v30  ;;  %1951 = vmatprep.subr.mxu1 %v1471_v31  ;;  %v1360_v29 = vld [vmem:[#allocation17 + $0xa30] sm:$0xff]  ;;  %v1097_v30 = vld [vmem:[#allocation17 + $0x1f8] sm:$0xff] }
 0x61e   :  { %1881 = vmatpush2.msra.mxu0 %v1214_v32  ;;  %1952 = vmatpush2.msra.mxu1 %v1470_v33  ;;  %v1353_v31 = vld [vmem:[#allocation17 + $0x9f8] sm:$0xff]  ;;  %v1096_v32 = vld [vmem:[#allocation17 + $0x1f0] sm:$0xff] }
 0x61f   :  { %1882 = vmatprep.subr.mxu0 %v1207_v34  ;;  %1953 = vmatprep.subr.mxu1 %v1463_v12  ;;  %v1352_v33 = vld [vmem:[#allocation17 + $0x9f0] sm:$0xff]  ;;  %v1089_v34 = vld [vmem:[#allocation17 + $0x1b8] sm:$0xff] }
 0x620   :  { %1883 = vmatpush2.msra.mxu0 %v1206_v11  ;;  %1954 = vmatpush2.msra.mxu1 %v1462_v36  ;;  %v1345_v12 = vld [vmem:[#allocation17 + $0x9b8] sm:$0xff]  ;;  %v1088_v11 = vld [vmem:[#allocation17 + $0x1b0] sm:$0xff] }
 0x621   :  { %1884 = vmatprep.subr.mxu0 %v1199_v39  ;;  %1955 = vmatprep.subr.mxu1 %v1455_v4  ;;  %v1344_v36 = vld [vmem:[#allocation17 + $0x9b0] sm:$0xff]  ;;  %v1081_v39 = vld [vmem:[#allocation17 + $0x178] sm:$0xff] }
 0x622   :  { %1885 = vmatpush2.msra.mxu0 %v1198_v41  ;;  %1956 = vmatpush2.msra.mxu1 %v1454_v42  ;;  %v1337_v4 = vld [vmem:[#allocation17 + $0x978] sm:$0xff]  ;;  %v1080_v41 = vld [vmem:[#allocation17 + $0x170] sm:$0xff] }
 0x623   :  { %1886 = vmatprep.subr.mxu0 %v1191_v43  ;;  %1957 = vmatprep.subr.mxu1 %v1447_v44  ;;  %v1336_v42 = vld [vmem:[#allocation17 + $0x970] sm:$0xff]  ;;  %v1073_v43 = vld [vmem:[#allocation17 + $0x138] sm:$0xff] }
 0x624   :  { %1887 = vmatpush2.msra.mxu0 %v1190_v45  ;;  %1958 = vmatpush2.msra.mxu1 %v1446_v46  ;;  %v1329_v44 = vld [vmem:[#allocation17 + $0x938] sm:$0xff]  ;;  %v1072_v45 = vld [vmem:[#allocation17 + $0x130] sm:$0xff] }
 0x625   :  { %1888 = vmatprep.subr.mxu0 %v1183_v47  ;;  %1959 = vmatprep.subr.mxu1 %v1439_v48  ;;  %v1328_v46 = vld [vmem:[#allocation17 + $0x930] sm:$0xff]  ;;  %v1065_v47 = vld [vmem:[#allocation17 + $0xf8] sm:$0xff] }
 0x626   :  { %1889 = vmatpush2.msra.mxu0 %v1182_v49  ;;  %1960 = vmatpush2.msra.mxu1 %v1438_v50  ;;  %v1321_v48 = vld [vmem:[#allocation17 + $0x8f8] sm:$0xff]  ;;  %v1064_v49 = vld [vmem:[#allocation17 + $0xf0] sm:$0xff] }
 0x627   :  { %1890 = vmatprep.subr.mxu0 %v1175_v51  ;;  %1961 = vmatprep.subr.mxu1 %v1431_v52  ;;  %v1320_v50 = vld [vmem:[#allocation17 + $0x8f0] sm:$0xff]  ;;  %v1057_v51 = vld [vmem:[#allocation17 + $0xb8] sm:$0xff] }
 0x628   :  { %1891 = vmatpush2.msra.mxu0 %v1174_v53  ;;  %1962 = vmatpush2.msra.mxu1 %v1430_v54  ;;  %v1313_v52 = vld [vmem:[#allocation17 + $0x8b8] sm:$0xff]  ;;  %v1056_v53 = vld [vmem:[#allocation17 + $0xb0] sm:$0xff] }
 0x629   :  { %1892 = vmatprep.subr.mxu0 %v1167_v55  ;;  %1963 = vmatprep.subr.mxu1 %v1423_v56  ;;  %v1312_v54 = vld [vmem:[#allocation17 + $0x8b0] sm:$0xff]  ;;  %v1049_v55 = vld [vmem:[#allocation17 + $0x78] sm:$0xff] }
 0x62a   :  { %1893 = vmatpush2.msra.mxu0 %v1166_v57  ;;  %1964 = vmatpush2.msra.mxu1 %v1422_v59  ;;  %v1305_v56 = vld [vmem:[#allocation17 + $0x878] sm:$0xff]  ;;  %v1048_v57 = vld [vmem:[#allocation17 + $0x70] sm:$0xff] }
 0x62b   :  { %1895 = vmatmul.mubr.f32.vlgmr.msra.gmra.mxu0 %v9184_v40  ;;  %1966 = vmatmul.mubr.f32.vlgmr.msra.gmra.mxu1 %v9186_v38  ;;  %v1304_v59 = vld [vmem:[#allocation17 + $0x870] sm:$0xff] }
 0x62c   :  { %1972 = vmatprep.subr.mxu0 %v1161_v61  ;;  %2043 = vmatprep.subr.mxu1 %v1417_v62  ;;  %v1041_v61 = vld [vmem:[#allocation17 + $0x38] sm:$0xff] }
 0x62d   :  { %1973 = vmatpush1.msra.mxu0 %v1160_v63  ;;  %2036 = vmatprep.mubr.f32.mxu0 %v9178_v35  ;;  %v1129_v35 = vld [vmem:[#allocation17 + $0x2f8] sm:$0xff]  ;;  %v1040_v63 = vld [vmem:[#allocation17 + $0x30] sm:$0xff] }
 0x62e   :  { %2044 = vmatpush1.msra.mxu1 %v1416_v2  ;;  %2107 = vmatprep.mubr.f32.mxu1 %v9180_v37  ;;  %v1128_v37 = vld [vmem:[#allocation17 + $0x2f0] sm:$0xff]  ;;  %v1297_v62 = vld [vmem:[#allocation17 + $0x838] sm:$0xff] }
 0x62f   :  { %1974 = vmatprep.subr.mxu0 %v1153_v6  ;;  %2045 = vmatprep.subr.mxu1 %v1409_v7  ;;  %v1296_v2 = vld [vmem:[#allocation17 + $0x830] sm:$0xff]  ;;  %v1289_v6 = vld [vmem:[#allocation17 + $0x7f8] sm:$0xff] }
 0x630   :  { %1975 = vmatpush1.msra.mxu0 %v1152_v8  ;;  %2046 = vmatpush1.msra.mxu1 %v1408_v9  ;;  %v1545_v7 = vld [vmem:[#allocation17 + $0xff8] sm:$0xff]  ;;  %v1288_v8 = vld [vmem:[#allocation17 + $0x7f0] sm:$0xff] }
 0x631   :  { %1976 = vmatprep.subr.mxu0 %v1145_v10  ;;  %2047 = vmatprep.subr.mxu1 %v1401_v60  ;;  %v1544_v9 = vld [vmem:[#allocation17 + $0xff0] sm:$0xff]  ;;  %v1281_v10 = vld [vmem:[#allocation17 + $0x7b8] sm:$0xff] }
 0x632   :  { %1977 = vmatpush1.msra.mxu0 %v1144_v1  ;;  %2048 = vmatpush1.msra.mxu1 %v1400_v3  ;;  %v1537_v60 = vld [vmem:[#allocation17 + $0xfb8] sm:$0xff]  ;;  %v1280_v1 = vld [vmem:[#allocation17 + $0x7b0] sm:$0xff] }
 0x633   :  { %1978 = vmatprep.subr.mxu0 %v1137_v13  ;;  %2049 = vmatprep.subr.mxu1 %v1393_v5  ;;  %v1536_v3 = vld [vmem:[#allocation17 + $0xfb0] sm:$0xff]  ;;  %v1273_v13 = vld [vmem:[#allocation17 + $0x778] sm:$0xff] }
 0x634   :  { %1979 = vmatpush1.msra.mxu0 %v1136_v14  ;;  %2050 = vmatpush1.msra.mxu1 %v1392_v15  ;;  %v1529_v5 = vld [vmem:[#allocation17 + $0xf78] sm:$0xff]  ;;  %v1272_v14 = vld [vmem:[#allocation17 + $0x770] sm:$0xff] }
 0x635   :  { %1980 = vmatprep.subr.mxu0 %v1129_v35  ;;  %2051 = vmatprep.subr.mxu1 %v1385_v16  ;;  %v1528_v15 = vld [vmem:[#allocation17 + $0xf70] sm:$0xff]  ;;  %v1265_v35 = vld [vmem:[#allocation17 + $0x738] sm:$0xff] }
 0x636   :  { %1981 = vmatpush1.msra.mxu0 %v1128_v37  ;;  %2052 = vmatpush1.msra.mxu1 %v1384_v17  ;;  %v1521_v16 = vld [vmem:[#allocation17 + $0xf38] sm:$0xff]  ;;  %v1264_v37 = vld [vmem:[#allocation17 + $0x730] sm:$0xff] }
 0x637   :  { %1982 = vmatprep.subr.mxu0 %v1121_v18  ;;  %2053 = vmatprep.subr.mxu1 %v1377_v19  ;;  %v1520_v17 = vld [vmem:[#allocation17 + $0xf30] sm:$0xff]  ;;  %v1257_v18 = vld [vmem:[#allocation17 + $0x6f8] sm:$0xff] }
 0x638   :  { %1983 = vmatpush1.msra.mxu0 %v1120_v20  ;;  %2054 = vmatpush1.msra.mxu1 %v1376_v21  ;;  %v1513_v19 = vld [vmem:[#allocation17 + $0xef8] sm:$0xff]  ;;  %v1256_v20 = vld [vmem:[#allocation17 + $0x6f0] sm:$0xff] }
 0x639   :  { %1984 = vmatprep.subr.mxu0 %v1113_v22  ;;  %2055 = vmatprep.subr.mxu1 %v1369_v23  ;;  %v1512_v21 = vld [vmem:[#allocation17 + $0xef0] sm:$0xff]  ;;  %v1249_v22 = vld [vmem:[#allocation17 + $0x6b8] sm:$0xff] }
 0x63a   :  { %1985 = vmatpush1.msra.mxu0 %v1112_v24  ;;  %2056 = vmatpush1.msra.mxu1 %v1368_v25  ;;  %v1505_v23 = vld [vmem:[#allocation17 + $0xeb8] sm:$0xff]  ;;  %v1248_v24 = vld [vmem:[#allocation17 + $0x6b0] sm:$0xff] }
 0x63b   :  { %1986 = vmatprep.subr.mxu0 %v1105_v26  ;;  %2057 = vmatprep.subr.mxu1 %v1361_v27  ;;  %v1504_v25 = vld [vmem:[#allocation17 + $0xeb0] sm:$0xff]  ;;  %v1241_v26 = vld [vmem:[#allocation17 + $0x678] sm:$0xff] }
 0x63c   :  { %1987 = vmatpush1.msra.mxu0 %v1104_v28  ;;  %2058 = vmatpush1.msra.mxu1 %v1360_v29  ;;  %v1497_v27 = vld [vmem:[#allocation17 + $0xe78] sm:$0xff]  ;;  %v1240_v28 = vld [vmem:[#allocation17 + $0x670] sm:$0xff] }
 0x63d   :  { %1988 = vmatprep.subr.mxu0 %v1097_v30  ;;  %2059 = vmatprep.subr.mxu1 %v1353_v31  ;;  %v1496_v29 = vld [vmem:[#allocation17 + $0xe70] sm:$0xff]  ;;  %v1233_v30 = vld [vmem:[#allocation17 + $0x638] sm:$0xff] }
 0x63e   :  { %1989 = vmatpush1.msra.mxu0 %v1096_v32  ;;  %2060 = vmatpush1.msra.mxu1 %v1352_v33  ;;  %v1489_v31 = vld [vmem:[#allocation17 + $0xe38] sm:$0xff]  ;;  %v1232_v32 = vld [vmem:[#allocation17 + $0x630] sm:$0xff] }
 0x63f   :  { %1990 = vmatprep.subr.mxu0 %v1089_v34  ;;  %2061 = vmatprep.subr.mxu1 %v1345_v12  ;;  %v1488_v33 = vld [vmem:[#allocation17 + $0xe30] sm:$0xff]  ;;  %v1225_v34 = vld [vmem:[#allocation17 + $0x5f8] sm:$0xff] }
 0x640   :  { %1991 = vmatpush1.msra.mxu0 %v1088_v11  ;;  %2062 = vmatpush1.msra.mxu1 %v1344_v36  ;;  %v1481_v12 = vld [vmem:[#allocation17 + $0xdf8] sm:$0xff]  ;;  %v1224_v11 = vld [vmem:[#allocation17 + $0x5f0] sm:$0xff] }
 0x641   :  { %1992 = vmatprep.subr.mxu0 %v1081_v39  ;;  %2063 = vmatprep.subr.mxu1 %v1337_v4  ;;  %v1480_v36 = vld [vmem:[#allocation17 + $0xdf0] sm:$0xff]  ;;  %v1217_v39 = vld [vmem:[#allocation17 + $0x5b8] sm:$0xff] }
 0x642   :  { %1993 = vmatpush1.msra.mxu0 %v1080_v41  ;;  %2064 = vmatpush1.msra.mxu1 %v1336_v42  ;;  %v1473_v4 = vld [vmem:[#allocation17 + $0xdb8] sm:$0xff]  ;;  %v1216_v41 = vld [vmem:[#allocation17 + $0x5b0] sm:$0xff] }
 0x643   :  { %1994 = vmatprep.subr.mxu0 %v1073_v43  ;;  %2065 = vmatprep.subr.mxu1 %v1329_v44  ;;  %v1472_v42 = vld [vmem:[#allocation17 + $0xdb0] sm:$0xff]  ;;  %v1209_v43 = vld [vmem:[#allocation17 + $0x578] sm:$0xff] }
 0x644   :  { %1995 = vmatpush1.msra.mxu0 %v1072_v45  ;;  %2066 = vmatpush1.msra.mxu1 %v1328_v46  ;;  %v1465_v44 = vld [vmem:[#allocation17 + $0xd78] sm:$0xff]  ;;  %v1208_v45 = vld [vmem:[#allocation17 + $0x570] sm:$0xff] }
 0x645   :  { %1996 = vmatprep.subr.mxu0 %v1065_v47  ;;  %2067 = vmatprep.subr.mxu1 %v1321_v48  ;;  %v1464_v46 = vld [vmem:[#allocation17 + $0xd70] sm:$0xff]  ;;  %v1201_v47 = vld [vmem:[#allocation17 + $0x538] sm:$0xff] }
 0x646   :  { %1997 = vmatpush1.msra.mxu0 %v1064_v49  ;;  %2068 = vmatpush1.msra.mxu1 %v1320_v50  ;;  %v1457_v48 = vld [vmem:[#allocation17 + $0xd38] sm:$0xff]  ;;  %v1200_v49 = vld [vmem:[#allocation17 + $0x530] sm:$0xff] }
 0x647   :  { %1998 = vmatprep.subr.mxu0 %v1057_v51  ;;  %2069 = vmatprep.subr.mxu1 %v1313_v52  ;;  %v1456_v50 = vld [vmem:[#allocation17 + $0xd30] sm:$0xff]  ;;  %v1193_v51 = vld [vmem:[#allocation17 + $0x4f8] sm:$0xff] }
 0x648   :  { %1999 = vmatpush1.msra.mxu0 %v1056_v53  ;;  %2070 = vmatpush1.msra.mxu1 %v1312_v54  ;;  %v1449_v52 = vld [vmem:[#allocation17 + $0xcf8] sm:$0xff]  ;;  %v1192_v53 = vld [vmem:[#allocation17 + $0x4f0] sm:$0xff] }
 0x649   :  { %2000 = vmatprep.subr.mxu0 %v1049_v55  ;;  %2071 = vmatprep.subr.mxu1 %v1305_v56  ;;  %v1448_v54 = vld [vmem:[#allocation17 + $0xcf0] sm:$0xff]  ;;  %v1185_v55 = vld [vmem:[#allocation17 + $0x4b8] sm:$0xff] }
 0x64a   :  { %2001 = vmatpush1.msra.mxu0 %v1048_v57  ;;  %2072 = vmatpush1.msra.mxu1 %v1304_v59  ;;  %v1441_v56 = vld [vmem:[#allocation17 + $0xcb8] sm:$0xff]  ;;  %v1184_v57 = vld [vmem:[#allocation17 + $0x4b0] sm:$0xff] }
 0x64b   :  { %2002 = vmatprep.subr.mxu0 %v1041_v61  ;;  %2073 = vmatprep.subr.mxu1 %v1297_v62  ;;  %v1440_v59 = vld [vmem:[#allocation17 + $0xcb0] sm:$0xff]  ;;  %v1177_v61 = vld [vmem:[#allocation17 + $0x478] sm:$0xff] }
 0x64c   :  { %2003 = vmatpush1.msra.mxu0 %v1040_v63  ;;  %2074 = vmatpush1.msra.mxu1 %v1296_v2  ;;  %v1433_v62 = vld [vmem:[#allocation17 + $0xc78] sm:$0xff]  ;;  %v1176_v63 = vld [vmem:[#allocation17 + $0x470] sm:$0xff] }
 0x64d   :  { %2004 = vmatprep.subr.mxu0 %v1289_v6  ;;  %2075 = vmatprep.subr.mxu1 %v1545_v7  ;;  %v1432_v2 = vld [vmem:[#allocation17 + $0xc70] sm:$0xff]  ;;  %v1169_v6 = vld [vmem:[#allocation17 + $0x438] sm:$0xff] }
 0x64e   :  { %2005 = vmatpush2.msra.mxu0 %v1288_v8  ;;  %2076 = vmatpush2.msra.mxu1 %v1544_v9  ;;  %v1425_v7 = vld [vmem:[#allocation17 + $0xc38] sm:$0xff]  ;;  %v1168_v8 = vld [vmem:[#allocation17 + $0x430] sm:$0xff] }
 0x64f   :  { %2006 = vmatprep.subr.mxu0 %v1281_v10  ;;  %2077 = vmatprep.subr.mxu1 %v1537_v60  ;;  %v1424_v9 = vld [vmem:[#allocation17 + $0xc30] sm:$0xff] }
 0x650   :  { %2007 = vmatpush2.msra.mxu0 %v1280_v1  ;;  %2078 = vmatpush2.msra.mxu1 %v1536_v3  ;;  %v2619_v10 = vld [vmem:[#allocation22 + $0x788] sm:$0xff]  ;;  %v2618_v1 = vld [vmem:[#allocation22 + $0x780] sm:$0xff] }
 0x651   :  { %2008 = vmatprep.subr.mxu0 %v1273_v13  ;;  %2079 = vmatprep.subr.mxu1 %v1529_v5  ;;  %v3131_v60 = vld [vmem:[#allocation22 + $0x1788] sm:$0xff]  ;;  %v3130_v3 = vld [vmem:[#allocation22 + $0x1780] sm:$0xff] }
 0x652   :  { %2009 = vmatpush2.msra.mxu0 %v1272_v14  ;;  %2080 = vmatpush2.msra.mxu1 %v1528_v15  ;;  %v2603_v13 = vld [vmem:[#allocation22 + $0x708] sm:$0xff]  ;;  %v2602_v14 = vld [vmem:[#allocation22 + $0x700] sm:$0xff] }
 0x653   :  { %2010 = vmatprep.subr.mxu0 %v1265_v35  ;;  %2081 = vmatprep.subr.mxu1 %v1521_v16  ;;  %v3115_v5 = vld [vmem:[#allocation22 + $0x1708] sm:$0xff]  ;;  %v3114_v15 = vld [vmem:[#allocation22 + $0x1700] sm:$0xff] }
 0x654   :  { %2011 = vmatpush2.msra.mxu0 %v1264_v37  ;;  %2082 = vmatpush2.msra.mxu1 %v1520_v17  ;;  %v2587_v35 = vld [vmem:[#allocation22 + $0x688] sm:$0xff]  ;;  %v3098_v16 = vld [vmem:[#allocation22 + $0x1680] sm:$0xff] }
 0x655   :  { %2012 = vmatprep.subr.mxu0 %v1257_v18  ;;  %2083 = vmatprep.subr.mxu1 %v1513_v19  ;;  %v2571_v37 = vld [vmem:[#allocation22 + $0x608] sm:$0xff]  ;;  %v2570_v18 = vld [vmem:[#allocation22 + $0x600] sm:$0xff] }
 0x656   :  { %2013 = vmatpush2.msra.mxu0 %v1256_v20  ;;  %2084 = vmatpush2.msra.mxu1 %v1512_v21  ;;  %v3083_v17 = vld [vmem:[#allocation22 + $0x1608] sm:$0xff]  ;;  %v3082_v19 = vld [vmem:[#allocation22 + $0x1600] sm:$0xff] }
 0x657   :  { %2014 = vmatprep.subr.mxu0 %v1249_v22  ;;  %2085 = vmatprep.subr.mxu1 %v1505_v23  ;;  %v2555_v20 = vld [vmem:[#allocation22 + $0x588] sm:$0xff]  ;;  %v2554_v22 = vld [vmem:[#allocation22 + $0x580] sm:$0xff] }
 0x658   :  { %2015 = vmatpush2.msra.mxu0 %v1248_v24  ;;  %2086 = vmatpush2.msra.mxu1 %v1504_v25  ;;  %v3067_v21 = vld [vmem:[#allocation22 + $0x1588] sm:$0xff]  ;;  %v3066_v23 = vld [vmem:[#allocation22 + $0x1580] sm:$0xff] }
 0x659   :  { %2016 = vmatprep.subr.mxu0 %v1241_v26  ;;  %2087 = vmatprep.subr.mxu1 %v1497_v27  ;;  %v2539_v24 = vld [vmem:[#allocation22 + $0x508] sm:$0xff]  ;;  %v2538_v26 = vld [vmem:[#allocation22 + $0x500] sm:$0xff] }
 0x65a   :  { %2017 = vmatpush2.msra.mxu0 %v1240_v28  ;;  %2088 = vmatpush2.msra.mxu1 %v1496_v29  ;;  %v3051_v25 = vld [vmem:[#allocation22 + $0x1508] sm:$0xff]  ;;  %v3050_v27 = vld [vmem:[#allocation22 + $0x1500] sm:$0xff] }
 0x65b   :  { %2018 = vmatprep.subr.mxu0 %v1233_v30  ;;  %2089 = vmatprep.subr.mxu1 %v1489_v31  ;;  %v2523_v28 = vld [vmem:[#allocation22 + $0x488] sm:$0xff]  ;;  %v2522_v30 = vld [vmem:[#allocation22 + $0x480] sm:$0xff] }
 0x65c   :  { %2019 = vmatpush2.msra.mxu0 %v1232_v32  ;;  %2090 = vmatpush2.msra.mxu1 %v1488_v33  ;;  %v3035_v29 = vld [vmem:[#allocation22 + $0x1488] sm:$0xff]  ;;  %v3034_v31 = vld [vmem:[#allocation22 + $0x1480] sm:$0xff] }
 0x65d   :  { %2020 = vmatprep.subr.mxu0 %v1225_v34  ;;  %2091 = vmatprep.subr.mxu1 %v1481_v12  ;;  %v2507_v32 = vld [vmem:[#allocation22 + $0x408] sm:$0xff]  ;;  %v2506_v34 = vld [vmem:[#allocation22 + $0x400] sm:$0xff] }
 0x65e   :  { %2021 = vmatpush2.msra.mxu0 %v1224_v11  ;;  %2092 = vmatpush2.msra.mxu1 %v1480_v36  ;;  %v3019_v33 = vld [vmem:[#allocation22 + $0x1408] sm:$0xff]  ;;  %v3018_v12 = vld [vmem:[#allocation22 + $0x1400] sm:$0xff] }
 0x65f   :  { %2022 = vmatprep.subr.mxu0 %v1217_v39  ;;  %2093 = vmatprep.subr.mxu1 %v1473_v4  ;;  %v2491_v11 = vld [vmem:[#allocation22 + $0x388] sm:$0xff]  ;;  %v2490_v39 = vld [vmem:[#allocation22 + $0x380] sm:$0xff] }
 0x660   :  { %2023 = vmatpush2.msra.mxu0 %v1216_v41  ;;  %2094 = vmatpush2.msra.mxu1 %v1472_v42  ;;  %v3003_v36 = vld [vmem:[#allocation22 + $0x1388] sm:$0xff]  ;;  %v3002_v4 = vld [vmem:[#allocation22 + $0x1380] sm:$0xff] }
 0x661   :  { %2024 = vmatprep.subr.mxu0 %v1209_v43  ;;  %2095 = vmatprep.subr.mxu1 %v1465_v44  ;;  %v2475_v41 = vld [vmem:[#allocation22 + $0x308] sm:$0xff]  ;;  %v2474_v43 = vld [vmem:[#allocation22 + $0x300] sm:$0xff] }
 0x662   :  { %2025 = vmatpush2.msra.mxu0 %v1208_v45  ;;  %2096 = vmatpush2.msra.mxu1 %v1464_v46  ;;  %v2987_v42 = vld [vmem:[#allocation22 + $0x1308] sm:$0xff]  ;;  %v2986_v44 = vld [vmem:[#allocation22 + $0x1300] sm:$0xff] }
 0x663   :  { %2026 = vmatprep.subr.mxu0 %v1201_v47  ;;  %2097 = vmatprep.subr.mxu1 %v1457_v48  ;;  %v2459_v45 = vld [vmem:[#allocation22 + $0x288] sm:$0xff]  ;;  %v2458_v47 = vld [vmem:[#allocation22 + $0x280] sm:$0xff] }
 0x664   :  { %2027 = vmatpush2.msra.mxu0 %v1200_v49  ;;  %2098 = vmatpush2.msra.mxu1 %v1456_v50  ;;  %v2971_v46 = vld [vmem:[#allocation22 + $0x1288] sm:$0xff]  ;;  %v2970_v48 = vld [vmem:[#allocation22 + $0x1280] sm:$0xff] }
 0x665   :  { %2028 = vmatprep.subr.mxu0 %v1193_v51  ;;  %2099 = vmatprep.subr.mxu1 %v1449_v52  ;;  %v2443_v49 = vld [vmem:[#allocation22 + $0x208] sm:$0xff]  ;;  %v2442_v51 = vld [vmem:[#allocation22 + $0x200] sm:$0xff] }
 0x666   :  { %2029 = vmatpush2.msra.mxu0 %v1192_v53  ;;  %2100 = vmatpush2.msra.mxu1 %v1448_v54  ;;  %v2955_v50 = vld [vmem:[#allocation22 + $0x1208] sm:$0xff]  ;;  %v2954_v52 = vld [vmem:[#allocation22 + $0x1200] sm:$0xff] }
 0x667   :  { %2030 = vmatprep.subr.mxu0 %v1185_v55  ;;  %2101 = vmatprep.subr.mxu1 %v1441_v56  ;;  %v2427_v53 = vld [vmem:[#allocation22 + $0x188] sm:$0xff]  ;;  %v2426_v55 = vld [vmem:[#allocation22 + $0x180] sm:$0xff] }
 0x668   :  { %2031 = vmatpush2.msra.mxu0 %v1184_v57  ;;  %2102 = vmatpush2.msra.mxu1 %v1440_v59  ;;  %v2939_v54 = vld [vmem:[#allocation22 + $0x1188] sm:$0xff]  ;;  %v2938_v56 = vld [vmem:[#allocation22 + $0x1180] sm:$0xff] }
 0x669   :  { %2032 = vmatprep.subr.mxu0 %v1177_v61  ;;  %2103 = vmatprep.subr.mxu1 %v1433_v62  ;;  %v2411_v57 = vld [vmem:[#allocation22 + $0x108] sm:$0xff]  ;;  %v2410_v61 = vld [vmem:[#allocation22 + $0x100] sm:$0xff] }
 0x66a   :  { %2033 = vmatpush2.msra.mxu0 %v1176_v63  ;;  %2104 = vmatpush2.msra.mxu1 %v1432_v2  ;;  %v2923_v59 = vld [vmem:[#allocation22 + $0x1108] sm:$0xff]  ;;  %v2922_v62 = vld [vmem:[#allocation22 + $0x1100] sm:$0xff] }
 0x66b   :  { %2034 = vmatprep.subr.mxu0 %v1169_v6  ;;  %2105 = vmatprep.subr.mxu1 %v1425_v7  ;;  %v2395_v63 = vld [vmem:[#allocation22 + $0x88] sm:$0xff]  ;;  %v2394_v6 = vld [vmem:[#allocation22 + $0x80] sm:$0xff] }
 0x66c   :  { %2035 = vmatpush2.msra.mxu0 %v1168_v8  ;;  %2106 = vmatpush2.msra.mxu1 %v1424_v9  ;;  %v2907_v2 = vld [vmem:[#allocation22 + $0x1088] sm:$0xff]  ;;  %v2906_v7 = vld [vmem:[#allocation22 + $0x1080] sm:$0xff] }
 0x66d   :  { %2037 = vmatmul.mubr.f32.vlgmr.msra.gmra.mxu0 %v9184_v40  ;;  %2108 = vmatmul.mubr.f32.vlgmr.msra.gmra.mxu1 %v9186_v38  ;;  %v3099_v40 = vld [vmem:[#allocation22 + $0x1688] sm:$0xff]  ;;  %v2586_v38 = vld [vmem:[#allocation22 + $0x680] sm:$0xff] }
 0x66e   :  { %4426 = vmatprep.subr.mxu0 %v2619_v10  ;;  %4497 = vmatprep.subr.mxu1 %v3131_v60  ;;  %v2379_v8 = vld [vmem:[#allocation22 + $0x8] sm:$0xff]  ;;  %v2378_v10 = vld [vmem:[#allocation22] sm:$0xff] }
 0x66f   :  { %4427 = vmatpush1.msra.mxu0 %v2618_v1  ;;  %4498 = vmatpush1.msra.mxu1 %v3130_v3  ;;  %v2891_v9 = vld [vmem:[#allocation22 + $0x1008] sm:$0xff]  ;;  %v2890_v60 = vld [vmem:[#allocation22 + $0x1000] sm:$0xff] }
 0x670   :  { %4428 = vmatprep.subr.mxu0 %v2603_v13  ;;  %4499 = vmatprep.subr.mxu1 %v3115_v5  ;;  %v2875_v1 = vld [vmem:[#allocation22 + $0xf88] sm:$0xff]  ;;  %v2874_v13 = vld [vmem:[#allocation22 + $0xf80] sm:$0xff] }
 0x671   :  { %4429 = vmatpush1.msra.mxu0 %v2602_v14  ;;  %4500 = vmatpush1.msra.mxu1 %v3114_v15  ;;  %v3387_v3 = vld [vmem:[#allocation22 + $0x1f88] sm:$0xff]  ;;  %v3386_v5 = vld [vmem:[#allocation22 + $0x1f80] sm:$0xff] }
 0x672   :  { %4430 = vmatprep.subr.mxu0 %v2587_v35  ;;  %4501 = vmatprep.subr.mxu1 %v3099_v40  ;;  %v2859_v14 = vld [vmem:[#allocation22 + $0xf08] sm:$0xff]  ;;  %v2858_v35 = vld [vmem:[#allocation22 + $0xf00] sm:$0xff] }
 0x673   :  { %4431 = vmatpush1.msra.mxu0 %v2586_v38  ;;  %4502 = vmatpush1.msra.mxu1 %v3098_v16  ;;  %v3371_v15 = vld [vmem:[#allocation22 + $0x1f08] sm:$0xff]  ;;  %v3370_v40 = vld [vmem:[#allocation22 + $0x1f00] sm:$0xff] }
 0x674   :  { %4432 = vmatprep.subr.mxu0 %v2571_v37  ;;  %4503 = vmatprep.subr.mxu1 %v3083_v17  ;;  %v2843_v38 = vld [vmem:[#allocation22 + $0xe88] sm:$0xff]  ;;  %v2842_v37 = vld [vmem:[#allocation22 + $0xe80] sm:$0xff] }
 0x675   :  { %4433 = vmatpush1.msra.mxu0 %v2570_v18  ;;  %4504 = vmatpush1.msra.mxu1 %v3082_v19  ;;  %v3355_v16 = vld [vmem:[#allocation22 + $0x1e88] sm:$0xff]  ;;  %v3354_v17 = vld [vmem:[#allocation22 + $0x1e80] sm:$0xff] }
 0x676   :  { %4434 = vmatprep.subr.mxu0 %v2555_v20  ;;  %4505 = vmatprep.subr.mxu1 %v3067_v21  ;;  %v2827_v18 = vld [vmem:[#allocation22 + $0xe08] sm:$0xff]  ;;  %v2826_v20 = vld [vmem:[#allocation22 + $0xe00] sm:$0xff] }
 0x677   :  { %4435 = vmatpush1.msra.mxu0 %v2554_v22  ;;  %4506 = vmatpush1.msra.mxu1 %v3066_v23  ;;  %v3339_v19 = vld [vmem:[#allocation22 + $0x1e08] sm:$0xff]  ;;  %v3338_v21 = vld [vmem:[#allocation22 + $0x1e00] sm:$0xff] }
 0x678   :  { %4436 = vmatprep.subr.mxu0 %v2539_v24  ;;  %4507 = vmatprep.subr.mxu1 %v3051_v25  ;;  %v2811_v22 = vld [vmem:[#allocation22 + $0xd88] sm:$0xff]  ;;  %v2810_v24 = vld [vmem:[#allocation22 + $0xd80] sm:$0xff] }
 0x679   :  { %4437 = vmatpush1.msra.mxu0 %v2538_v26  ;;  %4508 = vmatpush1.msra.mxu1 %v3050_v27  ;;  %v3323_v23 = vld [vmem:[#allocation22 + $0x1d88] sm:$0xff]  ;;  %v3322_v25 = vld [vmem:[#allocation22 + $0x1d80] sm:$0xff] }
 0x67a   :  { %4438 = vmatprep.subr.mxu0 %v2523_v28  ;;  %4509 = vmatprep.subr.mxu1 %v3035_v29  ;;  %v2795_v26 = vld [vmem:[#allocation22 + $0xd08] sm:$0xff]  ;;  %v2794_v28 = vld [vmem:[#allocation22 + $0xd00] sm:$0xff] }
 0x67b   :  { %4439 = vmatpush1.msra.mxu0 %v2522_v30  ;;  %4510 = vmatpush1.msra.mxu1 %v3034_v31  ;;  %v3307_v27 = vld [vmem:[#allocation22 + $0x1d08] sm:$0xff]  ;;  %v3306_v29 = vld [vmem:[#allocation22 + $0x1d00] sm:$0xff] }
 0x67c   :  { %4440 = vmatprep.subr.mxu0 %v2507_v32  ;;  %4511 = vmatprep.subr.mxu1 %v3019_v33  ;;  %v2779_v30 = vld [vmem:[#allocation22 + $0xc88] sm:$0xff]  ;;  %v2778_v32 = vld [vmem:[#allocation22 + $0xc80] sm:$0xff] }
 0x67d   :  { %4441 = vmatpush1.msra.mxu0 %v2506_v34  ;;  %4512 = vmatpush1.msra.mxu1 %v3018_v12  ;;  %v3291_v31 = vld [vmem:[#allocation22 + $0x1c88] sm:$0xff]  ;;  %v3290_v33 = vld [vmem:[#allocation22 + $0x1c80] sm:$0xff] }
 0x67e   :  { %4442 = vmatprep.subr.mxu0 %v2491_v11  ;;  %4513 = vmatprep.subr.mxu1 %v3003_v36  ;;  %v2763_v34 = vld [vmem:[#allocation22 + $0xc08] sm:$0xff]  ;;  %v2762_v11 = vld [vmem:[#allocation22 + $0xc00] sm:$0xff] }
 0x67f   :  { %4443 = vmatpush1.msra.mxu0 %v2490_v39  ;;  %4514 = vmatpush1.msra.mxu1 %v3002_v4  ;;  %v3275_v12 = vld [vmem:[#allocation22 + $0x1c08] sm:$0xff]  ;;  %v3274_v36 = vld [vmem:[#allocation22 + $0x1c00] sm:$0xff] }
 0x680   :  { %4444 = vmatprep.subr.mxu0 %v2475_v41  ;;  %4515 = vmatprep.subr.mxu1 %v2987_v42  ;;  %v2747_v39 = vld [vmem:[#allocation22 + $0xb88] sm:$0xff]  ;;  %v2746_v41 = vld [vmem:[#allocation22 + $0xb80] sm:$0xff] }
 0x681   :  { %4445 = vmatpush1.msra.mxu0 %v2474_v43  ;;  %4516 = vmatpush1.msra.mxu1 %v2986_v44  ;;  %v3259_v4 = vld [vmem:[#allocation22 + $0x1b88] sm:$0xff]  ;;  %v3258_v42 = vld [vmem:[#allocation22 + $0x1b80] sm:$0xff] }
 0x682   :  { %4446 = vmatprep.subr.mxu0 %v2459_v45  ;;  %4517 = vmatprep.subr.mxu1 %v2971_v46  ;;  %v2731_v43 = vld [vmem:[#allocation22 + $0xb08] sm:$0xff]  ;;  %v2730_v45 = vld [vmem:[#allocation22 + $0xb00] sm:$0xff] }
 0x683   :  { %4447 = vmatpush1.msra.mxu0 %v2458_v47  ;;  %4518 = vmatpush1.msra.mxu1 %v2970_v48  ;;  %v3243_v44 = vld [vmem:[#allocation22 + $0x1b08] sm:$0xff]  ;;  %v3242_v46 = vld [vmem:[#allocation22 + $0x1b00] sm:$0xff] }
 0x684   :  { %4448 = vmatprep.subr.mxu0 %v2443_v49  ;;  %4519 = vmatprep.subr.mxu1 %v2955_v50  ;;  %v2715_v47 = vld [vmem:[#allocation22 + $0xa88] sm:$0xff]  ;;  %v2714_v49 = vld [vmem:[#allocation22 + $0xa80] sm:$0xff] }
 0x685   :  { %4449 = vmatpush1.msra.mxu0 %v2442_v51  ;;  %4520 = vmatpush1.msra.mxu1 %v2954_v52  ;;  %v3227_v48 = vld [vmem:[#allocation22 + $0x1a88] sm:$0xff]  ;;  %v3226_v50 = vld [vmem:[#allocation22 + $0x1a80] sm:$0xff] }
 0x686   :  { %4450 = vmatprep.subr.mxu0 %v2427_v53  ;;  %4521 = vmatprep.subr.mxu1 %v2939_v54  ;;  %v2699_v51 = vld [vmem:[#allocation22 + $0xa08] sm:$0xff]  ;;  %v2698_v53 = vld [vmem:[#allocation22 + $0xa00] sm:$0xff] }
 0x687   :  { %4451 = vmatpush1.msra.mxu0 %v2426_v55  ;;  %4522 = vmatpush1.msra.mxu1 %v2938_v56  ;;  %v3211_v52 = vld [vmem:[#allocation22 + $0x1a08] sm:$0xff]  ;;  %v3210_v54 = vld [vmem:[#allocation22 + $0x1a00] sm:$0xff] }
 0x688   :  { %4452 = vmatprep.subr.mxu0 %v2411_v57  ;;  %4523 = vmatprep.subr.mxu1 %v2923_v59  ;;  %v2683_v55 = vld [vmem:[#allocation22 + $0x988] sm:$0xff]  ;;  %v2682_v57 = vld [vmem:[#allocation22 + $0x980] sm:$0xff] }
 0x689   :  { %4453 = vmatpush1.msra.mxu0 %v2410_v61  ;;  %4524 = vmatpush1.msra.mxu1 %v2922_v62  ;;  %v3195_v56 = vld [vmem:[#allocation22 + $0x1988] sm:$0xff]  ;;  %v3194_v59 = vld [vmem:[#allocation22 + $0x1980] sm:$0xff] }
 0x68a   :  { %4454 = vmatprep.subr.mxu0 %v2395_v63  ;;  %4525 = vmatprep.subr.mxu1 %v2907_v2  ;;  %v2667_v61 = vld [vmem:[#allocation22 + $0x908] sm:$0xff]  ;;  %v2666_v63 = vld [vmem:[#allocation22 + $0x900] sm:$0xff] }
 0x68b   :  { %4455 = vmatpush1.msra.mxu0 %v2394_v6  ;;  %4526 = vmatpush1.msra.mxu1 %v2906_v7  ;;  %v3179_v62 = vld [vmem:[#allocation22 + $0x1908] sm:$0xff]  ;;  %v3178_v2 = vld [vmem:[#allocation22 + $0x1900] sm:$0xff] }
 0x68c   :  { %4456 = vmatprep.subr.mxu0 %v2379_v8  ;;  %4527 = vmatprep.subr.mxu1 %v2891_v9  ;;  %v2651_v6 = vld [vmem:[#allocation22 + $0x888] sm:$0xff]  ;;  %v2650_v8 = vld [vmem:[#allocation22 + $0x880] sm:$0xff] }
 0x68d   :  { %4457 = vmatpush1.msra.mxu0 %v2378_v10  ;;  %4528 = vmatpush1.msra.mxu1 %v2890_v60  ;;  %v3163_v7 = vld [vmem:[#allocation22 + $0x1888] sm:$0xff]  ;;  %v3162_v9 = vld [vmem:[#allocation22 + $0x1880] sm:$0xff] }
 0x68e   :  { %4458 = vmatprep.subr.mxu0 %v2875_v1  ;;  %4529 = vmatprep.subr.mxu1 %v3387_v3  ;;  %v2635_v10 = vld [vmem:[#allocation22 + $0x808] sm:$0xff]  ;;  %v2634_v1 = vld [vmem:[#allocation22 + $0x800] sm:$0xff] }
 0x68f   :  { %4459 = vmatpush2.msra.mxu0 %v2874_v13  ;;  %4530 = vmatpush2.msra.mxu1 %v3386_v5  ;;  %v3147_v60 = vld [vmem:[#allocation22 + $0x1808] sm:$0xff]  ;;  %v3146_v3 = vld [vmem:[#allocation22 + $0x1800] sm:$0xff] }
 0x690   :  { %4460 = vmatprep.subr.mxu0 %v2859_v14  ;;  %4531 = vmatprep.subr.mxu1 %v3371_v15  ;;  %v3643_v13 = vld [vmem:[#allocation22 + $0x2788] sm:$0xff]  ;;  %v1612_v14 = vpop.f32.mrf.mxu0  ;;  %v1683_v15 = vpop.f32.mrf.mxu1 }
 0x691   :  { %4461 = vmatpush2.msra.mxu0 %v2858_v35  ;;  %4532 = vmatpush2.msra.mxu1 %v3370_v40  ;;  %v4155_v5 = vld [vmem:[#allocation22 + $0x3788] sm:$0xff] }
 0x692   :  { %4462 = vmatprep.subr.mxu0 %v2843_v38  ;;  %4533 = vmatprep.subr.mxu1 %v3355_v16  ;;  %v1614_v35 = vpop.f32.mrf.mxu0  ;;  %v1685_v40 = vpop.f32.mrf.mxu1  ;;  %v9202_v38 = vadd.f32 %v1683_v15, %v1612_v14 }
 0x693   :  { %4463 = vmatpush2.msra.mxu0 %v2842_v37  ;;  %4534 = vmatpush2.msra.mxu1 %v3354_v17  ;;  %v9204_v17 = vadd.f32 %v1685_v40, %v1614_v35 }
 0x694   :  { %4464 = vmatprep.subr.mxu0 %v2827_v18  ;;  %4535 = vmatprep.subr.mxu1 %v3339_v19  ;;  %v2170_v18 = vmul.f32 %v9202_v38, %v9202_v38 }
 0x695   :  { %4465 = vmatpush2.msra.mxu0 %v2826_v20  ;;  %4536 = vmatpush2.msra.mxu1 %v3338_v21  ;;  %v2171_v21 = vmul.f32 %v9204_v17, %v9204_v17 }
 0x696   :  { %4466 = vmatprep.subr.mxu0 %v2811_v22  ;;  %4537 = vmatprep.subr.mxu1 %v3323_v23 }
 0x697   :  { %4467 = vmatpush2.msra.mxu0 %v2810_v24  ;;  %4538 = vmatpush2.msra.mxu1 %v3322_v25  ;;  %v2114_v24 = vsel %vm354_vm3, %v9202_v38, 0.0  ;;  %v2178_v25 = vsel %vm354_vm3, %v2170_v18, 0.0 }
 0x698   :  { %4468 = vmatprep.subr.mxu0 %v2795_v26  ;;  %4539 = vmatprep.subr.mxu1 %v3307_v27  ;;  %v2121_v26 = vsel %vm354_vm3, %v9204_v17, 0.0 }
 0x699   :  { %4469 = vmatpush2.msra.mxu0 %v2794_v28  ;;  %4540 = vmatpush2.msra.mxu1 %v3306_v29  ;;  %v2185_v28 = vsel %vm354_vm3, %v2171_v21, 0.0  ;;  %v2115_v29 = vrot.slane %v2114_v24, 4 }
 0x69a   :  { %4470 = vmatprep.subr.mxu0 %v2779_v30  ;;  %4541 = vmatprep.subr.mxu1 %v3291_v31 }
 0x69b   :  { %4471 = vmatpush2.msra.mxu0 %v2778_v32  ;;  %4542 = vmatpush2.msra.mxu1 %v3290_v33 }
 0x69c   :  { %4472 = vmatprep.subr.mxu0 %v2763_v34  ;;  %4543 = vmatprep.subr.mxu1 %v3275_v12  ;;  %v2179_v34 = vrot.slane %v2178_v25, 4  ;;  %v2122_v12 = vrot.slane %v2121_v26, 4 }
 0x69d   :  { %4473 = vmatpush2.msra.mxu0 %v2762_v11  ;;  %4544 = vmatpush2.msra.mxu1 %v3274_v36  ;;  %v2186_v11 = vrot.slane %v2185_v28, 4 }
 0x69e   :  { %4474 = vmatprep.subr.mxu0 %v2747_v39  ;;  %4545 = vmatprep.subr.mxu1 %v3259_v4  ;;  %v2116_v4 = vadd.f32 %v2115_v29, %v2114_v24 }
 0x69f   :  { %4475 = vmatpush2.msra.mxu0 %v2746_v41  ;;  %4546 = vmatpush2.msra.mxu1 %v3258_v42 }
 0x6a0   :  { %4476 = vmatprep.subr.mxu0 %v2731_v43  ;;  %4547 = vmatprep.subr.mxu1 %v3243_v44  ;;  %v2180_v44 = vadd.f32 %v2179_v34, %v2178_v25 }
 0x6a1   :  { %4477 = vmatpush2.msra.mxu0 %v2730_v45  ;;  %4548 = vmatpush2.msra.mxu1 %v3242_v46  ;;  %v2123_v45 = vadd.f32 %v2122_v12, %v2121_v26  ;;  %v2187_v46 = vadd.f32 %v2186_v11, %v2185_v28 }
 0x6a2   :  { %4478 = vmatprep.subr.mxu0 %v2715_v47  ;;  %4549 = vmatprep.subr.mxu1 %v3227_v48 }
 0x6a3   :  { %4479 = vmatpush2.msra.mxu0 %v2714_v49  ;;  %4550 = vmatpush2.msra.mxu1 %v3226_v50 }
 0x6a4   :  { %4480 = vmatprep.subr.mxu0 %v2699_v51  ;;  %4551 = vmatprep.subr.mxu1 %v3211_v52  ;;  %v2117_v52 = vrot.slane %v2116_v4, 2 }
 0x6a5   :  { %4481 = vmatpush2.msra.mxu0 %v2698_v53  ;;  %4552 = vmatpush2.msra.mxu1 %v3210_v54 }
 0x6a6   :  { %4482 = vmatprep.subr.mxu0 %v2683_v55  ;;  %4553 = vmatprep.subr.mxu1 %v3195_v56 }
 0x6a7   :  { %4483 = vmatpush2.msra.mxu0 %v2682_v57  ;;  %4554 = vmatpush2.msra.mxu1 %v3194_v59 }
 0x6a8   :  { %4484 = vmatprep.subr.mxu0 %v2667_v61  ;;  %4555 = vmatprep.subr.mxu1 %v3179_v62  ;;  %v2181_v61 = vrot.slane %v2180_v44, 2  ;;  %v2124_v62 = vrot.slane %v2123_v45, 2 }
 0x6a9   :  { %4485 = vmatpush2.msra.mxu0 %v2666_v63  ;;  %4556 = vmatpush2.msra.mxu1 %v3178_v2  ;;  %v1754_v16 = vpop.f32.mrf.mxu0  ;;  %v1825_v37 = vpop.f32.mrf.mxu1  ;;  %v2188_v63 = vrot.slane %v2187_v46, 2 }
 0x6aa   :  { %4486 = vmatprep.subr.mxu0 %v2651_v6  ;;  %4557 = vmatprep.subr.mxu1 %v3163_v7  ;;  %v9215_v27 = vadd.f32 %v1825_v37, %v1754_v16 }
 0x6ab   :  { %4487 = vmatpush2.msra.mxu0 %v2650_v8  ;;  %4558 = vmatpush2.msra.mxu1 %v3162_v9  ;;  %v1756_v19 = vpop.f32.mrf.mxu0  ;;  %v1827_v20 = vpop.f32.mrf.mxu1  ;;  %v2189_v15 = vadd.f32 %v2188_v63, %v2187_v46 }
 0x6ac   :  { %4488 = vmatprep.subr.mxu0 %v2635_v10  ;;  %4559 = vmatprep.subr.mxu1 %v3147_v60  ;;  %v9218_v30 = vadd.f32 %v1827_v20, %v1756_v19  ;;  %v2172_v36 = vmul.f32 %v9215_v27, %v9215_v27  ;;  %v2128_v41 = vsel %vm354_vm3, %v9215_v27, 0.0  ;;  %v2118_v10 = vadd.f32 %v2117_v52, %v2116_v4 }
 0x6ad   :  { %4489 = vmatpush2.msra.mxu0 %v2634_v1  ;;  %4560 = vmatpush2.msra.mxu1 %v3146_v3  ;;  %v2129_v50 = vrot.slane %v2128_v41, 4  ;;  %v2190_v25 = vrot.slane %v2189_v15, 1 }
 0x6ae   :  { %4568 = vmatprep.subr.mxu0 %v3643_v13  ;;  %4639 = vmatprep.subr.mxu1 %v4155_v5  ;;  %v2173_v42 = vmul.f32 %v9218_v30, %v9218_v30  ;;  %v2192_v47 = vsel %vm354_vm3, %v2172_v36, 0.0  ;;  %v2135_v48 = vsel %vm354_vm3, %v9218_v30, 0.0  ;;  %v2182_v13 = vadd.f32 %v2181_v61, %v2180_v44 }
 0x6af   :  { %v2193_v55 = vrot.slane %v2192_v47, 4  ;;  %v2136_v56 = vrot.slane %v2135_v48, 4  ;;  %v2130_v2 = vadd.f32 %v2129_v50, %v2128_v41  ;;  %v2125_v5 = vadd.f32 %v2124_v62, %v2123_v45 }
 0x6b0   :  { %v2199_v53 = vsel %vm354_vm3, %v2173_v42, 0.0  ;;  %v2119_v18 = vrot.slane %v2118_v10, 1  ;;  %v2191_v45 = vadd.f32 %v2190_v25, %v2189_v15 }
 0x6b1   :  { %v2200_v6 = vrot.slane %v2199_v53, 4  ;;  %v2194_v60 = vadd.f32 %v2193_v55, %v2192_v47  ;;  %v2137_v1 = vadd.f32 %v2136_v56, %v2135_v48  ;;  %v2131_v35 = vrot.slane %v2130_v2, 2 }
 0x6b3   :  { %v2201_v40 = vadd.f32 %v2200_v6, %v2199_v53  ;;  %v2195_v19 = vrot.slane %v2194_v60, 2  ;;  %v2138_v20 = vrot.slane %v2137_v1, 2  ;;  %v2132_v26 = vadd.f32 %v2131_v35, %v2130_v2 }
 0x6b5   :  { %v2202_v28 = vrot.slane %v2201_v40, 2  ;;  %v2196_v34 = vadd.f32 %v2195_v19, %v2194_v60  ;;  %v2139_v12 = vadd.f32 %v2138_v20, %v2137_v1  ;;  %v2133_v46 = vrot.slane %v2132_v26, 1 }
 0x6b7   :  { %v2203_v47 = vadd.f32 %v2202_v28, %v2201_v40  ;;  %v2197_v55 = vrot.slane %v2196_v34, 1  ;;  %v2140_v56 = vrot.slane %v2139_v12, 1  ;;  %v2134_v6 = vadd.f32 %v2133_v46, %v2132_v26 }
 0x6b9   :  { %v2198_v35 = vadd.f32 %v2197_v55, %v2196_v34  ;;  %v2141_v40 = vadd.f32 %v2140_v56, %v2139_v12 }
 0x6eb   :  { %v1896_v22 = vpop.f32.mrf.mxu0  ;;  %v1967_v23 = vpop.f32.mrf.mxu1 }
 0x6ec   :  { %v9220_v31 = vadd.f32 %v1967_v23, %v1896_v22  ;;  %v2183_v22 = vrot.slane %v2182_v13, 1  ;;  %v2126_v23 = vrot.slane %v2125_v5, 1 }
 0x6ed   :  { %v1898_v32 = vpop.f32.mrf.mxu0  ;;  %v1969_v33 = vpop.f32.mrf.mxu1 }
 0x6ee   :  { %v9224_v39 = vadd.f32 %v1969_v33, %v1898_v32  ;;  %v2174_v43 = vmul.f32 %v9220_v31, %v9220_v31  ;;  %v2142_v49 = vsel %vm354_vm3, %v9220_v31, 0.0  ;;  %v2120_v33 = vadd.f32 %v2119_v18, %v2118_v10 }
 0x6ef   :  { %v2143_v57 = vrot.slane %v2142_v49, 4  ;;  %v2184_v41 = vadd.f32 %v2183_v22, %v2182_v13  ;;  %v2127_v42 = vadd.f32 %v2126_v23, %v2125_v5  ;;  %v2204_v10 = vrot.slane %v2203_v47, 1 }
 0x6f0   :  { %v2175_v51 = vmul.f32 %v9224_v39, %v9224_v39  ;;  %v2206_v54 = vsel %vm354_vm3, %v2174_v43, 0.0  ;;  %v2149_v59 = vsel %vm354_vm3, %v9224_v39, 0.0  ;;  %v2234_v22 = vadd.f32 %v2134_v6, %v2120_v33 }
 0x6f1   :  { %v2207_v7 = vrot.slane %v2206_v54, 4  ;;  %v2150_v9 = vrot.slane %v2149_v59, 4  ;;  %v2144_v3 = vadd.f32 %v2143_v57, %v2142_v49  ;;  %v2205_v23 = vadd.f32 %v2204_v10, %v2203_v47 }
 0x6f2   :  { %v2213_v8 = vsel %vm354_vm3, %v2175_v51, 0.0  ;;  %v8895_v10 = vmov 1966171168  }
 0x6f3   :  { %v2214_v14 = vrot.slane %v2213_v8, 4  ;;  %v2208_v16 = vadd.f32 %v2207_v7, %v2206_v54  ;;  %v2151_v37 = vadd.f32 %v2150_v9, %v2149_v59  ;;  %v2145_v21 = vrot.slane %v2144_v3, 2 }
 0x6f5   :  { %v2215_v24 = vadd.f32 %v2214_v14, %v2213_v8  ;;  %v2209_v29 = vrot.slane %v2208_v16, 2  ;;  %v2152_v32 = vrot.slane %v2151_v37, 2  ;;  %v2146_v11 = vadd.f32 %v2145_v21, %v2144_v3 }
 0x6f7   :  { %v2216_v43 = vrot.slane %v2215_v24, 2  ;;  %v2210_v48 = vadd.f32 %v2209_v29, %v2208_v16  ;;  %v2153_v51 = vadd.f32 %v2152_v32, %v2151_v37  ;;  %v2147_v57 = vrot.slane %v2146_v11, 1 }
 0x6f9   :  { %v2217_v61 = vadd.f32 %v2216_v43, %v2215_v24  ;;  %v2211_v60 = vrot.slane %v2210_v48, 1  ;;  %v2154_v1 = vrot.slane %v2153_v51, 1  ;;  %v2148_v16 = vadd.f32 %v2147_v57, %v2146_v11 }
 0x6fb   :  { %v2218_v37 = vrot.slane %v2217_v61, 1  ;;  %v2212_v24 = vadd.f32 %v2211_v60, %v2210_v48  ;;  %v2155_v25 = vadd.f32 %v2154_v1, %v2153_v51  ;;  %v2236_v43 = vadd.f32 %v2234_v22, %v2148_v16 }
 0x6fc   :  { %v2263_v60 = vunpack.c.l.s4 %v8895_v10  ;;  %v9264_v16 = vsub.s32 1, %v9082_v58  ;;  %v4123_v10 = vld [vmem:[#allocation22 + $0x3688] sm:$0xff] }
 0x6fd   :  { %v2219_v46 = vadd.f32 %v2218_v37, %v2217_v61 }
 0x6fe   :  { %v2264_v1 = vunpack.c.0.s8 %v2263_v60  ;;  %v3610_v60 = vld [vmem:[#allocation22 + $0x2680] sm:$0xff] }
 0x72d   :  { %v2038_v36 = vpop.f32.mrf.mxu0  ;;  %v2109_v4 = vpop.f32.mrf.mxu1 }
 0x72e   :  { %v9244_v44 = vadd.f32 %v2109_v4, %v2038_v36  ;;  %v2240_v36 = vadd.f32 %v2198_v35, %v2184_v41  ;;  %v2235_v4 = vadd.f32 %v2141_v40, %v2127_v42  ;;  %v2254_v35 = vld [vmem:[#allocation19] sm:$0x3] }
 0x72f   :  { %v2040_v49 = vpop.f32.mrf.mxu0  ;;  %v2111_v50 = vpop.f32.mrf.mxu1 }
 0x730   :  { %v2156_v52 = vsel %vm354_vm3, %v9244_v44, 0.0  ;;  %v2176_v53 = vmul.f32 %v9244_v44, %v9244_v44  ;;  %v9250_v54 = vadd.f32 %v2111_v50, %v2040_v49  ;;  %v2241_v50 = vadd.f32 %v2205_v23, %v2191_v45 }
 0x731   :  { %v2157_v59 = vrot.slane %v2156_v52, 4 }
 0x732   :  { %v2220_v62 = vsel %vm354_vm3, %v2176_v53, 0.0  ;;  %v2163_v63 = vsel %vm354_vm3, %v9250_v54, 0.0  ;;  %v2177_v2 = vmul.f32 %v9250_v54, %v9250_v54  ;;  %v2237_v53 = vadd.f32 %v2235_v4, %v2155_v25 }
 0x733   :  { %v2158_v7 = vadd.f32 %v2157_v59, %v2156_v52  ;;  %v2221_v8 = vrot.slane %v2220_v62, 4  ;;  %v2164_v9 = vrot.slane %v2163_v63, 4  ;;  %v2242_v52 = vadd.f32 %v2240_v36, %v2212_v24 }
 0x734   :  { %v2227_v3 = vsel %vm354_vm3, %v2177_v2, 0.0  ;;  %v2243_v51 = vadd.f32 %v2241_v50, %v2219_v46 }
 0x735   :  { %v2159_v13 = vrot.slane %v2158_v7, 2  ;;  %v2222_v5 = vadd.f32 %v2221_v8, %v2220_v62  ;;  %v2165_v14 = vadd.f32 %v2164_v9, %v2163_v63  ;;  %v2228_v15 = vrot.slane %v2227_v3, 4 }
 0x737   :  { %v2160_v18 = vadd.f32 %v2159_v13, %v2158_v7  ;;  %v2223_v19 = vrot.slane %v2222_v5, 2  ;;  %v2166_v20 = vrot.slane %v2165_v14, 2  ;;  %v2229_v21 = vadd.f32 %v2228_v15, %v2227_v3 }
 0x738   :  { %v9259_v13 = vsub.s32 %v2264_v1, %v9082_v58  ;;  %v4122_v1 = vld [vmem:[#allocation22 + $0x3680] sm:$0xff] }
 0x739   :  { %v2161_v26 = vrot.slane %v2160_v18, 1  ;;  %v2224_v28 = vadd.f32 %v2223_v19, %v2222_v5  ;;  %v2167_v29 = vadd.f32 %v2166_v20, %v2165_v14  ;;  %v2230_v32 = vrot.slane %v2229_v21, 2 }
 0x73b   :  { %v2162_v34 = vadd.f32 %v2161_v26, %v2160_v18  ;;  %v2225_v12 = vrot.slane %v2224_v28, 1  ;;  %v2168_v11 = vrot.slane %v2167_v29, 1  ;;  %v2231_v49 = vadd.f32 %v2230_v32, %v2229_v21  ;;  %v2278_v26 = vld [vmem:[#allocation20] sm:$0x3] }
 0x73d   :  { %v2226_v55 = vadd.f32 %v2225_v12, %v2224_v28  ;;  %v2238_v33 = vadd.f32 %v2236_v43, %v2162_v34  ;;  %v2169_v47 = vadd.f32 %v2168_v11, %v2167_v29  ;;  %v2232_v48 = vrot.slane %v2231_v49, 1 }
 0x73f   :  { %v2244_v56 = vadd.f32 %v2242_v52, %v2226_v55  ;;  %v2246_v57 = vmul.f32 0.125, %v2238_v33  ;;  %v2233_v59 = vadd.f32 %v2232_v48, %v2231_v49  ;;  %v2239_v62 = vadd.f32 %v2237_v53, %v2169_v47 }
 0x741   :  { %v2248_v41 = vmul.f32 0.125, %v2244_v56  ;;  %v2250_v42 = vmul.f32 %v2246_v57, %v2246_v57  ;;  %v2245_v63 = vadd.f32 %v2243_v51, %v2233_v59  ;;  %v2247_v61 = vmul.f32 0.125, %v2239_v62 }
 0x743   :  { %v2252_v2 = vsub.f32 %v2248_v41, %v2250_v42  ;;  %v2249_v6 = vmul.f32 0.125, %v2245_v63  ;;  %v2251_v7 = vmul.f32 %v2247_v61, %v2247_v61  ;;  %v4154_v41 = vld [vmem:[#allocation22 + $0x3780] sm:$0xff]  ;;  %v3627_v42 = vld [vmem:[#allocation22 + $0x2708] sm:$0xff] }
 0x745   :  { %v2255_v8 = vadd.f32 1e-05, %v2252_v2  ;;  %v2253_v45 = vsub.f32 %v2249_v6, %v2251_v7  ;;  %v4139_v2 = vld [vmem:[#allocation22 + $0x3708] sm:$0xff]  ;;  %v3626_v6 = vld [vmem:[#allocation22 + $0x2700] sm:$0xff] }
 0x747   :  { %v2256_v9 = vadd.f32 1e-05, %v2253_v45  ;;  %8430 = vrsqrt.f32 %v2255_v8  ;;  %v4138_v8 = vld [vmem:[#allocation22 + $0x3700] sm:$0xff]  ;;  %v3611_v45 = vld [vmem:[#allocation22 + $0x2688] sm:$0xff] }
 0x749   :  { %8432 = vrsqrt.f32 %v2256_v9 }
 0x754   :  { %v8431_v3 = vpop.eup %8430 }
 0x756   :  { %v8433_v5 = vpop.eup %8432 }
 0x757   :  { %v2261_v14 = vcombine.low %v8431_v3, %v8433_v5  ;;  %v3595_v3 = vld [vmem:[#allocation22 + $0x2608] sm:$0xff] }
 0x758   :  { %v4107_v5 = vld [vmem:[#allocation22 + $0x3608] sm:$0xff] }
 0x759   :  { %v2268_v15 = vrot.slane %v2261_v14, %v9259_v13  ;;  %v3594_v14 = vld [vmem:[#allocation22 + $0x2600] sm:$0xff] }
 0x75b   :  { %v2275_v40 = vrot.slane %v2268_v15, %v9259_v13  ;;  %v4106_v15 = vld [vmem:[#allocation22 + $0x3600] sm:$0xff] }
 0x75d   :  { %v2277_v37 = vmul.f32 %v2275_v40, %v2254_v35  ;;  %v3579_v35 = vld [vmem:[#allocation22 + $0x2588] sm:$0xff] }
 0x75e   :  { %v4091_v40 = vld [vmem:[#allocation22 + $0x3588] sm:$0xff] }
 0x75f   :  { %v2283_v18 = vrot.slane %v2277_v37, %v9085_v0  ;;  %v2287_v19 = vrot.slane %v2277_v37, %v9264_v16  ;;  %v3578_v37 = vld [vmem:[#allocation22 + $0x2580] sm:$0xff] }
 0x761   :  { %v2290_v20 = vmul.f32 %v2283_v18, %v2246_v57  ;;  %v2291_v21 = vmul.f32 %v2287_v19, %v2247_v61  ;;  %v2325_v22 = vrot.slane %v2283_v18, %v9085_v0  ;;  %v2329_v29 = vrot.slane %v2287_v19, %v9085_v0  ;;  %v3642_v57 = vld [vmem:[#allocation22 + $0x2780] sm:$0xff]  ;;  %v3563_v19 = vld [vmem:[#allocation22 + $0x2508] sm:$0xff] }
 0x762   :  { %v4090_v18 = vld [vmem:[#allocation22 + $0x3580] sm:$0xff] }
 0x763   :  { %v2294_v23 = vcombine.low %v2290_v20, %v2291_v21  ;;  %v2336_v25 = vmul.f32 %v2325_v22, %v9244_v44  ;;  %v2331_v43 = vmul.f32 %v2329_v29, %v9204_v17  ;;  %v2333_v46 = vmul.f32 %v2329_v29, %v9218_v30  ;;  %v4075_v20 = vld [vmem:[#allocation22 + $0x3508] sm:$0xff]  ;;  %v3562_v21 = vld [vmem:[#allocation22 + $0x2500] sm:$0xff] }
 0x764   :  { %v2337_v34 = vmul.f32 %v2329_v29, %v9250_v54  ;;  %v2330_v11 = vmul.f32 %v2325_v22, %v9202_v38  ;;  %v2335_v49 = vmul.f32 %v2329_v29, %v9224_v39  ;;  %v2332_v50 = vmul.f32 %v2325_v22, %v9215_v27  ;;  %v4043_v29 = vld [vmem:[#allocation22 + $0x3408] sm:$0xff] }
 0x765   :  { %v2301_v24 = vrot.slane %v2294_v23, %v9259_v13  ;;  %v2334_v52 = vmul.f32 %v2325_v22, %v9220_v31  ;;  %v4074_v22 = vld [vmem:[#allocation22 + $0x3500] sm:$0xff]  ;;  %v3547_v23 = vld [vmem:[#allocation22 + $0x2488] sm:$0xff] }
 0x767   :  { %v2308_v28 = vrot.slane %v2301_v24, %v9259_v13  ;;  %v4059_v24 = vld [vmem:[#allocation22 + $0x3488] sm:$0xff] }
 0x769   :  { %v2310_v32 = vsub.f32 %v2278_v26, %v2308_v28  ;;  %v4058_v26 = vld [vmem:[#allocation22 + $0x3480] sm:$0xff]  ;;  %v3531_v28 = vld [vmem:[#allocation22 + $0x2408] sm:$0xff] }
 0x76b   :  { %v2315_v36 = vrot.slane %v2310_v32, %v9085_v0  ;;  %v2319_v4 = vrot.slane %v2310_v32, %v9264_v16  ;;  %v3530_v32 = vld [vmem:[#allocation22 + $0x2400] sm:$0xff] }
 0x76d   :  { %v2341_v12 = vrot.slane %v2315_v36, %v9085_v0  ;;  %v2345_v44 = vrot.slane %v2319_v4, %v9085_v0  ;;  %v4042_v36 = vld [vmem:[#allocation22 + $0x3400] sm:$0xff]  ;;  %v3515_v4 = vld [vmem:[#allocation22 + $0x2388] sm:$0xff] }
 0x76f   :  { %v2353_v53 = vadd.f32 %v2345_v44, %v2337_v34  ;;  %v2347_v55 = vadd.f32 %v2345_v44, %v2331_v43  ;;  %v2349_v33 = vadd.f32 %v2345_v44, %v2333_v46  ;;  %v2346_v17 = vadd.f32 %v2341_v12, %v2330_v11  ;;  %v4027_v43 = vld [vmem:[#allocation22 + $0x3388] sm:$0xff]  ;;  %v3514_v46 = vld [vmem:[#allocation22 + $0x2380] sm:$0xff] }
 0x770   :  { %v2348_v47 = vadd.f32 %v2341_v12, %v2332_v50  ;;  %v2351_v30 = vadd.f32 %v2345_v44, %v2335_v49  ;;  %v9284_v48 = vadd.f32 %v2341_v12, %v2334_v52  ;;  %v9286_v54 = vadd.f32 %v2341_v12, %v2336_v25  ;;  %v3546_v25 = vld [vmem:[#allocation22 + $0x2480] sm:$0xff]  ;;  %v3499_v12 = vld [vmem:[#allocation22 + $0x2308] sm:$0xff] }
 0x771   :  { %vm2355_vm14 = vcmp.ge.f32.partialorder %v2347_v55, 0.0  ;;  %v2363_v51 = vmul.f32 0.01, %v2347_v55  ;;  %vm2357_vm15 = vcmp.ge.f32.partialorder %v2349_v33, 0.0  ;;  %v2365_v38 = vmul.f32 0.01, %v2349_v33 }
 0x772   :  { %vm2354_vm0 = vcmp.ge.f32.partialorder %v2346_v17, 0.0  ;;  %v2362_v39 = vmul.f32 0.01, %v2346_v17  ;;  %v2369_v56 = vmul.f32 0.01, %v2353_v53  ;;  %vm2356_vm1 = vcmp.ge.f32.partialorder %v2348_v47, 0.0 }
 0x773   :  { %v9288_v27 = vsel %vm2355_vm14, %v2347_v55, %v2363_v51  ;;  %v2364_v31 = vmul.f32 0.01, %v2348_v47  ;;  %v9291_v59 = vsel %vm2357_vm15, %v2349_v33, %v2365_v38  ;;  %vm2359_vm2 = vcmp.ge.f32.partialorder %v2351_v30, 0.0  ;;  %v4026_v34 = vld [vmem:[#allocation22 + $0x3380] sm:$0xff]  ;;  %v4011_v44 = vld [vmem:[#allocation22 + $0x3308] sm:$0xff] }
 0x774   :  { %4490 = vmatprep.mubr.f32.mxu0 %v9288_v27  ;;  %v9293_v62 = vsel %vm2354_vm0, %v2346_v17, %v2362_v39  ;;  %v2367_v63 = vmul.f32 0.01, %v2351_v30  ;;  %vm2361_vm4 = vcmp.ge.f32.partialorder %v2353_v53, 0.0  ;;  %4561 = vmatprep.mubr.f32.mxu1 %v9291_v59  ;;  %v3498_v11 = vld [vmem:[#allocation22 + $0x2300] sm:$0xff]  ;;  %v3483_v50 = vld [vmem:[#allocation22 + $0x2288] sm:$0xff]  ;;  %vm2358_vm5 = vcmp.ge.f32.partialorder %v9284_v48, 0.0 }
 0x775   :  { %4491 = vmatmul.mubr.f32.vlgmr.msra.gmra.mxu0 %v9293_v62  ;;  %v9297_v61 = vsel %vm2356_vm1, %v2348_v47, %v2364_v31  ;;  %v9302_v9 = vsel %vm2361_vm4, %v2353_v53, %v2369_v56  ;;  %v4010_v49 = vld [vmem:[#allocation22 + $0x3300] sm:$0xff]  ;;  %v3995_v52 = vld [vmem:[#allocation22 + $0x3288] sm:$0xff]  ;;  %vm2360_vm6 = vcmp.ge.f32.partialorder %v9286_v54, 0.0 }
 0x776   :  { %4562 = vmatmul.mubr.f32.vlgmr.msra.gmra.mxu1 %v9297_v61  ;;  %4569 = vmatpush1.msra.mxu0 %v3642_v57  ;;  %v9300_v7 = vsel %vm2359_vm2, %v2351_v30, %v2367_v63  ;;  %v3482_v53 = vld [vmem:[#allocation22 + $0x2280] sm:$0xff]  ;;  %v3467_v33 = vld [vmem:[#allocation22 + $0x2208] sm:$0xff] }
 0x777   :  { %4640 = vmatpush1.msra.mxu1 %v4154_v41  ;;  %4570 = vmatprep.subr.mxu0 %v3627_v42  ;;  %v3994_v55 = vld [vmem:[#allocation22 + $0x3280] sm:$0xff]  ;;  %v3979_v17 = vld [vmem:[#allocation22 + $0x3208] sm:$0xff] }
 0x778   :  { %4632 = vmatprep.mubr.f32.mxu0 %v9300_v7  ;;  %4641 = vmatprep.subr.mxu1 %v4139_v2  ;;  %v3466_v47 = vld [vmem:[#allocation22 + $0x2200] sm:$0xff]  ;;  %v3451_v51 = vld [vmem:[#allocation22 + $0x2188] sm:$0xff] }
 0x779   :  { %4703 = vmatprep.mubr.f32.mxu1 %v9302_v9  ;;  %4571 = vmatpush1.msra.mxu0 %v3626_v6  ;;  %v3978_v30 = vld [vmem:[#allocation22 + $0x3200] sm:$0xff]  ;;  %v3963_v38 = vld [vmem:[#allocation22 + $0x3188] sm:$0xff] }
 0x77a   :  { %4642 = vmatpush1.msra.mxu1 %v4138_v8  ;;  %4572 = vmatprep.subr.mxu0 %v3611_v45  ;;  %v3450_v39 = vld [vmem:[#allocation22 + $0x2180] sm:$0xff]  ;;  %v3435_v31 = vld [vmem:[#allocation22 + $0x2108] sm:$0xff] }
 0x77b   :  { %4643 = vmatprep.subr.mxu1 %v4123_v10  ;;  %4573 = vmatpush1.msra.mxu0 %v3610_v60  ;;  %v3962_v56 = vld [vmem:[#allocation22 + $0x3180] sm:$0xff]  ;;  %v3947_v57 = vld [vmem:[#allocation22 + $0x3108] sm:$0xff] }
 0x77c   :  { %4644 = vmatpush1.msra.mxu1 %v4122_v1  ;;  %4574 = vmatprep.subr.mxu0 %v3595_v3  ;;  %v3434_v41 = vld [vmem:[#allocation22 + $0x2100] sm:$0xff]  ;;  %v3419_v63 = vld [vmem:[#allocation22 + $0x2088] sm:$0xff] }
 0x77d   :  { %4645 = vmatprep.subr.mxu1 %v4107_v5  ;;  %4575 = vmatpush1.msra.mxu0 %v3594_v14  ;;  %v3946_v42 = vld [vmem:[#allocation22 + $0x3100] sm:$0xff]  ;;  %v3931_v2 = vld [vmem:[#allocation22 + $0x3088] sm:$0xff] }
 0x77e   :  { %4646 = vmatpush1.msra.mxu1 %v4106_v15  ;;  %4576 = vmatprep.subr.mxu0 %v3579_v35  ;;  %v3418_v6 = vld [vmem:[#allocation22 + $0x2080] sm:$0xff]  ;;  %v3403_v45 = vld [vmem:[#allocation22 + $0x2008] sm:$0xff] }
 0x77f   :  { %4647 = vmatprep.subr.mxu1 %v4091_v40  ;;  %4577 = vmatpush1.msra.mxu0 %v3578_v37  ;;  %v3930_v8 = vld [vmem:[#allocation22 + $0x3080] sm:$0xff]  ;;  %v3915_v10 = vld [vmem:[#allocation22 + $0x3008] sm:$0xff] }
 0x780   :  { %4648 = vmatpush1.msra.mxu1 %v4090_v18  ;;  %4578 = vmatprep.subr.mxu0 %v3563_v19  ;;  %v3402_v60 = vld [vmem:[#allocation22 + $0x2000] sm:$0xff]  ;;  %v3899_v3 = vld [vmem:[#allocation22 + $0x2f88] sm:$0xff] }
 0x781   :  { %4649 = vmatprep.subr.mxu1 %v4075_v20  ;;  %4579 = vmatpush1.msra.mxu0 %v3562_v21  ;;  %v3914_v1 = vld [vmem:[#allocation22 + $0x3000] sm:$0xff]  ;;  %v4411_v5 = vld [vmem:[#allocation22 + $0x3f88] sm:$0xff] }
 0x782   :  { %4650 = vmatpush1.msra.mxu1 %v4074_v22  ;;  %4580 = vmatprep.subr.mxu0 %v3547_v23  ;;  %v3898_v14 = vld [vmem:[#allocation22 + $0x2f80] sm:$0xff]  ;;  %v3883_v35 = vld [vmem:[#allocation22 + $0x2f08] sm:$0xff] }
 0x783   :  { %4651 = vmatprep.subr.mxu1 %v4059_v24  ;;  %4581 = vmatpush1.msra.mxu0 %v3546_v25  ;;  %v4410_v15 = vld [vmem:[#allocation22 + $0x3f80] sm:$0xff]  ;;  %v4395_v40 = vld [vmem:[#allocation22 + $0x3f08] sm:$0xff] }
 0x784   :  { %4652 = vmatpush1.msra.mxu1 %v4058_v26  ;;  %4582 = vmatprep.subr.mxu0 %v3531_v28  ;;  %v3882_v37 = vld [vmem:[#allocation22 + $0x2f00] sm:$0xff]  ;;  %v3867_v19 = vld [vmem:[#allocation22 + $0x2e88] sm:$0xff] }
 0x785   :  { %4653 = vmatprep.subr.mxu1 %v4043_v29  ;;  %4583 = vmatpush1.msra.mxu0 %v3530_v32  ;;  %v4394_v18 = vld [vmem:[#allocation22 + $0x3f00] sm:$0xff]  ;;  %v4379_v20 = vld [vmem:[#allocation22 + $0x3e88] sm:$0xff] }
 0x786   :  { %4654 = vmatpush1.msra.mxu1 %v4042_v36  ;;  %4584 = vmatprep.subr.mxu0 %v3515_v4  ;;  %v3866_v21 = vld [vmem:[#allocation22 + $0x2e80] sm:$0xff]  ;;  %v3851_v23 = vld [vmem:[#allocation22 + $0x2e08] sm:$0xff] }
 0x787   :  { %4655 = vmatprep.subr.mxu1 %v4027_v43  ;;  %4585 = vmatpush1.msra.mxu0 %v3514_v46  ;;  %v4378_v22 = vld [vmem:[#allocation22 + $0x3e80] sm:$0xff]  ;;  %v4363_v24 = vld [vmem:[#allocation22 + $0x3e08] sm:$0xff] }
 0x788   :  { %4656 = vmatpush1.msra.mxu1 %v4026_v34  ;;  %4586 = vmatprep.subr.mxu0 %v3499_v12  ;;  %v3850_v25 = vld [vmem:[#allocation22 + $0x2e00] sm:$0xff]  ;;  %v3835_v28 = vld [vmem:[#allocation22 + $0x2d88] sm:$0xff] }
 0x789   :  { %4657 = vmatprep.subr.mxu1 %v4011_v44  ;;  %4587 = vmatpush1.msra.mxu0 %v3498_v11  ;;  %v4362_v26 = vld [vmem:[#allocation22 + $0x3e00] sm:$0xff]  ;;  %v4347_v29 = vld [vmem:[#allocation22 + $0x3d88] sm:$0xff] }
 0x78a   :  { %4658 = vmatpush1.msra.mxu1 %v4010_v49  ;;  %4588 = vmatprep.subr.mxu0 %v3483_v50  ;;  %v3834_v32 = vld [vmem:[#allocation22 + $0x2d80] sm:$0xff]  ;;  %v3819_v4 = vld [vmem:[#allocation22 + $0x2d08] sm:$0xff] }
 0x78b   :  { %4659 = vmatprep.subr.mxu1 %v3995_v52  ;;  %4589 = vmatpush1.msra.mxu0 %v3482_v53  ;;  %v4346_v36 = vld [vmem:[#allocation22 + $0x3d80] sm:$0xff]  ;;  %v4331_v43 = vld [vmem:[#allocation22 + $0x3d08] sm:$0xff] }
 0x78c   :  { %4660 = vmatpush1.msra.mxu1 %v3994_v55  ;;  %4590 = vmatprep.subr.mxu0 %v3467_v33  ;;  %v3818_v46 = vld [vmem:[#allocation22 + $0x2d00] sm:$0xff]  ;;  %v3803_v12 = vld [vmem:[#allocation22 + $0x2c88] sm:$0xff] }
 0x78d   :  { %4661 = vmatprep.subr.mxu1 %v3979_v17  ;;  %4591 = vmatpush1.msra.mxu0 %v3466_v47  ;;  %v4330_v34 = vld [vmem:[#allocation22 + $0x3d00] sm:$0xff]  ;;  %v4315_v44 = vld [vmem:[#allocation22 + $0x3c88] sm:$0xff] }
 0x78e   :  { %4662 = vmatpush1.msra.mxu1 %v3978_v30  ;;  %4592 = vmatprep.subr.mxu0 %v3451_v51  ;;  %v3802_v11 = vld [vmem:[#allocation22 + $0x2c80] sm:$0xff]  ;;  %v3787_v50 = vld [vmem:[#allocation22 + $0x2c08] sm:$0xff] }
 0x78f   :  { %4663 = vmatprep.subr.mxu1 %v3963_v38  ;;  %4593 = vmatpush1.msra.mxu0 %v3450_v39  ;;  %v4314_v49 = vld [vmem:[#allocation22 + $0x3c80] sm:$0xff]  ;;  %v4299_v52 = vld [vmem:[#allocation22 + $0x3c08] sm:$0xff] }
 0x790   :  { %4664 = vmatpush1.msra.mxu1 %v3962_v56  ;;  %4594 = vmatprep.subr.mxu0 %v3435_v31  ;;  %v3786_v53 = vld [vmem:[#allocation22 + $0x2c00] sm:$0xff]  ;;  %v3771_v33 = vld [vmem:[#allocation22 + $0x2b88] sm:$0xff] }
 0x791   :  { %4665 = vmatprep.subr.mxu1 %v3947_v57  ;;  %4595 = vmatpush1.msra.mxu0 %v3434_v41  ;;  %v4298_v55 = vld [vmem:[#allocation22 + $0x3c00] sm:$0xff]  ;;  %v4283_v17 = vld [vmem:[#allocation22 + $0x3b88] sm:$0xff] }
 0x792   :  { %4666 = vmatpush1.msra.mxu1 %v3946_v42  ;;  %4596 = vmatprep.subr.mxu0 %v3419_v63  ;;  %v3770_v47 = vld [vmem:[#allocation22 + $0x2b80] sm:$0xff]  ;;  %v3755_v51 = vld [vmem:[#allocation22 + $0x2b08] sm:$0xff] }
 0x793   :  { %4667 = vmatprep.subr.mxu1 %v3931_v2  ;;  %4597 = vmatpush1.msra.mxu0 %v3418_v6  ;;  %v4282_v30 = vld [vmem:[#allocation22 + $0x3b80] sm:$0xff]  ;;  %v4267_v38 = vld [vmem:[#allocation22 + $0x3b08] sm:$0xff] }
 0x794   :  { %4668 = vmatpush1.msra.mxu1 %v3930_v8  ;;  %4598 = vmatprep.subr.mxu0 %v3403_v45  ;;  %v3754_v39 = vld [vmem:[#allocation22 + $0x2b00] sm:$0xff]  ;;  %v3739_v31 = vld [vmem:[#allocation22 + $0x2a88] sm:$0xff] }
 0x795   :  { %4669 = vmatprep.subr.mxu1 %v3915_v10  ;;  %4599 = vmatpush1.msra.mxu0 %v3402_v60  ;;  %v4266_v56 = vld [vmem:[#allocation22 + $0x3b00] sm:$0xff]  ;;  %v4251_v57 = vld [vmem:[#allocation22 + $0x3a88] sm:$0xff] }
 0x796   :  { %4670 = vmatpush1.msra.mxu1 %v3914_v1  ;;  %4600 = vmatprep.subr.mxu0 %v3899_v3  ;;  %v3738_v41 = vld [vmem:[#allocation22 + $0x2a80] sm:$0xff]  ;;  %v3723_v63 = vld [vmem:[#allocation22 + $0x2a08] sm:$0xff] }
 0x797   :  { %4671 = vmatprep.subr.mxu1 %v4411_v5  ;;  %4601 = vmatpush2.msra.mxu0 %v3898_v14  ;;  %v4250_v42 = vld [vmem:[#allocation22 + $0x3a80] sm:$0xff]  ;;  %v4235_v2 = vld [vmem:[#allocation22 + $0x3a08] sm:$0xff] }
 0x798   :  { %4672 = vmatpush2.msra.mxu1 %v4410_v15  ;;  %4602 = vmatprep.subr.mxu0 %v3883_v35  ;;  %v3722_v6 = vld [vmem:[#allocation22 + $0x2a00] sm:$0xff]  ;;  %v3707_v45 = vld [vmem:[#allocation22 + $0x2988] sm:$0xff] }
 0x799   :  { %4673 = vmatprep.subr.mxu1 %v4395_v40  ;;  %4603 = vmatpush2.msra.mxu0 %v3882_v37  ;;  %v4234_v8 = vld [vmem:[#allocation22 + $0x3a00] sm:$0xff]  ;;  %v4219_v10 = vld [vmem:[#allocation22 + $0x3988] sm:$0xff] }
 0x79a   :  { %4674 = vmatpush2.msra.mxu1 %v4394_v18  ;;  %4604 = vmatprep.subr.mxu0 %v3867_v19  ;;  %v3706_v60 = vld [vmem:[#allocation22 + $0x2980] sm:$0xff]  ;;  %v3691_v3 = vld [vmem:[#allocation22 + $0x2908] sm:$0xff] }
 0x79b   :  { %4675 = vmatprep.subr.mxu1 %v4379_v20  ;;  %4605 = vmatpush2.msra.mxu0 %v3866_v21  ;;  %v4218_v1 = vld [vmem:[#allocation22 + $0x3980] sm:$0xff]  ;;  %v4203_v5 = vld [vmem:[#allocation22 + $0x3908] sm:$0xff]  ;;  %v2366_v20 = vmul.f32 0.01, %v9284_v48 }
 0x79c   :  { %4676 = vmatpush2.msra.mxu1 %v4378_v22  ;;  %4606 = vmatprep.subr.mxu0 %v3851_v23  ;;  %v3690_v14 = vld [vmem:[#allocation22 + $0x2900] sm:$0xff]  ;;  %v3675_v35 = vld [vmem:[#allocation22 + $0x2888] sm:$0xff]  ;;  %v2368_v23 = vmul.f32 0.01, %v9286_v54 }
 0x79d   :  { %4677 = vmatprep.subr.mxu1 %v4363_v24  ;;  %4607 = vmatpush2.msra.mxu0 %v3850_v25  ;;  %v4202_v15 = vld [vmem:[#allocation22 + $0x3900] sm:$0xff]  ;;  %v4187_v40 = vld [vmem:[#allocation22 + $0x3888] sm:$0xff]  ;;  %v2621_v25 = vld [vmem:[#allocation22 + $0x798] sm:$0xff] }
 0x79e   :  { %4678 = vmatpush2.msra.mxu1 %v4362_v26  ;;  %4608 = vmatprep.subr.mxu0 %v3835_v28  ;;  %v3674_v37 = vld [vmem:[#allocation22 + $0x2880] sm:$0xff]  ;;  %v3659_v19 = vld [vmem:[#allocation22 + $0x2808] sm:$0xff]  ;;  %v9311_v26 = vsel %vm2358_vm5, %v9284_v48, %v2366_v20  ;;  %v3133_v28 = vld [vmem:[#allocation22 + $0x1798] sm:$0xff] }
 0x79f   :  { %4679 = vmatprep.subr.mxu1 %v4347_v29  ;;  %4609 = vmatpush2.msra.mxu0 %v3834_v32  ;;  %v4186_v18 = vld [vmem:[#allocation22 + $0x3880] sm:$0xff]  ;;  %v4171_v21 = vld [vmem:[#allocation22 + $0x3808] sm:$0xff]  ;;  %v2620_v29 = vld [vmem:[#allocation22 + $0x790] sm:$0xff]  ;;  %v9315_v32 = vsel %vm2360_vm6, %v9286_v54, %v2368_v23 }
 0x7a0   :  { %4680 = vmatpush2.msra.mxu1 %v4346_v36  ;;  %4610 = vmatprep.subr.mxu0 %v3819_v4  ;;  %v3658_v22 = vld [vmem:[#allocation22 + $0x2800] sm:$0xff]  ;;  %v3132_v36 = vld [vmem:[#allocation22 + $0x1790] sm:$0xff]  ;;  %v2605_v4 = vld [vmem:[#allocation22 + $0x718] sm:$0xff] }
 0x7a1   :  { %4681 = vmatprep.subr.mxu1 %v4331_v43  ;;  %4611 = vmatpush2.msra.mxu0 %v3818_v46  ;;  %v4170_v24 = vld [vmem:[#allocation22 + $0x3800] sm:$0xff]  ;;  %v3117_v43 = vld [vmem:[#allocation22 + $0x1718] sm:$0xff]  ;;  %v2604_v46 = vld [vmem:[#allocation22 + $0x710] sm:$0xff] }
 0x7a2   :  { %4682 = vmatpush2.msra.mxu1 %v4330_v34  ;;  %4612 = vmatprep.subr.mxu0 %v3803_v12  ;;  %v3116_v48 = vld [vmem:[#allocation22 + $0x1710] sm:$0xff]  ;;  %v2589_v34 = vld [vmem:[#allocation22 + $0x698] sm:$0xff] }
 0x7a3   :  { %4683 = vmatprep.subr.mxu1 %v4315_v44  ;;  %4613 = vmatpush2.msra.mxu0 %v3802_v11  ;;  %v3101_v12 = vld [vmem:[#allocation22 + $0x1698] sm:$0xff]  ;;  %v2588_v54 = vld [vmem:[#allocation22 + $0x690] sm:$0xff] }
 0x7a4   :  { %4684 = vmatpush2.msra.mxu1 %v4314_v49  ;;  %4614 = vmatprep.subr.mxu0 %v3787_v50  ;;  %v3100_v44 = vld [vmem:[#allocation22 + $0x1690] sm:$0xff]  ;;  %v2573_v11 = vld [vmem:[#allocation22 + $0x618] sm:$0xff] }
 0x7a5   :  { %4685 = vmatprep.subr.mxu1 %v4299_v52  ;;  %4615 = vmatpush2.msra.mxu0 %v3786_v53  ;;  %v3085_v49 = vld [vmem:[#allocation22 + $0x1618] sm:$0xff]  ;;  %v2572_v50 = vld [vmem:[#allocation22 + $0x610] sm:$0xff] }
 0x7a6   :  { %4686 = vmatpush2.msra.mxu1 %v4298_v55  ;;  %4616 = vmatprep.subr.mxu0 %v3771_v33  ;;  %v3084_v52 = vld [vmem:[#allocation22 + $0x1610] sm:$0xff]  ;;  %v2557_v53 = vld [vmem:[#allocation22 + $0x598] sm:$0xff] }
 0x7a7   :  { %4687 = vmatprep.subr.mxu1 %v4283_v17  ;;  %4617 = vmatpush2.msra.mxu0 %v3770_v47  ;;  %v3069_v55 = vld [vmem:[#allocation22 + $0x1598] sm:$0xff]  ;;  %v2556_v33 = vld [vmem:[#allocation22 + $0x590] sm:$0xff] }
 0x7a8   :  { %4688 = vmatpush2.msra.mxu1 %v4282_v30  ;;  %4618 = vmatprep.subr.mxu0 %v3755_v51  ;;  %v3068_v17 = vld [vmem:[#allocation22 + $0x1590] sm:$0xff]  ;;  %v2541_v47 = vld [vmem:[#allocation22 + $0x518] sm:$0xff] }
 0x7a9   :  { %4689 = vmatprep.subr.mxu1 %v4267_v38  ;;  %4619 = vmatpush2.msra.mxu0 %v3754_v39  ;;  %v3053_v30 = vld [vmem:[#allocation22 + $0x1518] sm:$0xff]  ;;  %v2540_v51 = vld [vmem:[#allocation22 + $0x510] sm:$0xff] }
 0x7aa   :  { %4690 = vmatpush2.msra.mxu1 %v4266_v56  ;;  %4620 = vmatprep.subr.mxu0 %v3739_v31  ;;  %v3052_v38 = vld [vmem:[#allocation22 + $0x1510] sm:$0xff]  ;;  %v2525_v39 = vld [vmem:[#allocation22 + $0x498] sm:$0xff] }
 0x7ab   :  { %4691 = vmatprep.subr.mxu1 %v4251_v57  ;;  %4621 = vmatpush2.msra.mxu0 %v3738_v41  ;;  %v3037_v56 = vld [vmem:[#allocation22 + $0x1498] sm:$0xff]  ;;  %v2524_v31 = vld [vmem:[#allocation22 + $0x490] sm:$0xff] }
 0x7ac   :  { %4692 = vmatpush2.msra.mxu1 %v4250_v42  ;;  %4622 = vmatprep.subr.mxu0 %v3723_v63  ;;  %v3036_v57 = vld [vmem:[#allocation22 + $0x1490] sm:$0xff]  ;;  %v2509_v41 = vld [vmem:[#allocation22 + $0x418] sm:$0xff] }
 0x7ad   :  { %4693 = vmatprep.subr.mxu1 %v4235_v2  ;;  %4623 = vmatpush2.msra.mxu0 %v3722_v6  ;;  %v3021_v42 = vld [vmem:[#allocation22 + $0x1418] sm:$0xff]  ;;  %v2508_v63 = vld [vmem:[#allocation22 + $0x410] sm:$0xff] }
 0x7ae   :  { %4694 = vmatpush2.msra.mxu1 %v4234_v8  ;;  %4624 = vmatprep.subr.mxu0 %v3707_v45  ;;  %v3020_v2 = vld [vmem:[#allocation22 + $0x1410] sm:$0xff]  ;;  %v2493_v6 = vld [vmem:[#allocation22 + $0x398] sm:$0xff] }
 0x7af   :  { %4695 = vmatprep.subr.mxu1 %v4219_v10  ;;  %4625 = vmatpush2.msra.mxu0 %v3706_v60  ;;  %v3005_v8 = vld [vmem:[#allocation22 + $0x1398] sm:$0xff]  ;;  %v2492_v45 = vld [vmem:[#allocation22 + $0x390] sm:$0xff] }
 0x7b0   :  { %4696 = vmatpush2.msra.mxu1 %v4218_v1  ;;  %4626 = vmatprep.subr.mxu0 %v3691_v3  ;;  %v3004_v10 = vld [vmem:[#allocation22 + $0x1390] sm:$0xff]  ;;  %v2477_v60 = vld [vmem:[#allocation22 + $0x318] sm:$0xff] }
 0x7b1   :  { %4697 = vmatprep.subr.mxu1 %v4203_v5  ;;  %4627 = vmatpush2.msra.mxu0 %v3690_v14  ;;  %v2989_v1 = vld [vmem:[#allocation22 + $0x1318] sm:$0xff]  ;;  %v2476_v3 = vld [vmem:[#allocation22 + $0x310] sm:$0xff] }
 0x7b2   :  { %4698 = vmatpush2.msra.mxu1 %v4202_v15  ;;  %4628 = vmatprep.subr.mxu0 %v3675_v35  ;;  %v2988_v5 = vld [vmem:[#allocation22 + $0x1310] sm:$0xff]  ;;  %v2461_v14 = vld [vmem:[#allocation22 + $0x298] sm:$0xff] }
 0x7b3   :  { %4699 = vmatprep.subr.mxu1 %v4187_v40  ;;  %4629 = vmatpush2.msra.mxu0 %v3674_v37  ;;  %v2973_v15 = vld [vmem:[#allocation22 + $0x1298] sm:$0xff]  ;;  %v2460_v35 = vld [vmem:[#allocation22 + $0x290] sm:$0xff] }
 0x7b4   :  { %4700 = vmatpush2.msra.mxu1 %v4186_v18  ;;  %4630 = vmatprep.subr.mxu0 %v3659_v19  ;;  %v2972_v40 = vld [vmem:[#allocation22 + $0x1290] sm:$0xff]  ;;  %v2445_v37 = vld [vmem:[#allocation22 + $0x218] sm:$0xff] }
 0x7b5   :  { %4701 = vmatprep.subr.mxu1 %v4171_v21  ;;  %4631 = vmatpush2.msra.mxu0 %v3658_v22  ;;  %v2957_v18 = vld [vmem:[#allocation22 + $0x1218] sm:$0xff]  ;;  %v2444_v19 = vld [vmem:[#allocation22 + $0x210] sm:$0xff] }
 0x7b6   :  { %4702 = vmatpush2.msra.mxu1 %v4170_v24  ;;  %4633 = vmatmul.mubr.f32.vlgmr.msra.gmra.mxu0 %v9311_v26  ;;  %v2956_v20 = vld [vmem:[#allocation22 + $0x1210] sm:$0xff]  ;;  %v2429_v21 = vld [vmem:[#allocation22 + $0x198] sm:$0xff] }
 0x7b7   :  { %4704 = vmatmul.mubr.f32.vlgmr.msra.gmra.mxu1 %v9315_v32  ;;  %4710 = vmatprep.subr.mxu0 %v2621_v25  ;;  %v2941_v22 = vld [vmem:[#allocation22 + $0x1198] sm:$0xff]  ;;  %v2428_v23 = vld [vmem:[#allocation22 + $0x190] sm:$0xff] }
 0x7b8   :  { %4781 = vmatprep.subr.mxu1 %v3133_v28  ;;  %4711 = vmatpush1.msra.mxu0 %v2620_v29  ;;  %v2940_v24 = vld [vmem:[#allocation22 + $0x1190] sm:$0xff]  ;;  %v2413_v25 = vld [vmem:[#allocation22 + $0x118] sm:$0xff] }
 0x7b9   :  { %4774 = vmatprep.mubr.f32.mxu0 %v9288_v27  ;;  %4782 = vmatpush1.msra.mxu1 %v3132_v36  ;;  %v2925_v28 = vld [vmem:[#allocation22 + $0x1118] sm:$0xff]  ;;  %v2412_v29 = vld [vmem:[#allocation22 + $0x110] sm:$0xff] }
 0x7ba   :  { %4845 = vmatprep.mubr.f32.mxu1 %v9291_v59  ;;  %4712 = vmatprep.subr.mxu0 %v2605_v4  ;;  %v2924_v36 = vld [vmem:[#allocation22 + $0x1110] sm:$0xff]  ;;  %v2397_v4 = vld [vmem:[#allocation22 + $0x98] sm:$0xff] }
 0x7bb   :  { %4783 = vmatprep.subr.mxu1 %v3117_v43  ;;  %4713 = vmatpush1.msra.mxu0 %v2604_v46  ;;  %v2909_v43 = vld [vmem:[#allocation22 + $0x1098] sm:$0xff]  ;;  %v2396_v46 = vld [vmem:[#allocation22 + $0x90] sm:$0xff] }
 0x7bc   :  { %4784 = vmatpush1.msra.mxu1 %v3116_v48  ;;  %4714 = vmatprep.subr.mxu0 %v2589_v34  ;;  %v2908_v48 = vld [vmem:[#allocation22 + $0x1090] sm:$0xff]  ;;  %v2381_v34 = vld [vmem:[#allocation22 + $0x18] sm:$0xff] }
 0x7bd   :  { %4785 = vmatprep.subr.mxu1 %v3101_v12  ;;  %4715 = vmatpush1.msra.mxu0 %v2588_v54  ;;  %v2893_v12 = vld [vmem:[#allocation22 + $0x1018] sm:$0xff]  ;;  %v2380_v54 = vld [vmem:[#allocation22 + $0x10] sm:$0xff] }
 0x7be   :  { %4786 = vmatpush1.msra.mxu1 %v3100_v44  ;;  %4716 = vmatprep.subr.mxu0 %v2573_v11  ;;  %v2892_v44 = vld [vmem:[#allocation22 + $0x1010] sm:$0xff]  ;;  %v2877_v11 = vld [vmem:[#allocation22 + $0xf98] sm:$0xff] }
 0x7bf   :  { %4787 = vmatprep.subr.mxu1 %v3085_v49  ;;  %4717 = vmatpush1.msra.mxu0 %v2572_v50  ;;  %v3389_v49 = vld [vmem:[#allocation22 + $0x1f98] sm:$0xff]  ;;  %v2876_v50 = vld [vmem:[#allocation22 + $0xf90] sm:$0xff] }
 0x7c0   :  { %4788 = vmatpush1.msra.mxu1 %v3084_v52  ;;  %4718 = vmatprep.subr.mxu0 %v2557_v53  ;;  %v3388_v52 = vld [vmem:[#allocation22 + $0x1f90] sm:$0xff]  ;;  %v2861_v53 = vld [vmem:[#allocation22 + $0xf18] sm:$0xff] }
 0x7c1   :  { %4789 = vmatprep.subr.mxu1 %v3069_v55  ;;  %4719 = vmatpush1.msra.mxu0 %v2556_v33  ;;  %v3373_v55 = vld [vmem:[#allocation22 + $0x1f18] sm:$0xff]  ;;  %v2860_v33 = vld [vmem:[#allocation22 + $0xf10] sm:$0xff] }
 0x7c2   :  { %4790 = vmatpush1.msra.mxu1 %v3068_v17  ;;  %4720 = vmatprep.subr.mxu0 %v2541_v47  ;;  %v3372_v17 = vld [vmem:[#allocation22 + $0x1f10] sm:$0xff]  ;;  %v2845_v47 = vld [vmem:[#allocation22 + $0xe98] sm:$0xff] }
 0x7c3   :  { %4791 = vmatprep.subr.mxu1 %v3053_v30  ;;  %4721 = vmatpush1.msra.mxu0 %v2540_v51  ;;  %v3357_v30 = vld [vmem:[#allocation22 + $0x1e98] sm:$0xff]  ;;  %v2844_v51 = vld [vmem:[#allocation22 + $0xe90] sm:$0xff] }
 0x7c4   :  { %4792 = vmatpush1.msra.mxu1 %v3052_v38  ;;  %4722 = vmatprep.subr.mxu0 %v2525_v39  ;;  %v3356_v38 = vld [vmem:[#allocation22 + $0x1e90] sm:$0xff]  ;;  %v2829_v39 = vld [vmem:[#allocation22 + $0xe18] sm:$0xff] }
 0x7c5   :  { %4793 = vmatprep.subr.mxu1 %v3037_v56  ;;  %4723 = vmatpush1.msra.mxu0 %v2524_v31  ;;  %v3341_v56 = vld [vmem:[#allocation22 + $0x1e18] sm:$0xff]  ;;  %v2828_v31 = vld [vmem:[#allocation22 + $0xe10] sm:$0xff] }
 0x7c6   :  { %4794 = vmatpush1.msra.mxu1 %v3036_v57  ;;  %4724 = vmatprep.subr.mxu0 %v2509_v41  ;;  %v3340_v57 = vld [vmem:[#allocation22 + $0x1e10] sm:$0xff]  ;;  %v2813_v41 = vld [vmem:[#allocation22 + $0xd98] sm:$0xff] }
 0x7c7   :  { %4795 = vmatprep.subr.mxu1 %v3021_v42  ;;  %4725 = vmatpush1.msra.mxu0 %v2508_v63  ;;  %v3325_v42 = vld [vmem:[#allocation22 + $0x1d98] sm:$0xff]  ;;  %v2812_v63 = vld [vmem:[#allocation22 + $0xd90] sm:$0xff] }
 0x7c8   :  { %4796 = vmatpush1.msra.mxu1 %v3020_v2  ;;  %4726 = vmatprep.subr.mxu0 %v2493_v6  ;;  %v3324_v2 = vld [vmem:[#allocation22 + $0x1d90] sm:$0xff]  ;;  %v2797_v6 = vld [vmem:[#allocation22 + $0xd18] sm:$0xff] }
 0x7c9   :  { %4797 = vmatprep.subr.mxu1 %v3005_v8  ;;  %4727 = vmatpush1.msra.mxu0 %v2492_v45  ;;  %v3309_v8 = vld [vmem:[#allocation22 + $0x1d18] sm:$0xff]  ;;  %v2796_v45 = vld [vmem:[#allocation22 + $0xd10] sm:$0xff] }
 0x7ca   :  { %4798 = vmatpush1.msra.mxu1 %v3004_v10  ;;  %4728 = vmatprep.subr.mxu0 %v2477_v60  ;;  %v3308_v10 = vld [vmem:[#allocation22 + $0x1d10] sm:$0xff]  ;;  %v2781_v60 = vld [vmem:[#allocation22 + $0xc98] sm:$0xff] }
 0x7cb   :  { %4799 = vmatprep.subr.mxu1 %v2989_v1  ;;  %4729 = vmatpush1.msra.mxu0 %v2476_v3  ;;  %v3293_v1 = vld [vmem:[#allocation22 + $0x1c98] sm:$0xff]  ;;  %v2780_v3 = vld [vmem:[#allocation22 + $0xc90] sm:$0xff] }
 0x7cc   :  { %4800 = vmatpush1.msra.mxu1 %v2988_v5  ;;  %4730 = vmatprep.subr.mxu0 %v2461_v14  ;;  %v3292_v5 = vld [vmem:[#allocation22 + $0x1c90] sm:$0xff]  ;;  %v2765_v14 = vld [vmem:[#allocation22 + $0xc18] sm:$0xff] }
 0x7cd   :  { %4801 = vmatprep.subr.mxu1 %v2973_v15  ;;  %4731 = vmatpush1.msra.mxu0 %v2460_v35  ;;  %v3277_v15 = vld [vmem:[#allocation22 + $0x1c18] sm:$0xff]  ;;  %v2764_v35 = vld [vmem:[#allocation22 + $0xc10] sm:$0xff] }
 0x7ce   :  { %4802 = vmatpush1.msra.mxu1 %v2972_v40  ;;  %4732 = vmatprep.subr.mxu0 %v2445_v37  ;;  %v3276_v40 = vld [vmem:[#allocation22 + $0x1c10] sm:$0xff]  ;;  %v2749_v37 = vld [vmem:[#allocation22 + $0xb98] sm:$0xff] }
 0x7cf   :  { %4803 = vmatprep.subr.mxu1 %v2957_v18  ;;  %4733 = vmatpush1.msra.mxu0 %v2444_v19  ;;  %v3261_v18 = vld [vmem:[#allocation22 + $0x1b98] sm:$0xff]  ;;  %v2748_v19 = vld [vmem:[#allocation22 + $0xb90] sm:$0xff] }
 0x7d0   :  { %4804 = vmatpush1.msra.mxu1 %v2956_v20  ;;  %4734 = vmatprep.subr.mxu0 %v2429_v21  ;;  %v3260_v20 = vld [vmem:[#allocation22 + $0x1b90] sm:$0xff]  ;;  %v2733_v21 = vld [vmem:[#allocation22 + $0xb18] sm:$0xff] }
 0x7d1   :  { %4805 = vmatprep.subr.mxu1 %v2941_v22  ;;  %4735 = vmatpush1.msra.mxu0 %v2428_v23  ;;  %v3245_v22 = vld [vmem:[#allocation22 + $0x1b18] sm:$0xff]  ;;  %v2732_v23 = vld [vmem:[#allocation22 + $0xb10] sm:$0xff] }
 0x7d2   :  { %4806 = vmatpush1.msra.mxu1 %v2940_v24  ;;  %4736 = vmatprep.subr.mxu0 %v2413_v25  ;;  %v3244_v24 = vld [vmem:[#allocation22 + $0x1b10] sm:$0xff]  ;;  %v2717_v25 = vld [vmem:[#allocation22 + $0xa98] sm:$0xff] }
 0x7d3   :  { %4807 = vmatprep.subr.mxu1 %v2925_v28  ;;  %4737 = vmatpush1.msra.mxu0 %v2412_v29  ;;  %v3229_v28 = vld [vmem:[#allocation22 + $0x1a98] sm:$0xff]  ;;  %v2716_v29 = vld [vmem:[#allocation22 + $0xa90] sm:$0xff] }
 0x7d4   :  { %4808 = vmatpush1.msra.mxu1 %v2924_v36  ;;  %4738 = vmatprep.subr.mxu0 %v2397_v4  ;;  %v3228_v36 = vld [vmem:[#allocation22 + $0x1a90] sm:$0xff]  ;;  %v2701_v4 = vld [vmem:[#allocation22 + $0xa18] sm:$0xff] }
 0x7d5   :  { %4809 = vmatprep.subr.mxu1 %v2909_v43  ;;  %4739 = vmatpush1.msra.mxu0 %v2396_v46  ;;  %v3213_v43 = vld [vmem:[#allocation22 + $0x1a18] sm:$0xff]  ;;  %v2700_v46 = vld [vmem:[#allocation22 + $0xa10] sm:$0xff] }
 0x7d6   :  { %4810 = vmatpush1.msra.mxu1 %v2908_v48  ;;  %4740 = vmatprep.subr.mxu0 %v2381_v34  ;;  %v3212_v48 = vld [vmem:[#allocation22 + $0x1a10] sm:$0xff]  ;;  %v2685_v34 = vld [vmem:[#allocation22 + $0x998] sm:$0xff] }
 0x7d7   :  { %4811 = vmatprep.subr.mxu1 %v2893_v12  ;;  %4741 = vmatpush1.msra.mxu0 %v2380_v54  ;;  %v3197_v12 = vld [vmem:[#allocation22 + $0x1998] sm:$0xff]  ;;  %v2684_v54 = vld [vmem:[#allocation22 + $0x990] sm:$0xff] }
 0x7d8   :  { %4812 = vmatpush1.msra.mxu1 %v2892_v44  ;;  %4742 = vmatprep.subr.mxu0 %v2877_v11  ;;  %v3196_v44 = vld [vmem:[#allocation22 + $0x1990] sm:$0xff]  ;;  %v2669_v11 = vld [vmem:[#allocation22 + $0x918] sm:$0xff] }
 0x7d9   :  { %4813 = vmatprep.subr.mxu1 %v3389_v49  ;;  %4743 = vmatpush2.msra.mxu0 %v2876_v50  ;;  %v3181_v49 = vld [vmem:[#allocation22 + $0x1918] sm:$0xff]  ;;  %v2668_v50 = vld [vmem:[#allocation22 + $0x910] sm:$0xff] }
 0x7da   :  { %4814 = vmatpush2.msra.mxu1 %v3388_v52  ;;  %4744 = vmatprep.subr.mxu0 %v2861_v53  ;;  %v3180_v52 = vld [vmem:[#allocation22 + $0x1910] sm:$0xff]  ;;  %v2653_v53 = vld [vmem:[#allocation22 + $0x898] sm:$0xff] }
 0x7db   :  { %4815 = vmatprep.subr.mxu1 %v3373_v55  ;;  %4745 = vmatpush2.msra.mxu0 %v2860_v33  ;;  %v3165_v55 = vld [vmem:[#allocation22 + $0x1898] sm:$0xff]  ;;  %v2652_v33 = vld [vmem:[#allocation22 + $0x890] sm:$0xff] }
 0x7dc   :  { %4816 = vmatpush2.msra.mxu1 %v3372_v17  ;;  %4746 = vmatprep.subr.mxu0 %v2845_v47  ;;  %v3164_v17 = vld [vmem:[#allocation22 + $0x1890] sm:$0xff]  ;;  %v2637_v47 = vld [vmem:[#allocation22 + $0x818] sm:$0xff] }
 0x7dd   :  { %4817 = vmatprep.subr.mxu1 %v3357_v30  ;;  %4747 = vmatpush2.msra.mxu0 %v2844_v51  ;;  %v3149_v30 = vld [vmem:[#allocation22 + $0x1818] sm:$0xff]  ;;  %v2636_v51 = vld [vmem:[#allocation22 + $0x810] sm:$0xff] }
 0x7de   :  { %4818 = vmatpush2.msra.mxu1 %v3356_v38  ;;  %4748 = vmatprep.subr.mxu0 %v2829_v39  ;;  %v3148_v38 = vld [vmem:[#allocation22 + $0x1810] sm:$0xff]  ;;  %v3645_v39 = vld [vmem:[#allocation22 + $0x2798] sm:$0xff] }
 0x7df   :  { %4819 = vmatprep.subr.mxu1 %v3341_v56  ;;  %4749 = vmatpush2.msra.mxu0 %v2828_v31  ;;  %v4157_v56 = vld [vmem:[#allocation22 + $0x3798] sm:$0xff]  ;;  %v3644_v31 = vld [vmem:[#allocation22 + $0x2790] sm:$0xff] }
 0x7e0   :  { %4820 = vmatpush2.msra.mxu1 %v3340_v57  ;;  %4750 = vmatprep.subr.mxu0 %v2813_v41  ;;  %v4156_v57 = vld [vmem:[#allocation22 + $0x3790] sm:$0xff]  ;;  %v3629_v41 = vld [vmem:[#allocation22 + $0x2718] sm:$0xff] }
 0x7e1   :  { %4821 = vmatprep.subr.mxu1 %v3325_v42  ;;  %4751 = vmatpush2.msra.mxu0 %v2812_v63  ;;  %v4141_v42 = vld [vmem:[#allocation22 + $0x3718] sm:$0xff]  ;;  %v3628_v63 = vld [vmem:[#allocation22 + $0x2710] sm:$0xff] }
 0x7e2   :  { %4822 = vmatpush2.msra.mxu1 %v3324_v2  ;;  %4752 = vmatprep.subr.mxu0 %v2797_v6  ;;  %v4140_v2 = vld [vmem:[#allocation22 + $0x3710] sm:$0xff]  ;;  %v3613_v6 = vld [vmem:[#allocation22 + $0x2698] sm:$0xff] }
 0x7e3   :  { %4823 = vmatprep.subr.mxu1 %v3309_v8  ;;  %4753 = vmatpush2.msra.mxu0 %v2796_v45  ;;  %v4125_v8 = vld [vmem:[#allocation22 + $0x3698] sm:$0xff]  ;;  %v3612_v45 = vld [vmem:[#allocation22 + $0x2690] sm:$0xff] }
 0x7e4   :  { %4824 = vmatpush2.msra.mxu1 %v3308_v10  ;;  %4754 = vmatprep.subr.mxu0 %v2781_v60  ;;  %v4124_v10 = vld [vmem:[#allocation22 + $0x3690] sm:$0xff]  ;;  %v3597_v60 = vld [vmem:[#allocation22 + $0x2618] sm:$0xff] }
 0x7e5   :  { %4825 = vmatprep.subr.mxu1 %v3293_v1  ;;  %4755 = vmatpush2.msra.mxu0 %v2780_v3  ;;  %v4109_v1 = vld [vmem:[#allocation22 + $0x3618] sm:$0xff]  ;;  %v3596_v3 = vld [vmem:[#allocation22 + $0x2610] sm:$0xff] }
 0x7e6   :  { %4826 = vmatpush2.msra.mxu1 %v3292_v5  ;;  %4756 = vmatprep.subr.mxu0 %v2765_v14  ;;  %v4108_v5 = vld [vmem:[#allocation22 + $0x3610] sm:$0xff]  ;;  %v3581_v14 = vld [vmem:[#allocation22 + $0x2598] sm:$0xff] }
 0x7e7   :  { %4827 = vmatprep.subr.mxu1 %v3277_v15  ;;  %4757 = vmatpush2.msra.mxu0 %v2764_v35  ;;  %v4093_v15 = vld [vmem:[#allocation22 + $0x3598] sm:$0xff]  ;;  %v3580_v35 = vld [vmem:[#allocation22 + $0x2590] sm:$0xff] }
 0x7e8   :  { %4828 = vmatpush2.msra.mxu1 %v3276_v40  ;;  %4758 = vmatprep.subr.mxu0 %v2749_v37  ;;  %v4092_v40 = vld [vmem:[#allocation22 + $0x3590] sm:$0xff]  ;;  %v3565_v37 = vld [vmem:[#allocation22 + $0x2518] sm:$0xff] }
 0x7e9   :  { %4829 = vmatprep.subr.mxu1 %v3261_v18  ;;  %4759 = vmatpush2.msra.mxu0 %v2748_v19  ;;  %v4077_v18 = vld [vmem:[#allocation22 + $0x3518] sm:$0xff]  ;;  %v3564_v19 = vld [vmem:[#allocation22 + $0x2510] sm:$0xff] }
 0x7ea   :  { %4830 = vmatpush2.msra.mxu1 %v3260_v20  ;;  %4760 = vmatprep.subr.mxu0 %v2733_v21  ;;  %v4076_v20 = vld [vmem:[#allocation22 + $0x3510] sm:$0xff]  ;;  %v3549_v21 = vld [vmem:[#allocation22 + $0x2498] sm:$0xff] }
 0x7eb   :  { %4831 = vmatprep.subr.mxu1 %v3245_v22  ;;  %4761 = vmatpush2.msra.mxu0 %v2732_v23  ;;  %v4061_v22 = vld [vmem:[#allocation22 + $0x3498] sm:$0xff]  ;;  %v3548_v23 = vld [vmem:[#allocation22 + $0x2490] sm:$0xff] }
 0x7ec   :  { %4832 = vmatpush2.msra.mxu1 %v3244_v24  ;;  %4762 = vmatprep.subr.mxu0 %v2717_v25  ;;  %v4060_v24 = vld [vmem:[#allocation22 + $0x3490] sm:$0xff]  ;;  %v3533_v25 = vld [vmem:[#allocation22 + $0x2418] sm:$0xff] }
 0x7ed   :  { %4833 = vmatprep.subr.mxu1 %v3229_v28  ;;  %4763 = vmatpush2.msra.mxu0 %v2716_v29  ;;  %v4045_v28 = vld [vmem:[#allocation22 + $0x3418] sm:$0xff]  ;;  %v3532_v29 = vld [vmem:[#allocation22 + $0x2410] sm:$0xff] }
 0x7ee   :  { %4834 = vmatpush2.msra.mxu1 %v3228_v36  ;;  %4764 = vmatprep.subr.mxu0 %v2701_v4  ;;  %v4044_v36 = vld [vmem:[#allocation22 + $0x3410] sm:$0xff]  ;;  %v3517_v4 = vld [vmem:[#allocation22 + $0x2398] sm:$0xff] }
 0x7ef   :  { %4835 = vmatprep.subr.mxu1 %v3213_v43  ;;  %4765 = vmatpush2.msra.mxu0 %v2700_v46  ;;  %v4029_v43 = vld [vmem:[#allocation22 + $0x3398] sm:$0xff]  ;;  %v3516_v46 = vld [vmem:[#allocation22 + $0x2390] sm:$0xff] }
 0x7f0   :  { %4836 = vmatpush2.msra.mxu1 %v3212_v48  ;;  %4766 = vmatprep.subr.mxu0 %v2685_v34  ;;  %v4028_v48 = vld [vmem:[#allocation22 + $0x3390] sm:$0xff]  ;;  %v3501_v34 = vld [vmem:[#allocation22 + $0x2318] sm:$0xff] }
 0x7f1   :  { %4837 = vmatprep.subr.mxu1 %v3197_v12  ;;  %4767 = vmatpush2.msra.mxu0 %v2684_v54  ;;  %v4013_v12 = vld [vmem:[#allocation22 + $0x3318] sm:$0xff]  ;;  %v3500_v54 = vld [vmem:[#allocation22 + $0x2310] sm:$0xff] }
 0x7f2   :  { %4838 = vmatpush2.msra.mxu1 %v3196_v44  ;;  %4768 = vmatprep.subr.mxu0 %v2669_v11  ;;  %v4012_v44 = vld [vmem:[#allocation22 + $0x3310] sm:$0xff]  ;;  %v3485_v11 = vld [vmem:[#allocation22 + $0x2298] sm:$0xff] }
 0x7f3   :  { %4839 = vmatprep.subr.mxu1 %v3181_v49  ;;  %4769 = vmatpush2.msra.mxu0 %v2668_v50  ;;  %v3997_v49 = vld [vmem:[#allocation22 + $0x3298] sm:$0xff]  ;;  %v3484_v50 = vld [vmem:[#allocation22 + $0x2290] sm:$0xff] }
 0x7f4   :  { %4840 = vmatpush2.msra.mxu1 %v3180_v52  ;;  %4770 = vmatprep.subr.mxu0 %v2653_v53  ;;  %v3996_v52 = vld [vmem:[#allocation22 + $0x3290] sm:$0xff]  ;;  %v3469_v53 = vld [vmem:[#allocation22 + $0x2218] sm:$0xff] }
 0x7f5   :  { %4841 = vmatprep.subr.mxu1 %v3165_v55  ;;  %4771 = vmatpush2.msra.mxu0 %v2652_v33  ;;  %v3981_v55 = vld [vmem:[#allocation22 + $0x3218] sm:$0xff]  ;;  %v3468_v33 = vld [vmem:[#allocation22 + $0x2210] sm:$0xff] }
 0x7f6   :  { %4842 = vmatpush2.msra.mxu1 %v3164_v17  ;;  %4772 = vmatprep.subr.mxu0 %v2637_v47  ;;  %v3980_v17 = vld [vmem:[#allocation22 + $0x3210] sm:$0xff]  ;;  %v3453_v47 = vld [vmem:[#allocation22 + $0x2198] sm:$0xff] }
 0x7f7   :  { %4843 = vmatprep.subr.mxu1 %v3149_v30  ;;  %4773 = vmatpush2.msra.mxu0 %v2636_v51  ;;  %v3965_v30 = vld [vmem:[#allocation22 + $0x3198] sm:$0xff]  ;;  %v3452_v51 = vld [vmem:[#allocation22 + $0x2190] sm:$0xff] }
 0x7f8   :  { %4844 = vmatpush2.msra.mxu1 %v3148_v38  ;;  %4775 = vmatmul.mubr.f32.vlgmr.msra.gmra.mxu0 %v9293_v62  ;;  %v3964_v38 = vld [vmem:[#allocation22 + $0x3190] sm:$0xff] }
 0x7f9   :  { %4846 = vmatmul.mubr.f32.vlgmr.msra.gmra.mxu1 %v9297_v61  ;;  %4852 = vmatprep.subr.mxu0 %v3645_v39  ;;  %v3437_v39 = vld [vmem:[#allocation22 + $0x2118] sm:$0xff] }
 0x7fa   :  { %4923 = vmatprep.subr.mxu1 %v4157_v56  ;;  %4853 = vmatpush1.msra.mxu0 %v3644_v31  ;;  %v3949_v56 = vld [vmem:[#allocation22 + $0x3118] sm:$0xff]  ;;  %v3436_v31 = vld [vmem:[#allocation22 + $0x2110] sm:$0xff] }
 0x7fb   :  { %4916 = vmatprep.mubr.f32.mxu0 %v9300_v7  ;;  %4924 = vmatpush1.msra.mxu1 %v4156_v57  ;;  %v3948_v57 = vld [vmem:[#allocation22 + $0x3110] sm:$0xff] }
 0x7fc   :  { %4987 = vmatprep.mubr.f32.mxu1 %v9302_v9  ;;  %4854 = vmatprep.subr.mxu0 %v3629_v41  ;;  %v3421_v41 = vld [vmem:[#allocation22 + $0x2098] sm:$0xff] }
 0x7fd   :  { %4925 = vmatprep.subr.mxu1 %v4141_v42  ;;  %4855 = vmatpush1.msra.mxu0 %v3628_v63  ;;  %v3933_v42 = vld [vmem:[#allocation22 + $0x3098] sm:$0xff]  ;;  %v3420_v63 = vld [vmem:[#allocation22 + $0x2090] sm:$0xff] }
 0x7fe   :  { %4926 = vmatpush1.msra.mxu1 %v4140_v2  ;;  %4856 = vmatprep.subr.mxu0 %v3613_v6  ;;  %v3932_v2 = vld [vmem:[#allocation22 + $0x3090] sm:$0xff]  ;;  %v3405_v6 = vld [vmem:[#allocation22 + $0x2018] sm:$0xff] }
 0x7ff   :  { %4927 = vmatprep.subr.mxu1 %v4125_v8  ;;  %4857 = vmatpush1.msra.mxu0 %v3612_v45  ;;  %v3917_v8 = vld [vmem:[#allocation22 + $0x3018] sm:$0xff]  ;;  %v3404_v45 = vld [vmem:[#allocation22 + $0x2010] sm:$0xff] }
 0x800   :  { %4928 = vmatpush1.msra.mxu1 %v4124_v10  ;;  %4858 = vmatprep.subr.mxu0 %v3597_v60  ;;  %v3916_v10 = vld [vmem:[#allocation22 + $0x3010] sm:$0xff]  ;;  %v3901_v60 = vld [vmem:[#allocation22 + $0x2f98] sm:$0xff] }
 0x801   :  { %4929 = vmatprep.subr.mxu1 %v4109_v1  ;;  %4859 = vmatpush1.msra.mxu0 %v3596_v3  ;;  %v4413_v1 = vld [vmem:[#allocation22 + $0x3f98] sm:$0xff]  ;;  %v3900_v3 = vld [vmem:[#allocation22 + $0x2f90] sm:$0xff] }
 0x802   :  { %4930 = vmatpush1.msra.mxu1 %v4108_v5  ;;  %4860 = vmatprep.subr.mxu0 %v3581_v14  ;;  %v4412_v5 = vld [vmem:[#allocation22 + $0x3f90] sm:$0xff]  ;;  %v3885_v14 = vld [vmem:[#allocation22 + $0x2f18] sm:$0xff] }
 0x803   :  { %4931 = vmatprep.subr.mxu1 %v4093_v15  ;;  %4861 = vmatpush1.msra.mxu0 %v3580_v35  ;;  %v4397_v15 = vld [vmem:[#allocation22 + $0x3f18] sm:$0xff]  ;;  %v3884_v35 = vld [vmem:[#allocation22 + $0x2f10] sm:$0xff] }
 0x804   :  { %4932 = vmatpush1.msra.mxu1 %v4092_v40  ;;  %4862 = vmatprep.subr.mxu0 %v3565_v37  ;;  %v4396_v40 = vld [vmem:[#allocation22 + $0x3f10] sm:$0xff]  ;;  %v3869_v37 = vld [vmem:[#allocation22 + $0x2e98] sm:$0xff] }
 0x805   :  { %4933 = vmatprep.subr.mxu1 %v4077_v18  ;;  %4863 = vmatpush1.msra.mxu0 %v3564_v19  ;;  %v4381_v18 = vld [vmem:[#allocation22 + $0x3e98] sm:$0xff]  ;;  %v3868_v19 = vld [vmem:[#allocation22 + $0x2e90] sm:$0xff] }
 0x806   :  { %4934 = vmatpush1.msra.mxu1 %v4076_v20  ;;  %4864 = vmatprep.subr.mxu0 %v3549_v21  ;;  %v4380_v20 = vld [vmem:[#allocation22 + $0x3e90] sm:$0xff]  ;;  %v3853_v21 = vld [vmem:[#allocation22 + $0x2e18] sm:$0xff] }
 0x807   :  { %4935 = vmatprep.subr.mxu1 %v4061_v22  ;;  %4865 = vmatpush1.msra.mxu0 %v3548_v23  ;;  %v4365_v22 = vld [vmem:[#allocation22 + $0x3e18] sm:$0xff]  ;;  %v3852_v23 = vld [vmem:[#allocation22 + $0x2e10] sm:$0xff] }
 0x808   :  { %4936 = vmatpush1.msra.mxu1 %v4060_v24  ;;  %4866 = vmatprep.subr.mxu0 %v3533_v25  ;;  %v4364_v24 = vld [vmem:[#allocation22 + $0x3e10] sm:$0xff]  ;;  %v3837_v25 = vld [vmem:[#allocation22 + $0x2d98] sm:$0xff] }
 0x809   :  { %4937 = vmatprep.subr.mxu1 %v4045_v28  ;;  %4867 = vmatpush1.msra.mxu0 %v3532_v29  ;;  %v4349_v28 = vld [vmem:[#allocation22 + $0x3d98] sm:$0xff]  ;;  %v3836_v29 = vld [vmem:[#allocation22 + $0x2d90] sm:$0xff] }
 0x80a   :  { %4938 = vmatpush1.msra.mxu1 %v4044_v36  ;;  %4868 = vmatprep.subr.mxu0 %v3517_v4  ;;  %v4348_v36 = vld [vmem:[#allocation22 + $0x3d90] sm:$0xff]  ;;  %v3821_v4 = vld [vmem:[#allocation22 + $0x2d18] sm:$0xff] }
 0x80b   :  { %4939 = vmatprep.subr.mxu1 %v4029_v43  ;;  %4869 = vmatpush1.msra.mxu0 %v3516_v46  ;;  %v4333_v43 = vld [vmem:[#allocation22 + $0x3d18] sm:$0xff]  ;;  %v3820_v46 = vld [vmem:[#allocation22 + $0x2d10] sm:$0xff] }
 0x80c   :  { %4940 = vmatpush1.msra.mxu1 %v4028_v48  ;;  %4870 = vmatprep.subr.mxu0 %v3501_v34  ;;  %v4332_v48 = vld [vmem:[#allocation22 + $0x3d10] sm:$0xff]  ;;  %v3805_v34 = vld [vmem:[#allocation22 + $0x2c98] sm:$0xff] }
 0x80d   :  { %4941 = vmatprep.subr.mxu1 %v4013_v12  ;;  %4871 = vmatpush1.msra.mxu0 %v3500_v54  ;;  %v4317_v12 = vld [vmem:[#allocation22 + $0x3c98] sm:$0xff]  ;;  %v3804_v54 = vld [vmem:[#allocation22 + $0x2c90] sm:$0xff] }
 0x80e   :  { %4942 = vmatpush1.msra.mxu1 %v4012_v44  ;;  %4872 = vmatprep.subr.mxu0 %v3485_v11  ;;  %v4316_v44 = vld [vmem:[#allocation22 + $0x3c90] sm:$0xff]  ;;  %v3789_v11 = vld [vmem:[#allocation22 + $0x2c18] sm:$0xff] }
 0x80f   :  { %4943 = vmatprep.subr.mxu1 %v3997_v49  ;;  %4873 = vmatpush1.msra.mxu0 %v3484_v50  ;;  %v4301_v49 = vld [vmem:[#allocation22 + $0x3c18] sm:$0xff]  ;;  %v3788_v50 = vld [vmem:[#allocation22 + $0x2c10] sm:$0xff] }
 0x810   :  { %4944 = vmatpush1.msra.mxu1 %v3996_v52  ;;  %4874 = vmatprep.subr.mxu0 %v3469_v53  ;;  %v4300_v52 = vld [vmem:[#allocation22 + $0x3c10] sm:$0xff]  ;;  %v3773_v53 = vld [vmem:[#allocation22 + $0x2b98] sm:$0xff] }
 0x811   :  { %4945 = vmatprep.subr.mxu1 %v3981_v55  ;;  %4875 = vmatpush1.msra.mxu0 %v3468_v33  ;;  %v4285_v55 = vld [vmem:[#allocation22 + $0x3b98] sm:$0xff]  ;;  %v3772_v33 = vld [vmem:[#allocation22 + $0x2b90] sm:$0xff] }
 0x812   :  { %4946 = vmatpush1.msra.mxu1 %v3980_v17  ;;  %4876 = vmatprep.subr.mxu0 %v3453_v47  ;;  %v4284_v17 = vld [vmem:[#allocation22 + $0x3b90] sm:$0xff]  ;;  %v3757_v47 = vld [vmem:[#allocation22 + $0x2b18] sm:$0xff] }
 0x813   :  { %4947 = vmatprep.subr.mxu1 %v3965_v30  ;;  %4877 = vmatpush1.msra.mxu0 %v3452_v51  ;;  %v4269_v30 = vld [vmem:[#allocation22 + $0x3b18] sm:$0xff]  ;;  %v3756_v51 = vld [vmem:[#allocation22 + $0x2b10] sm:$0xff] }
 0x814   :  { %4948 = vmatpush1.msra.mxu1 %v3964_v38  ;;  %4878 = vmatprep.subr.mxu0 %v3437_v39  ;;  %v4268_v38 = vld [vmem:[#allocation22 + $0x3b10] sm:$0xff]  ;;  %v3741_v39 = vld [vmem:[#allocation22 + $0x2a98] sm:$0xff] }
 0x815   :  { %4949 = vmatprep.subr.mxu1 %v3949_v56  ;;  %4879 = vmatpush1.msra.mxu0 %v3436_v31  ;;  %v4253_v56 = vld [vmem:[#allocation22 + $0x3a98] sm:$0xff]  ;;  %v3740_v31 = vld [vmem:[#allocation22 + $0x2a90] sm:$0xff] }
 0x816   :  { %4950 = vmatpush1.msra.mxu1 %v3948_v57  ;;  %4880 = vmatprep.subr.mxu0 %v3421_v41  ;;  %v4252_v57 = vld [vmem:[#allocation22 + $0x3a90] sm:$0xff]  ;;  %v3725_v41 = vld [vmem:[#allocation22 + $0x2a18] sm:$0xff] }
 0x817   :  { %4951 = vmatprep.subr.mxu1 %v3933_v42  ;;  %4881 = vmatpush1.msra.mxu0 %v3420_v63  ;;  %v4237_v42 = vld [vmem:[#allocation22 + $0x3a18] sm:$0xff]  ;;  %v3724_v63 = vld [vmem:[#allocation22 + $0x2a10] sm:$0xff] }
 0x818   :  { %4952 = vmatpush1.msra.mxu1 %v3932_v2  ;;  %4882 = vmatprep.subr.mxu0 %v3405_v6  ;;  %v4236_v2 = vld [vmem:[#allocation22 + $0x3a10] sm:$0xff]  ;;  %v3709_v6 = vld [vmem:[#allocation22 + $0x2998] sm:$0xff] }
 0x819   :  { %4953 = vmatprep.subr.mxu1 %v3917_v8  ;;  %4883 = vmatpush1.msra.mxu0 %v3404_v45  ;;  %v4221_v8 = vld [vmem:[#allocation22 + $0x3998] sm:$0xff]  ;;  %v3708_v45 = vld [vmem:[#allocation22 + $0x2990] sm:$0xff] }
 0x81a   :  { %4954 = vmatpush1.msra.mxu1 %v3916_v10  ;;  %4884 = vmatprep.subr.mxu0 %v3901_v60  ;;  %v4220_v10 = vld [vmem:[#allocation22 + $0x3990] sm:$0xff]  ;;  %v3693_v60 = vld [vmem:[#allocation22 + $0x2918] sm:$0xff] }
 0x81b   :  { %4955 = vmatprep.subr.mxu1 %v4413_v1  ;;  %4885 = vmatpush2.msra.mxu0 %v3900_v3  ;;  %v4205_v1 = vld [vmem:[#allocation22 + $0x3918] sm:$0xff]  ;;  %v3692_v3 = vld [vmem:[#allocation22 + $0x2910] sm:$0xff] }
 0x81c   :  { %4956 = vmatpush2.msra.mxu1 %v4412_v5  ;;  %4886 = vmatprep.subr.mxu0 %v3885_v14  ;;  %v4204_v5 = vld [vmem:[#allocation22 + $0x3910] sm:$0xff]  ;;  %v3677_v14 = vld [vmem:[#allocation22 + $0x2898] sm:$0xff] }
 0x81d   :  { %4957 = vmatprep.subr.mxu1 %v4397_v15  ;;  %4887 = vmatpush2.msra.mxu0 %v3884_v35  ;;  %v4189_v15 = vld [vmem:[#allocation22 + $0x3898] sm:$0xff]  ;;  %v3676_v35 = vld [vmem:[#allocation22 + $0x2890] sm:$0xff] }
 0x81e   :  { %4958 = vmatpush2.msra.mxu1 %v4396_v40  ;;  %4888 = vmatprep.subr.mxu0 %v3869_v37  ;;  %v4188_v40 = vld [vmem:[#allocation22 + $0x3890] sm:$0xff]  ;;  %v3661_v37 = vld [vmem:[#allocation22 + $0x2818] sm:$0xff] }
 0x81f   :  { %4959 = vmatprep.subr.mxu1 %v4381_v18  ;;  %4889 = vmatpush2.msra.mxu0 %v3868_v19  ;;  %v4173_v18 = vld [vmem:[#allocation22 + $0x3818] sm:$0xff]  ;;  %v3660_v19 = vld [vmem:[#allocation22 + $0x2810] sm:$0xff] }
 0x820   :  { %4960 = vmatpush2.msra.mxu1 %v4380_v20  ;;  %4890 = vmatprep.subr.mxu0 %v3853_v21  ;;  %v4172_v20 = vld [vmem:[#allocation22 + $0x3810] sm:$0xff]  ;;  %v2623_v21 = vld [vmem:[#allocation22 + $0x7a8] sm:$0xff] }
 0x821   :  { %4961 = vmatprep.subr.mxu1 %v4365_v22  ;;  %4891 = vmatpush2.msra.mxu0 %v3852_v23  ;;  %v3135_v22 = vld [vmem:[#allocation22 + $0x17a8] sm:$0xff]  ;;  %v2622_v23 = vld [vmem:[#allocation22 + $0x7a0] sm:$0xff] }
 0x822   :  { %4962 = vmatpush2.msra.mxu1 %v4364_v24  ;;  %4892 = vmatprep.subr.mxu0 %v3837_v25  ;;  %v3134_v24 = vld [vmem:[#allocation22 + $0x17a0] sm:$0xff]  ;;  %v2607_v25 = vld [vmem:[#allocation22 + $0x728] sm:$0xff] }
 0x823   :  { %4963 = vmatprep.subr.mxu1 %v4349_v28  ;;  %4893 = vmatpush2.msra.mxu0 %v3836_v29  ;;  %v3119_v28 = vld [vmem:[#allocation22 + $0x1728] sm:$0xff]  ;;  %v2606_v29 = vld [vmem:[#allocation22 + $0x720] sm:$0xff] }
 0x824   :  { %4964 = vmatpush2.msra.mxu1 %v4348_v36  ;;  %4894 = vmatprep.subr.mxu0 %v3821_v4  ;;  %v3118_v36 = vld [vmem:[#allocation22 + $0x1720] sm:$0xff]  ;;  %v2591_v4 = vld [vmem:[#allocation22 + $0x6a8] sm:$0xff] }
 0x825   :  { %4965 = vmatprep.subr.mxu1 %v4333_v43  ;;  %4895 = vmatpush2.msra.mxu0 %v3820_v46  ;;  %v3103_v43 = vld [vmem:[#allocation22 + $0x16a8] sm:$0xff]  ;;  %v2590_v46 = vld [vmem:[#allocation22 + $0x6a0] sm:$0xff] }
 0x826   :  { %4966 = vmatpush2.msra.mxu1 %v4332_v48  ;;  %4896 = vmatprep.subr.mxu0 %v3805_v34  ;;  %v3102_v48 = vld [vmem:[#allocation22 + $0x16a0] sm:$0xff]  ;;  %v2575_v34 = vld [vmem:[#allocation22 + $0x628] sm:$0xff] }
 0x827   :  { %4967 = vmatprep.subr.mxu1 %v4317_v12  ;;  %4897 = vmatpush2.msra.mxu0 %v3804_v54  ;;  %v3087_v12 = vld [vmem:[#allocation22 + $0x1628] sm:$0xff]  ;;  %v2574_v54 = vld [vmem:[#allocation22 + $0x620] sm:$0xff] }
 0x828   :  { %4968 = vmatpush2.msra.mxu1 %v4316_v44  ;;  %4898 = vmatprep.subr.mxu0 %v3789_v11  ;;  %v3086_v44 = vld [vmem:[#allocation22 + $0x1620] sm:$0xff]  ;;  %v2559_v11 = vld [vmem:[#allocation22 + $0x5a8] sm:$0xff] }
 0x829   :  { %4969 = vmatprep.subr.mxu1 %v4301_v49  ;;  %4899 = vmatpush2.msra.mxu0 %v3788_v50  ;;  %v3071_v49 = vld [vmem:[#allocation22 + $0x15a8] sm:$0xff]  ;;  %v2558_v50 = vld [vmem:[#allocation22 + $0x5a0] sm:$0xff] }
 0x82a   :  { %4970 = vmatpush2.msra.mxu1 %v4300_v52  ;;  %4900 = vmatprep.subr.mxu0 %v3773_v53  ;;  %v3070_v52 = vld [vmem:[#allocation22 + $0x15a0] sm:$0xff]  ;;  %v2543_v53 = vld [vmem:[#allocation22 + $0x528] sm:$0xff] }
 0x82b   :  { %4971 = vmatprep.subr.mxu1 %v4285_v55  ;;  %4901 = vmatpush2.msra.mxu0 %v3772_v33  ;;  %v3055_v55 = vld [vmem:[#allocation22 + $0x1528] sm:$0xff]  ;;  %v2542_v33 = vld [vmem:[#allocation22 + $0x520] sm:$0xff] }
 0x82c   :  { %4972 = vmatpush2.msra.mxu1 %v4284_v17  ;;  %4902 = vmatprep.subr.mxu0 %v3757_v47  ;;  %v3054_v17 = vld [vmem:[#allocation22 + $0x1520] sm:$0xff]  ;;  %v2527_v47 = vld [vmem:[#allocation22 + $0x4a8] sm:$0xff] }
 0x82d   :  { %4973 = vmatprep.subr.mxu1 %v4269_v30  ;;  %4903 = vmatpush2.msra.mxu0 %v3756_v51  ;;  %v3039_v30 = vld [vmem:[#allocation22 + $0x14a8] sm:$0xff]  ;;  %v2526_v51 = vld [vmem:[#allocation22 + $0x4a0] sm:$0xff] }
 0x82e   :  { %4974 = vmatpush2.msra.mxu1 %v4268_v38  ;;  %4904 = vmatprep.subr.mxu0 %v3741_v39  ;;  %v3038_v38 = vld [vmem:[#allocation22 + $0x14a0] sm:$0xff]  ;;  %v2511_v39 = vld [vmem:[#allocation22 + $0x428] sm:$0xff] }
 0x82f   :  { %4975 = vmatprep.subr.mxu1 %v4253_v56  ;;  %4905 = vmatpush2.msra.mxu0 %v3740_v31  ;;  %v3023_v56 = vld [vmem:[#allocation22 + $0x1428] sm:$0xff]  ;;  %v2510_v31 = vld [vmem:[#allocation22 + $0x420] sm:$0xff] }
 0x830   :  { %4976 = vmatpush2.msra.mxu1 %v4252_v57  ;;  %4906 = vmatprep.subr.mxu0 %v3725_v41  ;;  %v3022_v57 = vld [vmem:[#allocation22 + $0x1420] sm:$0xff]  ;;  %v2495_v41 = vld [vmem:[#allocation22 + $0x3a8] sm:$0xff] }
 0x831   :  { %4977 = vmatprep.subr.mxu1 %v4237_v42  ;;  %4907 = vmatpush2.msra.mxu0 %v3724_v63  ;;  %v3007_v42 = vld [vmem:[#allocation22 + $0x13a8] sm:$0xff]  ;;  %v2494_v63 = vld [vmem:[#allocation22 + $0x3a0] sm:$0xff] }
 0x832   :  { %4978 = vmatpush2.msra.mxu1 %v4236_v2  ;;  %4908 = vmatprep.subr.mxu0 %v3709_v6  ;;  %v3006_v2 = vld [vmem:[#allocation22 + $0x13a0] sm:$0xff]  ;;  %v2479_v6 = vld [vmem:[#allocation22 + $0x328] sm:$0xff] }
 0x833   :  { %4979 = vmatprep.subr.mxu1 %v4221_v8  ;;  %4909 = vmatpush2.msra.mxu0 %v3708_v45  ;;  %v2991_v8 = vld [vmem:[#allocation22 + $0x1328] sm:$0xff]  ;;  %v2478_v45 = vld [vmem:[#allocation22 + $0x320] sm:$0xff] }
 0x834   :  { %4980 = vmatpush2.msra.mxu1 %v4220_v10  ;;  %4910 = vmatprep.subr.mxu0 %v3693_v60  ;;  %v2990_v10 = vld [vmem:[#allocation22 + $0x1320] sm:$0xff]  ;;  %v2463_v60 = vld [vmem:[#allocation22 + $0x2a8] sm:$0xff] }
 0x835   :  { %4981 = vmatprep.subr.mxu1 %v4205_v1  ;;  %4911 = vmatpush2.msra.mxu0 %v3692_v3  ;;  %v2975_v1 = vld [vmem:[#allocation22 + $0x12a8] sm:$0xff]  ;;  %v2462_v3 = vld [vmem:[#allocation22 + $0x2a0] sm:$0xff] }
 0x836   :  { %4982 = vmatpush2.msra.mxu1 %v4204_v5  ;;  %4912 = vmatprep.subr.mxu0 %v3677_v14  ;;  %v2974_v5 = vld [vmem:[#allocation22 + $0x12a0] sm:$0xff]  ;;  %v2447_v14 = vld [vmem:[#allocation22 + $0x228] sm:$0xff] }
 0x837   :  { %4983 = vmatprep.subr.mxu1 %v4189_v15  ;;  %4913 = vmatpush2.msra.mxu0 %v3676_v35  ;;  %v2959_v15 = vld [vmem:[#allocation22 + $0x1228] sm:$0xff]  ;;  %v2446_v35 = vld [vmem:[#allocation22 + $0x220] sm:$0xff] }
 0x838   :  { %4984 = vmatpush2.msra.mxu1 %v4188_v40  ;;  %4914 = vmatprep.subr.mxu0 %v3661_v37  ;;  %v2958_v40 = vld [vmem:[#allocation22 + $0x1220] sm:$0xff]  ;;  %v2431_v37 = vld [vmem:[#allocation22 + $0x1a8] sm:$0xff] }
 0x839   :  { %4985 = vmatprep.subr.mxu1 %v4173_v18  ;;  %4915 = vmatpush2.msra.mxu0 %v3660_v19  ;;  %v2943_v18 = vld [vmem:[#allocation22 + $0x11a8] sm:$0xff]  ;;  %v2430_v19 = vld [vmem:[#allocation22 + $0x1a0] sm:$0xff] }
 0x83a   :  { %4986 = vmatpush2.msra.mxu1 %v4172_v20  ;;  %4917 = vmatmul.mubr.f32.vlgmr.msra.gmra.mxu0 %v9311_v26  ;;  %v2942_v20 = vld [vmem:[#allocation22 + $0x11a0] sm:$0xff] }
 0x83b   :  { %4988 = vmatmul.mubr.f32.vlgmr.msra.gmra.mxu1 %v9315_v32  ;;  %4994 = vmatprep.subr.mxu0 %v2623_v21  ;;  %v2415_v21 = vld [vmem:[#allocation22 + $0x128] sm:$0xff] }
 0x83c   :  { %5065 = vmatprep.subr.mxu1 %v3135_v22  ;;  %4995 = vmatpush1.msra.mxu0 %v2622_v23  ;;  %v2927_v22 = vld [vmem:[#allocation22 + $0x1128] sm:$0xff]  ;;  %v2414_v23 = vld [vmem:[#allocation22 + $0x120] sm:$0xff] }
 0x83d   :  { %5058 = vmatprep.mubr.f32.mxu0 %v9288_v27  ;;  %5066 = vmatpush1.msra.mxu1 %v3134_v24  ;;  %v2926_v24 = vld [vmem:[#allocation22 + $0x1120] sm:$0xff] }
 0x83e   :  { %5129 = vmatprep.mubr.f32.mxu1 %v9291_v59  ;;  %4996 = vmatprep.subr.mxu0 %v2607_v25  ;;  %v2399_v25 = vld [vmem:[#allocation22 + $0xa8] sm:$0xff] }
 0x83f   :  { %5067 = vmatprep.subr.mxu1 %v3119_v28  ;;  %4997 = vmatpush1.msra.mxu0 %v2606_v29  ;;  %v2911_v28 = vld [vmem:[#allocation22 + $0x10a8] sm:$0xff]  ;;  %v2398_v29 = vld [vmem:[#allocation22 + $0xa0] sm:$0xff] }
 0x840   :  { %5068 = vmatpush1.msra.mxu1 %v3118_v36  ;;  %4998 = vmatprep.subr.mxu0 %v2591_v4  ;;  %v2910_v36 = vld [vmem:[#allocation22 + $0x10a0] sm:$0xff]  ;;  %v2383_v4 = vld [vmem:[#allocation22 + $0x28] sm:$0xff] }
 0x841   :  { %5069 = vmatprep.subr.mxu1 %v3103_v43  ;;  %4999 = vmatpush1.msra.mxu0 %v2590_v46  ;;  %v2895_v43 = vld [vmem:[#allocation22 + $0x1028] sm:$0xff]  ;;  %v2382_v46 = vld [vmem:[#allocation22 + $0x20] sm:$0xff] }
 0x842   :  { %5070 = vmatpush1.msra.mxu1 %v3102_v48  ;;  %5000 = vmatprep.subr.mxu0 %v2575_v34  ;;  %v2894_v48 = vld [vmem:[#allocation22 + $0x1020] sm:$0xff]  ;;  %v2879_v34 = vld [vmem:[#allocation22 + $0xfa8] sm:$0xff] }
 0x843   :  { %5071 = vmatprep.subr.mxu1 %v3087_v12  ;;  %5001 = vmatpush1.msra.mxu0 %v2574_v54  ;;  %v3391_v12 = vld [vmem:[#allocation22 + $0x1fa8] sm:$0xff]  ;;  %v2878_v54 = vld [vmem:[#allocation22 + $0xfa0] sm:$0xff] }
 0x844   :  { %5072 = vmatpush1.msra.mxu1 %v3086_v44  ;;  %5002 = vmatprep.subr.mxu0 %v2559_v11  ;;  %v3390_v44 = vld [vmem:[#allocation22 + $0x1fa0] sm:$0xff]  ;;  %v2863_v11 = vld [vmem:[#allocation22 + $0xf28] sm:$0xff] }
 0x845   :  { %5073 = vmatprep.subr.mxu1 %v3071_v49  ;;  %5003 = vmatpush1.msra.mxu0 %v2558_v50  ;;  %v3375_v49 = vld [vmem:[#allocation22 + $0x1f28] sm:$0xff]  ;;  %v2862_v50 = vld [vmem:[#allocation22 + $0xf20] sm:$0xff] }
 0x846   :  { %5074 = vmatpush1.msra.mxu1 %v3070_v52  ;;  %5004 = vmatprep.subr.mxu0 %v2543_v53  ;;  %v3374_v52 = vld [vmem:[#allocation22 + $0x1f20] sm:$0xff]  ;;  %v2847_v53 = vld [vmem:[#allocation22 + $0xea8] sm:$0xff] }
 0x847   :  { %5075 = vmatprep.subr.mxu1 %v3055_v55  ;;  %5005 = vmatpush1.msra.mxu0 %v2542_v33  ;;  %v3359_v55 = vld [vmem:[#allocation22 + $0x1ea8] sm:$0xff]  ;;  %v2846_v33 = vld [vmem:[#allocation22 + $0xea0] sm:$0xff] }
 0x848   :  { %5076 = vmatpush1.msra.mxu1 %v3054_v17  ;;  %5006 = vmatprep.subr.mxu0 %v2527_v47  ;;  %v3358_v17 = vld [vmem:[#allocation22 + $0x1ea0] sm:$0xff]  ;;  %v2831_v47 = vld [vmem:[#allocation22 + $0xe28] sm:$0xff] }
 0x849   :  { %5077 = vmatprep.subr.mxu1 %v3039_v30  ;;  %5007 = vmatpush1.msra.mxu0 %v2526_v51  ;;  %v3343_v30 = vld [vmem:[#allocation22 + $0x1e28] sm:$0xff]  ;;  %v2830_v51 = vld [vmem:[#allocation22 + $0xe20] sm:$0xff] }
 0x84a   :  { %5078 = vmatpush1.msra.mxu1 %v3038_v38  ;;  %5008 = vmatprep.subr.mxu0 %v2511_v39  ;;  %v3342_v38 = vld [vmem:[#allocation22 + $0x1e20] sm:$0xff]  ;;  %v2815_v39 = vld [vmem:[#allocation22 + $0xda8] sm:$0xff] }
 0x84b   :  { %5079 = vmatprep.subr.mxu1 %v3023_v56  ;;  %5009 = vmatpush1.msra.mxu0 %v2510_v31  ;;  %v3327_v56 = vld [vmem:[#allocation22 + $0x1da8] sm:$0xff]  ;;  %v2814_v31 = vld [vmem:[#allocation22 + $0xda0] sm:$0xff] }
 0x84c   :  { %5080 = vmatpush1.msra.mxu1 %v3022_v57  ;;  %5010 = vmatprep.subr.mxu0 %v2495_v41  ;;  %v3326_v57 = vld [vmem:[#allocation22 + $0x1da0] sm:$0xff]  ;;  %v2799_v41 = vld [vmem:[#allocation22 + $0xd28] sm:$0xff] }
 0x84d   :  { %5081 = vmatprep.subr.mxu1 %v3007_v42  ;;  %5011 = vmatpush1.msra.mxu0 %v2494_v63  ;;  %v3311_v42 = vld [vmem:[#allocation22 + $0x1d28] sm:$0xff]  ;;  %v2798_v63 = vld [vmem:[#allocation22 + $0xd20] sm:$0xff] }
 0x84e   :  { %5082 = vmatpush1.msra.mxu1 %v3006_v2  ;;  %5012 = vmatprep.subr.mxu0 %v2479_v6  ;;  %v3310_v2 = vld [vmem:[#allocation22 + $0x1d20] sm:$0xff]  ;;  %v2783_v6 = vld [vmem:[#allocation22 + $0xca8] sm:$0xff] }
 0x84f   :  { %5083 = vmatprep.subr.mxu1 %v2991_v8  ;;  %5013 = vmatpush1.msra.mxu0 %v2478_v45  ;;  %v3295_v8 = vld [vmem:[#allocation22 + $0x1ca8] sm:$0xff]  ;;  %v2782_v45 = vld [vmem:[#allocation22 + $0xca0] sm:$0xff] }
 0x850   :  { %5084 = vmatpush1.msra.mxu1 %v2990_v10  ;;  %5014 = vmatprep.subr.mxu0 %v2463_v60  ;;  %v3294_v10 = vld [vmem:[#allocation22 + $0x1ca0] sm:$0xff]  ;;  %v2767_v60 = vld [vmem:[#allocation22 + $0xc28] sm:$0xff] }
 0x851   :  { %5085 = vmatprep.subr.mxu1 %v2975_v1  ;;  %5015 = vmatpush1.msra.mxu0 %v2462_v3  ;;  %v3279_v1 = vld [vmem:[#allocation22 + $0x1c28] sm:$0xff]  ;;  %v2766_v3 = vld [vmem:[#allocation22 + $0xc20] sm:$0xff] }
 0x852   :  { %5086 = vmatpush1.msra.mxu1 %v2974_v5  ;;  %5016 = vmatprep.subr.mxu0 %v2447_v14  ;;  %v3278_v5 = vld [vmem:[#allocation22 + $0x1c20] sm:$0xff]  ;;  %v2751_v14 = vld [vmem:[#allocation22 + $0xba8] sm:$0xff] }
 0x853   :  { %5087 = vmatprep.subr.mxu1 %v2959_v15  ;;  %5017 = vmatpush1.msra.mxu0 %v2446_v35  ;;  %v3263_v15 = vld [vmem:[#allocation22 + $0x1ba8] sm:$0xff]  ;;  %v2750_v35 = vld [vmem:[#allocation22 + $0xba0] sm:$0xff] }
 0x854   :  { %5088 = vmatpush1.msra.mxu1 %v2958_v40  ;;  %5018 = vmatprep.subr.mxu0 %v2431_v37  ;;  %v3262_v40 = vld [vmem:[#allocation22 + $0x1ba0] sm:$0xff]  ;;  %v2735_v37 = vld [vmem:[#allocation22 + $0xb28] sm:$0xff] }
 0x855   :  { %5089 = vmatprep.subr.mxu1 %v2943_v18  ;;  %5019 = vmatpush1.msra.mxu0 %v2430_v19  ;;  %v3247_v18 = vld [vmem:[#allocation22 + $0x1b28] sm:$0xff]  ;;  %v2734_v19 = vld [vmem:[#allocation22 + $0xb20] sm:$0xff] }
 0x856   :  { %5090 = vmatpush1.msra.mxu1 %v2942_v20  ;;  %5020 = vmatprep.subr.mxu0 %v2415_v21  ;;  %v3246_v20 = vld [vmem:[#allocation22 + $0x1b20] sm:$0xff]  ;;  %v2719_v21 = vld [vmem:[#allocation22 + $0xaa8] sm:$0xff] }
 0x857   :  { %5091 = vmatprep.subr.mxu1 %v2927_v22  ;;  %5021 = vmatpush1.msra.mxu0 %v2414_v23  ;;  %v3231_v22 = vld [vmem:[#allocation22 + $0x1aa8] sm:$0xff]  ;;  %v2718_v23 = vld [vmem:[#allocation22 + $0xaa0] sm:$0xff] }
 0x858   :  { %5092 = vmatpush1.msra.mxu1 %v2926_v24  ;;  %5022 = vmatprep.subr.mxu0 %v2399_v25  ;;  %v3230_v24 = vld [vmem:[#allocation22 + $0x1aa0] sm:$0xff]  ;;  %v2703_v25 = vld [vmem:[#allocation22 + $0xa28] sm:$0xff] }
 0x859   :  { %5093 = vmatprep.subr.mxu1 %v2911_v28  ;;  %5023 = vmatpush1.msra.mxu0 %v2398_v29  ;;  %v3215_v28 = vld [vmem:[#allocation22 + $0x1a28] sm:$0xff]  ;;  %v2702_v29 = vld [vmem:[#allocation22 + $0xa20] sm:$0xff] }
 0x85a   :  { %5094 = vmatpush1.msra.mxu1 %v2910_v36  ;;  %5024 = vmatprep.subr.mxu0 %v2383_v4  ;;  %v3214_v36 = vld [vmem:[#allocation22 + $0x1a20] sm:$0xff]  ;;  %v2687_v4 = vld [vmem:[#allocation22 + $0x9a8] sm:$0xff] }
 0x85b   :  { %5095 = vmatprep.subr.mxu1 %v2895_v43  ;;  %5025 = vmatpush1.msra.mxu0 %v2382_v46  ;;  %v3199_v43 = vld [vmem:[#allocation22 + $0x19a8] sm:$0xff]  ;;  %v2686_v46 = vld [vmem:[#allocation22 + $0x9a0] sm:$0xff] }
 0x85c   :  { %5096 = vmatpush1.msra.mxu1 %v2894_v48  ;;  %5026 = vmatprep.subr.mxu0 %v2879_v34  ;;  %v3198_v48 = vld [vmem:[#allocation22 + $0x19a0] sm:$0xff]  ;;  %v2671_v34 = vld [vmem:[#allocation22 + $0x928] sm:$0xff] }
 0x85d   :  { %5097 = vmatprep.subr.mxu1 %v3391_v12  ;;  %5027 = vmatpush2.msra.mxu0 %v2878_v54  ;;  %v3183_v12 = vld [vmem:[#allocation22 + $0x1928] sm:$0xff]  ;;  %v2670_v54 = vld [vmem:[#allocation22 + $0x920] sm:$0xff] }
 0x85e   :  { %5098 = vmatpush2.msra.mxu1 %v3390_v44  ;;  %5028 = vmatprep.subr.mxu0 %v2863_v11  ;;  %v3182_v44 = vld [vmem:[#allocation22 + $0x1920] sm:$0xff]  ;;  %v2655_v11 = vld [vmem:[#allocation22 + $0x8a8] sm:$0xff] }
 0x85f   :  { %5099 = vmatprep.subr.mxu1 %v3375_v49  ;;  %5029 = vmatpush2.msra.mxu0 %v2862_v50  ;;  %v3167_v49 = vld [vmem:[#allocation22 + $0x18a8] sm:$0xff]  ;;  %v2654_v50 = vld [vmem:[#allocation22 + $0x8a0] sm:$0xff] }
 0x860   :  { %5100 = vmatpush2.msra.mxu1 %v3374_v52  ;;  %5030 = vmatprep.subr.mxu0 %v2847_v53  ;;  %v3166_v52 = vld [vmem:[#allocation22 + $0x18a0] sm:$0xff]  ;;  %v2639_v53 = vld [vmem:[#allocation22 + $0x828] sm:$0xff] }
 0x861   :  { %5101 = vmatprep.subr.mxu1 %v3359_v55  ;;  %5031 = vmatpush2.msra.mxu0 %v2846_v33  ;;  %v3151_v55 = vld [vmem:[#allocation22 + $0x1828] sm:$0xff]  ;;  %v2638_v33 = vld [vmem:[#allocation22 + $0x820] sm:$0xff] }
 0x862   :  { %5102 = vmatpush2.msra.mxu1 %v3358_v17  ;;  %5032 = vmatprep.subr.mxu0 %v2831_v47  ;;  %v3150_v17 = vld [vmem:[#allocation22 + $0x1820] sm:$0xff]  ;;  %v3647_v47 = vld [vmem:[#allocation22 + $0x27a8] sm:$0xff] }
 0x863   :  { %5103 = vmatprep.subr.mxu1 %v3343_v30  ;;  %5033 = vmatpush2.msra.mxu0 %v2830_v51  ;;  %v4159_v30 = vld [vmem:[#allocation22 + $0x37a8] sm:$0xff]  ;;  %v3646_v51 = vld [vmem:[#allocation22 + $0x27a0] sm:$0xff] }
 0x864   :  { %5104 = vmatpush2.msra.mxu1 %v3342_v38  ;;  %5034 = vmatprep.subr.mxu0 %v2815_v39  ;;  %v4158_v38 = vld [vmem:[#allocation22 + $0x37a0] sm:$0xff]  ;;  %v3631_v39 = vld [vmem:[#allocation22 + $0x2728] sm:$0xff] }
 0x865   :  { %5105 = vmatprep.subr.mxu1 %v3327_v56  ;;  %5035 = vmatpush2.msra.mxu0 %v2814_v31  ;;  %v4143_v56 = vld [vmem:[#allocation22 + $0x3728] sm:$0xff]  ;;  %v3630_v31 = vld [vmem:[#allocation22 + $0x2720] sm:$0xff] }
 0x866   :  { %5106 = vmatpush2.msra.mxu1 %v3326_v57  ;;  %5036 = vmatprep.subr.mxu0 %v2799_v41  ;;  %v4142_v57 = vld [vmem:[#allocation22 + $0x3720] sm:$0xff]  ;;  %v3615_v41 = vld [vmem:[#allocation22 + $0x26a8] sm:$0xff] }
 0x867   :  { %5107 = vmatprep.subr.mxu1 %v3311_v42  ;;  %5037 = vmatpush2.msra.mxu0 %v2798_v63  ;;  %v4127_v42 = vld [vmem:[#allocation22 + $0x36a8] sm:$0xff]  ;;  %v3614_v63 = vld [vmem:[#allocation22 + $0x26a0] sm:$0xff] }
 0x868   :  { %5108 = vmatpush2.msra.mxu1 %v3310_v2  ;;  %5038 = vmatprep.subr.mxu0 %v2783_v6  ;;  %v4126_v2 = vld [vmem:[#allocation22 + $0x36a0] sm:$0xff]  ;;  %v3599_v6 = vld [vmem:[#allocation22 + $0x2628] sm:$0xff] }
 0x869   :  { %5109 = vmatprep.subr.mxu1 %v3295_v8  ;;  %5039 = vmatpush2.msra.mxu0 %v2782_v45  ;;  %v4111_v8 = vld [vmem:[#allocation22 + $0x3628] sm:$0xff]  ;;  %v3598_v45 = vld [vmem:[#allocation22 + $0x2620] sm:$0xff] }
 0x86a   :  { %5110 = vmatpush2.msra.mxu1 %v3294_v10  ;;  %5040 = vmatprep.subr.mxu0 %v2767_v60  ;;  %v4110_v10 = vld [vmem:[#allocation22 + $0x3620] sm:$0xff]  ;;  %v3583_v60 = vld [vmem:[#allocation22 + $0x25a8] sm:$0xff] }
 0x86b   :  { %5111 = vmatprep.subr.mxu1 %v3279_v1  ;;  %5041 = vmatpush2.msra.mxu0 %v2766_v3  ;;  %v4095_v1 = vld [vmem:[#allocation22 + $0x35a8] sm:$0xff]  ;;  %v3582_v3 = vld [vmem:[#allocation22 + $0x25a0] sm:$0xff] }
 0x86c   :  { %5112 = vmatpush2.msra.mxu1 %v3278_v5  ;;  %5042 = vmatprep.subr.mxu0 %v2751_v14  ;;  %v4094_v5 = vld [vmem:[#allocation22 + $0x35a0] sm:$0xff]  ;;  %v3567_v14 = vld [vmem:[#allocation22 + $0x2528] sm:$0xff] }
 0x86d   :  { %5113 = vmatprep.subr.mxu1 %v3263_v15  ;;  %5043 = vmatpush2.msra.mxu0 %v2750_v35  ;;  %v4079_v15 = vld [vmem:[#allocation22 + $0x3528] sm:$0xff]  ;;  %v3566_v35 = vld [vmem:[#allocation22 + $0x2520] sm:$0xff] }
 0x86e   :  { %5114 = vmatpush2.msra.mxu1 %v3262_v40  ;;  %5044 = vmatprep.subr.mxu0 %v2735_v37  ;;  %v4078_v40 = vld [vmem:[#allocation22 + $0x3520] sm:$0xff]  ;;  %v3551_v37 = vld [vmem:[#allocation22 + $0x24a8] sm:$0xff] }
 0x86f   :  { %5115 = vmatprep.subr.mxu1 %v3247_v18  ;;  %5045 = vmatpush2.msra.mxu0 %v2734_v19  ;;  %v4063_v18 = vld [vmem:[#allocation22 + $0x34a8] sm:$0xff]  ;;  %v3550_v19 = vld [vmem:[#allocation22 + $0x24a0] sm:$0xff] }
 0x870   :  { %5116 = vmatpush2.msra.mxu1 %v3246_v20  ;;  %5046 = vmatprep.subr.mxu0 %v2719_v21  ;;  %v4062_v20 = vld [vmem:[#allocation22 + $0x34a0] sm:$0xff]  ;;  %v3535_v21 = vld [vmem:[#allocation22 + $0x2428] sm:$0xff] }
 0x871   :  { %5117 = vmatprep.subr.mxu1 %v3231_v22  ;;  %5047 = vmatpush2.msra.mxu0 %v2718_v23  ;;  %v4047_v22 = vld [vmem:[#allocation22 + $0x3428] sm:$0xff]  ;;  %v3534_v23 = vld [vmem:[#allocation22 + $0x2420] sm:$0xff] }
 0x872   :  { %5118 = vmatpush2.msra.mxu1 %v3230_v24  ;;  %5048 = vmatprep.subr.mxu0 %v2703_v25  ;;  %v4046_v24 = vld [vmem:[#allocation22 + $0x3420] sm:$0xff]  ;;  %v3519_v25 = vld [vmem:[#allocation22 + $0x23a8] sm:$0xff] }
 0x873   :  { %5119 = vmatprep.subr.mxu1 %v3215_v28  ;;  %5049 = vmatpush2.msra.mxu0 %v2702_v29  ;;  %v4031_v28 = vld [vmem:[#allocation22 + $0x33a8] sm:$0xff]  ;;  %v3518_v29 = vld [vmem:[#allocation22 + $0x23a0] sm:$0xff] }
 0x874   :  { %5120 = vmatpush2.msra.mxu1 %v3214_v36  ;;  %5050 = vmatprep.subr.mxu0 %v2687_v4  ;;  %v4030_v36 = vld [vmem:[#allocation22 + $0x33a0] sm:$0xff]  ;;  %v3503_v4 = vld [vmem:[#allocation22 + $0x2328] sm:$0xff] }
 0x875   :  { %5121 = vmatprep.subr.mxu1 %v3199_v43  ;;  %5051 = vmatpush2.msra.mxu0 %v2686_v46  ;;  %v4015_v43 = vld [vmem:[#allocation22 + $0x3328] sm:$0xff]  ;;  %v3502_v46 = vld [vmem:[#allocation22 + $0x2320] sm:$0xff] }
 0x876   :  { %5122 = vmatpush2.msra.mxu1 %v3198_v48  ;;  %5052 = vmatprep.subr.mxu0 %v2671_v34  ;;  %v4014_v48 = vld [vmem:[#allocation22 + $0x3320] sm:$0xff]  ;;  %v3487_v34 = vld [vmem:[#allocation22 + $0x22a8] sm:$0xff] }
 0x877   :  { %5123 = vmatprep.subr.mxu1 %v3183_v12  ;;  %5053 = vmatpush2.msra.mxu0 %v2670_v54  ;;  %v3999_v12 = vld [vmem:[#allocation22 + $0x32a8] sm:$0xff]  ;;  %v3486_v54 = vld [vmem:[#allocation22 + $0x22a0] sm:$0xff] }
 0x878   :  { %5124 = vmatpush2.msra.mxu1 %v3182_v44  ;;  %5054 = vmatprep.subr.mxu0 %v2655_v11  ;;  %v3998_v44 = vld [vmem:[#allocation22 + $0x32a0] sm:$0xff]  ;;  %v3471_v11 = vld [vmem:[#allocation22 + $0x2228] sm:$0xff] }
 0x879   :  { %5125 = vmatprep.subr.mxu1 %v3167_v49  ;;  %5055 = vmatpush2.msra.mxu0 %v2654_v50  ;;  %v3983_v49 = vld [vmem:[#allocation22 + $0x3228] sm:$0xff]  ;;  %v3470_v50 = vld [vmem:[#allocation22 + $0x2220] sm:$0xff] }
 0x87a   :  { %5126 = vmatpush2.msra.mxu1 %v3166_v52  ;;  %5056 = vmatprep.subr.mxu0 %v2639_v53  ;;  %v3982_v52 = vld [vmem:[#allocation22 + $0x3220] sm:$0xff]  ;;  %v3455_v53 = vld [vmem:[#allocation22 + $0x21a8] sm:$0xff] }
 0x87b   :  { %5127 = vmatprep.subr.mxu1 %v3151_v55  ;;  %5057 = vmatpush2.msra.mxu0 %v2638_v33  ;;  %v3967_v55 = vld [vmem:[#allocation22 + $0x31a8] sm:$0xff]  ;;  %v3454_v33 = vld [vmem:[#allocation22 + $0x21a0] sm:$0xff] }
 0x87c   :  { %5128 = vmatpush2.msra.mxu1 %v3150_v17  ;;  %5059 = vmatmul.mubr.f32.vlgmr.msra.gmra.mxu0 %v9293_v62  ;;  %v3966_v17 = vld [vmem:[#allocation22 + $0x31a0] sm:$0xff] }
 0x87d   :  { %5130 = vmatmul.mubr.f32.vlgmr.msra.gmra.mxu1 %v9297_v61  ;;  %5136 = vmatprep.subr.mxu0 %v3647_v47  ;;  %v3439_v47 = vld [vmem:[#allocation22 + $0x2128] sm:$0xff] }
 0x87e   :  { %5207 = vmatprep.subr.mxu1 %v4159_v30  ;;  %5137 = vmatpush1.msra.mxu0 %v3646_v51  ;;  %v3951_v30 = vld [vmem:[#allocation22 + $0x3128] sm:$0xff]  ;;  %v3438_v51 = vld [vmem:[#allocation22 + $0x2120] sm:$0xff] }
 0x87f   :  { %5200 = vmatprep.mubr.f32.mxu0 %v9300_v7  ;;  %5208 = vmatpush1.msra.mxu1 %v4158_v38  ;;  %v3950_v38 = vld [vmem:[#allocation22 + $0x3120] sm:$0xff] }
 0x880   :  { %5271 = vmatprep.mubr.f32.mxu1 %v9302_v9  ;;  %5138 = vmatprep.subr.mxu0 %v3631_v39  ;;  %v3423_v39 = vld [vmem:[#allocation22 + $0x20a8] sm:$0xff] }
 0x881   :  { %5209 = vmatprep.subr.mxu1 %v4143_v56  ;;  %5139 = vmatpush1.msra.mxu0 %v3630_v31  ;;  %v3935_v56 = vld [vmem:[#allocation22 + $0x30a8] sm:$0xff]  ;;  %v3422_v31 = vld [vmem:[#allocation22 + $0x20a0] sm:$0xff] }
 0x882   :  { %5210 = vmatpush1.msra.mxu1 %v4142_v57  ;;  %5140 = vmatprep.subr.mxu0 %v3615_v41  ;;  %v3934_v57 = vld [vmem:[#allocation22 + $0x30a0] sm:$0xff]  ;;  %v3407_v41 = vld [vmem:[#allocation22 + $0x2028] sm:$0xff] }
 0x883   :  { %5211 = vmatprep.subr.mxu1 %v4127_v42  ;;  %5141 = vmatpush1.msra.mxu0 %v3614_v63  ;;  %v3919_v42 = vld [vmem:[#allocation22 + $0x3028] sm:$0xff]  ;;  %v3406_v63 = vld [vmem:[#allocation22 + $0x2020] sm:$0xff] }
 0x884   :  { %5212 = vmatpush1.msra.mxu1 %v4126_v2  ;;  %5142 = vmatprep.subr.mxu0 %v3599_v6  ;;  %v3918_v2 = vld [vmem:[#allocation22 + $0x3020] sm:$0xff]  ;;  %v3903_v6 = vld [vmem:[#allocation22 + $0x2fa8] sm:$0xff] }
 0x885   :  { %5213 = vmatprep.subr.mxu1 %v4111_v8  ;;  %5143 = vmatpush1.msra.mxu0 %v3598_v45  ;;  %v4415_v8 = vld [vmem:[#allocation22 + $0x3fa8] sm:$0xff]  ;;  %v3902_v45 = vld [vmem:[#allocation22 + $0x2fa0] sm:$0xff] }
 0x886   :  { %5214 = vmatpush1.msra.mxu1 %v4110_v10  ;;  %5144 = vmatprep.subr.mxu0 %v3583_v60  ;;  %v4414_v10 = vld [vmem:[#allocation22 + $0x3fa0] sm:$0xff]  ;;  %v3887_v60 = vld [vmem:[#allocation22 + $0x2f28] sm:$0xff] }
 0x887   :  { %5215 = vmatprep.subr.mxu1 %v4095_v1  ;;  %5145 = vmatpush1.msra.mxu0 %v3582_v3  ;;  %v4399_v1 = vld [vmem:[#allocation22 + $0x3f28] sm:$0xff]  ;;  %v3886_v3 = vld [vmem:[#allocation22 + $0x2f20] sm:$0xff] }
 0x888   :  { %5216 = vmatpush1.msra.mxu1 %v4094_v5  ;;  %5146 = vmatprep.subr.mxu0 %v3567_v14  ;;  %v4398_v5 = vld [vmem:[#allocation22 + $0x3f20] sm:$0xff]  ;;  %v3871_v14 = vld [vmem:[#allocation22 + $0x2ea8] sm:$0xff] }
 0x889   :  { %5217 = vmatprep.subr.mxu1 %v4079_v15  ;;  %5147 = vmatpush1.msra.mxu0 %v3566_v35  ;;  %v4383_v15 = vld [vmem:[#allocation22 + $0x3ea8] sm:$0xff]  ;;  %v3870_v35 = vld [vmem:[#allocation22 + $0x2ea0] sm:$0xff] }
 0x88a   :  { %5218 = vmatpush1.msra.mxu1 %v4078_v40  ;;  %5148 = vmatprep.subr.mxu0 %v3551_v37  ;;  %v4382_v40 = vld [vmem:[#allocation22 + $0x3ea0] sm:$0xff]  ;;  %v3855_v37 = vld [vmem:[#allocation22 + $0x2e28] sm:$0xff] }
 0x88b   :  { %5219 = vmatprep.subr.mxu1 %v4063_v18  ;;  %5149 = vmatpush1.msra.mxu0 %v3550_v19  ;;  %v4367_v18 = vld [vmem:[#allocation22 + $0x3e28] sm:$0xff]  ;;  %v3854_v19 = vld [vmem:[#allocation22 + $0x2e20] sm:$0xff] }
 0x88c   :  { %5220 = vmatpush1.msra.mxu1 %v4062_v20  ;;  %5150 = vmatprep.subr.mxu0 %v3535_v21  ;;  %v4366_v20 = vld [vmem:[#allocation22 + $0x3e20] sm:$0xff]  ;;  %v3839_v21 = vld [vmem:[#allocation22 + $0x2da8] sm:$0xff] }
 0x88d   :  { %5221 = vmatprep.subr.mxu1 %v4047_v22  ;;  %5151 = vmatpush1.msra.mxu0 %v3534_v23  ;;  %v4351_v22 = vld [vmem:[#allocation22 + $0x3da8] sm:$0xff]  ;;  %v3838_v23 = vld [vmem:[#allocation22 + $0x2da0] sm:$0xff] }
 0x88e   :  { %5222 = vmatpush1.msra.mxu1 %v4046_v24  ;;  %5152 = vmatprep.subr.mxu0 %v3519_v25  ;;  %v4350_v24 = vld [vmem:[#allocation22 + $0x3da0] sm:$0xff]  ;;  %v3823_v25 = vld [vmem:[#allocation22 + $0x2d28] sm:$0xff] }
 0x88f   :  { %5223 = vmatprep.subr.mxu1 %v4031_v28  ;;  %5153 = vmatpush1.msra.mxu0 %v3518_v29  ;;  %v4335_v28 = vld [vmem:[#allocation22 + $0x3d28] sm:$0xff]  ;;  %v3822_v29 = vld [vmem:[#allocation22 + $0x2d20] sm:$0xff] }
 0x890   :  { %5224 = vmatpush1.msra.mxu1 %v4030_v36  ;;  %5154 = vmatprep.subr.mxu0 %v3503_v4  ;;  %v4334_v36 = vld [vmem:[#allocation22 + $0x3d20] sm:$0xff]  ;;  %v3807_v4 = vld [vmem:[#allocation22 + $0x2ca8] sm:$0xff] }
 0x891   :  { %5225 = vmatprep.subr.mxu1 %v4015_v43  ;;  %5155 = vmatpush1.msra.mxu0 %v3502_v46  ;;  %v4319_v43 = vld [vmem:[#allocation22 + $0x3ca8] sm:$0xff]  ;;  %v3806_v46 = vld [vmem:[#allocation22 + $0x2ca0] sm:$0xff] }
 0x892   :  { %5226 = vmatpush1.msra.mxu1 %v4014_v48  ;;  %5156 = vmatprep.subr.mxu0 %v3487_v34  ;;  %v4318_v48 = vld [vmem:[#allocation22 + $0x3ca0] sm:$0xff]  ;;  %v3791_v34 = vld [vmem:[#allocation22 + $0x2c28] sm:$0xff] }
 0x893   :  { %5227 = vmatprep.subr.mxu1 %v3999_v12  ;;  %5157 = vmatpush1.msra.mxu0 %v3486_v54  ;;  %v4303_v12 = vld [vmem:[#allocation22 + $0x3c28] sm:$0xff]  ;;  %v3790_v54 = vld [vmem:[#allocation22 + $0x2c20] sm:$0xff] }
 0x894   :  { %5228 = vmatpush1.msra.mxu1 %v3998_v44  ;;  %5158 = vmatprep.subr.mxu0 %v3471_v11  ;;  %v4302_v44 = vld [vmem:[#allocation22 + $0x3c20] sm:$0xff]  ;;  %v3775_v11 = vld [vmem:[#allocation22 + $0x2ba8] sm:$0xff] }
 0x895   :  { %5229 = vmatprep.subr.mxu1 %v3983_v49  ;;  %5159 = vmatpush1.msra.mxu0 %v3470_v50  ;;  %v4287_v49 = vld [vmem:[#allocation22 + $0x3ba8] sm:$0xff]  ;;  %v3774_v50 = vld [vmem:[#allocation22 + $0x2ba0] sm:$0xff] }
 0x896   :  { %5230 = vmatpush1.msra.mxu1 %v3982_v52  ;;  %5160 = vmatprep.subr.mxu0 %v3455_v53  ;;  %v4286_v52 = vld [vmem:[#allocation22 + $0x3ba0] sm:$0xff]  ;;  %v3759_v53 = vld [vmem:[#allocation22 + $0x2b28] sm:$0xff] }
 0x897   :  { %5231 = vmatprep.subr.mxu1 %v3967_v55  ;;  %5161 = vmatpush1.msra.mxu0 %v3454_v33  ;;  %v4271_v55 = vld [vmem:[#allocation22 + $0x3b28] sm:$0xff]  ;;  %v3758_v33 = vld [vmem:[#allocation22 + $0x2b20] sm:$0xff] }
 0x898   :  { %5232 = vmatpush1.msra.mxu1 %v3966_v17  ;;  %5162 = vmatprep.subr.mxu0 %v3439_v47  ;;  %v4270_v17 = vld [vmem:[#allocation22 + $0x3b20] sm:$0xff]  ;;  %v3743_v47 = vld [vmem:[#allocation22 + $0x2aa8] sm:$0xff] }
 0x899   :  { %5233 = vmatprep.subr.mxu1 %v3951_v30  ;;  %5163 = vmatpush1.msra.mxu0 %v3438_v51  ;;  %v4255_v30 = vld [vmem:[#allocation22 + $0x3aa8] sm:$0xff]  ;;  %v3742_v51 = vld [vmem:[#allocation22 + $0x2aa0] sm:$0xff] }
 0x89a   :  { %5234 = vmatpush1.msra.mxu1 %v3950_v38  ;;  %5164 = vmatprep.subr.mxu0 %v3423_v39  ;;  %v4254_v38 = vld [vmem:[#allocation22 + $0x3aa0] sm:$0xff]  ;;  %v3727_v39 = vld [vmem:[#allocation22 + $0x2a28] sm:$0xff] }
 0x89b   :  { %5235 = vmatprep.subr.mxu1 %v3935_v56  ;;  %5165 = vmatpush1.msra.mxu0 %v3422_v31  ;;  %v4239_v56 = vld [vmem:[#allocation22 + $0x3a28] sm:$0xff]  ;;  %v3726_v31 = vld [vmem:[#allocation22 + $0x2a20] sm:$0xff] }
 0x89c   :  { %5236 = vmatpush1.msra.mxu1 %v3934_v57  ;;  %5166 = vmatprep.subr.mxu0 %v3407_v41  ;;  %v4238_v57 = vld [vmem:[#allocation22 + $0x3a20] sm:$0xff]  ;;  %v3711_v41 = vld [vmem:[#allocation22 + $0x29a8] sm:$0xff] }
 0x89d   :  { %5237 = vmatprep.subr.mxu1 %v3919_v42  ;;  %5167 = vmatpush1.msra.mxu0 %v3406_v63  ;;  %v4223_v42 = vld [vmem:[#allocation22 + $0x39a8] sm:$0xff]  ;;  %v3710_v63 = vld [vmem:[#allocation22 + $0x29a0] sm:$0xff] }
 0x89e   :  { %5238 = vmatpush1.msra.mxu1 %v3918_v2  ;;  %5168 = vmatprep.subr.mxu0 %v3903_v6  ;;  %v4222_v2 = vld [vmem:[#allocation22 + $0x39a0] sm:$0xff]  ;;  %v3695_v6 = vld [vmem:[#allocation22 + $0x2928] sm:$0xff] }
 0x89f   :  { %5239 = vmatprep.subr.mxu1 %v4415_v8  ;;  %5169 = vmatpush2.msra.mxu0 %v3902_v45  ;;  %v4207_v8 = vld [vmem:[#allocation22 + $0x3928] sm:$0xff]  ;;  %v3694_v45 = vld [vmem:[#allocation22 + $0x2920] sm:$0xff] }
 0x8a0   :  { %5240 = vmatpush2.msra.mxu1 %v4414_v10  ;;  %5170 = vmatprep.subr.mxu0 %v3887_v60  ;;  %v4206_v10 = vld [vmem:[#allocation22 + $0x3920] sm:$0xff]  ;;  %v3679_v60 = vld [vmem:[#allocation22 + $0x28a8] sm:$0xff] }
 0x8a1   :  { %5241 = vmatprep.subr.mxu1 %v4399_v1  ;;  %5171 = vmatpush2.msra.mxu0 %v3886_v3  ;;  %v4191_v1 = vld [vmem:[#allocation22 + $0x38a8] sm:$0xff]  ;;  %v3678_v3 = vld [vmem:[#allocation22 + $0x28a0] sm:$0xff] }
 0x8a2   :  { %5242 = vmatpush2.msra.mxu1 %v4398_v5  ;;  %5172 = vmatprep.subr.mxu0 %v3871_v14  ;;  %v4190_v5 = vld [vmem:[#allocation22 + $0x38a0] sm:$0xff]  ;;  %v3663_v14 = vld [vmem:[#allocation22 + $0x2828] sm:$0xff] }
 0x8a3   :  { %5243 = vmatprep.subr.mxu1 %v4383_v15  ;;  %5173 = vmatpush2.msra.mxu0 %v3870_v35  ;;  %v4175_v15 = vld [vmem:[#allocation22 + $0x3828] sm:$0xff]  ;;  %v3662_v35 = vld [vmem:[#allocation22 + $0x2820] sm:$0xff] }
 0x8a4   :  { %5244 = vmatpush2.msra.mxu1 %v4382_v40  ;;  %5174 = vmatprep.subr.mxu0 %v3855_v37  ;;  %v4174_v40 = vld [vmem:[#allocation22 + $0x3820] sm:$0xff]  ;;  %v2625_v37 = vld [vmem:[#allocation22 + $0x7b8] sm:$0xff] }
 0x8a5   :  { %5245 = vmatprep.subr.mxu1 %v4367_v18  ;;  %5175 = vmatpush2.msra.mxu0 %v3854_v19  ;;  %v3137_v18 = vld [vmem:[#allocation22 + $0x17b8] sm:$0xff]  ;;  %v2624_v19 = vld [vmem:[#allocation22 + $0x7b0] sm:$0xff] }
 0x8a6   :  { %5246 = vmatpush2.msra.mxu1 %v4366_v20  ;;  %5176 = vmatprep.subr.mxu0 %v3839_v21  ;;  %v3136_v20 = vld [vmem:[#allocation22 + $0x17b0] sm:$0xff]  ;;  %v2609_v21 = vld [vmem:[#allocation22 + $0x738] sm:$0xff] }
 0x8a7   :  { %5247 = vmatprep.subr.mxu1 %v4351_v22  ;;  %5177 = vmatpush2.msra.mxu0 %v3838_v23  ;;  %v3121_v22 = vld [vmem:[#allocation22 + $0x1738] sm:$0xff]  ;;  %v2608_v23 = vld [vmem:[#allocation22 + $0x730] sm:$0xff] }
 0x8a8   :  { %5248 = vmatpush2.msra.mxu1 %v4350_v24  ;;  %5178 = vmatprep.subr.mxu0 %v3823_v25  ;;  %v3120_v24 = vld [vmem:[#allocation22 + $0x1730] sm:$0xff]  ;;  %v2593_v25 = vld [vmem:[#allocation22 + $0x6b8] sm:$0xff] }
 0x8a9   :  { %5249 = vmatprep.subr.mxu1 %v4335_v28  ;;  %5179 = vmatpush2.msra.mxu0 %v3822_v29  ;;  %v3105_v28 = vld [vmem:[#allocation22 + $0x16b8] sm:$0xff]  ;;  %v2592_v29 = vld [vmem:[#allocation22 + $0x6b0] sm:$0xff] }
 0x8aa   :  { %5250 = vmatpush2.msra.mxu1 %v4334_v36  ;;  %5180 = vmatprep.subr.mxu0 %v3807_v4  ;;  %v3104_v36 = vld [vmem:[#allocation22 + $0x16b0] sm:$0xff]  ;;  %v2577_v4 = vld [vmem:[#allocation22 + $0x638] sm:$0xff] }
 0x8ab   :  { %5251 = vmatprep.subr.mxu1 %v4319_v43  ;;  %5181 = vmatpush2.msra.mxu0 %v3806_v46  ;;  %v3089_v43 = vld [vmem:[#allocation22 + $0x1638] sm:$0xff]  ;;  %v2576_v46 = vld [vmem:[#allocation22 + $0x630] sm:$0xff] }
 0x8ac   :  { %5252 = vmatpush2.msra.mxu1 %v4318_v48  ;;  %5182 = vmatprep.subr.mxu0 %v3791_v34  ;;  %v3088_v48 = vld [vmem:[#allocation22 + $0x1630] sm:$0xff]  ;;  %v2561_v34 = vld [vmem:[#allocation22 + $0x5b8] sm:$0xff] }
 0x8ad   :  { %5253 = vmatprep.subr.mxu1 %v4303_v12  ;;  %5183 = vmatpush2.msra.mxu0 %v3790_v54  ;;  %v3073_v12 = vld [vmem:[#allocation22 + $0x15b8] sm:$0xff]  ;;  %v2560_v54 = vld [vmem:[#allocation22 + $0x5b0] sm:$0xff] }
 0x8ae   :  { %5254 = vmatpush2.msra.mxu1 %v4302_v44  ;;  %5184 = vmatprep.subr.mxu0 %v3775_v11  ;;  %v3072_v44 = vld [vmem:[#allocation22 + $0x15b0] sm:$0xff]  ;;  %v2545_v11 = vld [vmem:[#allocation22 + $0x538] sm:$0xff] }
 0x8af   :  { %5255 = vmatprep.subr.mxu1 %v4287_v49  ;;  %5185 = vmatpush2.msra.mxu0 %v3774_v50  ;;  %v3057_v49 = vld [vmem:[#allocation22 + $0x1538] sm:$0xff]  ;;  %v2544_v50 = vld [vmem:[#allocation22 + $0x530] sm:$0xff] }
 0x8b0   :  { %5256 = vmatpush2.msra.mxu1 %v4286_v52  ;;  %5186 = vmatprep.subr.mxu0 %v3759_v53  ;;  %v3056_v52 = vld [vmem:[#allocation22 + $0x1530] sm:$0xff]  ;;  %v2529_v53 = vld [vmem:[#allocation22 + $0x4b8] sm:$0xff] }
 0x8b1   :  { %5257 = vmatprep.subr.mxu1 %v4271_v55  ;;  %5187 = vmatpush2.msra.mxu0 %v3758_v33  ;;  %v3041_v55 = vld [vmem:[#allocation22 + $0x14b8] sm:$0xff]  ;;  %v2528_v33 = vld [vmem:[#allocation22 + $0x4b0] sm:$0xff] }
 0x8b2   :  { %5258 = vmatpush2.msra.mxu1 %v4270_v17  ;;  %5188 = vmatprep.subr.mxu0 %v3743_v47  ;;  %v3040_v17 = vld [vmem:[#allocation22 + $0x14b0] sm:$0xff]  ;;  %v2513_v47 = vld [vmem:[#allocation22 + $0x438] sm:$0xff] }
 0x8b3   :  { %5259 = vmatprep.subr.mxu1 %v4255_v30  ;;  %5189 = vmatpush2.msra.mxu0 %v3742_v51  ;;  %v3025_v30 = vld [vmem:[#allocation22 + $0x1438] sm:$0xff]  ;;  %v2512_v51 = vld [vmem:[#allocation22 + $0x430] sm:$0xff] }
 0x8b4   :  { %5260 = vmatpush2.msra.mxu1 %v4254_v38  ;;  %5190 = vmatprep.subr.mxu0 %v3727_v39  ;;  %v3024_v38 = vld [vmem:[#allocation22 + $0x1430] sm:$0xff]  ;;  %v2497_v39 = vld [vmem:[#allocation22 + $0x3b8] sm:$0xff] }
 0x8b5   :  { %5261 = vmatprep.subr.mxu1 %v4239_v56  ;;  %5191 = vmatpush2.msra.mxu0 %v3726_v31  ;;  %v3009_v56 = vld [vmem:[#allocation22 + $0x13b8] sm:$0xff]  ;;  %v2496_v31 = vld [vmem:[#allocation22 + $0x3b0] sm:$0xff] }
 0x8b6   :  { %5262 = vmatpush2.msra.mxu1 %v4238_v57  ;;  %5192 = vmatprep.subr.mxu0 %v3711_v41  ;;  %v3008_v57 = vld [vmem:[#allocation22 + $0x13b0] sm:$0xff]  ;;  %v2481_v41 = vld [vmem:[#allocation22 + $0x338] sm:$0xff] }
 0x8b7   :  { %5263 = vmatprep.subr.mxu1 %v4223_v42  ;;  %5193 = vmatpush2.msra.mxu0 %v3710_v63  ;;  %v2993_v42 = vld [vmem:[#allocation22 + $0x1338] sm:$0xff]  ;;  %v2480_v63 = vld [vmem:[#allocation22 + $0x330] sm:$0xff] }
 0x8b8   :  { %5264 = vmatpush2.msra.mxu1 %v4222_v2  ;;  %5194 = vmatprep.subr.mxu0 %v3695_v6  ;;  %v2992_v2 = vld [vmem:[#allocation22 + $0x1330] sm:$0xff]  ;;  %v2465_v6 = vld [vmem:[#allocation22 + $0x2b8] sm:$0xff] }
 0x8b9   :  { %5265 = vmatprep.subr.mxu1 %v4207_v8  ;;  %5195 = vmatpush2.msra.mxu0 %v3694_v45  ;;  %v2977_v8 = vld [vmem:[#allocation22 + $0x12b8] sm:$0xff]  ;;  %v2464_v45 = vld [vmem:[#allocation22 + $0x2b0] sm:$0xff] }
 0x8ba   :  { %5266 = vmatpush2.msra.mxu1 %v4206_v10  ;;  %5196 = vmatprep.subr.mxu0 %v3679_v60  ;;  %v2976_v10 = vld [vmem:[#allocation22 + $0x12b0] sm:$0xff]  ;;  %v2449_v60 = vld [vmem:[#allocation22 + $0x238] sm:$0xff] }
 0x8bb   :  { %5267 = vmatprep.subr.mxu1 %v4191_v1  ;;  %5197 = vmatpush2.msra.mxu0 %v3678_v3  ;;  %v2961_v1 = vld [vmem:[#allocation22 + $0x1238] sm:$0xff]  ;;  %v2448_v3 = vld [vmem:[#allocation22 + $0x230] sm:$0xff] }
 0x8bc   :  { %5268 = vmatpush2.msra.mxu1 %v4190_v5  ;;  %5198 = vmatprep.subr.mxu0 %v3663_v14  ;;  %v2960_v5 = vld [vmem:[#allocation22 + $0x1230] sm:$0xff]  ;;  %v2433_v14 = vld [vmem:[#allocation22 + $0x1b8] sm:$0xff] }
 0x8bd   :  { %5269 = vmatprep.subr.mxu1 %v4175_v15  ;;  %5199 = vmatpush2.msra.mxu0 %v3662_v35  ;;  %v2945_v15 = vld [vmem:[#allocation22 + $0x11b8] sm:$0xff]  ;;  %v2432_v35 = vld [vmem:[#allocation22 + $0x1b0] sm:$0xff] }
 0x8be   :  { %5270 = vmatpush2.msra.mxu1 %v4174_v40  ;;  %5201 = vmatmul.mubr.f32.vlgmr.msra.gmra.mxu0 %v9311_v26  ;;  %v2944_v40 = vld [vmem:[#allocation22 + $0x11b0] sm:$0xff] }
 0x8bf   :  { %5272 = vmatmul.mubr.f32.vlgmr.msra.gmra.mxu1 %v9315_v32  ;;  %5278 = vmatprep.subr.mxu0 %v2625_v37  ;;  %v2417_v37 = vld [vmem:[#allocation22 + $0x138] sm:$0xff] }
 0x8c0   :  { %5349 = vmatprep.subr.mxu1 %v3137_v18  ;;  %5279 = vmatpush1.msra.mxu0 %v2624_v19  ;;  %v2929_v18 = vld [vmem:[#allocation22 + $0x1138] sm:$0xff]  ;;  %v2416_v19 = vld [vmem:[#allocation22 + $0x130] sm:$0xff] }
 0x8c1   :  { %5342 = vmatprep.mubr.f32.mxu0 %v9288_v27  ;;  %5350 = vmatpush1.msra.mxu1 %v3136_v20  ;;  %v2928_v20 = vld [vmem:[#allocation22 + $0x1130] sm:$0xff] }
 0x8c2   :  { %5413 = vmatprep.mubr.f32.mxu1 %v9291_v59  ;;  %5280 = vmatprep.subr.mxu0 %v2609_v21  ;;  %v2401_v21 = vld [vmem:[#allocation22 + $0xb8] sm:$0xff] }
 0x8c3   :  { %5351 = vmatprep.subr.mxu1 %v3121_v22  ;;  %5281 = vmatpush1.msra.mxu0 %v2608_v23  ;;  %v2913_v22 = vld [vmem:[#allocation22 + $0x10b8] sm:$0xff]  ;;  %v2400_v23 = vld [vmem:[#allocation22 + $0xb0] sm:$0xff] }
 0x8c4   :  { %5352 = vmatpush1.msra.mxu1 %v3120_v24  ;;  %5282 = vmatprep.subr.mxu0 %v2593_v25  ;;  %v2912_v24 = vld [vmem:[#allocation22 + $0x10b0] sm:$0xff]  ;;  %v2385_v25 = vld [vmem:[#allocation22 + $0x38] sm:$0xff] }
 0x8c5   :  { %5353 = vmatprep.subr.mxu1 %v3105_v28  ;;  %5283 = vmatpush1.msra.mxu0 %v2592_v29  ;;  %v2897_v28 = vld [vmem:[#allocation22 + $0x1038] sm:$0xff]  ;;  %v2384_v29 = vld [vmem:[#allocation22 + $0x30] sm:$0xff] }
 0x8c6   :  { %5354 = vmatpush1.msra.mxu1 %v3104_v36  ;;  %5284 = vmatprep.subr.mxu0 %v2577_v4  ;;  %v2896_v36 = vld [vmem:[#allocation22 + $0x1030] sm:$0xff]  ;;  %v2881_v4 = vld [vmem:[#allocation22 + $0xfb8] sm:$0xff] }
 0x8c7   :  { %5355 = vmatprep.subr.mxu1 %v3089_v43  ;;  %5285 = vmatpush1.msra.mxu0 %v2576_v46  ;;  %v3393_v43 = vld [vmem:[#allocation22 + $0x1fb8] sm:$0xff]  ;;  %v2880_v46 = vld [vmem:[#allocation22 + $0xfb0] sm:$0xff] }
 0x8c8   :  { %5356 = vmatpush1.msra.mxu1 %v3088_v48  ;;  %5286 = vmatprep.subr.mxu0 %v2561_v34  ;;  %v3392_v48 = vld [vmem:[#allocation22 + $0x1fb0] sm:$0xff]  ;;  %v2865_v34 = vld [vmem:[#allocation22 + $0xf38] sm:$0xff] }
 0x8c9   :  { %5357 = vmatprep.subr.mxu1 %v3073_v12  ;;  %5287 = vmatpush1.msra.mxu0 %v2560_v54  ;;  %v3377_v12 = vld [vmem:[#allocation22 + $0x1f38] sm:$0xff]  ;;  %v2864_v54 = vld [vmem:[#allocation22 + $0xf30] sm:$0xff] }
 0x8ca   :  { %5358 = vmatpush1.msra.mxu1 %v3072_v44  ;;  %5288 = vmatprep.subr.mxu0 %v2545_v11  ;;  %v3376_v44 = vld [vmem:[#allocation22 + $0x1f30] sm:$0xff]  ;;  %v2849_v11 = vld [vmem:[#allocation22 + $0xeb8] sm:$0xff] }
 0x8cb   :  { %5359 = vmatprep.subr.mxu1 %v3057_v49  ;;  %5289 = vmatpush1.msra.mxu0 %v2544_v50  ;;  %v3361_v49 = vld [vmem:[#allocation22 + $0x1eb8] sm:$0xff]  ;;  %v2848_v50 = vld [vmem:[#allocation22 + $0xeb0] sm:$0xff] }
 0x8cc   :  { %5360 = vmatpush1.msra.mxu1 %v3056_v52  ;;  %5290 = vmatprep.subr.mxu0 %v2529_v53  ;;  %v3360_v52 = vld [vmem:[#allocation22 + $0x1eb0] sm:$0xff]  ;;  %v2833_v53 = vld [vmem:[#allocation22 + $0xe38] sm:$0xff] }
 0x8cd   :  { %5361 = vmatprep.subr.mxu1 %v3041_v55  ;;  %5291 = vmatpush1.msra.mxu0 %v2528_v33  ;;  %v3345_v55 = vld [vmem:[#allocation22 + $0x1e38] sm:$0xff]  ;;  %v2832_v33 = vld [vmem:[#allocation22 + $0xe30] sm:$0xff] }
 0x8ce   :  { %5362 = vmatpush1.msra.mxu1 %v3040_v17  ;;  %5292 = vmatprep.subr.mxu0 %v2513_v47  ;;  %v3344_v17 = vld [vmem:[#allocation22 + $0x1e30] sm:$0xff]  ;;  %v2817_v47 = vld [vmem:[#allocation22 + $0xdb8] sm:$0xff] }
 0x8cf   :  { %5363 = vmatprep.subr.mxu1 %v3025_v30  ;;  %5293 = vmatpush1.msra.mxu0 %v2512_v51  ;;  %v3329_v30 = vld [vmem:[#allocation22 + $0x1db8] sm:$0xff]  ;;  %v2816_v51 = vld [vmem:[#allocation22 + $0xdb0] sm:$0xff] }
 0x8d0   :  { %5364 = vmatpush1.msra.mxu1 %v3024_v38  ;;  %5294 = vmatprep.subr.mxu0 %v2497_v39  ;;  %v3328_v38 = vld [vmem:[#allocation22 + $0x1db0] sm:$0xff]  ;;  %v2801_v39 = vld [vmem:[#allocation22 + $0xd38] sm:$0xff] }
 0x8d1   :  { %5365 = vmatprep.subr.mxu1 %v3009_v56  ;;  %5295 = vmatpush1.msra.mxu0 %v2496_v31  ;;  %v3313_v56 = vld [vmem:[#allocation22 + $0x1d38] sm:$0xff]  ;;  %v2800_v31 = vld [vmem:[#allocation22 + $0xd30] sm:$0xff] }
 0x8d2   :  { %5366 = vmatpush1.msra.mxu1 %v3008_v57  ;;  %5296 = vmatprep.subr.mxu0 %v2481_v41  ;;  %v3312_v57 = vld [vmem:[#allocation22 + $0x1d30] sm:$0xff]  ;;  %v2785_v41 = vld [vmem:[#allocation22 + $0xcb8] sm:$0xff] }
 0x8d3   :  { %5367 = vmatprep.subr.mxu1 %v2993_v42  ;;  %5297 = vmatpush1.msra.mxu0 %v2480_v63  ;;  %v3297_v42 = vld [vmem:[#allocation22 + $0x1cb8] sm:$0xff]  ;;  %v2784_v63 = vld [vmem:[#allocation22 + $0xcb0] sm:$0xff] }
 0x8d4   :  { %5368 = vmatpush1.msra.mxu1 %v2992_v2  ;;  %5298 = vmatprep.subr.mxu0 %v2465_v6  ;;  %v3296_v2 = vld [vmem:[#allocation22 + $0x1cb0] sm:$0xff]  ;;  %v2769_v6 = vld [vmem:[#allocation22 + $0xc38] sm:$0xff] }
 0x8d5   :  { %5369 = vmatprep.subr.mxu1 %v2977_v8  ;;  %5299 = vmatpush1.msra.mxu0 %v2464_v45  ;;  %v3281_v8 = vld [vmem:[#allocation22 + $0x1c38] sm:$0xff]  ;;  %v2768_v45 = vld [vmem:[#allocation22 + $0xc30] sm:$0xff] }
 0x8d6   :  { %5370 = vmatpush1.msra.mxu1 %v2976_v10  ;;  %5300 = vmatprep.subr.mxu0 %v2449_v60  ;;  %v3280_v10 = vld [vmem:[#allocation22 + $0x1c30] sm:$0xff]  ;;  %v2753_v60 = vld [vmem:[#allocation22 + $0xbb8] sm:$0xff] }
 0x8d7   :  { %5371 = vmatprep.subr.mxu1 %v2961_v1  ;;  %5301 = vmatpush1.msra.mxu0 %v2448_v3  ;;  %v3265_v1 = vld [vmem:[#allocation22 + $0x1bb8] sm:$0xff]  ;;  %v2752_v3 = vld [vmem:[#allocation22 + $0xbb0] sm:$0xff] }
 0x8d8   :  { %5372 = vmatpush1.msra.mxu1 %v2960_v5  ;;  %5302 = vmatprep.subr.mxu0 %v2433_v14  ;;  %v3264_v5 = vld [vmem:[#allocation22 + $0x1bb0] sm:$0xff]  ;;  %v2737_v14 = vld [vmem:[#allocation22 + $0xb38] sm:$0xff] }
 0x8d9   :  { %5373 = vmatprep.subr.mxu1 %v2945_v15  ;;  %5303 = vmatpush1.msra.mxu0 %v2432_v35  ;;  %v3249_v15 = vld [vmem:[#allocation22 + $0x1b38] sm:$0xff]  ;;  %v2736_v35 = vld [vmem:[#allocation22 + $0xb30] sm:$0xff] }
 0x8da   :  { %5374 = vmatpush1.msra.mxu1 %v2944_v40  ;;  %5304 = vmatprep.subr.mxu0 %v2417_v37  ;;  %v3248_v40 = vld [vmem:[#allocation22 + $0x1b30] sm:$0xff]  ;;  %v2721_v37 = vld [vmem:[#allocation22 + $0xab8] sm:$0xff] }
 0x8db   :  { %5375 = vmatprep.subr.mxu1 %v2929_v18  ;;  %5305 = vmatpush1.msra.mxu0 %v2416_v19  ;;  %v3233_v18 = vld [vmem:[#allocation22 + $0x1ab8] sm:$0xff]  ;;  %v2720_v19 = vld [vmem:[#allocation22 + $0xab0] sm:$0xff] }
 0x8dc   :  { %5376 = vmatpush1.msra.mxu1 %v2928_v20  ;;  %5306 = vmatprep.subr.mxu0 %v2401_v21  ;;  %v3232_v20 = vld [vmem:[#allocation22 + $0x1ab0] sm:$0xff]  ;;  %v2705_v21 = vld [vmem:[#allocation22 + $0xa38] sm:$0xff] }
 0x8dd   :  { %5377 = vmatprep.subr.mxu1 %v2913_v22  ;;  %5307 = vmatpush1.msra.mxu0 %v2400_v23  ;;  %v3217_v22 = vld [vmem:[#allocation22 + $0x1a38] sm:$0xff]  ;;  %v2704_v23 = vld [vmem:[#allocation22 + $0xa30] sm:$0xff] }
 0x8de   :  { %5378 = vmatpush1.msra.mxu1 %v2912_v24  ;;  %5308 = vmatprep.subr.mxu0 %v2385_v25  ;;  %v3216_v24 = vld [vmem:[#allocation22 + $0x1a30] sm:$0xff]  ;;  %v2689_v25 = vld [vmem:[#allocation22 + $0x9b8] sm:$0xff] }
 0x8df   :  { %5379 = vmatprep.subr.mxu1 %v2897_v28  ;;  %5309 = vmatpush1.msra.mxu0 %v2384_v29  ;;  %v3201_v28 = vld [vmem:[#allocation22 + $0x19b8] sm:$0xff]  ;;  %v2688_v29 = vld [vmem:[#allocation22 + $0x9b0] sm:$0xff] }
 0x8e0   :  { %5380 = vmatpush1.msra.mxu1 %v2896_v36  ;;  %5310 = vmatprep.subr.mxu0 %v2881_v4  ;;  %v3200_v36 = vld [vmem:[#allocation22 + $0x19b0] sm:$0xff]  ;;  %v2673_v4 = vld [vmem:[#allocation22 + $0x938] sm:$0xff] }
 0x8e1   :  { %5381 = vmatprep.subr.mxu1 %v3393_v43  ;;  %5311 = vmatpush2.msra.mxu0 %v2880_v46  ;;  %v3185_v43 = vld [vmem:[#allocation22 + $0x1938] sm:$0xff]  ;;  %v2672_v46 = vld [vmem:[#allocation22 + $0x930] sm:$0xff] }
 0x8e2   :  { %5382 = vmatpush2.msra.mxu1 %v3392_v48  ;;  %5312 = vmatprep.subr.mxu0 %v2865_v34  ;;  %v3184_v48 = vld [vmem:[#allocation22 + $0x1930] sm:$0xff]  ;;  %v2657_v34 = vld [vmem:[#allocation22 + $0x8b8] sm:$0xff] }
 0x8e3   :  { %5383 = vmatprep.subr.mxu1 %v3377_v12  ;;  %5313 = vmatpush2.msra.mxu0 %v2864_v54  ;;  %v3169_v12 = vld [vmem:[#allocation22 + $0x18b8] sm:$0xff]  ;;  %v2656_v54 = vld [vmem:[#allocation22 + $0x8b0] sm:$0xff] }
 0x8e4   :  { %5384 = vmatpush2.msra.mxu1 %v3376_v44  ;;  %5314 = vmatprep.subr.mxu0 %v2849_v11  ;;  %v3168_v44 = vld [vmem:[#allocation22 + $0x18b0] sm:$0xff]  ;;  %v2641_v11 = vld [vmem:[#allocation22 + $0x838] sm:$0xff] }
 0x8e5   :  { %5385 = vmatprep.subr.mxu1 %v3361_v49  ;;  %5315 = vmatpush2.msra.mxu0 %v2848_v50  ;;  %v3153_v49 = vld [vmem:[#allocation22 + $0x1838] sm:$0xff]  ;;  %v2640_v50 = vld [vmem:[#allocation22 + $0x830] sm:$0xff] }
 0x8e6   :  { %5386 = vmatpush2.msra.mxu1 %v3360_v52  ;;  %5316 = vmatprep.subr.mxu0 %v2833_v53  ;;  %v3152_v52 = vld [vmem:[#allocation22 + $0x1830] sm:$0xff]  ;;  %v3649_v53 = vld [vmem:[#allocation22 + $0x27b8] sm:$0xff] }
 0x8e7   :  { %5387 = vmatprep.subr.mxu1 %v3345_v55  ;;  %5317 = vmatpush2.msra.mxu0 %v2832_v33  ;;  %v4161_v55 = vld [vmem:[#allocation22 + $0x37b8] sm:$0xff]  ;;  %v3648_v33 = vld [vmem:[#allocation22 + $0x27b0] sm:$0xff] }
 0x8e8   :  { %5388 = vmatpush2.msra.mxu1 %v3344_v17  ;;  %5318 = vmatprep.subr.mxu0 %v2817_v47  ;;  %v4160_v17 = vld [vmem:[#allocation22 + $0x37b0] sm:$0xff]  ;;  %v3633_v47 = vld [vmem:[#allocation22 + $0x2738] sm:$0xff] }
 0x8e9   :  { %5389 = vmatprep.subr.mxu1 %v3329_v30  ;;  %5319 = vmatpush2.msra.mxu0 %v2816_v51  ;;  %v4145_v30 = vld [vmem:[#allocation22 + $0x3738] sm:$0xff]  ;;  %v3632_v51 = vld [vmem:[#allocation22 + $0x2730] sm:$0xff] }
 0x8ea   :  { %5390 = vmatpush2.msra.mxu1 %v3328_v38  ;;  %5320 = vmatprep.subr.mxu0 %v2801_v39  ;;  %v4144_v38 = vld [vmem:[#allocation22 + $0x3730] sm:$0xff]  ;;  %v3617_v39 = vld [vmem:[#allocation22 + $0x26b8] sm:$0xff] }
 0x8eb   :  { %5391 = vmatprep.subr.mxu1 %v3313_v56  ;;  %5321 = vmatpush2.msra.mxu0 %v2800_v31  ;;  %v4129_v56 = vld [vmem:[#allocation22 + $0x36b8] sm:$0xff]  ;;  %v3616_v31 = vld [vmem:[#allocation22 + $0x26b0] sm:$0xff] }
 0x8ec   :  { %5392 = vmatpush2.msra.mxu1 %v3312_v57  ;;  %5322 = vmatprep.subr.mxu0 %v2785_v41  ;;  %v4128_v57 = vld [vmem:[#allocation22 + $0x36b0] sm:$0xff]  ;;  %v3601_v41 = vld [vmem:[#allocation22 + $0x2638] sm:$0xff] }
 0x8ed   :  { %5393 = vmatprep.subr.mxu1 %v3297_v42  ;;  %5323 = vmatpush2.msra.mxu0 %v2784_v63  ;;  %v4113_v42 = vld [vmem:[#allocation22 + $0x3638] sm:$0xff]  ;;  %v3600_v63 = vld [vmem:[#allocation22 + $0x2630] sm:$0xff] }
 0x8ee   :  { %5394 = vmatpush2.msra.mxu1 %v3296_v2  ;;  %5324 = vmatprep.subr.mxu0 %v2769_v6  ;;  %v4112_v2 = vld [vmem:[#allocation22 + $0x3630] sm:$0xff]  ;;  %v3585_v6 = vld [vmem:[#allocation22 + $0x25b8] sm:$0xff] }
 0x8ef   :  { %5395 = vmatprep.subr.mxu1 %v3281_v8  ;;  %5325 = vmatpush2.msra.mxu0 %v2768_v45  ;;  %v4097_v8 = vld [vmem:[#allocation22 + $0x35b8] sm:$0xff]  ;;  %v3584_v45 = vld [vmem:[#allocation22 + $0x25b0] sm:$0xff] }
 0x8f0   :  { %5396 = vmatpush2.msra.mxu1 %v3280_v10  ;;  %5326 = vmatprep.subr.mxu0 %v2753_v60  ;;  %v4096_v10 = vld [vmem:[#allocation22 + $0x35b0] sm:$0xff]  ;;  %v3569_v60 = vld [vmem:[#allocation22 + $0x2538] sm:$0xff] }
 0x8f1   :  { %5397 = vmatprep.subr.mxu1 %v3265_v1  ;;  %5327 = vmatpush2.msra.mxu0 %v2752_v3  ;;  %v4081_v1 = vld [vmem:[#allocation22 + $0x3538] sm:$0xff]  ;;  %v3568_v3 = vld [vmem:[#allocation22 + $0x2530] sm:$0xff] }
 0x8f2   :  { %5398 = vmatpush2.msra.mxu1 %v3264_v5  ;;  %5328 = vmatprep.subr.mxu0 %v2737_v14  ;;  %v4080_v5 = vld [vmem:[#allocation22 + $0x3530] sm:$0xff]  ;;  %v3553_v14 = vld [vmem:[#allocation22 + $0x24b8] sm:$0xff] }
 0x8f3   :  { %5399 = vmatprep.subr.mxu1 %v3249_v15  ;;  %5329 = vmatpush2.msra.mxu0 %v2736_v35  ;;  %v4065_v15 = vld [vmem:[#allocation22 + $0x34b8] sm:$0xff]  ;;  %v3552_v35 = vld [vmem:[#allocation22 + $0x24b0] sm:$0xff] }
 0x8f4   :  { %5400 = vmatpush2.msra.mxu1 %v3248_v40  ;;  %5330 = vmatprep.subr.mxu0 %v2721_v37  ;;  %v4064_v40 = vld [vmem:[#allocation22 + $0x34b0] sm:$0xff]  ;;  %v3537_v37 = vld [vmem:[#allocation22 + $0x2438] sm:$0xff] }
 0x8f5   :  { %5401 = vmatprep.subr.mxu1 %v3233_v18  ;;  %5331 = vmatpush2.msra.mxu0 %v2720_v19  ;;  %v4049_v18 = vld [vmem:[#allocation22 + $0x3438] sm:$0xff]  ;;  %v3536_v19 = vld [vmem:[#allocation22 + $0x2430] sm:$0xff] }
 0x8f6   :  { %5402 = vmatpush2.msra.mxu1 %v3232_v20  ;;  %5332 = vmatprep.subr.mxu0 %v2705_v21  ;;  %v4048_v20 = vld [vmem:[#allocation22 + $0x3430] sm:$0xff]  ;;  %v3521_v21 = vld [vmem:[#allocation22 + $0x23b8] sm:$0xff] }
 0x8f7   :  { %5403 = vmatprep.subr.mxu1 %v3217_v22  ;;  %5333 = vmatpush2.msra.mxu0 %v2704_v23  ;;  %v4033_v22 = vld [vmem:[#allocation22 + $0x33b8] sm:$0xff]  ;;  %v3520_v23 = vld [vmem:[#allocation22 + $0x23b0] sm:$0xff] }
 0x8f8   :  { %5404 = vmatpush2.msra.mxu1 %v3216_v24  ;;  %5334 = vmatprep.subr.mxu0 %v2689_v25  ;;  %v4032_v24 = vld [vmem:[#allocation22 + $0x33b0] sm:$0xff]  ;;  %v3505_v25 = vld [vmem:[#allocation22 + $0x2338] sm:$0xff] }
 0x8f9   :  { %5405 = vmatprep.subr.mxu1 %v3201_v28  ;;  %5335 = vmatpush2.msra.mxu0 %v2688_v29  ;;  %v4017_v28 = vld [vmem:[#allocation22 + $0x3338] sm:$0xff]  ;;  %v3504_v29 = vld [vmem:[#allocation22 + $0x2330] sm:$0xff] }
 0x8fa   :  { %5406 = vmatpush2.msra.mxu1 %v3200_v36  ;;  %5336 = vmatprep.subr.mxu0 %v2673_v4  ;;  %v4016_v36 = vld [vmem:[#allocation22 + $0x3330] sm:$0xff]  ;;  %v3489_v4 = vld [vmem:[#allocation22 + $0x22b8] sm:$0xff] }
 0x8fb   :  { %5407 = vmatprep.subr.mxu1 %v3185_v43  ;;  %5337 = vmatpush2.msra.mxu0 %v2672_v46  ;;  %v4001_v43 = vld [vmem:[#allocation22 + $0x32b8] sm:$0xff]  ;;  %v3488_v46 = vld [vmem:[#allocation22 + $0x22b0] sm:$0xff] }
 0x8fc   :  { %5408 = vmatpush2.msra.mxu1 %v3184_v48  ;;  %5338 = vmatprep.subr.mxu0 %v2657_v34  ;;  %v4000_v48 = vld [vmem:[#allocation22 + $0x32b0] sm:$0xff]  ;;  %v3473_v34 = vld [vmem:[#allocation22 + $0x2238] sm:$0xff] }
 0x8fd   :  { %5409 = vmatprep.subr.mxu1 %v3169_v12  ;;  %5339 = vmatpush2.msra.mxu0 %v2656_v54  ;;  %v3985_v12 = vld [vmem:[#allocation22 + $0x3238] sm:$0xff]  ;;  %v3472_v54 = vld [vmem:[#allocation22 + $0x2230] sm:$0xff] }
 0x8fe   :  { %5410 = vmatpush2.msra.mxu1 %v3168_v44  ;;  %5340 = vmatprep.subr.mxu0 %v2641_v11  ;;  %v3984_v44 = vld [vmem:[#allocation22 + $0x3230] sm:$0xff]  ;;  %v3457_v11 = vld [vmem:[#allocation22 + $0x21b8] sm:$0xff] }
 0x8ff   :  { %5411 = vmatprep.subr.mxu1 %v3153_v49  ;;  %5341 = vmatpush2.msra.mxu0 %v2640_v50  ;;  %v3969_v49 = vld [vmem:[#allocation22 + $0x31b8] sm:$0xff]  ;;  %v3456_v50 = vld [vmem:[#allocation22 + $0x21b0] sm:$0xff] }
 0x900   :  { %5412 = vmatpush2.msra.mxu1 %v3152_v52  ;;  %5343 = vmatmul.mubr.f32.vlgmr.msra.gmra.mxu0 %v9293_v62  ;;  %v3968_v52 = vld [vmem:[#allocation22 + $0x31b0] sm:$0xff] }
 0x901   :  { %5414 = vmatmul.mubr.f32.vlgmr.msra.gmra.mxu1 %v9297_v61  ;;  %5420 = vmatprep.subr.mxu0 %v3649_v53  ;;  %v3441_v53 = vld [vmem:[#allocation22 + $0x2138] sm:$0xff] }
 0x902   :  { %5491 = vmatprep.subr.mxu1 %v4161_v55  ;;  %5421 = vmatpush1.msra.mxu0 %v3648_v33  ;;  %v3953_v55 = vld [vmem:[#allocation22 + $0x3138] sm:$0xff]  ;;  %v3440_v33 = vld [vmem:[#allocation22 + $0x2130] sm:$0xff] }
 0x903   :  { %5484 = vmatprep.mubr.f32.mxu0 %v9300_v7  ;;  %5492 = vmatpush1.msra.mxu1 %v4160_v17  ;;  %v3952_v17 = vld [vmem:[#allocation22 + $0x3130] sm:$0xff] }
 0x904   :  { %5555 = vmatprep.mubr.f32.mxu1 %v9302_v9  ;;  %5422 = vmatprep.subr.mxu0 %v3633_v47  ;;  %v3425_v47 = vld [vmem:[#allocation22 + $0x20b8] sm:$0xff] }
 0x905   :  { %5493 = vmatprep.subr.mxu1 %v4145_v30  ;;  %5423 = vmatpush1.msra.mxu0 %v3632_v51  ;;  %v3937_v30 = vld [vmem:[#allocation22 + $0x30b8] sm:$0xff]  ;;  %v3424_v51 = vld [vmem:[#allocation22 + $0x20b0] sm:$0xff] }
 0x906   :  { %5494 = vmatpush1.msra.mxu1 %v4144_v38  ;;  %5424 = vmatprep.subr.mxu0 %v3617_v39  ;;  %v3936_v38 = vld [vmem:[#allocation22 + $0x30b0] sm:$0xff]  ;;  %v3409_v39 = vld [vmem:[#allocation22 + $0x2038] sm:$0xff] }
 0x907   :  { %5495 = vmatprep.subr.mxu1 %v4129_v56  ;;  %5425 = vmatpush1.msra.mxu0 %v3616_v31  ;;  %v3921_v56 = vld [vmem:[#allocation22 + $0x3038] sm:$0xff]  ;;  %v3408_v31 = vld [vmem:[#allocation22 + $0x2030] sm:$0xff] }
 0x908   :  { %5496 = vmatpush1.msra.mxu1 %v4128_v57  ;;  %5426 = vmatprep.subr.mxu0 %v3601_v41  ;;  %v3920_v57 = vld [vmem:[#allocation22 + $0x3030] sm:$0xff]  ;;  %v3905_v41 = vld [vmem:[#allocation22 + $0x2fb8] sm:$0xff] }
 0x909   :  { %5497 = vmatprep.subr.mxu1 %v4113_v42  ;;  %5427 = vmatpush1.msra.mxu0 %v3600_v63  ;;  %v4417_v42 = vld [vmem:[#allocation22 + $0x3fb8] sm:$0xff]  ;;  %v3904_v63 = vld [vmem:[#allocation22 + $0x2fb0] sm:$0xff] }
 0x90a   :  { %5498 = vmatpush1.msra.mxu1 %v4112_v2  ;;  %5428 = vmatprep.subr.mxu0 %v3585_v6  ;;  %v4416_v2 = vld [vmem:[#allocation22 + $0x3fb0] sm:$0xff]  ;;  %v3889_v6 = vld [vmem:[#allocation22 + $0x2f38] sm:$0xff] }
 0x90b   :  { %5499 = vmatprep.subr.mxu1 %v4097_v8  ;;  %5429 = vmatpush1.msra.mxu0 %v3584_v45  ;;  %v4401_v8 = vld [vmem:[#allocation22 + $0x3f38] sm:$0xff]  ;;  %v3888_v45 = vld [vmem:[#allocation22 + $0x2f30] sm:$0xff] }
 0x90c   :  { %5500 = vmatpush1.msra.mxu1 %v4096_v10  ;;  %5430 = vmatprep.subr.mxu0 %v3569_v60  ;;  %v4400_v10 = vld [vmem:[#allocation22 + $0x3f30] sm:$0xff]  ;;  %v3873_v60 = vld [vmem:[#allocation22 + $0x2eb8] sm:$0xff] }
 0x90d   :  { %5501 = vmatprep.subr.mxu1 %v4081_v1  ;;  %5431 = vmatpush1.msra.mxu0 %v3568_v3  ;;  %v4385_v1 = vld [vmem:[#allocation22 + $0x3eb8] sm:$0xff]  ;;  %v3872_v3 = vld [vmem:[#allocation22 + $0x2eb0] sm:$0xff] }
 0x90e   :  { %5502 = vmatpush1.msra.mxu1 %v4080_v5  ;;  %5432 = vmatprep.subr.mxu0 %v3553_v14  ;;  %v4384_v5 = vld [vmem:[#allocation22 + $0x3eb0] sm:$0xff]  ;;  %v3857_v14 = vld [vmem:[#allocation22 + $0x2e38] sm:$0xff] }
 0x90f   :  { %5503 = vmatprep.subr.mxu1 %v4065_v15  ;;  %5433 = vmatpush1.msra.mxu0 %v3552_v35  ;;  %v4369_v15 = vld [vmem:[#allocation22 + $0x3e38] sm:$0xff]  ;;  %v3856_v35 = vld [vmem:[#allocation22 + $0x2e30] sm:$0xff] }
 0x910   :  { %5504 = vmatpush1.msra.mxu1 %v4064_v40  ;;  %5434 = vmatprep.subr.mxu0 %v3537_v37  ;;  %v4368_v40 = vld [vmem:[#allocation22 + $0x3e30] sm:$0xff]  ;;  %v3841_v37 = vld [vmem:[#allocation22 + $0x2db8] sm:$0xff] }
 0x911   :  { %5505 = vmatprep.subr.mxu1 %v4049_v18  ;;  %5435 = vmatpush1.msra.mxu0 %v3536_v19  ;;  %v4353_v18 = vld [vmem:[#allocation22 + $0x3db8] sm:$0xff]  ;;  %v3840_v19 = vld [vmem:[#allocation22 + $0x2db0] sm:$0xff] }
 0x912   :  { %5506 = vmatpush1.msra.mxu1 %v4048_v20  ;;  %5436 = vmatprep.subr.mxu0 %v3521_v21  ;;  %v4352_v20 = vld [vmem:[#allocation22 + $0x3db0] sm:$0xff]  ;;  %v3825_v21 = vld [vmem:[#allocation22 + $0x2d38] sm:$0xff] }
 0x913   :  { %5507 = vmatprep.subr.mxu1 %v4033_v22  ;;  %5437 = vmatpush1.msra.mxu0 %v3520_v23  ;;  %v4337_v22 = vld [vmem:[#allocation22 + $0x3d38] sm:$0xff]  ;;  %v3824_v23 = vld [vmem:[#allocation22 + $0x2d30] sm:$0xff] }
 0x914   :  { %5508 = vmatpush1.msra.mxu1 %v4032_v24  ;;  %5438 = vmatprep.subr.mxu0 %v3505_v25  ;;  %v4336_v24 = vld [vmem:[#allocation22 + $0x3d30] sm:$0xff]  ;;  %v3809_v25 = vld [vmem:[#allocation22 + $0x2cb8] sm:$0xff] }
 0x915   :  { %5509 = vmatprep.subr.mxu1 %v4017_v28  ;;  %5439 = vmatpush1.msra.mxu0 %v3504_v29  ;;  %v4321_v28 = vld [vmem:[#allocation22 + $0x3cb8] sm:$0xff]  ;;  %v3808_v29 = vld [vmem:[#allocation22 + $0x2cb0] sm:$0xff] }
 0x916   :  { %5510 = vmatpush1.msra.mxu1 %v4016_v36  ;;  %5440 = vmatprep.subr.mxu0 %v3489_v4  ;;  %v4320_v36 = vld [vmem:[#allocation22 + $0x3cb0] sm:$0xff]  ;;  %v3793_v4 = vld [vmem:[#allocation22 + $0x2c38] sm:$0xff] }
 0x917   :  { %5511 = vmatprep.subr.mxu1 %v4001_v43  ;;  %5441 = vmatpush1.msra.mxu0 %v3488_v46  ;;  %v4305_v43 = vld [vmem:[#allocation22 + $0x3c38] sm:$0xff]  ;;  %v3792_v46 = vld [vmem:[#allocation22 + $0x2c30] sm:$0xff] }
 0x918   :  { %5512 = vmatpush1.msra.mxu1 %v4000_v48  ;;  %5442 = vmatprep.subr.mxu0 %v3473_v34  ;;  %v4304_v48 = vld [vmem:[#allocation22 + $0x3c30] sm:$0xff]  ;;  %v3777_v34 = vld [vmem:[#allocation22 + $0x2bb8] sm:$0xff] }
 0x919   :  { %5513 = vmatprep.subr.mxu1 %v3985_v12  ;;  %5443 = vmatpush1.msra.mxu0 %v3472_v54  ;;  %v4289_v12 = vld [vmem:[#allocation22 + $0x3bb8] sm:$0xff]  ;;  %v3776_v54 = vld [vmem:[#allocation22 + $0x2bb0] sm:$0xff] }
 0x91a   :  { %5514 = vmatpush1.msra.mxu1 %v3984_v44  ;;  %5444 = vmatprep.subr.mxu0 %v3457_v11  ;;  %v4288_v44 = vld [vmem:[#allocation22 + $0x3bb0] sm:$0xff]  ;;  %v3761_v11 = vld [vmem:[#allocation22 + $0x2b38] sm:$0xff] }
 0x91b   :  { %5515 = vmatprep.subr.mxu1 %v3969_v49  ;;  %5445 = vmatpush1.msra.mxu0 %v3456_v50  ;;  %v4273_v49 = vld [vmem:[#allocation22 + $0x3b38] sm:$0xff]  ;;  %v3760_v50 = vld [vmem:[#allocation22 + $0x2b30] sm:$0xff] }
 0x91c   :  { %5516 = vmatpush1.msra.mxu1 %v3968_v52  ;;  %5446 = vmatprep.subr.mxu0 %v3441_v53  ;;  %v4272_v52 = vld [vmem:[#allocation22 + $0x3b30] sm:$0xff]  ;;  %v3745_v53 = vld [vmem:[#allocation22 + $0x2ab8] sm:$0xff] }
 0x91d   :  { %5517 = vmatprep.subr.mxu1 %v3953_v55  ;;  %5447 = vmatpush1.msra.mxu0 %v3440_v33  ;;  %v4257_v55 = vld [vmem:[#allocation22 + $0x3ab8] sm:$0xff]  ;;  %v3744_v33 = vld [vmem:[#allocation22 + $0x2ab0] sm:$0xff] }
 0x91e   :  { %5518 = vmatpush1.msra.mxu1 %v3952_v17  ;;  %5448 = vmatprep.subr.mxu0 %v3425_v47  ;;  %v4256_v17 = vld [vmem:[#allocation22 + $0x3ab0] sm:$0xff]  ;;  %v3729_v47 = vld [vmem:[#allocation22 + $0x2a38] sm:$0xff] }
 0x91f   :  { %5519 = vmatprep.subr.mxu1 %v3937_v30  ;;  %5449 = vmatpush1.msra.mxu0 %v3424_v51  ;;  %v4241_v30 = vld [vmem:[#allocation22 + $0x3a38] sm:$0xff]  ;;  %v3728_v51 = vld [vmem:[#allocation22 + $0x2a30] sm:$0xff] }
 0x920   :  { %5520 = vmatpush1.msra.mxu1 %v3936_v38  ;;  %5450 = vmatprep.subr.mxu0 %v3409_v39  ;;  %v4240_v38 = vld [vmem:[#allocation22 + $0x3a30] sm:$0xff]  ;;  %v3713_v39 = vld [vmem:[#allocation22 + $0x29b8] sm:$0xff] }
 0x921   :  { %5521 = vmatprep.subr.mxu1 %v3921_v56  ;;  %5451 = vmatpush1.msra.mxu0 %v3408_v31  ;;  %v4225_v56 = vld [vmem:[#allocation22 + $0x39b8] sm:$0xff]  ;;  %v3712_v31 = vld [vmem:[#allocation22 + $0x29b0] sm:$0xff] }
 0x922   :  { %5522 = vmatpush1.msra.mxu1 %v3920_v57  ;;  %5452 = vmatprep.subr.mxu0 %v3905_v41  ;;  %v4224_v57 = vld [vmem:[#allocation22 + $0x39b0] sm:$0xff]  ;;  %v3697_v41 = vld [vmem:[#allocation22 + $0x2938] sm:$0xff] }
 0x923   :  { %5523 = vmatprep.subr.mxu1 %v4417_v42  ;;  %5453 = vmatpush2.msra.mxu0 %v3904_v63  ;;  %v4209_v42 = vld [vmem:[#allocation22 + $0x3938] sm:$0xff]  ;;  %v3696_v63 = vld [vmem:[#allocation22 + $0x2930] sm:$0xff] }
 0x924   :  { %5524 = vmatpush2.msra.mxu1 %v4416_v2  ;;  %5454 = vmatprep.subr.mxu0 %v3889_v6  ;;  %v4208_v2 = vld [vmem:[#allocation22 + $0x3930] sm:$0xff]  ;;  %v3681_v6 = vld [vmem:[#allocation22 + $0x28b8] sm:$0xff] }
 0x925   :  { %5525 = vmatprep.subr.mxu1 %v4401_v8  ;;  %5455 = vmatpush2.msra.mxu0 %v3888_v45  ;;  %v4193_v8 = vld [vmem:[#allocation22 + $0x38b8] sm:$0xff]  ;;  %v3680_v45 = vld [vmem:[#allocation22 + $0x28b0] sm:$0xff] }
 0x926   :  { %5526 = vmatpush2.msra.mxu1 %v4400_v10  ;;  %5456 = vmatprep.subr.mxu0 %v3873_v60  ;;  %v4192_v10 = vld [vmem:[#allocation22 + $0x38b0] sm:$0xff]  ;;  %v3665_v60 = vld [vmem:[#allocation22 + $0x2838] sm:$0xff] }
 0x927   :  { %5527 = vmatprep.subr.mxu1 %v4385_v1  ;;  %5457 = vmatpush2.msra.mxu0 %v3872_v3  ;;  %v4177_v1 = vld [vmem:[#allocation22 + $0x3838] sm:$0xff]  ;;  %v3664_v3 = vld [vmem:[#allocation22 + $0x2830] sm:$0xff] }
 0x928   :  { %5528 = vmatpush2.msra.mxu1 %v4384_v5  ;;  %5458 = vmatprep.subr.mxu0 %v3857_v14  ;;  %v4176_v5 = vld [vmem:[#allocation22 + $0x3830] sm:$0xff]  ;;  %v2627_v14 = vld [vmem:[#allocation22 + $0x7c8] sm:$0xff] }
 0x929   :  { %5529 = vmatprep.subr.mxu1 %v4369_v15  ;;  %5459 = vmatpush2.msra.mxu0 %v3856_v35  ;;  %v3139_v15 = vld [vmem:[#allocation22 + $0x17c8] sm:$0xff]  ;;  %v2626_v35 = vld [vmem:[#allocation22 + $0x7c0] sm:$0xff] }
 0x92a   :  { %5530 = vmatpush2.msra.mxu1 %v4368_v40  ;;  %5460 = vmatprep.subr.mxu0 %v3841_v37  ;;  %v3138_v40 = vld [vmem:[#allocation22 + $0x17c0] sm:$0xff]  ;;  %v2611_v37 = vld [vmem:[#allocation22 + $0x748] sm:$0xff] }
 0x92b   :  { %5531 = vmatprep.subr.mxu1 %v4353_v18  ;;  %5461 = vmatpush2.msra.mxu0 %v3840_v19  ;;  %v3123_v18 = vld [vmem:[#allocation22 + $0x1748] sm:$0xff]  ;;  %v2610_v19 = vld [vmem:[#allocation22 + $0x740] sm:$0xff] }
 0x92c   :  { %5532 = vmatpush2.msra.mxu1 %v4352_v20  ;;  %5462 = vmatprep.subr.mxu0 %v3825_v21  ;;  %v3122_v20 = vld [vmem:[#allocation22 + $0x1740] sm:$0xff]  ;;  %v2595_v21 = vld [vmem:[#allocation22 + $0x6c8] sm:$0xff] }
 0x92d   :  { %5533 = vmatprep.subr.mxu1 %v4337_v22  ;;  %5463 = vmatpush2.msra.mxu0 %v3824_v23  ;;  %v3107_v22 = vld [vmem:[#allocation22 + $0x16c8] sm:$0xff]  ;;  %v2594_v23 = vld [vmem:[#allocation22 + $0x6c0] sm:$0xff] }
 0x92e   :  { %5534 = vmatpush2.msra.mxu1 %v4336_v24  ;;  %5464 = vmatprep.subr.mxu0 %v3809_v25  ;;  %v3106_v24 = vld [vmem:[#allocation22 + $0x16c0] sm:$0xff]  ;;  %v2579_v25 = vld [vmem:[#allocation22 + $0x648] sm:$0xff] }
 0x92f   :  { %5535 = vmatprep.subr.mxu1 %v4321_v28  ;;  %5465 = vmatpush2.msra.mxu0 %v3808_v29  ;;  %v3091_v28 = vld [vmem:[#allocation22 + $0x1648] sm:$0xff]  ;;  %v2578_v29 = vld [vmem:[#allocation22 + $0x640] sm:$0xff] }
 0x930   :  { %5536 = vmatpush2.msra.mxu1 %v4320_v36  ;;  %5466 = vmatprep.subr.mxu0 %v3793_v4  ;;  %v3090_v36 = vld [vmem:[#allocation22 + $0x1640] sm:$0xff]  ;;  %v2563_v4 = vld [vmem:[#allocation22 + $0x5c8] sm:$0xff] }
 0x931   :  { %5537 = vmatprep.subr.mxu1 %v4305_v43  ;;  %5467 = vmatpush2.msra.mxu0 %v3792_v46  ;;  %v3075_v43 = vld [vmem:[#allocation22 + $0x15c8] sm:$0xff]  ;;  %v2562_v46 = vld [vmem:[#allocation22 + $0x5c0] sm:$0xff] }
 0x932   :  { %5538 = vmatpush2.msra.mxu1 %v4304_v48  ;;  %5468 = vmatprep.subr.mxu0 %v3777_v34  ;;  %v3074_v48 = vld [vmem:[#allocation22 + $0x15c0] sm:$0xff]  ;;  %v2547_v34 = vld [vmem:[#allocation22 + $0x548] sm:$0xff] }
 0x933   :  { %5539 = vmatprep.subr.mxu1 %v4289_v12  ;;  %5469 = vmatpush2.msra.mxu0 %v3776_v54  ;;  %v3059_v12 = vld [vmem:[#allocation22 + $0x1548] sm:$0xff]  ;;  %v2546_v54 = vld [vmem:[#allocation22 + $0x540] sm:$0xff] }
 0x934   :  { %5540 = vmatpush2.msra.mxu1 %v4288_v44  ;;  %5470 = vmatprep.subr.mxu0 %v3761_v11  ;;  %v3058_v44 = vld [vmem:[#allocation22 + $0x1540] sm:$0xff]  ;;  %v2531_v11 = vld [vmem:[#allocation22 + $0x4c8] sm:$0xff] }
 0x935   :  { %5541 = vmatprep.subr.mxu1 %v4273_v49  ;;  %5471 = vmatpush2.msra.mxu0 %v3760_v50  ;;  %v3043_v49 = vld [vmem:[#allocation22 + $0x14c8] sm:$0xff]  ;;  %v2530_v50 = vld [vmem:[#allocation22 + $0x4c0] sm:$0xff] }
 0x936   :  { %5542 = vmatpush2.msra.mxu1 %v4272_v52  ;;  %5472 = vmatprep.subr.mxu0 %v3745_v53  ;;  %v3042_v52 = vld [vmem:[#allocation22 + $0x14c0] sm:$0xff]  ;;  %v2515_v53 = vld [vmem:[#allocation22 + $0x448] sm:$0xff] }
 0x937   :  { %5543 = vmatprep.subr.mxu1 %v4257_v55  ;;  %5473 = vmatpush2.msra.mxu0 %v3744_v33  ;;  %v3027_v55 = vld [vmem:[#allocation22 + $0x1448] sm:$0xff]  ;;  %v2514_v33 = vld [vmem:[#allocation22 + $0x440] sm:$0xff] }
 0x938   :  { %5544 = vmatpush2.msra.mxu1 %v4256_v17  ;;  %5474 = vmatprep.subr.mxu0 %v3729_v47  ;;  %v3026_v17 = vld [vmem:[#allocation22 + $0x1440] sm:$0xff]  ;;  %v2499_v47 = vld [vmem:[#allocation22 + $0x3c8] sm:$0xff] }
 0x939   :  { %5545 = vmatprep.subr.mxu1 %v4241_v30  ;;  %5475 = vmatpush2.msra.mxu0 %v3728_v51  ;;  %v3011_v30 = vld [vmem:[#allocation22 + $0x13c8] sm:$0xff]  ;;  %v2498_v51 = vld [vmem:[#allocation22 + $0x3c0] sm:$0xff] }
 0x93a   :  { %5546 = vmatpush2.msra.mxu1 %v4240_v38  ;;  %5476 = vmatprep.subr.mxu0 %v3713_v39  ;;  %v3010_v38 = vld [vmem:[#allocation22 + $0x13c0] sm:$0xff]  ;;  %v2483_v39 = vld [vmem:[#allocation22 + $0x348] sm:$0xff] }
 0x93b   :  { %5547 = vmatprep.subr.mxu1 %v4225_v56  ;;  %5477 = vmatpush2.msra.mxu0 %v3712_v31  ;;  %v2995_v56 = vld [vmem:[#allocation22 + $0x1348] sm:$0xff]  ;;  %v2482_v31 = vld [vmem:[#allocation22 + $0x340] sm:$0xff] }
 0x93c   :  { %5548 = vmatpush2.msra.mxu1 %v4224_v57  ;;  %5478 = vmatprep.subr.mxu0 %v3697_v41  ;;  %v2994_v57 = vld [vmem:[#allocation22 + $0x1340] sm:$0xff]  ;;  %v2467_v41 = vld [vmem:[#allocation22 + $0x2c8] sm:$0xff] }
 0x93d   :  { %5549 = vmatprep.subr.mxu1 %v4209_v42  ;;  %5479 = vmatpush2.msra.mxu0 %v3696_v63  ;;  %v2979_v42 = vld [vmem:[#allocation22 + $0x12c8] sm:$0xff]  ;;  %v2466_v63 = vld [vmem:[#allocation22 + $0x2c0] sm:$0xff] }
 0x93e   :  { %5550 = vmatpush2.msra.mxu1 %v4208_v2  ;;  %5480 = vmatprep.subr.mxu0 %v3681_v6  ;;  %v2978_v2 = vld [vmem:[#allocation22 + $0x12c0] sm:$0xff]  ;;  %v2451_v6 = vld [vmem:[#allocation22 + $0x248] sm:$0xff] }
 0x93f   :  { %5551 = vmatprep.subr.mxu1 %v4193_v8  ;;  %5481 = vmatpush2.msra.mxu0 %v3680_v45  ;;  %v2963_v8 = vld [vmem:[#allocation22 + $0x1248] sm:$0xff]  ;;  %v2450_v45 = vld [vmem:[#allocation22 + $0x240] sm:$0xff] }
 0x940   :  { %5552 = vmatpush2.msra.mxu1 %v4192_v10  ;;  %5482 = vmatprep.subr.mxu0 %v3665_v60  ;;  %v2962_v10 = vld [vmem:[#allocation22 + $0x1240] sm:$0xff]  ;;  %v2435_v60 = vld [vmem:[#allocation22 + $0x1c8] sm:$0xff] }
 0x941   :  { %5553 = vmatprep.subr.mxu1 %v4177_v1  ;;  %5483 = vmatpush2.msra.mxu0 %v3664_v3  ;;  %v2947_v1 = vld [vmem:[#allocation22 + $0x11c8] sm:$0xff]  ;;  %v2434_v3 = vld [vmem:[#allocation22 + $0x1c0] sm:$0xff] }
 0x942   :  { %5554 = vmatpush2.msra.mxu1 %v4176_v5  ;;  %5485 = vmatmul.mubr.f32.vlgmr.msra.gmra.mxu0 %v9311_v26  ;;  %v2946_v5 = vld [vmem:[#allocation22 + $0x11c0] sm:$0xff] }
 0x943   :  { %5556 = vmatmul.mubr.f32.vlgmr.msra.gmra.mxu1 %v9315_v32  ;;  %5562 = vmatprep.subr.mxu0 %v2627_v14  ;;  %v2419_v14 = vld [vmem:[#allocation22 + $0x148] sm:$0xff] }
 0x944   :  { %5633 = vmatprep.subr.mxu1 %v3139_v15  ;;  %5563 = vmatpush1.msra.mxu0 %v2626_v35  ;;  %v2931_v15 = vld [vmem:[#allocation22 + $0x1148] sm:$0xff]  ;;  %v2418_v35 = vld [vmem:[#allocation22 + $0x140] sm:$0xff] }
 0x945   :  { %5626 = vmatprep.mubr.f32.mxu0 %v9288_v27  ;;  %5634 = vmatpush1.msra.mxu1 %v3138_v40  ;;  %v2930_v40 = vld [vmem:[#allocation22 + $0x1140] sm:$0xff] }
 0x946   :  { %5697 = vmatprep.mubr.f32.mxu1 %v9291_v59  ;;  %5564 = vmatprep.subr.mxu0 %v2611_v37  ;;  %v2403_v37 = vld [vmem:[#allocation22 + $0xc8] sm:$0xff] }
 0x947   :  { %5635 = vmatprep.subr.mxu1 %v3123_v18  ;;  %5565 = vmatpush1.msra.mxu0 %v2610_v19  ;;  %v2915_v18 = vld [vmem:[#allocation22 + $0x10c8] sm:$0xff]  ;;  %v2402_v19 = vld [vmem:[#allocation22 + $0xc0] sm:$0xff] }
 0x948   :  { %5636 = vmatpush1.msra.mxu1 %v3122_v20  ;;  %5566 = vmatprep.subr.mxu0 %v2595_v21  ;;  %v2914_v20 = vld [vmem:[#allocation22 + $0x10c0] sm:$0xff]  ;;  %v2387_v21 = vld [vmem:[#allocation22 + $0x48] sm:$0xff] }
 0x949   :  { %5637 = vmatprep.subr.mxu1 %v3107_v22  ;;  %5567 = vmatpush1.msra.mxu0 %v2594_v23  ;;  %v2899_v22 = vld [vmem:[#allocation22 + $0x1048] sm:$0xff]  ;;  %v2386_v23 = vld [vmem:[#allocation22 + $0x40] sm:$0xff] }
 0x94a   :  { %5638 = vmatpush1.msra.mxu1 %v3106_v24  ;;  %5568 = vmatprep.subr.mxu0 %v2579_v25  ;;  %v2898_v24 = vld [vmem:[#allocation22 + $0x1040] sm:$0xff]  ;;  %v2883_v25 = vld [vmem:[#allocation22 + $0xfc8] sm:$0xff] }
 0x94b   :  { %5639 = vmatprep.subr.mxu1 %v3091_v28  ;;  %5569 = vmatpush1.msra.mxu0 %v2578_v29  ;;  %v3395_v28 = vld [vmem:[#allocation22 + $0x1fc8] sm:$0xff]  ;;  %v2882_v29 = vld [vmem:[#allocation22 + $0xfc0] sm:$0xff] }
 0x94c   :  { %5640 = vmatpush1.msra.mxu1 %v3090_v36  ;;  %5570 = vmatprep.subr.mxu0 %v2563_v4  ;;  %v3394_v36 = vld [vmem:[#allocation22 + $0x1fc0] sm:$0xff]  ;;  %v2867_v4 = vld [vmem:[#allocation22 + $0xf48] sm:$0xff] }
 0x94d   :  { %5641 = vmatprep.subr.mxu1 %v3075_v43  ;;  %5571 = vmatpush1.msra.mxu0 %v2562_v46  ;;  %v3379_v43 = vld [vmem:[#allocation22 + $0x1f48] sm:$0xff]  ;;  %v2866_v46 = vld [vmem:[#allocation22 + $0xf40] sm:$0xff] }
 0x94e   :  { %5642 = vmatpush1.msra.mxu1 %v3074_v48  ;;  %5572 = vmatprep.subr.mxu0 %v2547_v34  ;;  %v3378_v48 = vld [vmem:[#allocation22 + $0x1f40] sm:$0xff]  ;;  %v2851_v34 = vld [vmem:[#allocation22 + $0xec8] sm:$0xff] }
 0x94f   :  { %5643 = vmatprep.subr.mxu1 %v3059_v12  ;;  %5573 = vmatpush1.msra.mxu0 %v2546_v54  ;;  %v3363_v12 = vld [vmem:[#allocation22 + $0x1ec8] sm:$0xff]  ;;  %v2850_v54 = vld [vmem:[#allocation22 + $0xec0] sm:$0xff] }
 0x950   :  { %5644 = vmatpush1.msra.mxu1 %v3058_v44  ;;  %5574 = vmatprep.subr.mxu0 %v2531_v11  ;;  %v3362_v44 = vld [vmem:[#allocation22 + $0x1ec0] sm:$0xff]  ;;  %v2835_v11 = vld [vmem:[#allocation22 + $0xe48] sm:$0xff] }
 0x951   :  { %5645 = vmatprep.subr.mxu1 %v3043_v49  ;;  %5575 = vmatpush1.msra.mxu0 %v2530_v50  ;;  %v3347_v49 = vld [vmem:[#allocation22 + $0x1e48] sm:$0xff]  ;;  %v2834_v50 = vld [vmem:[#allocation22 + $0xe40] sm:$0xff] }
 0x952   :  { %5646 = vmatpush1.msra.mxu1 %v3042_v52  ;;  %5576 = vmatprep.subr.mxu0 %v2515_v53  ;;  %v3346_v52 = vld [vmem:[#allocation22 + $0x1e40] sm:$0xff]  ;;  %v2819_v53 = vld [vmem:[#allocation22 + $0xdc8] sm:$0xff] }
 0x953   :  { %5647 = vmatprep.subr.mxu1 %v3027_v55  ;;  %5577 = vmatpush1.msra.mxu0 %v2514_v33  ;;  %v3331_v55 = vld [vmem:[#allocation22 + $0x1dc8] sm:$0xff]  ;;  %v2818_v33 = vld [vmem:[#allocation22 + $0xdc0] sm:$0xff] }
 0x954   :  { %5648 = vmatpush1.msra.mxu1 %v3026_v17  ;;  %5578 = vmatprep.subr.mxu0 %v2499_v47  ;;  %v3330_v17 = vld [vmem:[#allocation22 + $0x1dc0] sm:$0xff]  ;;  %v2803_v47 = vld [vmem:[#allocation22 + $0xd48] sm:$0xff] }
 0x955   :  { %5649 = vmatprep.subr.mxu1 %v3011_v30  ;;  %5579 = vmatpush1.msra.mxu0 %v2498_v51  ;;  %v3315_v30 = vld [vmem:[#allocation22 + $0x1d48] sm:$0xff]  ;;  %v2802_v51 = vld [vmem:[#allocation22 + $0xd40] sm:$0xff] }
 0x956   :  { %5650 = vmatpush1.msra.mxu1 %v3010_v38  ;;  %5580 = vmatprep.subr.mxu0 %v2483_v39  ;;  %v3314_v38 = vld [vmem:[#allocation22 + $0x1d40] sm:$0xff]  ;;  %v2787_v39 = vld [vmem:[#allocation22 + $0xcc8] sm:$0xff] }
 0x957   :  { %5651 = vmatprep.subr.mxu1 %v2995_v56  ;;  %5581 = vmatpush1.msra.mxu0 %v2482_v31  ;;  %v3299_v56 = vld [vmem:[#allocation22 + $0x1cc8] sm:$0xff]  ;;  %v2786_v31 = vld [vmem:[#allocation22 + $0xcc0] sm:$0xff] }
 0x958   :  { %5652 = vmatpush1.msra.mxu1 %v2994_v57  ;;  %5582 = vmatprep.subr.mxu0 %v2467_v41  ;;  %v3298_v57 = vld [vmem:[#allocation22 + $0x1cc0] sm:$0xff]  ;;  %v2771_v41 = vld [vmem:[#allocation22 + $0xc48] sm:$0xff] }
 0x959   :  { %5653 = vmatprep.subr.mxu1 %v2979_v42  ;;  %5583 = vmatpush1.msra.mxu0 %v2466_v63  ;;  %v3283_v42 = vld [vmem:[#allocation22 + $0x1c48] sm:$0xff]  ;;  %v2770_v63 = vld [vmem:[#allocation22 + $0xc40] sm:$0xff] }
 0x95a   :  { %5654 = vmatpush1.msra.mxu1 %v2978_v2  ;;  %5584 = vmatprep.subr.mxu0 %v2451_v6  ;;  %v3282_v2 = vld [vmem:[#allocation22 + $0x1c40] sm:$0xff]  ;;  %v2755_v6 = vld [vmem:[#allocation22 + $0xbc8] sm:$0xff] }
 0x95b   :  { %5655 = vmatprep.subr.mxu1 %v2963_v8  ;;  %5585 = vmatpush1.msra.mxu0 %v2450_v45  ;;  %v3267_v8 = vld [vmem:[#allocation22 + $0x1bc8] sm:$0xff]  ;;  %v2754_v45 = vld [vmem:[#allocation22 + $0xbc0] sm:$0xff] }
 0x95c   :  { %5656 = vmatpush1.msra.mxu1 %v2962_v10  ;;  %5586 = vmatprep.subr.mxu0 %v2435_v60  ;;  %v3266_v10 = vld [vmem:[#allocation22 + $0x1bc0] sm:$0xff]  ;;  %v2739_v60 = vld [vmem:[#allocation22 + $0xb48] sm:$0xff] }
 0x95d   :  { %5657 = vmatprep.subr.mxu1 %v2947_v1  ;;  %5587 = vmatpush1.msra.mxu0 %v2434_v3  ;;  %v3251_v1 = vld [vmem:[#allocation22 + $0x1b48] sm:$0xff]  ;;  %v2738_v3 = vld [vmem:[#allocation22 + $0xb40] sm:$0xff] }
 0x95e   :  { %5658 = vmatpush1.msra.mxu1 %v2946_v5  ;;  %5588 = vmatprep.subr.mxu0 %v2419_v14  ;;  %v3250_v5 = vld [vmem:[#allocation22 + $0x1b40] sm:$0xff]  ;;  %v2723_v14 = vld [vmem:[#allocation22 + $0xac8] sm:$0xff] }
 0x95f   :  { %5659 = vmatprep.subr.mxu1 %v2931_v15  ;;  %5589 = vmatpush1.msra.mxu0 %v2418_v35  ;;  %v3235_v15 = vld [vmem:[#allocation22 + $0x1ac8] sm:$0xff]  ;;  %v2722_v35 = vld [vmem:[#allocation22 + $0xac0] sm:$0xff] }
 0x960   :  { %5660 = vmatpush1.msra.mxu1 %v2930_v40  ;;  %5590 = vmatprep.subr.mxu0 %v2403_v37  ;;  %v3234_v40 = vld [vmem:[#allocation22 + $0x1ac0] sm:$0xff]  ;;  %v2707_v37 = vld [vmem:[#allocation22 + $0xa48] sm:$0xff] }
 0x961   :  { %5661 = vmatprep.subr.mxu1 %v2915_v18  ;;  %5591 = vmatpush1.msra.mxu0 %v2402_v19  ;;  %v3219_v18 = vld [vmem:[#allocation22 + $0x1a48] sm:$0xff]  ;;  %v2706_v19 = vld [vmem:[#allocation22 + $0xa40] sm:$0xff] }
 0x962   :  { %5662 = vmatpush1.msra.mxu1 %v2914_v20  ;;  %5592 = vmatprep.subr.mxu0 %v2387_v21  ;;  %v3218_v20 = vld [vmem:[#allocation22 + $0x1a40] sm:$0xff]  ;;  %v2691_v21 = vld [vmem:[#allocation22 + $0x9c8] sm:$0xff] }
 0x963   :  { %5663 = vmatprep.subr.mxu1 %v2899_v22  ;;  %5593 = vmatpush1.msra.mxu0 %v2386_v23  ;;  %v3203_v22 = vld [vmem:[#allocation22 + $0x19c8] sm:$0xff]  ;;  %v2690_v23 = vld [vmem:[#allocation22 + $0x9c0] sm:$0xff] }
 0x964   :  { %5664 = vmatpush1.msra.mxu1 %v2898_v24  ;;  %5594 = vmatprep.subr.mxu0 %v2883_v25  ;;  %v3202_v24 = vld [vmem:[#allocation22 + $0x19c0] sm:$0xff]  ;;  %v2675_v25 = vld [vmem:[#allocation22 + $0x948] sm:$0xff] }
 0x965   :  { %5665 = vmatprep.subr.mxu1 %v3395_v28  ;;  %5595 = vmatpush2.msra.mxu0 %v2882_v29  ;;  %v3187_v28 = vld [vmem:[#allocation22 + $0x1948] sm:$0xff]  ;;  %v2674_v29 = vld [vmem:[#allocation22 + $0x940] sm:$0xff] }
 0x966   :  { %5666 = vmatpush2.msra.mxu1 %v3394_v36  ;;  %5596 = vmatprep.subr.mxu0 %v2867_v4  ;;  %v3186_v36 = vld [vmem:[#allocation22 + $0x1940] sm:$0xff]  ;;  %v2659_v4 = vld [vmem:[#allocation22 + $0x8c8] sm:$0xff] }
 0x967   :  { %5667 = vmatprep.subr.mxu1 %v3379_v43  ;;  %5597 = vmatpush2.msra.mxu0 %v2866_v46  ;;  %v3171_v43 = vld [vmem:[#allocation22 + $0x18c8] sm:$0xff]  ;;  %v2658_v46 = vld [vmem:[#allocation22 + $0x8c0] sm:$0xff] }
 0x968   :  { %5668 = vmatpush2.msra.mxu1 %v3378_v48  ;;  %5598 = vmatprep.subr.mxu0 %v2851_v34  ;;  %v3170_v48 = vld [vmem:[#allocation22 + $0x18c0] sm:$0xff]  ;;  %v2643_v34 = vld [vmem:[#allocation22 + $0x848] sm:$0xff] }
 0x969   :  { %5669 = vmatprep.subr.mxu1 %v3363_v12  ;;  %5599 = vmatpush2.msra.mxu0 %v2850_v54  ;;  %v3155_v12 = vld [vmem:[#allocation22 + $0x1848] sm:$0xff]  ;;  %v2642_v54 = vld [vmem:[#allocation22 + $0x840] sm:$0xff] }
 0x96a   :  { %5670 = vmatpush2.msra.mxu1 %v3362_v44  ;;  %5600 = vmatprep.subr.mxu0 %v2835_v11  ;;  %v3154_v44 = vld [vmem:[#allocation22 + $0x1840] sm:$0xff]  ;;  %v3651_v11 = vld [vmem:[#allocation22 + $0x27c8] sm:$0xff] }
 0x96b   :  { %5671 = vmatprep.subr.mxu1 %v3347_v49  ;;  %5601 = vmatpush2.msra.mxu0 %v2834_v50  ;;  %v4163_v49 = vld [vmem:[#allocation22 + $0x37c8] sm:$0xff]  ;;  %v3650_v50 = vld [vmem:[#allocation22 + $0x27c0] sm:$0xff] }
 0x96c   :  { %5672 = vmatpush2.msra.mxu1 %v3346_v52  ;;  %5602 = vmatprep.subr.mxu0 %v2819_v53  ;;  %v4162_v52 = vld [vmem:[#allocation22 + $0x37c0] sm:$0xff]  ;;  %v3635_v53 = vld [vmem:[#allocation22 + $0x2748] sm:$0xff] }
 0x96d   :  { %5673 = vmatprep.subr.mxu1 %v3331_v55  ;;  %5603 = vmatpush2.msra.mxu0 %v2818_v33  ;;  %v4147_v55 = vld [vmem:[#allocation22 + $0x3748] sm:$0xff]  ;;  %v3634_v33 = vld [vmem:[#allocation22 + $0x2740] sm:$0xff] }
 0x96e   :  { %5674 = vmatpush2.msra.mxu1 %v3330_v17  ;;  %5604 = vmatprep.subr.mxu0 %v2803_v47  ;;  %v4146_v17 = vld [vmem:[#allocation22 + $0x3740] sm:$0xff]  ;;  %v3619_v47 = vld [vmem:[#allocation22 + $0x26c8] sm:$0xff] }
 0x96f   :  { %5675 = vmatprep.subr.mxu1 %v3315_v30  ;;  %5605 = vmatpush2.msra.mxu0 %v2802_v51  ;;  %v4131_v30 = vld [vmem:[#allocation22 + $0x36c8] sm:$0xff]  ;;  %v3618_v51 = vld [vmem:[#allocation22 + $0x26c0] sm:$0xff] }
 0x970   :  { %5676 = vmatpush2.msra.mxu1 %v3314_v38  ;;  %5606 = vmatprep.subr.mxu0 %v2787_v39  ;;  %v4130_v38 = vld [vmem:[#allocation22 + $0x36c0] sm:$0xff]  ;;  %v3603_v39 = vld [vmem:[#allocation22 + $0x2648] sm:$0xff] }
 0x971   :  { %5677 = vmatprep.subr.mxu1 %v3299_v56  ;;  %5607 = vmatpush2.msra.mxu0 %v2786_v31  ;;  %v4115_v56 = vld [vmem:[#allocation22 + $0x3648] sm:$0xff]  ;;  %v3602_v31 = vld [vmem:[#allocation22 + $0x2640] sm:$0xff] }
 0x972   :  { %5678 = vmatpush2.msra.mxu1 %v3298_v57  ;;  %5608 = vmatprep.subr.mxu0 %v2771_v41  ;;  %v4114_v57 = vld [vmem:[#allocation22 + $0x3640] sm:$0xff]  ;;  %v3587_v41 = vld [vmem:[#allocation22 + $0x25c8] sm:$0xff] }
 0x973   :  { %5679 = vmatprep.subr.mxu1 %v3283_v42  ;;  %5609 = vmatpush2.msra.mxu0 %v2770_v63  ;;  %v4099_v42 = vld [vmem:[#allocation22 + $0x35c8] sm:$0xff]  ;;  %v3586_v63 = vld [vmem:[#allocation22 + $0x25c0] sm:$0xff] }
 0x974   :  { %5680 = vmatpush2.msra.mxu1 %v3282_v2  ;;  %5610 = vmatprep.subr.mxu0 %v2755_v6  ;;  %v4098_v2 = vld [vmem:[#allocation22 + $0x35c0] sm:$0xff]  ;;  %v3571_v6 = vld [vmem:[#allocation22 + $0x2548] sm:$0xff] }
 0x975   :  { %5681 = vmatprep.subr.mxu1 %v3267_v8  ;;  %5611 = vmatpush2.msra.mxu0 %v2754_v45  ;;  %v4083_v8 = vld [vmem:[#allocation22 + $0x3548] sm:$0xff]  ;;  %v3570_v45 = vld [vmem:[#allocation22 + $0x2540] sm:$0xff] }
 0x976   :  { %5682 = vmatpush2.msra.mxu1 %v3266_v10  ;;  %5612 = vmatprep.subr.mxu0 %v2739_v60  ;;  %v4082_v10 = vld [vmem:[#allocation22 + $0x3540] sm:$0xff]  ;;  %v3555_v60 = vld [vmem:[#allocation22 + $0x24c8] sm:$0xff] }
 0x977   :  { %5683 = vmatprep.subr.mxu1 %v3251_v1  ;;  %5613 = vmatpush2.msra.mxu0 %v2738_v3  ;;  %v4067_v1 = vld [vmem:[#allocation22 + $0x34c8] sm:$0xff]  ;;  %v3554_v3 = vld [vmem:[#allocation22 + $0x24c0] sm:$0xff] }
 0x978   :  { %5684 = vmatpush2.msra.mxu1 %v3250_v5  ;;  %5614 = vmatprep.subr.mxu0 %v2723_v14  ;;  %v4066_v5 = vld [vmem:[#allocation22 + $0x34c0] sm:$0xff]  ;;  %v3539_v14 = vld [vmem:[#allocation22 + $0x2448] sm:$0xff] }
 0x979   :  { %5685 = vmatprep.subr.mxu1 %v3235_v15  ;;  %5615 = vmatpush2.msra.mxu0 %v2722_v35  ;;  %v4051_v15 = vld [vmem:[#allocation22 + $0x3448] sm:$0xff]  ;;  %v3538_v35 = vld [vmem:[#allocation22 + $0x2440] sm:$0xff] }
 0x97a   :  { %5686 = vmatpush2.msra.mxu1 %v3234_v40  ;;  %5616 = vmatprep.subr.mxu0 %v2707_v37  ;;  %v4050_v40 = vld [vmem:[#allocation22 + $0x3440] sm:$0xff]  ;;  %v3523_v37 = vld [vmem:[#allocation22 + $0x23c8] sm:$0xff] }
 0x97b   :  { %5687 = vmatprep.subr.mxu1 %v3219_v18  ;;  %5617 = vmatpush2.msra.mxu0 %v2706_v19  ;;  %v4035_v18 = vld [vmem:[#allocation22 + $0x33c8] sm:$0xff]  ;;  %v3522_v19 = vld [vmem:[#allocation22 + $0x23c0] sm:$0xff] }
 0x97c   :  { %5688 = vmatpush2.msra.mxu1 %v3218_v20  ;;  %5618 = vmatprep.subr.mxu0 %v2691_v21  ;;  %v4034_v20 = vld [vmem:[#allocation22 + $0x33c0] sm:$0xff]  ;;  %v3507_v21 = vld [vmem:[#allocation22 + $0x2348] sm:$0xff] }
 0x97d   :  { %5689 = vmatprep.subr.mxu1 %v3203_v22  ;;  %5619 = vmatpush2.msra.mxu0 %v2690_v23  ;;  %v4019_v22 = vld [vmem:[#allocation22 + $0x3348] sm:$0xff]  ;;  %v3506_v23 = vld [vmem:[#allocation22 + $0x2340] sm:$0xff] }
 0x97e   :  { %5690 = vmatpush2.msra.mxu1 %v3202_v24  ;;  %5620 = vmatprep.subr.mxu0 %v2675_v25  ;;  %v4018_v24 = vld [vmem:[#allocation22 + $0x3340] sm:$0xff]  ;;  %v3491_v25 = vld [vmem:[#allocation22 + $0x22c8] sm:$0xff] }
 0x97f   :  { %5691 = vmatprep.subr.mxu1 %v3187_v28  ;;  %5621 = vmatpush2.msra.mxu0 %v2674_v29  ;;  %v4003_v28 = vld [vmem:[#allocation22 + $0x32c8] sm:$0xff]  ;;  %v3490_v29 = vld [vmem:[#allocation22 + $0x22c0] sm:$0xff] }
 0x980   :  { %5692 = vmatpush2.msra.mxu1 %v3186_v36  ;;  %5622 = vmatprep.subr.mxu0 %v2659_v4  ;;  %v4002_v36 = vld [vmem:[#allocation22 + $0x32c0] sm:$0xff]  ;;  %v3475_v4 = vld [vmem:[#allocation22 + $0x2248] sm:$0xff] }
 0x981   :  { %5693 = vmatprep.subr.mxu1 %v3171_v43  ;;  %5623 = vmatpush2.msra.mxu0 %v2658_v46  ;;  %v3987_v43 = vld [vmem:[#allocation22 + $0x3248] sm:$0xff]  ;;  %v3474_v46 = vld [vmem:[#allocation22 + $0x2240] sm:$0xff] }
 0x982   :  { %5694 = vmatpush2.msra.mxu1 %v3170_v48  ;;  %5624 = vmatprep.subr.mxu0 %v2643_v34  ;;  %v3986_v48 = vld [vmem:[#allocation22 + $0x3240] sm:$0xff]  ;;  %v3459_v34 = vld [vmem:[#allocation22 + $0x21c8] sm:$0xff] }
 0x983   :  { %5695 = vmatprep.subr.mxu1 %v3155_v12  ;;  %5625 = vmatpush2.msra.mxu0 %v2642_v54  ;;  %v3971_v12 = vld [vmem:[#allocation22 + $0x31c8] sm:$0xff]  ;;  %v3458_v54 = vld [vmem:[#allocation22 + $0x21c0] sm:$0xff] }
 0x984   :  { %5696 = vmatpush2.msra.mxu1 %v3154_v44  ;;  %5627 = vmatmul.mubr.f32.vlgmr.msra.gmra.mxu0 %v9293_v62  ;;  %v3970_v44 = vld [vmem:[#allocation22 + $0x31c0] sm:$0xff] }
 0x985   :  { %5698 = vmatmul.mubr.f32.vlgmr.msra.gmra.mxu1 %v9297_v61  ;;  %5704 = vmatprep.subr.mxu0 %v3651_v11  ;;  %v3443_v11 = vld [vmem:[#allocation22 + $0x2148] sm:$0xff] }
 0x986   :  { %5775 = vmatprep.subr.mxu1 %v4163_v49  ;;  %5705 = vmatpush1.msra.mxu0 %v3650_v50  ;;  %v3955_v49 = vld [vmem:[#allocation22 + $0x3148] sm:$0xff]  ;;  %v3442_v50 = vld [vmem:[#allocation22 + $0x2140] sm:$0xff] }
 0x987   :  { %5768 = vmatprep.mubr.f32.mxu0 %v9300_v7  ;;  %5776 = vmatpush1.msra.mxu1 %v4162_v52  ;;  %v3954_v52 = vld [vmem:[#allocation22 + $0x3140] sm:$0xff] }
 0x988   :  { %5839 = vmatprep.mubr.f32.mxu1 %v9302_v9  ;;  %5706 = vmatprep.subr.mxu0 %v3635_v53  ;;  %v3427_v53 = vld [vmem:[#allocation22 + $0x20c8] sm:$0xff] }
 0x989   :  { %5777 = vmatprep.subr.mxu1 %v4147_v55  ;;  %5707 = vmatpush1.msra.mxu0 %v3634_v33  ;;  %v3939_v55 = vld [vmem:[#allocation22 + $0x30c8] sm:$0xff]  ;;  %v3426_v33 = vld [vmem:[#allocation22 + $0x20c0] sm:$0xff] }
 0x98a   :  { %5778 = vmatpush1.msra.mxu1 %v4146_v17  ;;  %5708 = vmatprep.subr.mxu0 %v3619_v47  ;;  %v3938_v17 = vld [vmem:[#allocation22 + $0x30c0] sm:$0xff]  ;;  %v3411_v47 = vld [vmem:[#allocation22 + $0x2048] sm:$0xff] }
 0x98b   :  { %5779 = vmatprep.subr.mxu1 %v4131_v30  ;;  %5709 = vmatpush1.msra.mxu0 %v3618_v51  ;;  %v3923_v30 = vld [vmem:[#allocation22 + $0x3048] sm:$0xff]  ;;  %v3410_v51 = vld [vmem:[#allocation22 + $0x2040] sm:$0xff] }
 0x98c   :  { %5780 = vmatpush1.msra.mxu1 %v4130_v38  ;;  %5710 = vmatprep.subr.mxu0 %v3603_v39  ;;  %v3922_v38 = vld [vmem:[#allocation22 + $0x3040] sm:$0xff]  ;;  %v3907_v39 = vld [vmem:[#allocation22 + $0x2fc8] sm:$0xff] }
 0x98d   :  { %5781 = vmatprep.subr.mxu1 %v4115_v56  ;;  %5711 = vmatpush1.msra.mxu0 %v3602_v31  ;;  %v4419_v56 = vld [vmem:[#allocation22 + $0x3fc8] sm:$0xff]  ;;  %v3906_v31 = vld [vmem:[#allocation22 + $0x2fc0] sm:$0xff] }
 0x98e   :  { %5782 = vmatpush1.msra.mxu1 %v4114_v57  ;;  %5712 = vmatprep.subr.mxu0 %v3587_v41  ;;  %v4418_v57 = vld [vmem:[#allocation22 + $0x3fc0] sm:$0xff]  ;;  %v3891_v41 = vld [vmem:[#allocation22 + $0x2f48] sm:$0xff] }
 0x98f   :  { %5783 = vmatprep.subr.mxu1 %v4099_v42  ;;  %5713 = vmatpush1.msra.mxu0 %v3586_v63  ;;  %v4403_v42 = vld [vmem:[#allocation22 + $0x3f48] sm:$0xff]  ;;  %v3890_v63 = vld [vmem:[#allocation22 + $0x2f40] sm:$0xff] }
 0x990   :  { %5784 = vmatpush1.msra.mxu1 %v4098_v2  ;;  %5714 = vmatprep.subr.mxu0 %v3571_v6  ;;  %v4402_v2 = vld [vmem:[#allocation22 + $0x3f40] sm:$0xff]  ;;  %v3875_v6 = vld [vmem:[#allocation22 + $0x2ec8] sm:$0xff] }
 0x991   :  { %5785 = vmatprep.subr.mxu1 %v4083_v8  ;;  %5715 = vmatpush1.msra.mxu0 %v3570_v45  ;;  %v4387_v8 = vld [vmem:[#allocation22 + $0x3ec8] sm:$0xff]  ;;  %v3874_v45 = vld [vmem:[#allocation22 + $0x2ec0] sm:$0xff] }
 0x992   :  { %5786 = vmatpush1.msra.mxu1 %v4082_v10  ;;  %5716 = vmatprep.subr.mxu0 %v3555_v60  ;;  %v4386_v10 = vld [vmem:[#allocation22 + $0x3ec0] sm:$0xff]  ;;  %v3859_v60 = vld [vmem:[#allocation22 + $0x2e48] sm:$0xff] }
 0x993   :  { %5787 = vmatprep.subr.mxu1 %v4067_v1  ;;  %5717 = vmatpush1.msra.mxu0 %v3554_v3  ;;  %v4371_v1 = vld [vmem:[#allocation22 + $0x3e48] sm:$0xff]  ;;  %v3858_v3 = vld [vmem:[#allocation22 + $0x2e40] sm:$0xff] }
 0x994   :  { %5788 = vmatpush1.msra.mxu1 %v4066_v5  ;;  %5718 = vmatprep.subr.mxu0 %v3539_v14  ;;  %v4370_v5 = vld [vmem:[#allocation22 + $0x3e40] sm:$0xff]  ;;  %v3843_v14 = vld [vmem:[#allocation22 + $0x2dc8] sm:$0xff] }
 0x995   :  { %5789 = vmatprep.subr.mxu1 %v4051_v15  ;;  %5719 = vmatpush1.msra.mxu0 %v3538_v35  ;;  %v4355_v15 = vld [vmem:[#allocation22 + $0x3dc8] sm:$0xff]  ;;  %v3842_v35 = vld [vmem:[#allocation22 + $0x2dc0] sm:$0xff] }
 0x996   :  { %5790 = vmatpush1.msra.mxu1 %v4050_v40  ;;  %5720 = vmatprep.subr.mxu0 %v3523_v37  ;;  %v4354_v40 = vld [vmem:[#allocation22 + $0x3dc0] sm:$0xff]  ;;  %v3827_v37 = vld [vmem:[#allocation22 + $0x2d48] sm:$0xff] }
 0x997   :  { %5791 = vmatprep.subr.mxu1 %v4035_v18  ;;  %5721 = vmatpush1.msra.mxu0 %v3522_v19  ;;  %v4339_v18 = vld [vmem:[#allocation22 + $0x3d48] sm:$0xff]  ;;  %v3826_v19 = vld [vmem:[#allocation22 + $0x2d40] sm:$0xff] }
 0x998   :  { %5792 = vmatpush1.msra.mxu1 %v4034_v20  ;;  %5722 = vmatprep.subr.mxu0 %v3507_v21  ;;  %v4338_v20 = vld [vmem:[#allocation22 + $0x3d40] sm:$0xff]  ;;  %v3811_v21 = vld [vmem:[#allocation22 + $0x2cc8] sm:$0xff] }
 0x999   :  { %5793 = vmatprep.subr.mxu1 %v4019_v22  ;;  %5723 = vmatpush1.msra.mxu0 %v3506_v23  ;;  %v4323_v22 = vld [vmem:[#allocation22 + $0x3cc8] sm:$0xff]  ;;  %v3810_v23 = vld [vmem:[#allocation22 + $0x2cc0] sm:$0xff] }
 0x99a   :  { %5794 = vmatpush1.msra.mxu1 %v4018_v24  ;;  %5724 = vmatprep.subr.mxu0 %v3491_v25  ;;  %v4322_v24 = vld [vmem:[#allocation22 + $0x3cc0] sm:$0xff]  ;;  %v3795_v25 = vld [vmem:[#allocation22 + $0x2c48] sm:$0xff] }
 0x99b   :  { %5795 = vmatprep.subr.mxu1 %v4003_v28  ;;  %5725 = vmatpush1.msra.mxu0 %v3490_v29  ;;  %v4307_v28 = vld [vmem:[#allocation22 + $0x3c48] sm:$0xff]  ;;  %v3794_v29 = vld [vmem:[#allocation22 + $0x2c40] sm:$0xff] }
 0x99c   :  { %5796 = vmatpush1.msra.mxu1 %v4002_v36  ;;  %5726 = vmatprep.subr.mxu0 %v3475_v4  ;;  %v4306_v36 = vld [vmem:[#allocation22 + $0x3c40] sm:$0xff]  ;;  %v3779_v4 = vld [vmem:[#allocation22 + $0x2bc8] sm:$0xff] }
 0x99d   :  { %5797 = vmatprep.subr.mxu1 %v3987_v43  ;;  %5727 = vmatpush1.msra.mxu0 %v3474_v46  ;;  %v4291_v43 = vld [vmem:[#allocation22 + $0x3bc8] sm:$0xff]  ;;  %v3778_v46 = vld [vmem:[#allocation22 + $0x2bc0] sm:$0xff] }
 0x99e   :  { %5798 = vmatpush1.msra.mxu1 %v3986_v48  ;;  %5728 = vmatprep.subr.mxu0 %v3459_v34  ;;  %v4290_v48 = vld [vmem:[#allocation22 + $0x3bc0] sm:$0xff]  ;;  %v3763_v34 = vld [vmem:[#allocation22 + $0x2b48] sm:$0xff] }
 0x99f   :  { %5799 = vmatprep.subr.mxu1 %v3971_v12  ;;  %5729 = vmatpush1.msra.mxu0 %v3458_v54  ;;  %v4275_v12 = vld [vmem:[#allocation22 + $0x3b48] sm:$0xff]  ;;  %v3762_v54 = vld [vmem:[#allocation22 + $0x2b40] sm:$0xff] }
 0x9a0   :  { %5800 = vmatpush1.msra.mxu1 %v3970_v44  ;;  %5730 = vmatprep.subr.mxu0 %v3443_v11  ;;  %v4274_v44 = vld [vmem:[#allocation22 + $0x3b40] sm:$0xff]  ;;  %v3747_v11 = vld [vmem:[#allocation22 + $0x2ac8] sm:$0xff] }
 0x9a1   :  { %5801 = vmatprep.subr.mxu1 %v3955_v49  ;;  %5731 = vmatpush1.msra.mxu0 %v3442_v50  ;;  %v4259_v49 = vld [vmem:[#allocation22 + $0x3ac8] sm:$0xff]  ;;  %v3746_v50 = vld [vmem:[#allocation22 + $0x2ac0] sm:$0xff] }
 0x9a2   :  { %5802 = vmatpush1.msra.mxu1 %v3954_v52  ;;  %5732 = vmatprep.subr.mxu0 %v3427_v53  ;;  %v4258_v52 = vld [vmem:[#allocation22 + $0x3ac0] sm:$0xff]  ;;  %v3731_v53 = vld [vmem:[#allocation22 + $0x2a48] sm:$0xff] }
 0x9a3   :  { %5803 = vmatprep.subr.mxu1 %v3939_v55  ;;  %5733 = vmatpush1.msra.mxu0 %v3426_v33  ;;  %v4243_v55 = vld [vmem:[#allocation22 + $0x3a48] sm:$0xff]  ;;  %v3730_v33 = vld [vmem:[#allocation22 + $0x2a40] sm:$0xff] }
 0x9a4   :  { %5804 = vmatpush1.msra.mxu1 %v3938_v17  ;;  %5734 = vmatprep.subr.mxu0 %v3411_v47  ;;  %v4242_v17 = vld [vmem:[#allocation22 + $0x3a40] sm:$0xff]  ;;  %v3715_v47 = vld [vmem:[#allocation22 + $0x29c8] sm:$0xff] }
 0x9a5   :  { %5805 = vmatprep.subr.mxu1 %v3923_v30  ;;  %5735 = vmatpush1.msra.mxu0 %v3410_v51  ;;  %v4227_v30 = vld [vmem:[#allocation22 + $0x39c8] sm:$0xff]  ;;  %v3714_v51 = vld [vmem:[#allocation22 + $0x29c0] sm:$0xff] }
 0x9a6   :  { %5806 = vmatpush1.msra.mxu1 %v3922_v38  ;;  %5736 = vmatprep.subr.mxu0 %v3907_v39  ;;  %v4226_v38 = vld [vmem:[#allocation22 + $0x39c0] sm:$0xff]  ;;  %v3699_v39 = vld [vmem:[#allocation22 + $0x2948] sm:$0xff] }
 0x9a7   :  { %5807 = vmatprep.subr.mxu1 %v4419_v56  ;;  %5737 = vmatpush2.msra.mxu0 %v3906_v31  ;;  %v4211_v56 = vld [vmem:[#allocation22 + $0x3948] sm:$0xff]  ;;  %v3698_v31 = vld [vmem:[#allocation22 + $0x2940] sm:$0xff] }
 0x9a8   :  { %5808 = vmatpush2.msra.mxu1 %v4418_v57  ;;  %5738 = vmatprep.subr.mxu0 %v3891_v41  ;;  %v4210_v57 = vld [vmem:[#allocation22 + $0x3940] sm:$0xff]  ;;  %v3683_v41 = vld [vmem:[#allocation22 + $0x28c8] sm:$0xff] }
 0x9a9   :  { %5809 = vmatprep.subr.mxu1 %v4403_v42  ;;  %5739 = vmatpush2.msra.mxu0 %v3890_v63  ;;  %v4195_v42 = vld [vmem:[#allocation22 + $0x38c8] sm:$0xff]  ;;  %v3682_v63 = vld [vmem:[#allocation22 + $0x28c0] sm:$0xff] }
 0x9aa   :  { %5810 = vmatpush2.msra.mxu1 %v4402_v2  ;;  %5740 = vmatprep.subr.mxu0 %v3875_v6  ;;  %v4194_v2 = vld [vmem:[#allocation22 + $0x38c0] sm:$0xff]  ;;  %v3667_v6 = vld [vmem:[#allocation22 + $0x2848] sm:$0xff] }
 0x9ab   :  { %5811 = vmatprep.subr.mxu1 %v4387_v8  ;;  %5741 = vmatpush2.msra.mxu0 %v3874_v45  ;;  %v4179_v8 = vld [vmem:[#allocation22 + $0x3848] sm:$0xff]  ;;  %v3666_v45 = vld [vmem:[#allocation22 + $0x2840] sm:$0xff] }
 0x9ac   :  { %5812 = vmatpush2.msra.mxu1 %v4386_v10  ;;  %5742 = vmatprep.subr.mxu0 %v3859_v60  ;;  %v4178_v10 = vld [vmem:[#allocation22 + $0x3840] sm:$0xff]  ;;  %v2629_v60 = vld [vmem:[#allocation22 + $0x7d8] sm:$0xff] }
 0x9ad   :  { %5813 = vmatprep.subr.mxu1 %v4371_v1  ;;  %5743 = vmatpush2.msra.mxu0 %v3858_v3  ;;  %v3141_v1 = vld [vmem:[#allocation22 + $0x17d8] sm:$0xff]  ;;  %v2628_v3 = vld [vmem:[#allocation22 + $0x7d0] sm:$0xff] }
 0x9ae   :  { %5814 = vmatpush2.msra.mxu1 %v4370_v5  ;;  %5744 = vmatprep.subr.mxu0 %v3843_v14  ;;  %v3140_v5 = vld [vmem:[#allocation22 + $0x17d0] sm:$0xff]  ;;  %v2613_v14 = vld [vmem:[#allocation22 + $0x758] sm:$0xff] }
 0x9af   :  { %5815 = vmatprep.subr.mxu1 %v4355_v15  ;;  %5745 = vmatpush2.msra.mxu0 %v3842_v35  ;;  %v3125_v15 = vld [vmem:[#allocation22 + $0x1758] sm:$0xff]  ;;  %v2612_v35 = vld [vmem:[#allocation22 + $0x750] sm:$0xff] }
 0x9b0   :  { %5816 = vmatpush2.msra.mxu1 %v4354_v40  ;;  %5746 = vmatprep.subr.mxu0 %v3827_v37  ;;  %v3124_v40 = vld [vmem:[#allocation22 + $0x1750] sm:$0xff]  ;;  %v2597_v37 = vld [vmem:[#allocation22 + $0x6d8] sm:$0xff] }
 0x9b1   :  { %5817 = vmatprep.subr.mxu1 %v4339_v18  ;;  %5747 = vmatpush2.msra.mxu0 %v3826_v19  ;;  %v3109_v18 = vld [vmem:[#allocation22 + $0x16d8] sm:$0xff]  ;;  %v2596_v19 = vld [vmem:[#allocation22 + $0x6d0] sm:$0xff] }
 0x9b2   :  { %5818 = vmatpush2.msra.mxu1 %v4338_v20  ;;  %5748 = vmatprep.subr.mxu0 %v3811_v21  ;;  %v3108_v20 = vld [vmem:[#allocation22 + $0x16d0] sm:$0xff]  ;;  %v2581_v21 = vld [vmem:[#allocation22 + $0x658] sm:$0xff] }
 0x9b3   :  { %5819 = vmatprep.subr.mxu1 %v4323_v22  ;;  %5749 = vmatpush2.msra.mxu0 %v3810_v23  ;;  %v3093_v22 = vld [vmem:[#allocation22 + $0x1658] sm:$0xff]  ;;  %v2580_v23 = vld [vmem:[#allocation22 + $0x650] sm:$0xff] }
 0x9b4   :  { %5820 = vmatpush2.msra.mxu1 %v4322_v24  ;;  %5750 = vmatprep.subr.mxu0 %v3795_v25  ;;  %v3092_v24 = vld [vmem:[#allocation22 + $0x1650] sm:$0xff]  ;;  %v2565_v25 = vld [vmem:[#allocation22 + $0x5d8] sm:$0xff] }
 0x9b5   :  { %5821 = vmatprep.subr.mxu1 %v4307_v28  ;;  %5751 = vmatpush2.msra.mxu0 %v3794_v29  ;;  %v3077_v28 = vld [vmem:[#allocation22 + $0x15d8] sm:$0xff]  ;;  %v2564_v29 = vld [vmem:[#allocation22 + $0x5d0] sm:$0xff] }
 0x9b6   :  { %5822 = vmatpush2.msra.mxu1 %v4306_v36  ;;  %5752 = vmatprep.subr.mxu0 %v3779_v4  ;;  %v3076_v36 = vld [vmem:[#allocation22 + $0x15d0] sm:$0xff]  ;;  %v2549_v4 = vld [vmem:[#allocation22 + $0x558] sm:$0xff] }
 0x9b7   :  { %5823 = vmatprep.subr.mxu1 %v4291_v43  ;;  %5753 = vmatpush2.msra.mxu0 %v3778_v46  ;;  %v3061_v43 = vld [vmem:[#allocation22 + $0x1558] sm:$0xff]  ;;  %v2548_v46 = vld [vmem:[#allocation22 + $0x550] sm:$0xff] }
 0x9b8   :  { %5824 = vmatpush2.msra.mxu1 %v4290_v48  ;;  %5754 = vmatprep.subr.mxu0 %v3763_v34  ;;  %v3060_v48 = vld [vmem:[#allocation22 + $0x1550] sm:$0xff]  ;;  %v2533_v34 = vld [vmem:[#allocation22 + $0x4d8] sm:$0xff] }
 0x9b9   :  { %5825 = vmatprep.subr.mxu1 %v4275_v12  ;;  %5755 = vmatpush2.msra.mxu0 %v3762_v54  ;;  %v3045_v12 = vld [vmem:[#allocation22 + $0x14d8] sm:$0xff]  ;;  %v2532_v54 = vld [vmem:[#allocation22 + $0x4d0] sm:$0xff] }
 0x9ba   :  { %5826 = vmatpush2.msra.mxu1 %v4274_v44  ;;  %5756 = vmatprep.subr.mxu0 %v3747_v11  ;;  %v3044_v44 = vld [vmem:[#allocation22 + $0x14d0] sm:$0xff]  ;;  %v2517_v11 = vld [vmem:[#allocation22 + $0x458] sm:$0xff] }
 0x9bb   :  { %5827 = vmatprep.subr.mxu1 %v4259_v49  ;;  %5757 = vmatpush2.msra.mxu0 %v3746_v50  ;;  %v3029_v49 = vld [vmem:[#allocation22 + $0x1458] sm:$0xff]  ;;  %v2516_v50 = vld [vmem:[#allocation22 + $0x450] sm:$0xff] }
 0x9bc   :  { %5828 = vmatpush2.msra.mxu1 %v4258_v52  ;;  %5758 = vmatprep.subr.mxu0 %v3731_v53  ;;  %v3028_v52 = vld [vmem:[#allocation22 + $0x1450] sm:$0xff]  ;;  %v2501_v53 = vld [vmem:[#allocation22 + $0x3d8] sm:$0xff] }
 0x9bd   :  { %5829 = vmatprep.subr.mxu1 %v4243_v55  ;;  %5759 = vmatpush2.msra.mxu0 %v3730_v33  ;;  %v3013_v55 = vld [vmem:[#allocation22 + $0x13d8] sm:$0xff]  ;;  %v2500_v33 = vld [vmem:[#allocation22 + $0x3d0] sm:$0xff] }
 0x9be   :  { %5830 = vmatpush2.msra.mxu1 %v4242_v17  ;;  %5760 = vmatprep.subr.mxu0 %v3715_v47  ;;  %v3012_v17 = vld [vmem:[#allocation22 + $0x13d0] sm:$0xff]  ;;  %v2485_v47 = vld [vmem:[#allocation22 + $0x358] sm:$0xff] }
 0x9bf   :  { %5831 = vmatprep.subr.mxu1 %v4227_v30  ;;  %5761 = vmatpush2.msra.mxu0 %v3714_v51  ;;  %v2997_v30 = vld [vmem:[#allocation22 + $0x1358] sm:$0xff]  ;;  %v2484_v51 = vld [vmem:[#allocation22 + $0x350] sm:$0xff] }
 0x9c0   :  { %5832 = vmatpush2.msra.mxu1 %v4226_v38  ;;  %5762 = vmatprep.subr.mxu0 %v3699_v39  ;;  %v2996_v38 = vld [vmem:[#allocation22 + $0x1350] sm:$0xff]  ;;  %v2469_v39 = vld [vmem:[#allocation22 + $0x2d8] sm:$0xff] }
 0x9c1   :  { %5833 = vmatprep.subr.mxu1 %v4211_v56  ;;  %5763 = vmatpush2.msra.mxu0 %v3698_v31  ;;  %v2981_v56 = vld [vmem:[#allocation22 + $0x12d8] sm:$0xff]  ;;  %v2468_v31 = vld [vmem:[#allocation22 + $0x2d0] sm:$0xff] }
 0x9c2   :  { %5834 = vmatpush2.msra.mxu1 %v4210_v57  ;;  %5764 = vmatprep.subr.mxu0 %v3683_v41  ;;  %v2980_v57 = vld [vmem:[#allocation22 + $0x12d0] sm:$0xff]  ;;  %v2453_v41 = vld [vmem:[#allocation22 + $0x258] sm:$0xff] }
 0x9c3   :  { %5835 = vmatprep.subr.mxu1 %v4195_v42  ;;  %5765 = vmatpush2.msra.mxu0 %v3682_v63  ;;  %v2965_v42 = vld [vmem:[#allocation22 + $0x1258] sm:$0xff]  ;;  %v2452_v63 = vld [vmem:[#allocation22 + $0x250] sm:$0xff] }
 0x9c4   :  { %5836 = vmatpush2.msra.mxu1 %v4194_v2  ;;  %5766 = vmatprep.subr.mxu0 %v3667_v6  ;;  %v2964_v2 = vld [vmem:[#allocation22 + $0x1250] sm:$0xff]  ;;  %v2437_v6 = vld [vmem:[#allocation22 + $0x1d8] sm:$0xff] }
 0x9c5   :  { %5837 = vmatprep.subr.mxu1 %v4179_v8  ;;  %5767 = vmatpush2.msra.mxu0 %v3666_v45  ;;  %v2949_v8 = vld [vmem:[#allocation22 + $0x11d8] sm:$0xff]  ;;  %v2436_v45 = vld [vmem:[#allocation22 + $0x1d0] sm:$0xff] }
 0x9c6   :  { %5838 = vmatpush2.msra.mxu1 %v4178_v10  ;;  %5769 = vmatmul.mubr.f32.vlgmr.msra.gmra.mxu0 %v9311_v26  ;;  %v2948_v10 = vld [vmem:[#allocation22 + $0x11d0] sm:$0xff] }
 0x9c7   :  { %5840 = vmatmul.mubr.f32.vlgmr.msra.gmra.mxu1 %v9315_v32  ;;  %5846 = vmatprep.subr.mxu0 %v2629_v60  ;;  %v2421_v60 = vld [vmem:[#allocation22 + $0x158] sm:$0xff] }
 0x9c8   :  { %5917 = vmatprep.subr.mxu1 %v3141_v1  ;;  %5847 = vmatpush1.msra.mxu0 %v2628_v3  ;;  %v2933_v1 = vld [vmem:[#allocation22 + $0x1158] sm:$0xff]  ;;  %v2420_v3 = vld [vmem:[#allocation22 + $0x150] sm:$0xff] }
 0x9c9   :  { %5910 = vmatprep.mubr.f32.mxu0 %v9288_v27  ;;  %5918 = vmatpush1.msra.mxu1 %v3140_v5  ;;  %v2932_v5 = vld [vmem:[#allocation22 + $0x1150] sm:$0xff] }
 0x9ca   :  { %5981 = vmatprep.mubr.f32.mxu1 %v9291_v59  ;;  %5848 = vmatprep.subr.mxu0 %v2613_v14  ;;  %v2405_v14 = vld [vmem:[#allocation22 + $0xd8] sm:$0xff] }
 0x9cb   :  { %5919 = vmatprep.subr.mxu1 %v3125_v15  ;;  %5849 = vmatpush1.msra.mxu0 %v2612_v35  ;;  %v2917_v15 = vld [vmem:[#allocation22 + $0x10d8] sm:$0xff]  ;;  %v2404_v35 = vld [vmem:[#allocation22 + $0xd0] sm:$0xff] }
 0x9cc   :  { %5920 = vmatpush1.msra.mxu1 %v3124_v40  ;;  %5850 = vmatprep.subr.mxu0 %v2597_v37  ;;  %v2916_v40 = vld [vmem:[#allocation22 + $0x10d0] sm:$0xff]  ;;  %v2389_v37 = vld [vmem:[#allocation22 + $0x58] sm:$0xff] }
 0x9cd   :  { %5921 = vmatprep.subr.mxu1 %v3109_v18  ;;  %5851 = vmatpush1.msra.mxu0 %v2596_v19  ;;  %v2901_v18 = vld [vmem:[#allocation22 + $0x1058] sm:$0xff]  ;;  %v2388_v19 = vld [vmem:[#allocation22 + $0x50] sm:$0xff] }
 0x9ce   :  { %5922 = vmatpush1.msra.mxu1 %v3108_v20  ;;  %5852 = vmatprep.subr.mxu0 %v2581_v21  ;;  %v2900_v20 = vld [vmem:[#allocation22 + $0x1050] sm:$0xff]  ;;  %v2885_v21 = vld [vmem:[#allocation22 + $0xfd8] sm:$0xff] }
 0x9cf   :  { %5923 = vmatprep.subr.mxu1 %v3093_v22  ;;  %5853 = vmatpush1.msra.mxu0 %v2580_v23  ;;  %v3397_v22 = vld [vmem:[#allocation22 + $0x1fd8] sm:$0xff]  ;;  %v2884_v23 = vld [vmem:[#allocation22 + $0xfd0] sm:$0xff] }
 0x9d0   :  { %5924 = vmatpush1.msra.mxu1 %v3092_v24  ;;  %5854 = vmatprep.subr.mxu0 %v2565_v25  ;;  %v3396_v24 = vld [vmem:[#allocation22 + $0x1fd0] sm:$0xff]  ;;  %v2869_v25 = vld [vmem:[#allocation22 + $0xf58] sm:$0xff] }
 0x9d1   :  { %5925 = vmatprep.subr.mxu1 %v3077_v28  ;;  %5855 = vmatpush1.msra.mxu0 %v2564_v29  ;;  %v3381_v28 = vld [vmem:[#allocation22 + $0x1f58] sm:$0xff]  ;;  %v2868_v29 = vld [vmem:[#allocation22 + $0xf50] sm:$0xff] }
 0x9d2   :  { %5926 = vmatpush1.msra.mxu1 %v3076_v36  ;;  %5856 = vmatprep.subr.mxu0 %v2549_v4  ;;  %v3380_v36 = vld [vmem:[#allocation22 + $0x1f50] sm:$0xff]  ;;  %v2853_v4 = vld [vmem:[#allocation22 + $0xed8] sm:$0xff] }
 0x9d3   :  { %5927 = vmatprep.subr.mxu1 %v3061_v43  ;;  %5857 = vmatpush1.msra.mxu0 %v2548_v46  ;;  %v3365_v43 = vld [vmem:[#allocation22 + $0x1ed8] sm:$0xff]  ;;  %v2852_v46 = vld [vmem:[#allocation22 + $0xed0] sm:$0xff] }
 0x9d4   :  { %5928 = vmatpush1.msra.mxu1 %v3060_v48  ;;  %5858 = vmatprep.subr.mxu0 %v2533_v34  ;;  %v3364_v48 = vld [vmem:[#allocation22 + $0x1ed0] sm:$0xff]  ;;  %v2837_v34 = vld [vmem:[#allocation22 + $0xe58] sm:$0xff] }
 0x9d5   :  { %5929 = vmatprep.subr.mxu1 %v3045_v12  ;;  %5859 = vmatpush1.msra.mxu0 %v2532_v54  ;;  %v3349_v12 = vld [vmem:[#allocation22 + $0x1e58] sm:$0xff]  ;;  %v2836_v54 = vld [vmem:[#allocation22 + $0xe50] sm:$0xff] }
 0x9d6   :  { %5930 = vmatpush1.msra.mxu1 %v3044_v44  ;;  %5860 = vmatprep.subr.mxu0 %v2517_v11  ;;  %v3348_v44 = vld [vmem:[#allocation22 + $0x1e50] sm:$0xff]  ;;  %v2821_v11 = vld [vmem:[#allocation22 + $0xdd8] sm:$0xff] }
 0x9d7   :  { %5931 = vmatprep.subr.mxu1 %v3029_v49  ;;  %5861 = vmatpush1.msra.mxu0 %v2516_v50  ;;  %v3333_v49 = vld [vmem:[#allocation22 + $0x1dd8] sm:$0xff]  ;;  %v2820_v50 = vld [vmem:[#allocation22 + $0xdd0] sm:$0xff] }
 0x9d8   :  { %5932 = vmatpush1.msra.mxu1 %v3028_v52  ;;  %5862 = vmatprep.subr.mxu0 %v2501_v53  ;;  %v3332_v52 = vld [vmem:[#allocation22 + $0x1dd0] sm:$0xff]  ;;  %v2805_v53 = vld [vmem:[#allocation22 + $0xd58] sm:$0xff] }
 0x9d9   :  { %5933 = vmatprep.subr.mxu1 %v3013_v55  ;;  %5863 = vmatpush1.msra.mxu0 %v2500_v33  ;;  %v3317_v55 = vld [vmem:[#allocation22 + $0x1d58] sm:$0xff]  ;;  %v2804_v33 = vld [vmem:[#allocation22 + $0xd50] sm:$0xff] }
 0x9da   :  { %5934 = vmatpush1.msra.mxu1 %v3012_v17  ;;  %5864 = vmatprep.subr.mxu0 %v2485_v47  ;;  %v3316_v17 = vld [vmem:[#allocation22 + $0x1d50] sm:$0xff]  ;;  %v2789_v47 = vld [vmem:[#allocation22 + $0xcd8] sm:$0xff] }
 0x9db   :  { %5935 = vmatprep.subr.mxu1 %v2997_v30  ;;  %5865 = vmatpush1.msra.mxu0 %v2484_v51  ;;  %v3301_v30 = vld [vmem:[#allocation22 + $0x1cd8] sm:$0xff]  ;;  %v2788_v51 = vld [vmem:[#allocation22 + $0xcd0] sm:$0xff] }
 0x9dc   :  { %5936 = vmatpush1.msra.mxu1 %v2996_v38  ;;  %5866 = vmatprep.subr.mxu0 %v2469_v39  ;;  %v3300_v38 = vld [vmem:[#allocation22 + $0x1cd0] sm:$0xff]  ;;  %v2773_v39 = vld [vmem:[#allocation22 + $0xc58] sm:$0xff] }
 0x9dd   :  { %5937 = vmatprep.subr.mxu1 %v2981_v56  ;;  %5867 = vmatpush1.msra.mxu0 %v2468_v31  ;;  %v3285_v56 = vld [vmem:[#allocation22 + $0x1c58] sm:$0xff]  ;;  %v2772_v31 = vld [vmem:[#allocation22 + $0xc50] sm:$0xff] }
 0x9de   :  { %5938 = vmatpush1.msra.mxu1 %v2980_v57  ;;  %5868 = vmatprep.subr.mxu0 %v2453_v41  ;;  %v3284_v57 = vld [vmem:[#allocation22 + $0x1c50] sm:$0xff]  ;;  %v2757_v41 = vld [vmem:[#allocation22 + $0xbd8] sm:$0xff] }
 0x9df   :  { %5939 = vmatprep.subr.mxu1 %v2965_v42  ;;  %5869 = vmatpush1.msra.mxu0 %v2452_v63  ;;  %v3269_v42 = vld [vmem:[#allocation22 + $0x1bd8] sm:$0xff]  ;;  %v2756_v63 = vld [vmem:[#allocation22 + $0xbd0] sm:$0xff] }
 0x9e0   :  { %5940 = vmatpush1.msra.mxu1 %v2964_v2  ;;  %5870 = vmatprep.subr.mxu0 %v2437_v6  ;;  %v3268_v2 = vld [vmem:[#allocation22 + $0x1bd0] sm:$0xff]  ;;  %v2741_v6 = vld [vmem:[#allocation22 + $0xb58] sm:$0xff] }
 0x9e1   :  { %5941 = vmatprep.subr.mxu1 %v2949_v8  ;;  %5871 = vmatpush1.msra.mxu0 %v2436_v45  ;;  %v3253_v8 = vld [vmem:[#allocation22 + $0x1b58] sm:$0xff]  ;;  %v2740_v45 = vld [vmem:[#allocation22 + $0xb50] sm:$0xff] }
 0x9e2   :  { %5942 = vmatpush1.msra.mxu1 %v2948_v10  ;;  %5872 = vmatprep.subr.mxu0 %v2421_v60  ;;  %v3252_v10 = vld [vmem:[#allocation22 + $0x1b50] sm:$0xff]  ;;  %v2725_v60 = vld [vmem:[#allocation22 + $0xad8] sm:$0xff] }
 0x9e3   :  { %5943 = vmatprep.subr.mxu1 %v2933_v1  ;;  %5873 = vmatpush1.msra.mxu0 %v2420_v3  ;;  %v3237_v1 = vld [vmem:[#allocation22 + $0x1ad8] sm:$0xff]  ;;  %v2724_v3 = vld [vmem:[#allocation22 + $0xad0] sm:$0xff] }
 0x9e4   :  { %5944 = vmatpush1.msra.mxu1 %v2932_v5  ;;  %5874 = vmatprep.subr.mxu0 %v2405_v14  ;;  %v3236_v5 = vld [vmem:[#allocation22 + $0x1ad0] sm:$0xff]  ;;  %v2709_v14 = vld [vmem:[#allocation22 + $0xa58] sm:$0xff] }
 0x9e5   :  { %5945 = vmatprep.subr.mxu1 %v2917_v15  ;;  %5875 = vmatpush1.msra.mxu0 %v2404_v35  ;;  %v3221_v15 = vld [vmem:[#allocation22 + $0x1a58] sm:$0xff]  ;;  %v2708_v35 = vld [vmem:[#allocation22 + $0xa50] sm:$0xff] }
 0x9e6   :  { %5946 = vmatpush1.msra.mxu1 %v2916_v40  ;;  %5876 = vmatprep.subr.mxu0 %v2389_v37  ;;  %v3220_v40 = vld [vmem:[#allocation22 + $0x1a50] sm:$0xff]  ;;  %v2693_v37 = vld [vmem:[#allocation22 + $0x9d8] sm:$0xff] }
 0x9e7   :  { %5947 = vmatprep.subr.mxu1 %v2901_v18  ;;  %5877 = vmatpush1.msra.mxu0 %v2388_v19  ;;  %v3205_v18 = vld [vmem:[#allocation22 + $0x19d8] sm:$0xff]  ;;  %v2692_v19 = vld [vmem:[#allocation22 + $0x9d0] sm:$0xff] }
 0x9e8   :  { %5948 = vmatpush1.msra.mxu1 %v2900_v20  ;;  %5878 = vmatprep.subr.mxu0 %v2885_v21  ;;  %v3204_v20 = vld [vmem:[#allocation22 + $0x19d0] sm:$0xff]  ;;  %v2677_v21 = vld [vmem:[#allocation22 + $0x958] sm:$0xff] }
 0x9e9   :  { %5949 = vmatprep.subr.mxu1 %v3397_v22  ;;  %5879 = vmatpush2.msra.mxu0 %v2884_v23  ;;  %v3189_v22 = vld [vmem:[#allocation22 + $0x1958] sm:$0xff]  ;;  %v2676_v23 = vld [vmem:[#allocation22 + $0x950] sm:$0xff] }
 0x9ea   :  { %5950 = vmatpush2.msra.mxu1 %v3396_v24  ;;  %5880 = vmatprep.subr.mxu0 %v2869_v25  ;;  %v3188_v24 = vld [vmem:[#allocation22 + $0x1950] sm:$0xff]  ;;  %v2661_v25 = vld [vmem:[#allocation22 + $0x8d8] sm:$0xff] }
 0x9eb   :  { %5951 = vmatprep.subr.mxu1 %v3381_v28  ;;  %5881 = vmatpush2.msra.mxu0 %v2868_v29  ;;  %v3173_v28 = vld [vmem:[#allocation22 + $0x18d8] sm:$0xff]  ;;  %v2660_v29 = vld [vmem:[#allocation22 + $0x8d0] sm:$0xff] }
 0x9ec   :  { %5952 = vmatpush2.msra.mxu1 %v3380_v36  ;;  %5882 = vmatprep.subr.mxu0 %v2853_v4  ;;  %v3172_v36 = vld [vmem:[#allocation22 + $0x18d0] sm:$0xff]  ;;  %v2645_v4 = vld [vmem:[#allocation22 + $0x858] sm:$0xff] }
 0x9ed   :  { %5953 = vmatprep.subr.mxu1 %v3365_v43  ;;  %5883 = vmatpush2.msra.mxu0 %v2852_v46  ;;  %v3157_v43 = vld [vmem:[#allocation22 + $0x1858] sm:$0xff]  ;;  %v2644_v46 = vld [vmem:[#allocation22 + $0x850] sm:$0xff] }
 0x9ee   :  { %5954 = vmatpush2.msra.mxu1 %v3364_v48  ;;  %5884 = vmatprep.subr.mxu0 %v2837_v34  ;;  %v3156_v48 = vld [vmem:[#allocation22 + $0x1850] sm:$0xff]  ;;  %v3653_v34 = vld [vmem:[#allocation22 + $0x27d8] sm:$0xff] }
 0x9ef   :  { %5955 = vmatprep.subr.mxu1 %v3349_v12  ;;  %5885 = vmatpush2.msra.mxu0 %v2836_v54  ;;  %v4165_v12 = vld [vmem:[#allocation22 + $0x37d8] sm:$0xff]  ;;  %v3652_v54 = vld [vmem:[#allocation22 + $0x27d0] sm:$0xff] }
 0x9f0   :  { %5956 = vmatpush2.msra.mxu1 %v3348_v44  ;;  %5886 = vmatprep.subr.mxu0 %v2821_v11  ;;  %v4164_v44 = vld [vmem:[#allocation22 + $0x37d0] sm:$0xff]  ;;  %v3637_v11 = vld [vmem:[#allocation22 + $0x2758] sm:$0xff] }
 0x9f1   :  { %5957 = vmatprep.subr.mxu1 %v3333_v49  ;;  %5887 = vmatpush2.msra.mxu0 %v2820_v50  ;;  %v4149_v49 = vld [vmem:[#allocation22 + $0x3758] sm:$0xff]  ;;  %v3636_v50 = vld [vmem:[#allocation22 + $0x2750] sm:$0xff] }
 0x9f2   :  { %5958 = vmatpush2.msra.mxu1 %v3332_v52  ;;  %5888 = vmatprep.subr.mxu0 %v2805_v53  ;;  %v4148_v52 = vld [vmem:[#allocation22 + $0x3750] sm:$0xff]  ;;  %v3621_v53 = vld [vmem:[#allocation22 + $0x26d8] sm:$0xff] }
 0x9f3   :  { %5959 = vmatprep.subr.mxu1 %v3317_v55  ;;  %5889 = vmatpush2.msra.mxu0 %v2804_v33  ;;  %v4133_v55 = vld [vmem:[#allocation22 + $0x36d8] sm:$0xff]  ;;  %v3620_v33 = vld [vmem:[#allocation22 + $0x26d0] sm:$0xff] }
 0x9f4   :  { %5960 = vmatpush2.msra.mxu1 %v3316_v17  ;;  %5890 = vmatprep.subr.mxu0 %v2789_v47  ;;  %v4132_v17 = vld [vmem:[#allocation22 + $0x36d0] sm:$0xff]  ;;  %v3605_v47 = vld [vmem:[#allocation22 + $0x2658] sm:$0xff] }
 0x9f5   :  { %5961 = vmatprep.subr.mxu1 %v3301_v30  ;;  %5891 = vmatpush2.msra.mxu0 %v2788_v51  ;;  %v4117_v30 = vld [vmem:[#allocation22 + $0x3658] sm:$0xff]  ;;  %v3604_v51 = vld [vmem:[#allocation22 + $0x2650] sm:$0xff] }
 0x9f6   :  { %5962 = vmatpush2.msra.mxu1 %v3300_v38  ;;  %5892 = vmatprep.subr.mxu0 %v2773_v39  ;;  %v4116_v38 = vld [vmem:[#allocation22 + $0x3650] sm:$0xff]  ;;  %v3589_v39 = vld [vmem:[#allocation22 + $0x25d8] sm:$0xff] }
 0x9f7   :  { %5963 = vmatprep.subr.mxu1 %v3285_v56  ;;  %5893 = vmatpush2.msra.mxu0 %v2772_v31  ;;  %v4101_v56 = vld [vmem:[#allocation22 + $0x35d8] sm:$0xff]  ;;  %v3588_v31 = vld [vmem:[#allocation22 + $0x25d0] sm:$0xff] }
 0x9f8   :  { %5964 = vmatpush2.msra.mxu1 %v3284_v57  ;;  %5894 = vmatprep.subr.mxu0 %v2757_v41  ;;  %v4100_v57 = vld [vmem:[#allocation22 + $0x35d0] sm:$0xff]  ;;  %v3573_v41 = vld [vmem:[#allocation22 + $0x2558] sm:$0xff] }
 0x9f9   :  { %5965 = vmatprep.subr.mxu1 %v3269_v42  ;;  %5895 = vmatpush2.msra.mxu0 %v2756_v63  ;;  %v4085_v42 = vld [vmem:[#allocation22 + $0x3558] sm:$0xff]  ;;  %v3572_v63 = vld [vmem:[#allocation22 + $0x2550] sm:$0xff] }
 0x9fa   :  { %5966 = vmatpush2.msra.mxu1 %v3268_v2  ;;  %5896 = vmatprep.subr.mxu0 %v2741_v6  ;;  %v4084_v2 = vld [vmem:[#allocation22 + $0x3550] sm:$0xff]  ;;  %v3557_v6 = vld [vmem:[#allocation22 + $0x24d8] sm:$0xff] }
 0x9fb   :  { %5967 = vmatprep.subr.mxu1 %v3253_v8  ;;  %5897 = vmatpush2.msra.mxu0 %v2740_v45  ;;  %v4069_v8 = vld [vmem:[#allocation22 + $0x34d8] sm:$0xff]  ;;  %v3556_v45 = vld [vmem:[#allocation22 + $0x24d0] sm:$0xff] }
 0x9fc   :  { %5968 = vmatpush2.msra.mxu1 %v3252_v10  ;;  %5898 = vmatprep.subr.mxu0 %v2725_v60  ;;  %v4068_v10 = vld [vmem:[#allocation22 + $0x34d0] sm:$0xff]  ;;  %v3541_v60 = vld [vmem:[#allocation22 + $0x2458] sm:$0xff] }
 0x9fd   :  { %5969 = vmatprep.subr.mxu1 %v3237_v1  ;;  %5899 = vmatpush2.msra.mxu0 %v2724_v3  ;;  %v4053_v1 = vld [vmem:[#allocation22 + $0x3458] sm:$0xff]  ;;  %v3540_v3 = vld [vmem:[#allocation22 + $0x2450] sm:$0xff] }
 0x9fe   :  { %5970 = vmatpush2.msra.mxu1 %v3236_v5  ;;  %5900 = vmatprep.subr.mxu0 %v2709_v14  ;;  %v4052_v5 = vld [vmem:[#allocation22 + $0x3450] sm:$0xff]  ;;  %v3525_v14 = vld [vmem:[#allocation22 + $0x23d8] sm:$0xff] }
 0x9ff   :  { %5971 = vmatprep.subr.mxu1 %v3221_v15  ;;  %5901 = vmatpush2.msra.mxu0 %v2708_v35  ;;  %v4037_v15 = vld [vmem:[#allocation22 + $0x33d8] sm:$0xff]  ;;  %v3524_v35 = vld [vmem:[#allocation22 + $0x23d0] sm:$0xff] }
 0xa00   :  { %5972 = vmatpush2.msra.mxu1 %v3220_v40  ;;  %5902 = vmatprep.subr.mxu0 %v2693_v37  ;;  %v4036_v40 = vld [vmem:[#allocation22 + $0x33d0] sm:$0xff]  ;;  %v3509_v37 = vld [vmem:[#allocation22 + $0x2358] sm:$0xff] }
 0xa01   :  { %5973 = vmatprep.subr.mxu1 %v3205_v18  ;;  %5903 = vmatpush2.msra.mxu0 %v2692_v19  ;;  %v4021_v18 = vld [vmem:[#allocation22 + $0x3358] sm:$0xff]  ;;  %v3508_v19 = vld [vmem:[#allocation22 + $0x2350] sm:$0xff] }
 0xa02   :  { %5974 = vmatpush2.msra.mxu1 %v3204_v20  ;;  %5904 = vmatprep.subr.mxu0 %v2677_v21  ;;  %v4020_v20 = vld [vmem:[#allocation22 + $0x3350] sm:$0xff]  ;;  %v3493_v21 = vld [vmem:[#allocation22 + $0x22d8] sm:$0xff] }
 0xa03   :  { %5975 = vmatprep.subr.mxu1 %v3189_v22  ;;  %5905 = vmatpush2.msra.mxu0 %v2676_v23  ;;  %v4005_v22 = vld [vmem:[#allocation22 + $0x32d8] sm:$0xff]  ;;  %v3492_v23 = vld [vmem:[#allocation22 + $0x22d0] sm:$0xff] }
 0xa04   :  { %5976 = vmatpush2.msra.mxu1 %v3188_v24  ;;  %5906 = vmatprep.subr.mxu0 %v2661_v25  ;;  %v4004_v24 = vld [vmem:[#allocation22 + $0x32d0] sm:$0xff]  ;;  %v3477_v25 = vld [vmem:[#allocation22 + $0x2258] sm:$0xff] }
 0xa05   :  { %5977 = vmatprep.subr.mxu1 %v3173_v28  ;;  %5907 = vmatpush2.msra.mxu0 %v2660_v29  ;;  %v3989_v28 = vld [vmem:[#allocation22 + $0x3258] sm:$0xff]  ;;  %v3476_v29 = vld [vmem:[#allocation22 + $0x2250] sm:$0xff] }
 0xa06   :  { %5978 = vmatpush2.msra.mxu1 %v3172_v36  ;;  %5908 = vmatprep.subr.mxu0 %v2645_v4  ;;  %v3988_v36 = vld [vmem:[#allocation22 + $0x3250] sm:$0xff]  ;;  %v3461_v4 = vld [vmem:[#allocation22 + $0x21d8] sm:$0xff] }
 0xa07   :  { %5979 = vmatprep.subr.mxu1 %v3157_v43  ;;  %5909 = vmatpush2.msra.mxu0 %v2644_v46  ;;  %v3973_v43 = vld [vmem:[#allocation22 + $0x31d8] sm:$0xff]  ;;  %v3460_v46 = vld [vmem:[#allocation22 + $0x21d0] sm:$0xff] }
 0xa08   :  { %5980 = vmatpush2.msra.mxu1 %v3156_v48  ;;  %5911 = vmatmul.mubr.f32.vlgmr.msra.gmra.mxu0 %v9293_v62  ;;  %v3972_v48 = vld [vmem:[#allocation22 + $0x31d0] sm:$0xff] }
 0xa09   :  { %5982 = vmatmul.mubr.f32.vlgmr.msra.gmra.mxu1 %v9297_v61  ;;  %5988 = vmatprep.subr.mxu0 %v3653_v34  ;;  %v3445_v34 = vld [vmem:[#allocation22 + $0x2158] sm:$0xff] }
 0xa0a   :  { %6059 = vmatprep.subr.mxu1 %v4165_v12  ;;  %5989 = vmatpush1.msra.mxu0 %v3652_v54  ;;  %v3957_v12 = vld [vmem:[#allocation22 + $0x3158] sm:$0xff]  ;;  %v3444_v54 = vld [vmem:[#allocation22 + $0x2150] sm:$0xff] }
 0xa0b   :  { %6052 = vmatprep.mubr.f32.mxu0 %v9300_v7  ;;  %6060 = vmatpush1.msra.mxu1 %v4164_v44  ;;  %v3956_v44 = vld [vmem:[#allocation22 + $0x3150] sm:$0xff] }
 0xa0c   :  { %6123 = vmatprep.mubr.f32.mxu1 %v9302_v9  ;;  %5990 = vmatprep.subr.mxu0 %v3637_v11  ;;  %v3429_v11 = vld [vmem:[#allocation22 + $0x20d8] sm:$0xff] }
 0xa0d   :  { %6061 = vmatprep.subr.mxu1 %v4149_v49  ;;  %5991 = vmatpush1.msra.mxu0 %v3636_v50  ;;  %v3941_v49 = vld [vmem:[#allocation22 + $0x30d8] sm:$0xff]  ;;  %v3428_v50 = vld [vmem:[#allocation22 + $0x20d0] sm:$0xff] }
 0xa0e   :  { %6062 = vmatpush1.msra.mxu1 %v4148_v52  ;;  %5992 = vmatprep.subr.mxu0 %v3621_v53  ;;  %v3940_v52 = vld [vmem:[#allocation22 + $0x30d0] sm:$0xff]  ;;  %v3413_v53 = vld [vmem:[#allocation22 + $0x2058] sm:$0xff] }
 0xa0f   :  { %6063 = vmatprep.subr.mxu1 %v4133_v55  ;;  %5993 = vmatpush1.msra.mxu0 %v3620_v33  ;;  %v3925_v55 = vld [vmem:[#allocation22 + $0x3058] sm:$0xff]  ;;  %v3412_v33 = vld [vmem:[#allocation22 + $0x2050] sm:$0xff] }
 0xa10   :  { %6064 = vmatpush1.msra.mxu1 %v4132_v17  ;;  %5994 = vmatprep.subr.mxu0 %v3605_v47  ;;  %v3924_v17 = vld [vmem:[#allocation22 + $0x3050] sm:$0xff]  ;;  %v3909_v47 = vld [vmem:[#allocation22 + $0x2fd8] sm:$0xff] }
 0xa11   :  { %6065 = vmatprep.subr.mxu1 %v4117_v30  ;;  %5995 = vmatpush1.msra.mxu0 %v3604_v51  ;;  %v4421_v30 = vld [vmem:[#allocation22 + $0x3fd8] sm:$0xff]  ;;  %v3908_v51 = vld [vmem:[#allocation22 + $0x2fd0] sm:$0xff] }
 0xa12   :  { %6066 = vmatpush1.msra.mxu1 %v4116_v38  ;;  %5996 = vmatprep.subr.mxu0 %v3589_v39  ;;  %v4420_v38 = vld [vmem:[#allocation22 + $0x3fd0] sm:$0xff]  ;;  %v3893_v39 = vld [vmem:[#allocation22 + $0x2f58] sm:$0xff] }
 0xa13   :  { %6067 = vmatprep.subr.mxu1 %v4101_v56  ;;  %5997 = vmatpush1.msra.mxu0 %v3588_v31  ;;  %v4405_v56 = vld [vmem:[#allocation22 + $0x3f58] sm:$0xff]  ;;  %v3892_v31 = vld [vmem:[#allocation22 + $0x2f50] sm:$0xff] }
 0xa14   :  { %6068 = vmatpush1.msra.mxu1 %v4100_v57  ;;  %5998 = vmatprep.subr.mxu0 %v3573_v41  ;;  %v4404_v57 = vld [vmem:[#allocation22 + $0x3f50] sm:$0xff]  ;;  %v3877_v41 = vld [vmem:[#allocation22 + $0x2ed8] sm:$0xff] }
 0xa15   :  { %6069 = vmatprep.subr.mxu1 %v4085_v42  ;;  %5999 = vmatpush1.msra.mxu0 %v3572_v63  ;;  %v4389_v42 = vld [vmem:[#allocation22 + $0x3ed8] sm:$0xff]  ;;  %v3876_v63 = vld [vmem:[#allocation22 + $0x2ed0] sm:$0xff] }
 0xa16   :  { %6070 = vmatpush1.msra.mxu1 %v4084_v2  ;;  %6000 = vmatprep.subr.mxu0 %v3557_v6  ;;  %v4388_v2 = vld [vmem:[#allocation22 + $0x3ed0] sm:$0xff]  ;;  %v3861_v6 = vld [vmem:[#allocation22 + $0x2e58] sm:$0xff] }
 0xa17   :  { %6071 = vmatprep.subr.mxu1 %v4069_v8  ;;  %6001 = vmatpush1.msra.mxu0 %v3556_v45  ;;  %v4373_v8 = vld [vmem:[#allocation22 + $0x3e58] sm:$0xff]  ;;  %v3860_v45 = vld [vmem:[#allocation22 + $0x2e50] sm:$0xff] }
 0xa18   :  { %6072 = vmatpush1.msra.mxu1 %v4068_v10  ;;  %6002 = vmatprep.subr.mxu0 %v3541_v60  ;;  %v4372_v10 = vld [vmem:[#allocation22 + $0x3e50] sm:$0xff]  ;;  %v3845_v60 = vld [vmem:[#allocation22 + $0x2dd8] sm:$0xff] }
 0xa19   :  { %6073 = vmatprep.subr.mxu1 %v4053_v1  ;;  %6003 = vmatpush1.msra.mxu0 %v3540_v3  ;;  %v4357_v1 = vld [vmem:[#allocation22 + $0x3dd8] sm:$0xff]  ;;  %v3844_v3 = vld [vmem:[#allocation22 + $0x2dd0] sm:$0xff] }
 0xa1a   :  { %6074 = vmatpush1.msra.mxu1 %v4052_v5  ;;  %6004 = vmatprep.subr.mxu0 %v3525_v14  ;;  %v4356_v5 = vld [vmem:[#allocation22 + $0x3dd0] sm:$0xff]  ;;  %v3829_v14 = vld [vmem:[#allocation22 + $0x2d58] sm:$0xff] }
 0xa1b   :  { %6075 = vmatprep.subr.mxu1 %v4037_v15  ;;  %6005 = vmatpush1.msra.mxu0 %v3524_v35  ;;  %v4341_v15 = vld [vmem:[#allocation22 + $0x3d58] sm:$0xff]  ;;  %v3828_v35 = vld [vmem:[#allocation22 + $0x2d50] sm:$0xff] }
 0xa1c   :  { %6076 = vmatpush1.msra.mxu1 %v4036_v40  ;;  %6006 = vmatprep.subr.mxu0 %v3509_v37  ;;  %v4340_v40 = vld [vmem:[#allocation22 + $0x3d50] sm:$0xff]  ;;  %v3813_v37 = vld [vmem:[#allocation22 + $0x2cd8] sm:$0xff] }
 0xa1d   :  { %6077 = vmatprep.subr.mxu1 %v4021_v18  ;;  %6007 = vmatpush1.msra.mxu0 %v3508_v19  ;;  %v4325_v18 = vld [vmem:[#allocation22 + $0x3cd8] sm:$0xff]  ;;  %v3812_v19 = vld [vmem:[#allocation22 + $0x2cd0] sm:$0xff] }
 0xa1e   :  { %6078 = vmatpush1.msra.mxu1 %v4020_v20  ;;  %6008 = vmatprep.subr.mxu0 %v3493_v21  ;;  %v4324_v20 = vld [vmem:[#allocation22 + $0x3cd0] sm:$0xff]  ;;  %v3797_v21 = vld [vmem:[#allocation22 + $0x2c58] sm:$0xff] }
 0xa1f   :  { %6079 = vmatprep.subr.mxu1 %v4005_v22  ;;  %6009 = vmatpush1.msra.mxu0 %v3492_v23  ;;  %v4309_v22 = vld [vmem:[#allocation22 + $0x3c58] sm:$0xff]  ;;  %v3796_v23 = vld [vmem:[#allocation22 + $0x2c50] sm:$0xff] }
 0xa20   :  { %6080 = vmatpush1.msra.mxu1 %v4004_v24  ;;  %6010 = vmatprep.subr.mxu0 %v3477_v25  ;;  %v4308_v24 = vld [vmem:[#allocation22 + $0x3c50] sm:$0xff]  ;;  %v3781_v25 = vld [vmem:[#allocation22 + $0x2bd8] sm:$0xff] }
 0xa21   :  { %6081 = vmatprep.subr.mxu1 %v3989_v28  ;;  %6011 = vmatpush1.msra.mxu0 %v3476_v29  ;;  %v4293_v28 = vld [vmem:[#allocation22 + $0x3bd8] sm:$0xff]  ;;  %v3780_v29 = vld [vmem:[#allocation22 + $0x2bd0] sm:$0xff] }
 0xa22   :  { %6082 = vmatpush1.msra.mxu1 %v3988_v36  ;;  %6012 = vmatprep.subr.mxu0 %v3461_v4  ;;  %v4292_v36 = vld [vmem:[#allocation22 + $0x3bd0] sm:$0xff]  ;;  %v3765_v4 = vld [vmem:[#allocation22 + $0x2b58] sm:$0xff] }
 0xa23   :  { %6083 = vmatprep.subr.mxu1 %v3973_v43  ;;  %6013 = vmatpush1.msra.mxu0 %v3460_v46  ;;  %v4277_v43 = vld [vmem:[#allocation22 + $0x3b58] sm:$0xff]  ;;  %v3764_v46 = vld [vmem:[#allocation22 + $0x2b50] sm:$0xff] }
 0xa24   :  { %6084 = vmatpush1.msra.mxu1 %v3972_v48  ;;  %6014 = vmatprep.subr.mxu0 %v3445_v34  ;;  %v4276_v48 = vld [vmem:[#allocation22 + $0x3b50] sm:$0xff]  ;;  %v3749_v34 = vld [vmem:[#allocation22 + $0x2ad8] sm:$0xff] }
 0xa25   :  { %6085 = vmatprep.subr.mxu1 %v3957_v12  ;;  %6015 = vmatpush1.msra.mxu0 %v3444_v54  ;;  %v4261_v12 = vld [vmem:[#allocation22 + $0x3ad8] sm:$0xff]  ;;  %v3748_v54 = vld [vmem:[#allocation22 + $0x2ad0] sm:$0xff] }
 0xa26   :  { %6086 = vmatpush1.msra.mxu1 %v3956_v44  ;;  %6016 = vmatprep.subr.mxu0 %v3429_v11  ;;  %v4260_v44 = vld [vmem:[#allocation22 + $0x3ad0] sm:$0xff]  ;;  %v3733_v11 = vld [vmem:[#allocation22 + $0x2a58] sm:$0xff] }
 0xa27   :  { %6087 = vmatprep.subr.mxu1 %v3941_v49  ;;  %6017 = vmatpush1.msra.mxu0 %v3428_v50  ;;  %v4245_v49 = vld [vmem:[#allocation22 + $0x3a58] sm:$0xff]  ;;  %v3732_v50 = vld [vmem:[#allocation22 + $0x2a50] sm:$0xff] }
 0xa28   :  { %6088 = vmatpush1.msra.mxu1 %v3940_v52  ;;  %6018 = vmatprep.subr.mxu0 %v3413_v53  ;;  %v4244_v52 = vld [vmem:[#allocation22 + $0x3a50] sm:$0xff]  ;;  %v3717_v53 = vld [vmem:[#allocation22 + $0x29d8] sm:$0xff] }
 0xa29   :  { %6089 = vmatprep.subr.mxu1 %v3925_v55  ;;  %6019 = vmatpush1.msra.mxu0 %v3412_v33  ;;  %v4229_v55 = vld [vmem:[#allocation22 + $0x39d8] sm:$0xff]  ;;  %v3716_v33 = vld [vmem:[#allocation22 + $0x29d0] sm:$0xff] }
 0xa2a   :  { %6090 = vmatpush1.msra.mxu1 %v3924_v17  ;;  %6020 = vmatprep.subr.mxu0 %v3909_v47  ;;  %v4228_v17 = vld [vmem:[#allocation22 + $0x39d0] sm:$0xff]  ;;  %v3701_v47 = vld [vmem:[#allocation22 + $0x2958] sm:$0xff] }
 0xa2b   :  { %6091 = vmatprep.subr.mxu1 %v4421_v30  ;;  %6021 = vmatpush2.msra.mxu0 %v3908_v51  ;;  %v4213_v30 = vld [vmem:[#allocation22 + $0x3958] sm:$0xff]  ;;  %v3700_v51 = vld [vmem:[#allocation22 + $0x2950] sm:$0xff] }
 0xa2c   :  { %6092 = vmatpush2.msra.mxu1 %v4420_v38  ;;  %6022 = vmatprep.subr.mxu0 %v3893_v39  ;;  %v4212_v38 = vld [vmem:[#allocation22 + $0x3950] sm:$0xff]  ;;  %v3685_v39 = vld [vmem:[#allocation22 + $0x28d8] sm:$0xff] }
 0xa2d   :  { %6093 = vmatprep.subr.mxu1 %v4405_v56  ;;  %6023 = vmatpush2.msra.mxu0 %v3892_v31  ;;  %v4197_v56 = vld [vmem:[#allocation22 + $0x38d8] sm:$0xff]  ;;  %v3684_v31 = vld [vmem:[#allocation22 + $0x28d0] sm:$0xff] }
 0xa2e   :  { %6094 = vmatpush2.msra.mxu1 %v4404_v57  ;;  %6024 = vmatprep.subr.mxu0 %v3877_v41  ;;  %v4196_v57 = vld [vmem:[#allocation22 + $0x38d0] sm:$0xff]  ;;  %v3669_v41 = vld [vmem:[#allocation22 + $0x2858] sm:$0xff] }
 0xa2f   :  { %6095 = vmatprep.subr.mxu1 %v4389_v42  ;;  %6025 = vmatpush2.msra.mxu0 %v3876_v63  ;;  %v4181_v42 = vld [vmem:[#allocation22 + $0x3858] sm:$0xff]  ;;  %v3668_v63 = vld [vmem:[#allocation22 + $0x2850] sm:$0xff] }
 0xa30   :  { %6096 = vmatpush2.msra.mxu1 %v4388_v2  ;;  %6026 = vmatprep.subr.mxu0 %v3861_v6  ;;  %v4180_v2 = vld [vmem:[#allocation22 + $0x3850] sm:$0xff]  ;;  %v2631_v6 = vld [vmem:[#allocation22 + $0x7e8] sm:$0xff] }
 0xa31   :  { %6097 = vmatprep.subr.mxu1 %v4373_v8  ;;  %6027 = vmatpush2.msra.mxu0 %v3860_v45  ;;  %v3143_v8 = vld [vmem:[#allocation22 + $0x17e8] sm:$0xff]  ;;  %v2630_v45 = vld [vmem:[#allocation22 + $0x7e0] sm:$0xff] }
 0xa32   :  { %6098 = vmatpush2.msra.mxu1 %v4372_v10  ;;  %6028 = vmatprep.subr.mxu0 %v3845_v60  ;;  %v3142_v10 = vld [vmem:[#allocation22 + $0x17e0] sm:$0xff]  ;;  %v2615_v60 = vld [vmem:[#allocation22 + $0x768] sm:$0xff] }
 0xa33   :  { %6099 = vmatprep.subr.mxu1 %v4357_v1  ;;  %6029 = vmatpush2.msra.mxu0 %v3844_v3  ;;  %v3127_v1 = vld [vmem:[#allocation22 + $0x1768] sm:$0xff]  ;;  %v2614_v3 = vld [vmem:[#allocation22 + $0x760] sm:$0xff] }
 0xa34   :  { %6100 = vmatpush2.msra.mxu1 %v4356_v5  ;;  %6030 = vmatprep.subr.mxu0 %v3829_v14  ;;  %v3126_v5 = vld [vmem:[#allocation22 + $0x1760] sm:$0xff]  ;;  %v2599_v14 = vld [vmem:[#allocation22 + $0x6e8] sm:$0xff] }
 0xa35   :  { %6101 = vmatprep.subr.mxu1 %v4341_v15  ;;  %6031 = vmatpush2.msra.mxu0 %v3828_v35  ;;  %v3111_v15 = vld [vmem:[#allocation22 + $0x16e8] sm:$0xff]  ;;  %v2598_v35 = vld [vmem:[#allocation22 + $0x6e0] sm:$0xff] }
 0xa36   :  { %6102 = vmatpush2.msra.mxu1 %v4340_v40  ;;  %6032 = vmatprep.subr.mxu0 %v3813_v37  ;;  %v3110_v40 = vld [vmem:[#allocation22 + $0x16e0] sm:$0xff]  ;;  %v2583_v37 = vld [vmem:[#allocation22 + $0x668] sm:$0xff] }
 0xa37   :  { %6103 = vmatprep.subr.mxu1 %v4325_v18  ;;  %6033 = vmatpush2.msra.mxu0 %v3812_v19  ;;  %v3095_v18 = vld [vmem:[#allocation22 + $0x1668] sm:$0xff]  ;;  %v2582_v19 = vld [vmem:[#allocation22 + $0x660] sm:$0xff] }
 0xa38   :  { %6104 = vmatpush2.msra.mxu1 %v4324_v20  ;;  %6034 = vmatprep.subr.mxu0 %v3797_v21  ;;  %v3094_v20 = vld [vmem:[#allocation22 + $0x1660] sm:$0xff]  ;;  %v2567_v21 = vld [vmem:[#allocation22 + $0x5e8] sm:$0xff] }
 0xa39   :  { %6105 = vmatprep.subr.mxu1 %v4309_v22  ;;  %6035 = vmatpush2.msra.mxu0 %v3796_v23  ;;  %v3079_v22 = vld [vmem:[#allocation22 + $0x15e8] sm:$0xff]  ;;  %v2566_v23 = vld [vmem:[#allocation22 + $0x5e0] sm:$0xff] }
 0xa3a   :  { %6106 = vmatpush2.msra.mxu1 %v4308_v24  ;;  %6036 = vmatprep.subr.mxu0 %v3781_v25  ;;  %v3078_v24 = vld [vmem:[#allocation22 + $0x15e0] sm:$0xff]  ;;  %v2551_v25 = vld [vmem:[#allocation22 + $0x568] sm:$0xff] }
 0xa3b   :  { %6107 = vmatprep.subr.mxu1 %v4293_v28  ;;  %6037 = vmatpush2.msra.mxu0 %v3780_v29  ;;  %v3063_v28 = vld [vmem:[#allocation22 + $0x1568] sm:$0xff]  ;;  %v2550_v29 = vld [vmem:[#allocation22 + $0x560] sm:$0xff] }
 0xa3c   :  { %6108 = vmatpush2.msra.mxu1 %v4292_v36  ;;  %6038 = vmatprep.subr.mxu0 %v3765_v4  ;;  %v3062_v36 = vld [vmem:[#allocation22 + $0x1560] sm:$0xff]  ;;  %v2535_v4 = vld [vmem:[#allocation22 + $0x4e8] sm:$0xff] }
 0xa3d   :  { %6109 = vmatprep.subr.mxu1 %v4277_v43  ;;  %6039 = vmatpush2.msra.mxu0 %v3764_v46  ;;  %v3047_v43 = vld [vmem:[#allocation22 + $0x14e8] sm:$0xff]  ;;  %v2534_v46 = vld [vmem:[#allocation22 + $0x4e0] sm:$0xff] }
 0xa3e   :  { %6110 = vmatpush2.msra.mxu1 %v4276_v48  ;;  %6040 = vmatprep.subr.mxu0 %v3749_v34  ;;  %v3046_v48 = vld [vmem:[#allocation22 + $0x14e0] sm:$0xff]  ;;  %v2519_v34 = vld [vmem:[#allocation22 + $0x468] sm:$0xff] }
 0xa3f   :  { %6111 = vmatprep.subr.mxu1 %v4261_v12  ;;  %6041 = vmatpush2.msra.mxu0 %v3748_v54  ;;  %v3031_v12 = vld [vmem:[#allocation22 + $0x1468] sm:$0xff]  ;;  %v2518_v54 = vld [vmem:[#allocation22 + $0x460] sm:$0xff] }
 0xa40   :  { %6112 = vmatpush2.msra.mxu1 %v4260_v44  ;;  %6042 = vmatprep.subr.mxu0 %v3733_v11  ;;  %v3030_v44 = vld [vmem:[#allocation22 + $0x1460] sm:$0xff]  ;;  %v2503_v11 = vld [vmem:[#allocation22 + $0x3e8] sm:$0xff] }
 0xa41   :  { %6113 = vmatprep.subr.mxu1 %v4245_v49  ;;  %6043 = vmatpush2.msra.mxu0 %v3732_v50  ;;  %v3015_v49 = vld [vmem:[#allocation22 + $0x13e8] sm:$0xff]  ;;  %v2502_v50 = vld [vmem:[#allocation22 + $0x3e0] sm:$0xff] }
 0xa42   :  { %6114 = vmatpush2.msra.mxu1 %v4244_v52  ;;  %6044 = vmatprep.subr.mxu0 %v3717_v53  ;;  %v3014_v52 = vld [vmem:[#allocation22 + $0x13e0] sm:$0xff]  ;;  %v2487_v53 = vld [vmem:[#allocation22 + $0x368] sm:$0xff] }
 0xa43   :  { %6115 = vmatprep.subr.mxu1 %v4229_v55  ;;  %6045 = vmatpush2.msra.mxu0 %v3716_v33  ;;  %v2999_v55 = vld [vmem:[#allocation22 + $0x1368] sm:$0xff]  ;;  %v2486_v33 = vld [vmem:[#allocation22 + $0x360] sm:$0xff] }
 0xa44   :  { %6116 = vmatpush2.msra.mxu1 %v4228_v17  ;;  %6046 = vmatprep.subr.mxu0 %v3701_v47  ;;  %v2998_v17 = vld [vmem:[#allocation22 + $0x1360] sm:$0xff]  ;;  %v2471_v47 = vld [vmem:[#allocation22 + $0x2e8] sm:$0xff] }
 0xa45   :  { %6117 = vmatprep.subr.mxu1 %v4213_v30  ;;  %6047 = vmatpush2.msra.mxu0 %v3700_v51  ;;  %v2983_v30 = vld [vmem:[#allocation22 + $0x12e8] sm:$0xff]  ;;  %v2470_v51 = vld [vmem:[#allocation22 + $0x2e0] sm:$0xff] }
 0xa46   :  { %6118 = vmatpush2.msra.mxu1 %v4212_v38  ;;  %6048 = vmatprep.subr.mxu0 %v3685_v39  ;;  %v2982_v38 = vld [vmem:[#allocation22 + $0x12e0] sm:$0xff]  ;;  %v2455_v39 = vld [vmem:[#allocation22 + $0x268] sm:$0xff] }
 0xa47   :  { %6119 = vmatprep.subr.mxu1 %v4197_v56  ;;  %6049 = vmatpush2.msra.mxu0 %v3684_v31  ;;  %v2967_v56 = vld [vmem:[#allocation22 + $0x1268] sm:$0xff]  ;;  %v2454_v31 = vld [vmem:[#allocation22 + $0x260] sm:$0xff] }
 0xa48   :  { %6120 = vmatpush2.msra.mxu1 %v4196_v57  ;;  %6050 = vmatprep.subr.mxu0 %v3669_v41  ;;  %v2966_v57 = vld [vmem:[#allocation22 + $0x1260] sm:$0xff]  ;;  %v2439_v41 = vld [vmem:[#allocation22 + $0x1e8] sm:$0xff] }
 0xa49   :  { %6121 = vmatprep.subr.mxu1 %v4181_v42  ;;  %6051 = vmatpush2.msra.mxu0 %v3668_v63  ;;  %v2951_v42 = vld [vmem:[#allocation22 + $0x11e8] sm:$0xff]  ;;  %v2438_v63 = vld [vmem:[#allocation22 + $0x1e0] sm:$0xff] }
 0xa4a   :  { %6122 = vmatpush2.msra.mxu1 %v4180_v2  ;;  %6053 = vmatmul.mubr.f32.vlgmr.msra.gmra.mxu0 %v9311_v26  ;;  %v2950_v2 = vld [vmem:[#allocation22 + $0x11e0] sm:$0xff] }
 0xa4b   :  { %6124 = vmatmul.mubr.f32.vlgmr.msra.gmra.mxu1 %v9315_v32  ;;  %6130 = vmatprep.subr.mxu0 %v2631_v6  ;;  %v2423_v6 = vld [vmem:[#allocation22 + $0x168] sm:$0xff] }
 0xa4c   :  { %6201 = vmatprep.subr.mxu1 %v3143_v8  ;;  %6131 = vmatpush1.msra.mxu0 %v2630_v45  ;;  %v2935_v8 = vld [vmem:[#allocation22 + $0x1168] sm:$0xff]  ;;  %v2422_v45 = vld [vmem:[#allocation22 + $0x160] sm:$0xff] }
 0xa4d   :  { %6194 = vmatprep.mubr.f32.mxu0 %v9288_v27  ;;  %6202 = vmatpush1.msra.mxu1 %v3142_v10  ;;  %v2934_v10 = vld [vmem:[#allocation22 + $0x1160] sm:$0xff] }
 0xa4e   :  { %6265 = vmatprep.mubr.f32.mxu1 %v9291_v59  ;;  %6132 = vmatprep.subr.mxu0 %v2615_v60  ;;  %v2407_v60 = vld [vmem:[#allocation22 + $0xe8] sm:$0xff] }
 0xa4f   :  { %6203 = vmatprep.subr.mxu1 %v3127_v1  ;;  %6133 = vmatpush1.msra.mxu0 %v2614_v3  ;;  %v2919_v1 = vld [vmem:[#allocation22 + $0x10e8] sm:$0xff]  ;;  %v2406_v3 = vld [vmem:[#allocation22 + $0xe0] sm:$0xff] }
 0xa50   :  { %6204 = vmatpush1.msra.mxu1 %v3126_v5  ;;  %6134 = vmatprep.subr.mxu0 %v2599_v14  ;;  %v2918_v5 = vld [vmem:[#allocation22 + $0x10e0] sm:$0xff]  ;;  %v2391_v14 = vld [vmem:[#allocation22 + $0x68] sm:$0xff] }
 0xa51   :  { %6205 = vmatprep.subr.mxu1 %v3111_v15  ;;  %6135 = vmatpush1.msra.mxu0 %v2598_v35  ;;  %v2903_v15 = vld [vmem:[#allocation22 + $0x1068] sm:$0xff]  ;;  %v2390_v35 = vld [vmem:[#allocation22 + $0x60] sm:$0xff] }
 0xa52   :  { %6206 = vmatpush1.msra.mxu1 %v3110_v40  ;;  %6136 = vmatprep.subr.mxu0 %v2583_v37  ;;  %v2902_v40 = vld [vmem:[#allocation22 + $0x1060] sm:$0xff]  ;;  %v2887_v37 = vld [vmem:[#allocation22 + $0xfe8] sm:$0xff] }
 0xa53   :  { %6207 = vmatprep.subr.mxu1 %v3095_v18  ;;  %6137 = vmatpush1.msra.mxu0 %v2582_v19  ;;  %v3399_v18 = vld [vmem:[#allocation22 + $0x1fe8] sm:$0xff]  ;;  %v2886_v19 = vld [vmem:[#allocation22 + $0xfe0] sm:$0xff] }
 0xa54   :  { %6208 = vmatpush1.msra.mxu1 %v3094_v20  ;;  %6138 = vmatprep.subr.mxu0 %v2567_v21  ;;  %v3398_v20 = vld [vmem:[#allocation22 + $0x1fe0] sm:$0xff]  ;;  %v2871_v21 = vld [vmem:[#allocation22 + $0xf68] sm:$0xff] }
 0xa55   :  { %6209 = vmatprep.subr.mxu1 %v3079_v22  ;;  %6139 = vmatpush1.msra.mxu0 %v2566_v23  ;;  %v3383_v22 = vld [vmem:[#allocation22 + $0x1f68] sm:$0xff]  ;;  %v2870_v23 = vld [vmem:[#allocation22 + $0xf60] sm:$0xff] }
 0xa56   :  { %6210 = vmatpush1.msra.mxu1 %v3078_v24  ;;  %6140 = vmatprep.subr.mxu0 %v2551_v25  ;;  %v3382_v24 = vld [vmem:[#allocation22 + $0x1f60] sm:$0xff]  ;;  %v2855_v25 = vld [vmem:[#allocation22 + $0xee8] sm:$0xff] }
 0xa57   :  { %6211 = vmatprep.subr.mxu1 %v3063_v28  ;;  %6141 = vmatpush1.msra.mxu0 %v2550_v29  ;;  %v3367_v28 = vld [vmem:[#allocation22 + $0x1ee8] sm:$0xff]  ;;  %v2854_v29 = vld [vmem:[#allocation22 + $0xee0] sm:$0xff] }
 0xa58   :  { %6212 = vmatpush1.msra.mxu1 %v3062_v36  ;;  %6142 = vmatprep.subr.mxu0 %v2535_v4  ;;  %v3366_v36 = vld [vmem:[#allocation22 + $0x1ee0] sm:$0xff]  ;;  %v2839_v4 = vld [vmem:[#allocation22 + $0xe68] sm:$0xff] }
 0xa59   :  { %6213 = vmatprep.subr.mxu1 %v3047_v43  ;;  %6143 = vmatpush1.msra.mxu0 %v2534_v46  ;;  %v3351_v43 = vld [vmem:[#allocation22 + $0x1e68] sm:$0xff]  ;;  %v2838_v46 = vld [vmem:[#allocation22 + $0xe60] sm:$0xff] }
 0xa5a   :  { %6214 = vmatpush1.msra.mxu1 %v3046_v48  ;;  %6144 = vmatprep.subr.mxu0 %v2519_v34  ;;  %v3350_v48 = vld [vmem:[#allocation22 + $0x1e60] sm:$0xff]  ;;  %v2823_v34 = vld [vmem:[#allocation22 + $0xde8] sm:$0xff] }
 0xa5b   :  { %6215 = vmatprep.subr.mxu1 %v3031_v12  ;;  %6145 = vmatpush1.msra.mxu0 %v2518_v54  ;;  %v3335_v12 = vld [vmem:[#allocation22 + $0x1de8] sm:$0xff]  ;;  %v2822_v54 = vld [vmem:[#allocation22 + $0xde0] sm:$0xff] }
 0xa5c   :  { %6216 = vmatpush1.msra.mxu1 %v3030_v44  ;;  %6146 = vmatprep.subr.mxu0 %v2503_v11  ;;  %v3334_v44 = vld [vmem:[#allocation22 + $0x1de0] sm:$0xff]  ;;  %v2807_v11 = vld [vmem:[#allocation22 + $0xd68] sm:$0xff] }
 0xa5d   :  { %6217 = vmatprep.subr.mxu1 %v3015_v49  ;;  %6147 = vmatpush1.msra.mxu0 %v2502_v50  ;;  %v3319_v49 = vld [vmem:[#allocation22 + $0x1d68] sm:$0xff]  ;;  %v2806_v50 = vld [vmem:[#allocation22 + $0xd60] sm:$0xff] }
 0xa5e   :  { %6218 = vmatpush1.msra.mxu1 %v3014_v52  ;;  %6148 = vmatprep.subr.mxu0 %v2487_v53  ;;  %v3318_v52 = vld [vmem:[#allocation22 + $0x1d60] sm:$0xff]  ;;  %v2791_v53 = vld [vmem:[#allocation22 + $0xce8] sm:$0xff] }
 0xa5f   :  { %6219 = vmatprep.subr.mxu1 %v2999_v55  ;;  %6149 = vmatpush1.msra.mxu0 %v2486_v33  ;;  %v3303_v55 = vld [vmem:[#allocation22 + $0x1ce8] sm:$0xff]  ;;  %v2790_v33 = vld [vmem:[#allocation22 + $0xce0] sm:$0xff] }
 0xa60   :  { %6220 = vmatpush1.msra.mxu1 %v2998_v17  ;;  %6150 = vmatprep.subr.mxu0 %v2471_v47  ;;  %v3302_v17 = vld [vmem:[#allocation22 + $0x1ce0] sm:$0xff]  ;;  %v2775_v47 = vld [vmem:[#allocation22 + $0xc68] sm:$0xff] }
 0xa61   :  { %6221 = vmatprep.subr.mxu1 %v2983_v30  ;;  %6151 = vmatpush1.msra.mxu0 %v2470_v51  ;;  %v3287_v30 = vld [vmem:[#allocation22 + $0x1c68] sm:$0xff]  ;;  %v2774_v51 = vld [vmem:[#allocation22 + $0xc60] sm:$0xff] }
 0xa62   :  { %6222 = vmatpush1.msra.mxu1 %v2982_v38  ;;  %6152 = vmatprep.subr.mxu0 %v2455_v39  ;;  %v3286_v38 = vld [vmem:[#allocation22 + $0x1c60] sm:$0xff]  ;;  %v2759_v39 = vld [vmem:[#allocation22 + $0xbe8] sm:$0xff] }
 0xa63   :  { %6223 = vmatprep.subr.mxu1 %v2967_v56  ;;  %6153 = vmatpush1.msra.mxu0 %v2454_v31  ;;  %v3271_v56 = vld [vmem:[#allocation22 + $0x1be8] sm:$0xff]  ;;  %v2758_v31 = vld [vmem:[#allocation22 + $0xbe0] sm:$0xff] }
 0xa64   :  { %6224 = vmatpush1.msra.mxu1 %v2966_v57  ;;  %6154 = vmatprep.subr.mxu0 %v2439_v41  ;;  %v3270_v57 = vld [vmem:[#allocation22 + $0x1be0] sm:$0xff]  ;;  %v2743_v41 = vld [vmem:[#allocation22 + $0xb68] sm:$0xff] }
 0xa65   :  { %6225 = vmatprep.subr.mxu1 %v2951_v42  ;;  %6155 = vmatpush1.msra.mxu0 %v2438_v63  ;;  %v3255_v42 = vld [vmem:[#allocation22 + $0x1b68] sm:$0xff]  ;;  %v2742_v63 = vld [vmem:[#allocation22 + $0xb60] sm:$0xff] }
 0xa66   :  { %6226 = vmatpush1.msra.mxu1 %v2950_v2  ;;  %6156 = vmatprep.subr.mxu0 %v2423_v6  ;;  %v3254_v2 = vld [vmem:[#allocation22 + $0x1b60] sm:$0xff]  ;;  %v2727_v6 = vld [vmem:[#allocation22 + $0xae8] sm:$0xff] }
 0xa67   :  { %6227 = vmatprep.subr.mxu1 %v2935_v8  ;;  %6157 = vmatpush1.msra.mxu0 %v2422_v45  ;;  %v3239_v8 = vld [vmem:[#allocation22 + $0x1ae8] sm:$0xff]  ;;  %v2726_v45 = vld [vmem:[#allocation22 + $0xae0] sm:$0xff] }
 0xa68   :  { %6228 = vmatpush1.msra.mxu1 %v2934_v10  ;;  %6158 = vmatprep.subr.mxu0 %v2407_v60  ;;  %v3238_v10 = vld [vmem:[#allocation22 + $0x1ae0] sm:$0xff]  ;;  %v2711_v60 = vld [vmem:[#allocation22 + $0xa68] sm:$0xff] }
 0xa69   :  { %6229 = vmatprep.subr.mxu1 %v2919_v1  ;;  %6159 = vmatpush1.msra.mxu0 %v2406_v3  ;;  %v3223_v1 = vld [vmem:[#allocation22 + $0x1a68] sm:$0xff]  ;;  %v2710_v3 = vld [vmem:[#allocation22 + $0xa60] sm:$0xff] }
 0xa6a   :  { %6230 = vmatpush1.msra.mxu1 %v2918_v5  ;;  %6160 = vmatprep.subr.mxu0 %v2391_v14  ;;  %v3222_v5 = vld [vmem:[#allocation22 + $0x1a60] sm:$0xff]  ;;  %v2695_v14 = vld [vmem:[#allocation22 + $0x9e8] sm:$0xff] }
 0xa6b   :  { %6231 = vmatprep.subr.mxu1 %v2903_v15  ;;  %6161 = vmatpush1.msra.mxu0 %v2390_v35  ;;  %v3207_v15 = vld [vmem:[#allocation22 + $0x19e8] sm:$0xff]  ;;  %v2694_v35 = vld [vmem:[#allocation22 + $0x9e0] sm:$0xff] }
 0xa6c   :  { %6232 = vmatpush1.msra.mxu1 %v2902_v40  ;;  %6162 = vmatprep.subr.mxu0 %v2887_v37  ;;  %v3206_v40 = vld [vmem:[#allocation22 + $0x19e0] sm:$0xff]  ;;  %v2679_v37 = vld [vmem:[#allocation22 + $0x968] sm:$0xff] }
 0xa6d   :  { %6233 = vmatprep.subr.mxu1 %v3399_v18  ;;  %6163 = vmatpush2.msra.mxu0 %v2886_v19  ;;  %v3191_v18 = vld [vmem:[#allocation22 + $0x1968] sm:$0xff]  ;;  %v2678_v19 = vld [vmem:[#allocation22 + $0x960] sm:$0xff] }
 0xa6e   :  { %6234 = vmatpush2.msra.mxu1 %v3398_v20  ;;  %6164 = vmatprep.subr.mxu0 %v2871_v21  ;;  %v3190_v20 = vld [vmem:[#allocation22 + $0x1960] sm:$0xff]  ;;  %v2663_v21 = vld [vmem:[#allocation22 + $0x8e8] sm:$0xff] }
 0xa6f   :  { %6235 = vmatprep.subr.mxu1 %v3383_v22  ;;  %6165 = vmatpush2.msra.mxu0 %v2870_v23  ;;  %v3175_v22 = vld [vmem:[#allocation22 + $0x18e8] sm:$0xff]  ;;  %v2662_v23 = vld [vmem:[#allocation22 + $0x8e0] sm:$0xff] }
 0xa70   :  { %6236 = vmatpush2.msra.mxu1 %v3382_v24  ;;  %6166 = vmatprep.subr.mxu0 %v2855_v25  ;;  %v3174_v24 = vld [vmem:[#allocation22 + $0x18e0] sm:$0xff]  ;;  %v2647_v25 = vld [vmem:[#allocation22 + $0x868] sm:$0xff] }
 0xa71   :  { %6237 = vmatprep.subr.mxu1 %v3367_v28  ;;  %6167 = vmatpush2.msra.mxu0 %v2854_v29  ;;  %v3159_v28 = vld [vmem:[#allocation22 + $0x1868] sm:$0xff]  ;;  %v2646_v29 = vld [vmem:[#allocation22 + $0x860] sm:$0xff] }
 0xa72   :  { %6238 = vmatpush2.msra.mxu1 %v3366_v36  ;;  %6168 = vmatprep.subr.mxu0 %v2839_v4  ;;  %v3158_v36 = vld [vmem:[#allocation22 + $0x1860] sm:$0xff]  ;;  %v3655_v4 = vld [vmem:[#allocation22 + $0x27e8] sm:$0xff] }
 0xa73   :  { %6239 = vmatprep.subr.mxu1 %v3351_v43  ;;  %6169 = vmatpush2.msra.mxu0 %v2838_v46  ;;  %v4167_v43 = vld [vmem:[#allocation22 + $0x37e8] sm:$0xff]  ;;  %v3654_v46 = vld [vmem:[#allocation22 + $0x27e0] sm:$0xff] }
 0xa74   :  { %6240 = vmatpush2.msra.mxu1 %v3350_v48  ;;  %6170 = vmatprep.subr.mxu0 %v2823_v34  ;;  %v4166_v48 = vld [vmem:[#allocation22 + $0x37e0] sm:$0xff]  ;;  %v3639_v34 = vld [vmem:[#allocation22 + $0x2768] sm:$0xff] }
 0xa75   :  { %6241 = vmatprep.subr.mxu1 %v3335_v12  ;;  %6171 = vmatpush2.msra.mxu0 %v2822_v54  ;;  %v4151_v12 = vld [vmem:[#allocation22 + $0x3768] sm:$0xff]  ;;  %v3638_v54 = vld [vmem:[#allocation22 + $0x2760] sm:$0xff] }
 0xa76   :  { %6242 = vmatpush2.msra.mxu1 %v3334_v44  ;;  %6172 = vmatprep.subr.mxu0 %v2807_v11  ;;  %v4150_v44 = vld [vmem:[#allocation22 + $0x3760] sm:$0xff]  ;;  %v3623_v11 = vld [vmem:[#allocation22 + $0x26e8] sm:$0xff] }
 0xa77   :  { %6243 = vmatprep.subr.mxu1 %v3319_v49  ;;  %6173 = vmatpush2.msra.mxu0 %v2806_v50  ;;  %v4135_v49 = vld [vmem:[#allocation22 + $0x36e8] sm:$0xff]  ;;  %v3622_v50 = vld [vmem:[#allocation22 + $0x26e0] sm:$0xff] }
 0xa78   :  { %6244 = vmatpush2.msra.mxu1 %v3318_v52  ;;  %6174 = vmatprep.subr.mxu0 %v2791_v53  ;;  %v4134_v52 = vld [vmem:[#allocation22 + $0x36e0] sm:$0xff]  ;;  %v3607_v53 = vld [vmem:[#allocation22 + $0x2668] sm:$0xff] }
 0xa79   :  { %6245 = vmatprep.subr.mxu1 %v3303_v55  ;;  %6175 = vmatpush2.msra.mxu0 %v2790_v33  ;;  %v4119_v55 = vld [vmem:[#allocation22 + $0x3668] sm:$0xff]  ;;  %v3606_v33 = vld [vmem:[#allocation22 + $0x2660] sm:$0xff] }
 0xa7a   :  { %6246 = vmatpush2.msra.mxu1 %v3302_v17  ;;  %6176 = vmatprep.subr.mxu0 %v2775_v47  ;;  %v4118_v17 = vld [vmem:[#allocation22 + $0x3660] sm:$0xff]  ;;  %v3591_v47 = vld [vmem:[#allocation22 + $0x25e8] sm:$0xff] }
 0xa7b   :  { %6247 = vmatprep.subr.mxu1 %v3287_v30  ;;  %6177 = vmatpush2.msra.mxu0 %v2774_v51  ;;  %v4103_v30 = vld [vmem:[#allocation22 + $0x35e8] sm:$0xff]  ;;  %v3590_v51 = vld [vmem:[#allocation22 + $0x25e0] sm:$0xff] }
 0xa7c   :  { %6248 = vmatpush2.msra.mxu1 %v3286_v38  ;;  %6178 = vmatprep.subr.mxu0 %v2759_v39  ;;  %v4102_v38 = vld [vmem:[#allocation22 + $0x35e0] sm:$0xff]  ;;  %v3575_v39 = vld [vmem:[#allocation22 + $0x2568] sm:$0xff] }
 0xa7d   :  { %6249 = vmatprep.subr.mxu1 %v3271_v56  ;;  %6179 = vmatpush2.msra.mxu0 %v2758_v31  ;;  %v4087_v56 = vld [vmem:[#allocation22 + $0x3568] sm:$0xff]  ;;  %v3574_v31 = vld [vmem:[#allocation22 + $0x2560] sm:$0xff] }
 0xa7e   :  { %6250 = vmatpush2.msra.mxu1 %v3270_v57  ;;  %6180 = vmatprep.subr.mxu0 %v2743_v41  ;;  %v4086_v57 = vld [vmem:[#allocation22 + $0x3560] sm:$0xff]  ;;  %v3559_v41 = vld [vmem:[#allocation22 + $0x24e8] sm:$0xff] }
 0xa7f   :  { %6251 = vmatprep.subr.mxu1 %v3255_v42  ;;  %6181 = vmatpush2.msra.mxu0 %v2742_v63  ;;  %v4071_v42 = vld [vmem:[#allocation22 + $0x34e8] sm:$0xff]  ;;  %v3558_v63 = vld [vmem:[#allocation22 + $0x24e0] sm:$0xff] }
 0xa80   :  { %6252 = vmatpush2.msra.mxu1 %v3254_v2  ;;  %6182 = vmatprep.subr.mxu0 %v2727_v6  ;;  %v4070_v2 = vld [vmem:[#allocation22 + $0x34e0] sm:$0xff]  ;;  %v3543_v6 = vld [vmem:[#allocation22 + $0x2468] sm:$0xff] }
 0xa81   :  { %6253 = vmatprep.subr.mxu1 %v3239_v8  ;;  %6183 = vmatpush2.msra.mxu0 %v2726_v45  ;;  %v4055_v8 = vld [vmem:[#allocation22 + $0x3468] sm:$0xff]  ;;  %v3542_v45 = vld [vmem:[#allocation22 + $0x2460] sm:$0xff] }
 0xa82   :  { %6254 = vmatpush2.msra.mxu1 %v3238_v10  ;;  %6184 = vmatprep.subr.mxu0 %v2711_v60  ;;  %v4054_v10 = vld [vmem:[#allocation22 + $0x3460] sm:$0xff]  ;;  %v3527_v60 = vld [vmem:[#allocation22 + $0x23e8] sm:$0xff] }
 0xa83   :  { %6255 = vmatprep.subr.mxu1 %v3223_v1  ;;  %6185 = vmatpush2.msra.mxu0 %v2710_v3  ;;  %v4039_v1 = vld [vmem:[#allocation22 + $0x33e8] sm:$0xff]  ;;  %v3526_v3 = vld [vmem:[#allocation22 + $0x23e0] sm:$0xff] }
 0xa84   :  { %6256 = vmatpush2.msra.mxu1 %v3222_v5  ;;  %6186 = vmatprep.subr.mxu0 %v2695_v14  ;;  %v4038_v5 = vld [vmem:[#allocation22 + $0x33e0] sm:$0xff]  ;;  %v3511_v14 = vld [vmem:[#allocation22 + $0x2368] sm:$0xff] }
 0xa85   :  { %6257 = vmatprep.subr.mxu1 %v3207_v15  ;;  %6187 = vmatpush2.msra.mxu0 %v2694_v35  ;;  %v4023_v15 = vld [vmem:[#allocation22 + $0x3368] sm:$0xff]  ;;  %v3510_v35 = vld [vmem:[#allocation22 + $0x2360] sm:$0xff] }
 0xa86   :  { %6258 = vmatpush2.msra.mxu1 %v3206_v40  ;;  %6188 = vmatprep.subr.mxu0 %v2679_v37  ;;  %v4022_v40 = vld [vmem:[#allocation22 + $0x3360] sm:$0xff]  ;;  %v3495_v37 = vld [vmem:[#allocation22 + $0x22e8] sm:$0xff] }
 0xa87   :  { %6259 = vmatprep.subr.mxu1 %v3191_v18  ;;  %6189 = vmatpush2.msra.mxu0 %v2678_v19  ;;  %v4007_v18 = vld [vmem:[#allocation22 + $0x32e8] sm:$0xff]  ;;  %v3494_v19 = vld [vmem:[#allocation22 + $0x22e0] sm:$0xff] }
 0xa88   :  { %6260 = vmatpush2.msra.mxu1 %v3190_v20  ;;  %6190 = vmatprep.subr.mxu0 %v2663_v21  ;;  %v4006_v20 = vld [vmem:[#allocation22 + $0x32e0] sm:$0xff]  ;;  %v3479_v21 = vld [vmem:[#allocation22 + $0x2268] sm:$0xff] }
 0xa89   :  { %6261 = vmatprep.subr.mxu1 %v3175_v22  ;;  %6191 = vmatpush2.msra.mxu0 %v2662_v23  ;;  %v3991_v22 = vld [vmem:[#allocation22 + $0x3268] sm:$0xff]  ;;  %v3478_v23 = vld [vmem:[#allocation22 + $0x2260] sm:$0xff] }
 0xa8a   :  { %6262 = vmatpush2.msra.mxu1 %v3174_v24  ;;  %6192 = vmatprep.subr.mxu0 %v2647_v25  ;;  %v3990_v24 = vld [vmem:[#allocation22 + $0x3260] sm:$0xff]  ;;  %v3463_v25 = vld [vmem:[#allocation22 + $0x21e8] sm:$0xff] }
 0xa8b   :  { %6263 = vmatprep.subr.mxu1 %v3159_v28  ;;  %6193 = vmatpush2.msra.mxu0 %v2646_v29  ;;  %v3975_v28 = vld [vmem:[#allocation22 + $0x31e8] sm:$0xff]  ;;  %v3462_v29 = vld [vmem:[#allocation22 + $0x21e0] sm:$0xff] }
 0xa8c   :  { %6264 = vmatpush2.msra.mxu1 %v3158_v36  ;;  %6195 = vmatmul.mubr.f32.vlgmr.msra.gmra.mxu0 %v9293_v62  ;;  %v3974_v36 = vld [vmem:[#allocation22 + $0x31e0] sm:$0xff] }
 0xa8d   :  { %6266 = vmatmul.mubr.f32.vlgmr.msra.gmra.mxu1 %v9297_v61  ;;  %6272 = vmatprep.subr.mxu0 %v3655_v4  ;;  %v3447_v4 = vld [vmem:[#allocation22 + $0x2168] sm:$0xff] }
 0xa8e   :  { %6343 = vmatprep.subr.mxu1 %v4167_v43  ;;  %6273 = vmatpush1.msra.mxu0 %v3654_v46  ;;  %v3959_v43 = vld [vmem:[#allocation22 + $0x3168] sm:$0xff]  ;;  %v3446_v46 = vld [vmem:[#allocation22 + $0x2160] sm:$0xff] }
 0xa8f   :  { %6336 = vmatprep.mubr.f32.mxu0 %v9300_v7  ;;  %6344 = vmatpush1.msra.mxu1 %v4166_v48  ;;  %v3958_v48 = vld [vmem:[#allocation22 + $0x3160] sm:$0xff] }
 0xa90   :  { %6407 = vmatprep.mubr.f32.mxu1 %v9302_v9  ;;  %6274 = vmatprep.subr.mxu0 %v3639_v34  ;;  %v3431_v34 = vld [vmem:[#allocation22 + $0x20e8] sm:$0xff] }
 0xa91   :  { %6345 = vmatprep.subr.mxu1 %v4151_v12  ;;  %6275 = vmatpush1.msra.mxu0 %v3638_v54  ;;  %v3943_v12 = vld [vmem:[#allocation22 + $0x30e8] sm:$0xff]  ;;  %v3430_v54 = vld [vmem:[#allocation22 + $0x20e0] sm:$0xff] }
 0xa92   :  { %6346 = vmatpush1.msra.mxu1 %v4150_v44  ;;  %6276 = vmatprep.subr.mxu0 %v3623_v11  ;;  %v3942_v44 = vld [vmem:[#allocation22 + $0x30e0] sm:$0xff]  ;;  %v3415_v11 = vld [vmem:[#allocation22 + $0x2068] sm:$0xff] }
 0xa93   :  { %6347 = vmatprep.subr.mxu1 %v4135_v49  ;;  %6277 = vmatpush1.msra.mxu0 %v3622_v50  ;;  %v3927_v49 = vld [vmem:[#allocation22 + $0x3068] sm:$0xff]  ;;  %v3414_v50 = vld [vmem:[#allocation22 + $0x2060] sm:$0xff] }
 0xa94   :  { %6348 = vmatpush1.msra.mxu1 %v4134_v52  ;;  %6278 = vmatprep.subr.mxu0 %v3607_v53  ;;  %v3926_v52 = vld [vmem:[#allocation22 + $0x3060] sm:$0xff]  ;;  %v3911_v53 = vld [vmem:[#allocation22 + $0x2fe8] sm:$0xff] }
 0xa95   :  { %6349 = vmatprep.subr.mxu1 %v4119_v55  ;;  %6279 = vmatpush1.msra.mxu0 %v3606_v33  ;;  %v4423_v55 = vld [vmem:[#allocation22 + $0x3fe8] sm:$0xff]  ;;  %v3910_v33 = vld [vmem:[#allocation22 + $0x2fe0] sm:$0xff] }
 0xa96   :  { %6350 = vmatpush1.msra.mxu1 %v4118_v17  ;;  %6280 = vmatprep.subr.mxu0 %v3591_v47  ;;  %v4422_v17 = vld [vmem:[#allocation22 + $0x3fe0] sm:$0xff]  ;;  %v3895_v47 = vld [vmem:[#allocation22 + $0x2f68] sm:$0xff] }
 0xa97   :  { %6351 = vmatprep.subr.mxu1 %v4103_v30  ;;  %6281 = vmatpush1.msra.mxu0 %v3590_v51  ;;  %v4407_v30 = vld [vmem:[#allocation22 + $0x3f68] sm:$0xff]  ;;  %v3894_v51 = vld [vmem:[#allocation22 + $0x2f60] sm:$0xff] }
 0xa98   :  { %6352 = vmatpush1.msra.mxu1 %v4102_v38  ;;  %6282 = vmatprep.subr.mxu0 %v3575_v39  ;;  %v4406_v38 = vld [vmem:[#allocation22 + $0x3f60] sm:$0xff]  ;;  %v3879_v39 = vld [vmem:[#allocation22 + $0x2ee8] sm:$0xff] }
 0xa99   :  { %6353 = vmatprep.subr.mxu1 %v4087_v56  ;;  %6283 = vmatpush1.msra.mxu0 %v3574_v31  ;;  %v4391_v56 = vld [vmem:[#allocation22 + $0x3ee8] sm:$0xff]  ;;  %v3878_v31 = vld [vmem:[#allocation22 + $0x2ee0] sm:$0xff] }
 0xa9a   :  { %6354 = vmatpush1.msra.mxu1 %v4086_v57  ;;  %6284 = vmatprep.subr.mxu0 %v3559_v41  ;;  %v4390_v57 = vld [vmem:[#allocation22 + $0x3ee0] sm:$0xff]  ;;  %v3863_v41 = vld [vmem:[#allocation22 + $0x2e68] sm:$0xff] }
 0xa9b   :  { %6355 = vmatprep.subr.mxu1 %v4071_v42  ;;  %6285 = vmatpush1.msra.mxu0 %v3558_v63  ;;  %v4375_v42 = vld [vmem:[#allocation22 + $0x3e68] sm:$0xff]  ;;  %v3862_v63 = vld [vmem:[#allocation22 + $0x2e60] sm:$0xff] }
 0xa9c   :  { %6356 = vmatpush1.msra.mxu1 %v4070_v2  ;;  %6286 = vmatprep.subr.mxu0 %v3543_v6  ;;  %v4374_v2 = vld [vmem:[#allocation22 + $0x3e60] sm:$0xff]  ;;  %v3847_v6 = vld [vmem:[#allocation22 + $0x2de8] sm:$0xff] }
 0xa9d   :  { %6357 = vmatprep.subr.mxu1 %v4055_v8  ;;  %6287 = vmatpush1.msra.mxu0 %v3542_v45  ;;  %v4359_v8 = vld [vmem:[#allocation22 + $0x3de8] sm:$0xff]  ;;  %v3846_v45 = vld [vmem:[#allocation22 + $0x2de0] sm:$0xff] }
 0xa9e   :  { %6358 = vmatpush1.msra.mxu1 %v4054_v10  ;;  %6288 = vmatprep.subr.mxu0 %v3527_v60  ;;  %v4358_v10 = vld [vmem:[#allocation22 + $0x3de0] sm:$0xff]  ;;  %v3831_v60 = vld [vmem:[#allocation22 + $0x2d68] sm:$0xff] }
 0xa9f   :  { %6359 = vmatprep.subr.mxu1 %v4039_v1  ;;  %6289 = vmatpush1.msra.mxu0 %v3526_v3  ;;  %v4343_v1 = vld [vmem:[#allocation22 + $0x3d68] sm:$0xff]  ;;  %v3830_v3 = vld [vmem:[#allocation22 + $0x2d60] sm:$0xff] }
 0xaa0   :  { %6360 = vmatpush1.msra.mxu1 %v4038_v5  ;;  %6290 = vmatprep.subr.mxu0 %v3511_v14  ;;  %v4342_v5 = vld [vmem:[#allocation22 + $0x3d60] sm:$0xff]  ;;  %v3815_v14 = vld [vmem:[#allocation22 + $0x2ce8] sm:$0xff] }
 0xaa1   :  { %6361 = vmatprep.subr.mxu1 %v4023_v15  ;;  %6291 = vmatpush1.msra.mxu0 %v3510_v35  ;;  %v4327_v15 = vld [vmem:[#allocation22 + $0x3ce8] sm:$0xff]  ;;  %v3814_v35 = vld [vmem:[#allocation22 + $0x2ce0] sm:$0xff] }
 0xaa2   :  { %6362 = vmatpush1.msra.mxu1 %v4022_v40  ;;  %6292 = vmatprep.subr.mxu0 %v3495_v37  ;;  %v4326_v40 = vld [vmem:[#allocation22 + $0x3ce0] sm:$0xff]  ;;  %v3799_v37 = vld [vmem:[#allocation22 + $0x2c68] sm:$0xff] }
 0xaa3   :  { %6363 = vmatprep.subr.mxu1 %v4007_v18  ;;  %6293 = vmatpush1.msra.mxu0 %v3494_v19  ;;  %v4311_v18 = vld [vmem:[#allocation22 + $0x3c68] sm:$0xff]  ;;  %v3798_v19 = vld [vmem:[#allocation22 + $0x2c60] sm:$0xff] }
 0xaa4   :  { %6364 = vmatpush1.msra.mxu1 %v4006_v20  ;;  %6294 = vmatprep.subr.mxu0 %v3479_v21  ;;  %v4310_v20 = vld [vmem:[#allocation22 + $0x3c60] sm:$0xff]  ;;  %v3783_v21 = vld [vmem:[#allocation22 + $0x2be8] sm:$0xff] }
 0xaa5   :  { %6365 = vmatprep.subr.mxu1 %v3991_v22  ;;  %6295 = vmatpush1.msra.mxu0 %v3478_v23  ;;  %v4295_v22 = vld [vmem:[#allocation22 + $0x3be8] sm:$0xff]  ;;  %v3782_v23 = vld [vmem:[#allocation22 + $0x2be0] sm:$0xff] }
 0xaa6   :  { %6366 = vmatpush1.msra.mxu1 %v3990_v24  ;;  %6296 = vmatprep.subr.mxu0 %v3463_v25  ;;  %v4294_v24 = vld [vmem:[#allocation22 + $0x3be0] sm:$0xff]  ;;  %v3767_v25 = vld [vmem:[#allocation22 + $0x2b68] sm:$0xff] }
 0xaa7   :  { %6367 = vmatprep.subr.mxu1 %v3975_v28  ;;  %6297 = vmatpush1.msra.mxu0 %v3462_v29  ;;  %v4279_v28 = vld [vmem:[#allocation22 + $0x3b68] sm:$0xff]  ;;  %v3766_v29 = vld [vmem:[#allocation22 + $0x2b60] sm:$0xff] }
 0xaa8   :  { %6368 = vmatpush1.msra.mxu1 %v3974_v36  ;;  %6298 = vmatprep.subr.mxu0 %v3447_v4  ;;  %v4278_v36 = vld [vmem:[#allocation22 + $0x3b60] sm:$0xff]  ;;  %v3751_v4 = vld [vmem:[#allocation22 + $0x2ae8] sm:$0xff] }
 0xaa9   :  { %6369 = vmatprep.subr.mxu1 %v3959_v43  ;;  %6299 = vmatpush1.msra.mxu0 %v3446_v46  ;;  %v4263_v43 = vld [vmem:[#allocation22 + $0x3ae8] sm:$0xff]  ;;  %v3750_v46 = vld [vmem:[#allocation22 + $0x2ae0] sm:$0xff] }
 0xaaa   :  { %6370 = vmatpush1.msra.mxu1 %v3958_v48  ;;  %6300 = vmatprep.subr.mxu0 %v3431_v34  ;;  %v4262_v48 = vld [vmem:[#allocation22 + $0x3ae0] sm:$0xff]  ;;  %v3735_v34 = vld [vmem:[#allocation22 + $0x2a68] sm:$0xff] }
 0xaab   :  { %6371 = vmatprep.subr.mxu1 %v3943_v12  ;;  %6301 = vmatpush1.msra.mxu0 %v3430_v54  ;;  %v4247_v12 = vld [vmem:[#allocation22 + $0x3a68] sm:$0xff]  ;;  %v3734_v54 = vld [vmem:[#allocation22 + $0x2a60] sm:$0xff] }
 0xaac   :  { %6372 = vmatpush1.msra.mxu1 %v3942_v44  ;;  %6302 = vmatprep.subr.mxu0 %v3415_v11  ;;  %v4246_v44 = vld [vmem:[#allocation22 + $0x3a60] sm:$0xff]  ;;  %v3719_v11 = vld [vmem:[#allocation22 + $0x29e8] sm:$0xff] }
 0xaad   :  { %6373 = vmatprep.subr.mxu1 %v3927_v49  ;;  %6303 = vmatpush1.msra.mxu0 %v3414_v50  ;;  %v4231_v49 = vld [vmem:[#allocation22 + $0x39e8] sm:$0xff]  ;;  %v3718_v50 = vld [vmem:[#allocation22 + $0x29e0] sm:$0xff] }
 0xaae   :  { %6374 = vmatpush1.msra.mxu1 %v3926_v52  ;;  %6304 = vmatprep.subr.mxu0 %v3911_v53  ;;  %v4230_v52 = vld [vmem:[#allocation22 + $0x39e0] sm:$0xff]  ;;  %v3703_v53 = vld [vmem:[#allocation22 + $0x2968] sm:$0xff] }
 0xaaf   :  { %6375 = vmatprep.subr.mxu1 %v4423_v55  ;;  %6305 = vmatpush2.msra.mxu0 %v3910_v33  ;;  %v4215_v55 = vld [vmem:[#allocation22 + $0x3968] sm:$0xff]  ;;  %v3702_v33 = vld [vmem:[#allocation22 + $0x2960] sm:$0xff] }
 0xab0   :  { %6376 = vmatpush2.msra.mxu1 %v4422_v17  ;;  %6306 = vmatprep.subr.mxu0 %v3895_v47  ;;  %v4214_v17 = vld [vmem:[#allocation22 + $0x3960] sm:$0xff]  ;;  %v3687_v47 = vld [vmem:[#allocation22 + $0x28e8] sm:$0xff] }
 0xab1   :  { %6377 = vmatprep.subr.mxu1 %v4407_v30  ;;  %6307 = vmatpush2.msra.mxu0 %v3894_v51  ;;  %v4199_v30 = vld [vmem:[#allocation22 + $0x38e8] sm:$0xff]  ;;  %v3686_v51 = vld [vmem:[#allocation22 + $0x28e0] sm:$0xff] }
 0xab2   :  { %6378 = vmatpush2.msra.mxu1 %v4406_v38  ;;  %6308 = vmatprep.subr.mxu0 %v3879_v39  ;;  %v4198_v38 = vld [vmem:[#allocation22 + $0x38e0] sm:$0xff]  ;;  %v3671_v39 = vld [vmem:[#allocation22 + $0x2868] sm:$0xff] }
 0xab3   :  { %6379 = vmatprep.subr.mxu1 %v4391_v56  ;;  %6309 = vmatpush2.msra.mxu0 %v3878_v31  ;;  %v4183_v56 = vld [vmem:[#allocation22 + $0x3868] sm:$0xff]  ;;  %v3670_v31 = vld [vmem:[#allocation22 + $0x2860] sm:$0xff] }
 0xab4   :  { %6380 = vmatpush2.msra.mxu1 %v4390_v57  ;;  %6310 = vmatprep.subr.mxu0 %v3863_v41  ;;  %v4182_v57 = vld [vmem:[#allocation22 + $0x3860] sm:$0xff]  ;;  %v2633_v41 = vld [vmem:[#allocation22 + $0x7f8] sm:$0xff] }
 0xab5   :  { %6381 = vmatprep.subr.mxu1 %v4375_v42  ;;  %6311 = vmatpush2.msra.mxu0 %v3862_v63  ;;  %v3145_v42 = vld [vmem:[#allocation22 + $0x17f8] sm:$0xff]  ;;  %v2632_v63 = vld [vmem:[#allocation22 + $0x7f0] sm:$0xff] }
 0xab6   :  { %6382 = vmatpush2.msra.mxu1 %v4374_v2  ;;  %6312 = vmatprep.subr.mxu0 %v3847_v6  ;;  %v3144_v2 = vld [vmem:[#allocation22 + $0x17f0] sm:$0xff]  ;;  %v2617_v6 = vld [vmem:[#allocation22 + $0x778] sm:$0xff] }
 0xab7   :  { %6383 = vmatprep.subr.mxu1 %v4359_v8  ;;  %6313 = vmatpush2.msra.mxu0 %v3846_v45  ;;  %v3129_v8 = vld [vmem:[#allocation22 + $0x1778] sm:$0xff]  ;;  %v2616_v45 = vld [vmem:[#allocation22 + $0x770] sm:$0xff] }
 0xab8   :  { %6384 = vmatpush2.msra.mxu1 %v4358_v10  ;;  %6314 = vmatprep.subr.mxu0 %v3831_v60  ;;  %v3128_v10 = vld [vmem:[#allocation22 + $0x1770] sm:$0xff]  ;;  %v2601_v60 = vld [vmem:[#allocation22 + $0x6f8] sm:$0xff] }
 0xab9   :  { %6385 = vmatprep.subr.mxu1 %v4343_v1  ;;  %6315 = vmatpush2.msra.mxu0 %v3830_v3  ;;  %v3113_v1 = vld [vmem:[#allocation22 + $0x16f8] sm:$0xff]  ;;  %v2600_v3 = vld [vmem:[#allocation22 + $0x6f0] sm:$0xff] }
 0xaba   :  { %6386 = vmatpush2.msra.mxu1 %v4342_v5  ;;  %6316 = vmatprep.subr.mxu0 %v3815_v14  ;;  %v3112_v5 = vld [vmem:[#allocation22 + $0x16f0] sm:$0xff]  ;;  %v2585_v14 = vld [vmem:[#allocation22 + $0x678] sm:$0xff] }
 0xabb   :  { %6387 = vmatprep.subr.mxu1 %v4327_v15  ;;  %6317 = vmatpush2.msra.mxu0 %v3814_v35  ;;  %v3097_v15 = vld [vmem:[#allocation22 + $0x1678] sm:$0xff]  ;;  %v2584_v35 = vld [vmem:[#allocation22 + $0x670] sm:$0xff] }
 0xabc   :  { %6388 = vmatpush2.msra.mxu1 %v4326_v40  ;;  %6318 = vmatprep.subr.mxu0 %v3799_v37  ;;  %v3096_v40 = vld [vmem:[#allocation22 + $0x1670] sm:$0xff]  ;;  %v3081_v37 = vld [vmem:[#allocation22 + $0x15f8] sm:$0xff] }
 0xabd   :  { %6389 = vmatprep.subr.mxu1 %v4311_v18  ;;  %6319 = vmatpush2.msra.mxu0 %v3798_v19  ;;  %v2568_v18 = vld [vmem:[#allocation22 + $0x5f0] sm:$0xff]  ;;  %v2553_v19 = vld [vmem:[#allocation22 + $0x578] sm:$0xff] }
 0xabe   :  { %6390 = vmatpush2.msra.mxu1 %v4310_v20  ;;  %6320 = vmatprep.subr.mxu0 %v3783_v21  ;;  %v3065_v20 = vld [vmem:[#allocation22 + $0x1578] sm:$0xff]  ;;  %v2552_v21 = vld [vmem:[#allocation22 + $0x570] sm:$0xff] }
 0xabf   :  { %6391 = vmatprep.subr.mxu1 %v4295_v22  ;;  %6321 = vmatpush2.msra.mxu0 %v3782_v23  ;;  %v3064_v22 = vld [vmem:[#allocation22 + $0x1570] sm:$0xff]  ;;  %v2537_v23 = vld [vmem:[#allocation22 + $0x4f8] sm:$0xff] }
 0xac0   :  { %6392 = vmatpush2.msra.mxu1 %v4294_v24  ;;  %6322 = vmatprep.subr.mxu0 %v3767_v25  ;;  %v3049_v24 = vld [vmem:[#allocation22 + $0x14f8] sm:$0xff]  ;;  %v2536_v25 = vld [vmem:[#allocation22 + $0x4f0] sm:$0xff] }
 0xac1   :  { %6393 = vmatprep.subr.mxu1 %v4279_v28  ;;  %6323 = vmatpush2.msra.mxu0 %v3766_v29  ;;  %v3048_v28 = vld [vmem:[#allocation22 + $0x14f0] sm:$0xff]  ;;  %v2521_v29 = vld [vmem:[#allocation22 + $0x478] sm:$0xff] }
 0xac2   :  { %6394 = vmatpush2.msra.mxu1 %v4278_v36  ;;  %6324 = vmatprep.subr.mxu0 %v3751_v4  ;;  %v3033_v36 = vld [vmem:[#allocation22 + $0x1478] sm:$0xff]  ;;  %v2520_v4 = vld [vmem:[#allocation22 + $0x470] sm:$0xff] }
 0xac3   :  { %6395 = vmatprep.subr.mxu1 %v4263_v43  ;;  %6325 = vmatpush2.msra.mxu0 %v3750_v46  ;;  %v3032_v43 = vld [vmem:[#allocation22 + $0x1470] sm:$0xff]  ;;  %v2505_v46 = vld [vmem:[#allocation22 + $0x3f8] sm:$0xff] }
 0xac4   :  { %6396 = vmatpush2.msra.mxu1 %v4262_v48  ;;  %6326 = vmatprep.subr.mxu0 %v3735_v34  ;;  %v3017_v48 = vld [vmem:[#allocation22 + $0x13f8] sm:$0xff]  ;;  %v2504_v34 = vld [vmem:[#allocation22 + $0x3f0] sm:$0xff] }
 0xac5   :  { %6397 = vmatprep.subr.mxu1 %v4247_v12  ;;  %6327 = vmatpush2.msra.mxu0 %v3734_v54  ;;  %v3016_v12 = vld [vmem:[#allocation22 + $0x13f0] sm:$0xff]  ;;  %v2489_v54 = vld [vmem:[#allocation22 + $0x378] sm:$0xff] }
 0xac6   :  { %6398 = vmatpush2.msra.mxu1 %v4246_v44  ;;  %6328 = vmatprep.subr.mxu0 %v3719_v11  ;;  %v3001_v44 = vld [vmem:[#allocation22 + $0x1378] sm:$0xff]  ;;  %v2488_v11 = vld [vmem:[#allocation22 + $0x370] sm:$0xff] }
 0xac7   :  { %6399 = vmatprep.subr.mxu1 %v4231_v49  ;;  %6329 = vmatpush2.msra.mxu0 %v3718_v50  ;;  %v3000_v49 = vld [vmem:[#allocation22 + $0x1370] sm:$0xff]  ;;  %v2473_v50 = vld [vmem:[#allocation22 + $0x2f8] sm:$0xff] }
 0xac8   :  { %6400 = vmatpush2.msra.mxu1 %v4230_v52  ;;  %6330 = vmatprep.subr.mxu0 %v3703_v53  ;;  %v2985_v52 = vld [vmem:[#allocation22 + $0x12f8] sm:$0xff]  ;;  %v2472_v53 = vld [vmem:[#allocation22 + $0x2f0] sm:$0xff] }
 0xac9   :  { %6401 = vmatprep.subr.mxu1 %v4215_v55  ;;  %6331 = vmatpush2.msra.mxu0 %v3702_v33  ;;  %v2984_v55 = vld [vmem:[#allocation22 + $0x12f0] sm:$0xff]  ;;  %v2457_v33 = vld [vmem:[#allocation22 + $0x278] sm:$0xff] }
 0xaca   :  { %6402 = vmatpush2.msra.mxu1 %v4214_v17  ;;  %6332 = vmatprep.subr.mxu0 %v3687_v47  ;;  %v2969_v17 = vld [vmem:[#allocation22 + $0x1278] sm:$0xff]  ;;  %v2456_v47 = vld [vmem:[#allocation22 + $0x270] sm:$0xff] }
 0xacb   :  { %6403 = vmatprep.subr.mxu1 %v4199_v30  ;;  %6333 = vmatpush2.msra.mxu0 %v3686_v51  ;;  %v2968_v30 = vld [vmem:[#allocation22 + $0x1270] sm:$0xff]  ;;  %v2441_v51 = vld [vmem:[#allocation22 + $0x1f8] sm:$0xff] }
 0xacc   :  { %6404 = vmatpush2.msra.mxu1 %v4198_v38  ;;  %6334 = vmatprep.subr.mxu0 %v3671_v39  ;;  %v2953_v38 = vld [vmem:[#allocation22 + $0x11f8] sm:$0xff]  ;;  %v2440_v39 = vld [vmem:[#allocation22 + $0x1f0] sm:$0xff] }
 0xacd   :  { %6405 = vmatprep.subr.mxu1 %v4183_v56  ;;  %6335 = vmatpush2.msra.mxu0 %v3670_v31  ;;  %v2952_v56 = vld [vmem:[#allocation22 + $0x11f0] sm:$0xff]  ;;  %v2425_v31 = vld [vmem:[#allocation22 + $0x178] sm:$0xff] }
 0xace   :  { %6406 = vmatpush2.msra.mxu1 %v4182_v57  ;;  %6337 = vmatmul.mubr.f32.vlgmr.msra.gmra.mxu0 %v9311_v26  ;;  %v2937_v57 = vld [vmem:[#allocation22 + $0x1178] sm:$0xff] }
 0xacf   :  { %6408 = vmatmul.mubr.f32.vlgmr.msra.gmra.mxu1 %v9315_v32  ;;  %6414 = vmatprep.subr.mxu0 %v2633_v41  ;;  %v2424_v41 = vld [vmem:[#allocation22 + $0x170] sm:$0xff] }
 0xad0   :  { %6485 = vmatprep.subr.mxu1 %v3145_v42  ;;  %6415 = vmatpush1.msra.mxu0 %v2632_v63  ;;  %v2936_v42 = vld [vmem:[#allocation22 + $0x1170] sm:$0xff]  ;;  %v2409_v63 = vld [vmem:[#allocation22 + $0xf8] sm:$0xff] }
 0xad1   :  { %6478 = vmatprep.mubr.f32.mxu0 %v9288_v27  ;;  %6486 = vmatpush1.msra.mxu1 %v3144_v2  ;;  %v2569_v27 = vld [vmem:[#allocation22 + $0x5f8] sm:$0xff] }
 0xad2   :  { %6549 = vmatprep.mubr.f32.mxu1 %v9291_v59  ;;  %6416 = vmatprep.subr.mxu0 %v2617_v6  ;;  %v3080_v59 = vld [vmem:[#allocation22 + $0x15f0] sm:$0xff]  ;;  %v2921_v2 = vld [vmem:[#allocation22 + $0x10f8] sm:$0xff] }
 0xad3   :  { %6487 = vmatprep.subr.mxu1 %v3129_v8  ;;  %6417 = vmatpush1.msra.mxu0 %v2616_v45  ;;  %v2408_v6 = vld [vmem:[#allocation22 + $0xf0] sm:$0xff]  ;;  %v2393_v45 = vld [vmem:[#allocation22 + $0x78] sm:$0xff] }
 0xad4   :  { %6488 = vmatpush1.msra.mxu1 %v3128_v10  ;;  %6418 = vmatprep.subr.mxu0 %v2601_v60  ;;  %v2920_v8 = vld [vmem:[#allocation22 + $0x10f0] sm:$0xff]  ;;  %v2905_v10 = vld [vmem:[#allocation22 + $0x1078] sm:$0xff] }
 0xad5   :  { %6489 = vmatprep.subr.mxu1 %v3113_v1  ;;  %6419 = vmatpush1.msra.mxu0 %v2600_v3  ;;  %v2392_v60 = vld [vmem:[#allocation22 + $0x70] sm:$0xff]  ;;  %v2889_v3 = vld [vmem:[#allocation22 + $0xff8] sm:$0xff] }
 0xad6   :  { %6490 = vmatpush1.msra.mxu1 %v3112_v5  ;;  %6420 = vmatprep.subr.mxu0 %v2585_v14  ;;  %v2904_v1 = vld [vmem:[#allocation22 + $0x1070] sm:$0xff]  ;;  %v3401_v5 = vld [vmem:[#allocation22 + $0x1ff8] sm:$0xff] }
 0xad7   :  { %6491 = vmatprep.subr.mxu1 %v3097_v15  ;;  %6421 = vmatpush1.msra.mxu0 %v2584_v35  ;;  %v2888_v14 = vld [vmem:[#allocation22 + $0xff0] sm:$0xff]  ;;  %v2873_v35 = vld [vmem:[#allocation22 + $0xf78] sm:$0xff] }
 0xad8   :  { %6492 = vmatpush1.msra.mxu1 %v3096_v40  ;;  %6422 = vmatprep.subr.mxu0 %v2569_v27  ;;  %v3400_v15 = vld [vmem:[#allocation22 + $0x1ff0] sm:$0xff]  ;;  %v3385_v40 = vld [vmem:[#allocation22 + $0x1f78] sm:$0xff] }
 0xad9   :  { %6493 = vmatprep.subr.mxu1 %v3081_v37  ;;  %6423 = vmatpush1.msra.mxu0 %v2568_v18  ;;  %v2872_v27 = vld [vmem:[#allocation22 + $0xf70] sm:$0xff]  ;;  %v2857_v18 = vld [vmem:[#allocation22 + $0xef8] sm:$0xff] }
 0xada   :  { %6494 = vmatpush1.msra.mxu1 %v3080_v59  ;;  %6424 = vmatprep.subr.mxu0 %v2553_v19  ;;  %v3384_v37 = vld [vmem:[#allocation22 + $0x1f70] sm:$0xff]  ;;  %v3369_v59 = vld [vmem:[#allocation22 + $0x1ef8] sm:$0xff] }
 0xadb   :  { %6495 = vmatprep.subr.mxu1 %v3065_v20  ;;  %6425 = vmatpush1.msra.mxu0 %v2552_v21  ;;  %v2856_v19 = vld [vmem:[#allocation22 + $0xef0] sm:$0xff]  ;;  %v2841_v21 = vld [vmem:[#allocation22 + $0xe78] sm:$0xff] }
 0xadc   :  { %6496 = vmatpush1.msra.mxu1 %v3064_v22  ;;  %6426 = vmatprep.subr.mxu0 %v2537_v23  ;;  %v3368_v20 = vld [vmem:[#allocation22 + $0x1ef0] sm:$0xff]  ;;  %v3353_v22 = vld [vmem:[#allocation22 + $0x1e78] sm:$0xff] }
 0xadd   :  { %6497 = vmatprep.subr.mxu1 %v3049_v24  ;;  %6427 = vmatpush1.msra.mxu0 %v2536_v25  ;;  %v2840_v23 = vld [vmem:[#allocation22 + $0xe70] sm:$0xff]  ;;  %v2825_v25 = vld [vmem:[#allocation22 + $0xdf8] sm:$0xff] }
 0xade   :  { %6498 = vmatpush1.msra.mxu1 %v3048_v28  ;;  %6428 = vmatprep.subr.mxu0 %v2521_v29  ;;  %v3352_v24 = vld [vmem:[#allocation22 + $0x1e70] sm:$0xff]  ;;  %v3337_v28 = vld [vmem:[#allocation22 + $0x1df8] sm:$0xff] }
 0xadf   :  { %6499 = vmatprep.subr.mxu1 %v3033_v36  ;;  %6429 = vmatpush1.msra.mxu0 %v2520_v4  ;;  %v2824_v29 = vld [vmem:[#allocation22 + $0xdf0] sm:$0xff]  ;;  %v2809_v4 = vld [vmem:[#allocation22 + $0xd78] sm:$0xff] }
 0xae0   :  { %6500 = vmatpush1.msra.mxu1 %v3032_v43  ;;  %6430 = vmatprep.subr.mxu0 %v2505_v46  ;;  %v3336_v36 = vld [vmem:[#allocation22 + $0x1df0] sm:$0xff]  ;;  %v3321_v43 = vld [vmem:[#allocation22 + $0x1d78] sm:$0xff] }
 0xae1   :  { %6501 = vmatprep.subr.mxu1 %v3017_v48  ;;  %6431 = vmatpush1.msra.mxu0 %v2504_v34  ;;  %v2808_v46 = vld [vmem:[#allocation22 + $0xd70] sm:$0xff]  ;;  %v2793_v34 = vld [vmem:[#allocation22 + $0xcf8] sm:$0xff] }
 0xae2   :  { %6502 = vmatpush1.msra.mxu1 %v3016_v12  ;;  %6432 = vmatprep.subr.mxu0 %v2489_v54  ;;  %v3320_v48 = vld [vmem:[#allocation22 + $0x1d70] sm:$0xff]  ;;  %v3305_v12 = vld [vmem:[#allocation22 + $0x1cf8] sm:$0xff] }
 0xae3   :  { %6503 = vmatprep.subr.mxu1 %v3001_v44  ;;  %6433 = vmatpush1.msra.mxu0 %v2488_v11  ;;  %v2792_v54 = vld [vmem:[#allocation22 + $0xcf0] sm:$0xff]  ;;  %v2777_v11 = vld [vmem:[#allocation22 + $0xc78] sm:$0xff] }
 0xae4   :  { %6504 = vmatpush1.msra.mxu1 %v3000_v49  ;;  %6434 = vmatprep.subr.mxu0 %v2473_v50  ;;  %v3304_v44 = vld [vmem:[#allocation22 + $0x1cf0] sm:$0xff]  ;;  %v3289_v49 = vld [vmem:[#allocation22 + $0x1c78] sm:$0xff] }
 0xae5   :  { %6505 = vmatprep.subr.mxu1 %v2985_v52  ;;  %6435 = vmatpush1.msra.mxu0 %v2472_v53  ;;  %v2776_v50 = vld [vmem:[#allocation22 + $0xc70] sm:$0xff]  ;;  %v2761_v53 = vld [vmem:[#allocation22 + $0xbf8] sm:$0xff] }
 0xae6   :  { %6506 = vmatpush1.msra.mxu1 %v2984_v55  ;;  %6436 = vmatprep.subr.mxu0 %v2457_v33  ;;  %v3288_v52 = vld [vmem:[#allocation22 + $0x1c70] sm:$0xff]  ;;  %v3273_v55 = vld [vmem:[#allocation22 + $0x1bf8] sm:$0xff] }
 0xae7   :  { %6507 = vmatprep.subr.mxu1 %v2969_v17  ;;  %6437 = vmatpush1.msra.mxu0 %v2456_v47  ;;  %v2760_v33 = vld [vmem:[#allocation22 + $0xbf0] sm:$0xff]  ;;  %v2745_v47 = vld [vmem:[#allocation22 + $0xb78] sm:$0xff] }
 0xae8   :  { %6508 = vmatpush1.msra.mxu1 %v2968_v30  ;;  %6438 = vmatprep.subr.mxu0 %v2441_v51  ;;  %v3272_v17 = vld [vmem:[#allocation22 + $0x1bf0] sm:$0xff]  ;;  %v3257_v30 = vld [vmem:[#allocation22 + $0x1b78] sm:$0xff] }
 0xae9   :  { %6509 = vmatprep.subr.mxu1 %v2953_v38  ;;  %6439 = vmatpush1.msra.mxu0 %v2440_v39  ;;  %v2744_v51 = vld [vmem:[#allocation22 + $0xb70] sm:$0xff]  ;;  %v2729_v39 = vld [vmem:[#allocation22 + $0xaf8] sm:$0xff] }
 0xaea   :  { %6510 = vmatpush1.msra.mxu1 %v2952_v56  ;;  %6440 = vmatprep.subr.mxu0 %v2425_v31  ;;  %v3256_v38 = vld [vmem:[#allocation22 + $0x1b70] sm:$0xff]  ;;  %v3241_v56 = vld [vmem:[#allocation22 + $0x1af8] sm:$0xff] }
 0xaeb   :  { %6511 = vmatprep.subr.mxu1 %v2937_v57  ;;  %6441 = vmatpush1.msra.mxu0 %v2424_v41  ;;  %v2728_v31 = vld [vmem:[#allocation22 + $0xaf0] sm:$0xff]  ;;  %v2713_v41 = vld [vmem:[#allocation22 + $0xa78] sm:$0xff] }
 0xaec   :  { %6512 = vmatpush1.msra.mxu1 %v2936_v42  ;;  %6442 = vmatprep.subr.mxu0 %v2409_v63  ;;  %v3240_v57 = vld [vmem:[#allocation22 + $0x1af0] sm:$0xff]  ;;  %v3225_v42 = vld [vmem:[#allocation22 + $0x1a78] sm:$0xff] }
 0xaed   :  { %6513 = vmatprep.subr.mxu1 %v2921_v2  ;;  %6443 = vmatpush1.msra.mxu0 %v2408_v6  ;;  %v2712_v63 = vld [vmem:[#allocation22 + $0xa70] sm:$0xff]  ;;  %v2697_v6 = vld [vmem:[#allocation22 + $0x9f8] sm:$0xff] }
 0xaee   :  { %6514 = vmatpush1.msra.mxu1 %v2920_v8  ;;  %6444 = vmatprep.subr.mxu0 %v2393_v45  ;;  %v3224_v2 = vld [vmem:[#allocation22 + $0x1a70] sm:$0xff]  ;;  %v3209_v8 = vld [vmem:[#allocation22 + $0x19f8] sm:$0xff] }
 0xaef   :  { %6515 = vmatprep.subr.mxu1 %v2905_v10  ;;  %6445 = vmatpush1.msra.mxu0 %v2392_v60  ;;  %v2696_v45 = vld [vmem:[#allocation22 + $0x9f0] sm:$0xff]  ;;  %v2681_v60 = vld [vmem:[#allocation22 + $0x978] sm:$0xff] }
 0xaf0   :  { %6516 = vmatpush1.msra.mxu1 %v2904_v1  ;;  %6446 = vmatprep.subr.mxu0 %v2889_v3  ;;  %v3208_v10 = vld [vmem:[#allocation22 + $0x19f0] sm:$0xff]  ;;  %v3193_v1 = vld [vmem:[#allocation22 + $0x1978] sm:$0xff] }
 0xaf1   :  { %6517 = vmatprep.subr.mxu1 %v3401_v5  ;;  %6447 = vmatpush2.msra.mxu0 %v2888_v14  ;;  %v2680_v3 = vld [vmem:[#allocation22 + $0x970] sm:$0xff]  ;;  %v2665_v14 = vld [vmem:[#allocation22 + $0x8f8] sm:$0xff] }
 0xaf2   :  { %6518 = vmatpush2.msra.mxu1 %v3400_v15  ;;  %6448 = vmatprep.subr.mxu0 %v2873_v35  ;;  %v3192_v5 = vld [vmem:[#allocation22 + $0x1970] sm:$0xff]  ;;  %v3177_v15 = vld [vmem:[#allocation22 + $0x18f8] sm:$0xff] }
 0xaf3   :  { %6519 = vmatprep.subr.mxu1 %v3385_v40  ;;  %6449 = vmatpush2.msra.mxu0 %v2872_v27  ;;  %v2664_v35 = vld [vmem:[#allocation22 + $0x8f0] sm:$0xff]  ;;  %v2649_v27 = vld [vmem:[#allocation22 + $0x878] sm:$0xff] }
 0xaf4   :  { %6520 = vmatpush2.msra.mxu1 %v3384_v37  ;;  %6450 = vmatprep.subr.mxu0 %v2857_v18  ;;  %v3176_v40 = vld [vmem:[#allocation22 + $0x18f0] sm:$0xff]  ;;  %v3161_v37 = vld [vmem:[#allocation22 + $0x1878] sm:$0xff] }
 0xaf5   :  { %6521 = vmatprep.subr.mxu1 %v3369_v59  ;;  %6451 = vmatpush2.msra.mxu0 %v2856_v19  ;;  %v2648_v18 = vld [vmem:[#allocation22 + $0x870] sm:$0xff]  ;;  %v3657_v19 = vld [vmem:[#allocation22 + $0x27f8] sm:$0xff] }
 0xaf6   :  { %6522 = vmatpush2.msra.mxu1 %v3368_v20  ;;  %6452 = vmatprep.subr.mxu0 %v2841_v21  ;;  %v3160_v59 = vld [vmem:[#allocation22 + $0x1870] sm:$0xff]  ;;  %v4169_v20 = vld [vmem:[#allocation22 + $0x37f8] sm:$0xff] }
 0xaf7   :  { %6523 = vmatprep.subr.mxu1 %v3353_v22  ;;  %6453 = vmatpush2.msra.mxu0 %v2840_v23  ;;  %v3656_v21 = vld [vmem:[#allocation22 + $0x27f0] sm:$0xff]  ;;  %v3641_v23 = vld [vmem:[#allocation22 + $0x2778] sm:$0xff] }
 0xaf8   :  { %6524 = vmatpush2.msra.mxu1 %v3352_v24  ;;  %6454 = vmatprep.subr.mxu0 %v2825_v25  ;;  %v4168_v22 = vld [vmem:[#allocation22 + $0x37f0] sm:$0xff]  ;;  %v4153_v24 = vld [vmem:[#allocation22 + $0x3778] sm:$0xff] }
 0xaf9   :  { %6525 = vmatprep.subr.mxu1 %v3337_v28  ;;  %6455 = vmatpush2.msra.mxu0 %v2824_v29  ;;  %v3640_v25 = vld [vmem:[#allocation22 + $0x2770] sm:$0xff]  ;;  %v3625_v29 = vld [vmem:[#allocation22 + $0x26f8] sm:$0xff] }
 0xafa   :  { %6526 = vmatpush2.msra.mxu1 %v3336_v36  ;;  %6456 = vmatprep.subr.mxu0 %v2809_v4  ;;  %v4152_v28 = vld [vmem:[#allocation22 + $0x3770] sm:$0xff]  ;;  %v4137_v36 = vld [vmem:[#allocation22 + $0x36f8] sm:$0xff] }
 0xafb   :  { %6527 = vmatprep.subr.mxu1 %v3321_v43  ;;  %6457 = vmatpush2.msra.mxu0 %v2808_v46  ;;  %v3624_v4 = vld [vmem:[#allocation22 + $0x26f0] sm:$0xff]  ;;  %v4121_v43 = vld [vmem:[#allocation22 + $0x3678] sm:$0xff] }
 0xafc   :  { %6528 = vmatpush2.msra.mxu1 %v3320_v48  ;;  %6458 = vmatprep.subr.mxu0 %v2793_v34  ;;  %v3608_v46 = vld [vmem:[#allocation22 + $0x2670] sm:$0xff]  ;;  %v4105_v34 = vld [vmem:[#allocation22 + $0x35f8] sm:$0xff] }
 0xafd   :  { %6529 = vmatprep.subr.mxu1 %v3305_v12  ;;  %6459 = vmatpush2.msra.mxu0 %v2792_v54  ;;  %v4120_v48 = vld [vmem:[#allocation22 + $0x3670] sm:$0xff]  ;;  %v3577_v54 = vld [vmem:[#allocation22 + $0x2578] sm:$0xff] }
 0xafe   :  { %6530 = vmatpush2.msra.mxu1 %v3304_v44  ;;  %6460 = vmatprep.subr.mxu0 %v2777_v11  ;;  %v3592_v12 = vld [vmem:[#allocation22 + $0x25f0] sm:$0xff]  ;;  %v4089_v44 = vld [vmem:[#allocation22 + $0x3578] sm:$0xff] }
 0xaff   :  { %6531 = vmatprep.subr.mxu1 %v3289_v49  ;;  %6461 = vmatpush2.msra.mxu0 %v2776_v50  ;;  %v3576_v11 = vld [vmem:[#allocation22 + $0x2570] sm:$0xff]  ;;  %v3561_v50 = vld [vmem:[#allocation22 + $0x24f8] sm:$0xff] }
 0xb00   :  { %6532 = vmatpush2.msra.mxu1 %v3288_v52  ;;  %6462 = vmatprep.subr.mxu0 %v2761_v53  ;;  %v4088_v49 = vld [vmem:[#allocation22 + $0x3570] sm:$0xff]  ;;  %v4073_v52 = vld [vmem:[#allocation22 + $0x34f8] sm:$0xff] }
 0xb01   :  { %6533 = vmatprep.subr.mxu1 %v3273_v55  ;;  %6463 = vmatpush2.msra.mxu0 %v2760_v33  ;;  %v3560_v53 = vld [vmem:[#allocation22 + $0x24f0] sm:$0xff]  ;;  %v3545_v33 = vld [vmem:[#allocation22 + $0x2478] sm:$0xff] }
 0xb02   :  { %6534 = vmatpush2.msra.mxu1 %v3272_v17  ;;  %6464 = vmatprep.subr.mxu0 %v2745_v47  ;;  %v4072_v55 = vld [vmem:[#allocation22 + $0x34f0] sm:$0xff]  ;;  %v4057_v17 = vld [vmem:[#allocation22 + $0x3478] sm:$0xff] }
 0xb03   :  { %6535 = vmatprep.subr.mxu1 %v3257_v30  ;;  %6465 = vmatpush2.msra.mxu0 %v2744_v51  ;;  %v3544_v47 = vld [vmem:[#allocation22 + $0x2470] sm:$0xff]  ;;  %v3529_v51 = vld [vmem:[#allocation22 + $0x23f8] sm:$0xff] }
 0xb04   :  { %6536 = vmatpush2.msra.mxu1 %v3256_v38  ;;  %6466 = vmatprep.subr.mxu0 %v2729_v39  ;;  %v4056_v30 = vld [vmem:[#allocation22 + $0x3470] sm:$0xff]  ;;  %v4041_v38 = vld [vmem:[#allocation22 + $0x33f8] sm:$0xff] }
 0xb05   :  { %6537 = vmatprep.subr.mxu1 %v3241_v56  ;;  %6467 = vmatpush2.msra.mxu0 %v2728_v31  ;;  %v3528_v39 = vld [vmem:[#allocation22 + $0x23f0] sm:$0xff]  ;;  %v3513_v31 = vld [vmem:[#allocation22 + $0x2378] sm:$0xff] }
 0xb06   :  { %6538 = vmatpush2.msra.mxu1 %v3240_v57  ;;  %6468 = vmatprep.subr.mxu0 %v2713_v41  ;;  %v4040_v56 = vld [vmem:[#allocation22 + $0x33f0] sm:$0xff]  ;;  %v4025_v57 = vld [vmem:[#allocation22 + $0x3378] sm:$0xff] }
 0xb07   :  { %6539 = vmatprep.subr.mxu1 %v3225_v42  ;;  %6469 = vmatpush2.msra.mxu0 %v2712_v63  ;;  %v3512_v41 = vld [vmem:[#allocation22 + $0x2370] sm:$0xff]  ;;  %v3497_v63 = vld [vmem:[#allocation22 + $0x22f8] sm:$0xff] }
 0xb08   :  { %6540 = vmatpush2.msra.mxu1 %v3224_v2  ;;  %6470 = vmatprep.subr.mxu0 %v2697_v6  ;;  %v4024_v42 = vld [vmem:[#allocation22 + $0x3370] sm:$0xff]  ;;  %v4009_v2 = vld [vmem:[#allocation22 + $0x32f8] sm:$0xff] }
 0xb09   :  { %6541 = vmatprep.subr.mxu1 %v3209_v8  ;;  %6471 = vmatpush2.msra.mxu0 %v2696_v45  ;;  %v3496_v6 = vld [vmem:[#allocation22 + $0x22f0] sm:$0xff]  ;;  %v3481_v45 = vld [vmem:[#allocation22 + $0x2278] sm:$0xff] }
 0xb0a   :  { %6542 = vmatpush2.msra.mxu1 %v3208_v10  ;;  %6472 = vmatprep.subr.mxu0 %v2681_v60  ;;  %v4008_v8 = vld [vmem:[#allocation22 + $0x32f0] sm:$0xff]  ;;  %v3993_v10 = vld [vmem:[#allocation22 + $0x3278] sm:$0xff] }
 0xb0b   :  { %6543 = vmatprep.subr.mxu1 %v3193_v1  ;;  %6473 = vmatpush2.msra.mxu0 %v2680_v3  ;;  %v3480_v60 = vld [vmem:[#allocation22 + $0x2270] sm:$0xff]  ;;  %v3465_v3 = vld [vmem:[#allocation22 + $0x21f8] sm:$0xff] }
 0xb0c   :  { %6544 = vmatpush2.msra.mxu1 %v3192_v5  ;;  %6474 = vmatprep.subr.mxu0 %v2665_v14  ;;  %v3992_v1 = vld [vmem:[#allocation22 + $0x3270] sm:$0xff]  ;;  %v3977_v5 = vld [vmem:[#allocation22 + $0x31f8] sm:$0xff] }
 0xb0d   :  { %6545 = vmatprep.subr.mxu1 %v3177_v15  ;;  %6475 = vmatpush2.msra.mxu0 %v2664_v35  ;;  %v3464_v14 = vld [vmem:[#allocation22 + $0x21f0] sm:$0xff]  ;;  %v3449_v35 = vld [vmem:[#allocation22 + $0x2178] sm:$0xff] }
 0xb0e   :  { %6546 = vmatpush2.msra.mxu1 %v3176_v40  ;;  %6476 = vmatprep.subr.mxu0 %v2649_v27  ;;  %v3976_v15 = vld [vmem:[#allocation22 + $0x31f0] sm:$0xff]  ;;  %v3961_v40 = vld [vmem:[#allocation22 + $0x3178] sm:$0xff] }
 0xb0f   :  { %6547 = vmatprep.subr.mxu1 %v3161_v37  ;;  %6477 = vmatpush2.msra.mxu0 %v2648_v18  ;;  %v3448_v27 = vld [vmem:[#allocation22 + $0x2170] sm:$0xff]  ;;  %v3433_v18 = vld [vmem:[#allocation22 + $0x20f8] sm:$0xff] }
 0xb10   :  { %6548 = vmatpush2.msra.mxu1 %v3160_v59  ;;  %6479 = vmatmul.mubr.f32.vlgmr.msra.gmra.mxu0 %v9293_v62  ;;  %v4136_v62 = vld [vmem:[#allocation22 + $0x36f0] sm:$0xff]  ;;  %v3945_v59 = vld [vmem:[#allocation22 + $0x30f8] sm:$0xff] }
 0xb11   :  { %6550 = vmatmul.mubr.f32.vlgmr.msra.gmra.mxu1 %v9297_v61  ;;  %6556 = vmatprep.subr.mxu0 %v3657_v19  ;;  %v3609_v61 = vld [vmem:[#allocation22 + $0x2678] sm:$0xff]  ;;  %v3960_v37 = vld [vmem:[#allocation22 + $0x3170] sm:$0xff] }
 0xb12   :  { %6627 = vmatprep.subr.mxu1 %v4169_v20  ;;  %6557 = vmatpush1.msra.mxu0 %v3656_v21  ;;  %v3432_v19 = vld [vmem:[#allocation22 + $0x20f0] sm:$0xff]  ;;  %v3417_v21 = vld [vmem:[#allocation22 + $0x2078] sm:$0xff] }
 0xb13   :  { %6620 = vmatprep.mubr.f32.mxu0 %v9300_v7  ;;  %6628 = vmatpush1.msra.mxu1 %v4168_v22  ;;  %v3593_v7 = vld [vmem:[#allocation22 + $0x25f8] sm:$0xff]  ;;  %v3944_v20 = vld [vmem:[#allocation22 + $0x30f0] sm:$0xff] }
 0xb14   :  { %6691 = vmatprep.mubr.f32.mxu1 %v9302_v9  ;;  %6558 = vmatprep.subr.mxu0 %v3641_v23  ;;  %v4104_v9 = vld [vmem:[#allocation22 + $0x35f0] sm:$0xff]  ;;  %v3929_v22 = vld [vmem:[#allocation22 + $0x3078] sm:$0xff] }
 0xb15   :  { %6629 = vmatprep.subr.mxu1 %v4153_v24  ;;  %6559 = vmatpush1.msra.mxu0 %v3640_v25  ;;  %v3416_v23 = vld [vmem:[#allocation22 + $0x2070] sm:$0xff]  ;;  %v3913_v25 = vld [vmem:[#allocation22 + $0x2ff8] sm:$0xff] }
 0xb16   :  { %6630 = vmatpush1.msra.mxu1 %v4152_v28  ;;  %6560 = vmatprep.subr.mxu0 %v3625_v29  ;;  %v3928_v24 = vld [vmem:[#allocation22 + $0x3070] sm:$0xff]  ;;  %v4425_v28 = vld [vmem:[#allocation22 + $0x3ff8] sm:$0xff] }
 0xb17   :  { %6631 = vmatprep.subr.mxu1 %v4137_v36  ;;  %6561 = vmatpush1.msra.mxu0 %v3624_v4  ;;  %v3912_v29 = vld [vmem:[#allocation22 + $0x2ff0] sm:$0xff]  ;;  %v3897_v4 = vld [vmem:[#allocation22 + $0x2f78] sm:$0xff] }
 0xb18   :  { %6632 = vmatpush1.msra.mxu1 %v4136_v62  ;;  %6562 = vmatprep.subr.mxu0 %v3609_v61  ;;  %v4424_v36 = vld [vmem:[#allocation22 + $0x3ff0] sm:$0xff]  ;;  %v4409_v62 = vld [vmem:[#allocation22 + $0x3f78] sm:$0xff] }
 0xb19   :  { %6633 = vmatprep.subr.mxu1 %v4121_v43  ;;  %6563 = vmatpush1.msra.mxu0 %v3608_v46  ;;  %v3896_v61 = vld [vmem:[#allocation22 + $0x2f70] sm:$0xff]  ;;  %v3881_v46 = vld [vmem:[#allocation22 + $0x2ef8] sm:$0xff] }
 0xb1a   :  { %6634 = vmatpush1.msra.mxu1 %v4120_v48  ;;  %6564 = vmatprep.subr.mxu0 %v3593_v7  ;;  %v4408_v43 = vld [vmem:[#allocation22 + $0x3f70] sm:$0xff]  ;;  %v4393_v48 = vld [vmem:[#allocation22 + $0x3ef8] sm:$0xff] }
 0xb1b   :  { %6635 = vmatprep.subr.mxu1 %v4105_v34  ;;  %6565 = vmatpush1.msra.mxu0 %v3592_v12  ;;  %v3880_v7 = vld [vmem:[#allocation22 + $0x2ef0] sm:$0xff]  ;;  %v3865_v12 = vld [vmem:[#allocation22 + $0x2e78] sm:$0xff] }
 0xb1c   :  { %6636 = vmatpush1.msra.mxu1 %v4104_v9  ;;  %6566 = vmatprep.subr.mxu0 %v3577_v54  ;;  %v4392_v34 = vld [vmem:[#allocation22 + $0x3ef0] sm:$0xff]  ;;  %v4377_v9 = vld [vmem:[#allocation22 + $0x3e78] sm:$0xff] }
 0xb1d   :  { %6637 = vmatprep.subr.mxu1 %v4089_v44  ;;  %6567 = vmatpush1.msra.mxu0 %v3576_v11  ;;  %v3864_v54 = vld [vmem:[#allocation22 + $0x2e70] sm:$0xff]  ;;  %v3849_v11 = vld [vmem:[#allocation22 + $0x2df8] sm:$0xff] }
 0xb1e   :  { %6638 = vmatpush1.msra.mxu1 %v4088_v49  ;;  %6568 = vmatprep.subr.mxu0 %v3561_v50  ;;  %v4376_v44 = vld [vmem:[#allocation22 + $0x3e70] sm:$0xff]  ;;  %v4361_v49 = vld [vmem:[#allocation22 + $0x3df8] sm:$0xff] }
 0xb1f   :  { %6639 = vmatprep.subr.mxu1 %v4073_v52  ;;  %6569 = vmatpush1.msra.mxu0 %v3560_v53  ;;  %v3848_v50 = vld [vmem:[#allocation22 + $0x2df0] sm:$0xff]  ;;  %v3833_v53 = vld [vmem:[#allocation22 + $0x2d78] sm:$0xff] }
 0xb20   :  { %6640 = vmatpush1.msra.mxu1 %v4072_v55  ;;  %6570 = vmatprep.subr.mxu0 %v3545_v33  ;;  %v4360_v52 = vld [vmem:[#allocation22 + $0x3df0] sm:$0xff]  ;;  %v4345_v55 = vld [vmem:[#allocation22 + $0x3d78] sm:$0xff] }
 0xb21   :  { %6641 = vmatprep.subr.mxu1 %v4057_v17  ;;  %6571 = vmatpush1.msra.mxu0 %v3544_v47  ;;  %v3832_v33 = vld [vmem:[#allocation22 + $0x2d70] sm:$0xff]  ;;  %v3817_v47 = vld [vmem:[#allocation22 + $0x2cf8] sm:$0xff] }
 0xb22   :  { %6642 = vmatpush1.msra.mxu1 %v4056_v30  ;;  %6572 = vmatprep.subr.mxu0 %v3529_v51  ;;  %v4344_v17 = vld [vmem:[#allocation22 + $0x3d70] sm:$0xff]  ;;  %v4329_v30 = vld [vmem:[#allocation22 + $0x3cf8] sm:$0xff] }
 0xb23   :  { %6643 = vmatprep.subr.mxu1 %v4041_v38  ;;  %6573 = vmatpush1.msra.mxu0 %v3528_v39  ;;  %v3816_v51 = vld [vmem:[#allocation22 + $0x2cf0] sm:$0xff]  ;;  %v3801_v39 = vld [vmem:[#allocation22 + $0x2c78] sm:$0xff] }
 0xb24   :  { %6644 = vmatpush1.msra.mxu1 %v4040_v56  ;;  %6574 = vmatprep.subr.mxu0 %v3513_v31  ;;  %v4328_v38 = vld [vmem:[#allocation22 + $0x3cf0] sm:$0xff]  ;;  %v4313_v56 = vld [vmem:[#allocation22 + $0x3c78] sm:$0xff] }
 0xb25   :  { %6645 = vmatprep.subr.mxu1 %v4025_v57  ;;  %6575 = vmatpush1.msra.mxu0 %v3512_v41  ;;  %v3800_v31 = vld [vmem:[#allocation22 + $0x2c70] sm:$0xff]  ;;  %v3785_v41 = vld [vmem:[#allocation22 + $0x2bf8] sm:$0xff] }
 0xb26   :  { %6646 = vmatpush1.msra.mxu1 %v4024_v42  ;;  %6576 = vmatprep.subr.mxu0 %v3497_v63  ;;  %v4312_v57 = vld [vmem:[#allocation22 + $0x3c70] sm:$0xff]  ;;  %v4297_v42 = vld [vmem:[#allocation22 + $0x3bf8] sm:$0xff] }
 0xb27   :  { %6647 = vmatprep.subr.mxu1 %v4009_v2  ;;  %6577 = vmatpush1.msra.mxu0 %v3496_v6  ;;  %v3784_v63 = vld [vmem:[#allocation22 + $0x2bf0] sm:$0xff]  ;;  %v3769_v6 = vld [vmem:[#allocation22 + $0x2b78] sm:$0xff] }
 0xb28   :  { %6648 = vmatpush1.msra.mxu1 %v4008_v8  ;;  %6578 = vmatprep.subr.mxu0 %v3481_v45  ;;  %v4296_v2 = vld [vmem:[#allocation22 + $0x3bf0] sm:$0xff]  ;;  %v4281_v8 = vld [vmem:[#allocation22 + $0x3b78] sm:$0xff] }
 0xb29   :  { %6649 = vmatprep.subr.mxu1 %v3993_v10  ;;  %6579 = vmatpush1.msra.mxu0 %v3480_v60  ;;  %v3768_v45 = vld [vmem:[#allocation22 + $0x2b70] sm:$0xff]  ;;  %v3753_v60 = vld [vmem:[#allocation22 + $0x2af8] sm:$0xff] }
 0xb2a   :  { %6650 = vmatpush1.msra.mxu1 %v3992_v1  ;;  %6580 = vmatprep.subr.mxu0 %v3465_v3  ;;  %v4280_v10 = vld [vmem:[#allocation22 + $0x3b70] sm:$0xff]  ;;  %v4265_v1 = vld [vmem:[#allocation22 + $0x3af8] sm:$0xff] }
 0xb2b   :  { %6651 = vmatprep.subr.mxu1 %v3977_v5  ;;  %6581 = vmatpush1.msra.mxu0 %v3464_v14  ;;  %v3752_v3 = vld [vmem:[#allocation22 + $0x2af0] sm:$0xff]  ;;  %v3737_v14 = vld [vmem:[#allocation22 + $0x2a78] sm:$0xff] }
 0xb2c   :  { %6652 = vmatpush1.msra.mxu1 %v3976_v15  ;;  %6582 = vmatprep.subr.mxu0 %v3449_v35  ;;  %v4264_v5 = vld [vmem:[#allocation22 + $0x3af0] sm:$0xff]  ;;  %v4249_v15 = vld [vmem:[#allocation22 + $0x3a78] sm:$0xff] }
 0xb2d   :  { %6653 = vmatprep.subr.mxu1 %v3961_v40  ;;  %6583 = vmatpush1.msra.mxu0 %v3448_v27  ;;  %v3736_v35 = vld [vmem:[#allocation22 + $0x2a70] sm:$0xff]  ;;  %v3721_v27 = vld [vmem:[#allocation22 + $0x29f8] sm:$0xff] }
 0xb2e   :  { %6654 = vmatpush1.msra.mxu1 %v3960_v37  ;;  %6584 = vmatprep.subr.mxu0 %v3433_v18  ;;  %v4248_v40 = vld [vmem:[#allocation22 + $0x3a70] sm:$0xff]  ;;  %v4233_v37 = vld [vmem:[#allocation22 + $0x39f8] sm:$0xff] }
 0xb2f   :  { %6655 = vmatprep.subr.mxu1 %v3945_v59  ;;  %6585 = vmatpush1.msra.mxu0 %v3432_v19  ;;  %v3720_v18 = vld [vmem:[#allocation22 + $0x29f0] sm:$0xff]  ;;  %v3705_v19 = vld [vmem:[#allocation22 + $0x2978] sm:$0xff] }
 0xb30   :  { %6656 = vmatpush1.msra.mxu1 %v3944_v20  ;;  %6586 = vmatprep.subr.mxu0 %v3417_v21  ;;  %v4232_v59 = vld [vmem:[#allocation22 + $0x39f0] sm:$0xff]  ;;  %v4217_v20 = vld [vmem:[#allocation22 + $0x3978] sm:$0xff] }
 0xb31   :  { %6657 = vmatprep.subr.mxu1 %v3929_v22  ;;  %6587 = vmatpush1.msra.mxu0 %v3416_v23  ;;  %v3704_v21 = vld [vmem:[#allocation22 + $0x2970] sm:$0xff]  ;;  %v3689_v23 = vld [vmem:[#allocation22 + $0x28f8] sm:$0xff] }
 0xb32   :  { %6658 = vmatpush1.msra.mxu1 %v3928_v24  ;;  %6588 = vmatprep.subr.mxu0 %v3913_v25  ;;  %v4216_v22 = vld [vmem:[#allocation22 + $0x3970] sm:$0xff]  ;;  %v4201_v24 = vld [vmem:[#allocation22 + $0x38f8] sm:$0xff] }
 0xb33   :  { %6659 = vmatprep.subr.mxu1 %v4425_v28  ;;  %6589 = vmatpush2.msra.mxu0 %v3912_v29  ;;  %v3688_v25 = vld [vmem:[#allocation22 + $0x28f0] sm:$0xff]  ;;  %v3673_v29 = vld [vmem:[#allocation22 + $0x2878] sm:$0xff] }
 0xb34   :  { %6660 = vmatpush2.msra.mxu1 %v4424_v36  ;;  %6590 = vmatprep.subr.mxu0 %v3897_v4  ;;  %v4200_v28 = vld [vmem:[#allocation22 + $0x38f0] sm:$0xff]  ;;  %v4185_v36 = vld [vmem:[#allocation22 + $0x3878] sm:$0xff] }
 0xb35   :  { %6661 = vmatprep.subr.mxu1 %v4409_v62  ;;  %6591 = vmatpush2.msra.mxu0 %v3896_v61  ;;  %v3672_v4 = vld [vmem:[#allocation22 + $0x2870] sm:$0xff]  ;;  %v4492_v61 = vpop.f32.mrf.mxu0 }
 0xb36   :  { %6662 = vmatpush2.msra.mxu1 %v4408_v43  ;;  %6592 = vmatprep.subr.mxu0 %v3881_v46  ;;  %v4184_v62 = vld [vmem:[#allocation22 + $0x3870] sm:$0xff]  ;;  %v4563_v43 = vpop.f32.mrf.mxu1 }
 0xb37   :  { %6663 = vmatprep.subr.mxu1 %v4393_v48  ;;  %6593 = vmatpush2.msra.mxu0 %v3880_v7  ;;  %v9374_v46 = vpop.f32.mrf.mxu0 }
 0xb38   :  { %6664 = vmatpush2.msra.mxu1 %v4392_v34  ;;  %6594 = vmatprep.subr.mxu0 %v3865_v12  ;;  %v9378_v7 = vpop.f32.mrf.mxu1 }
 0xb39   :  { %6665 = vmatprep.subr.mxu1 %v4377_v9  ;;  %6595 = vmatpush2.msra.mxu0 %v3864_v54  ;;  %v9376_v48 = vpop.f32.mrf.mxu0 }
 0xb3a   :  { %6666 = vmatpush2.msra.mxu1 %v4376_v44  ;;  %6596 = vmatprep.subr.mxu0 %v3849_v11  ;;  %v9380_v34 = vpop.f32.mrf.mxu1 }
 0xb3b   :  { %6667 = vmatprep.subr.mxu1 %v4361_v49  ;;  %6597 = vmatpush2.msra.mxu0 %v3848_v50  ;;  %v9382_v12 = vpop.f32.mrf.mxu0 }
 0xb3c   :  { %6668 = vmatpush2.msra.mxu1 %v4360_v52  ;;  %6598 = vmatprep.subr.mxu0 %v3833_v53  ;;  %v9386_v54 = vpop.f32.mrf.mxu1 }
 0xb3d   :  { %6669 = vmatprep.subr.mxu1 %v4345_v55  ;;  %6599 = vmatpush2.msra.mxu0 %v3832_v33  ;;  %v9384_v9 = vpop.f32.mrf.mxu0 }
 0xb3e   :  { %6670 = vmatpush2.msra.mxu1 %v4344_v17  ;;  %6600 = vmatprep.subr.mxu0 %v3817_v47  ;;  %v9388_v44 = vpop.f32.mrf.mxu1 }
 0xb3f   :  { %6671 = vmatprep.subr.mxu1 %v4329_v30  ;;  %6601 = vmatpush2.msra.mxu0 %v3816_v51  ;;  %v7237_v30 = vld [vmem:[%s10593_s16 + $0xf8] sm:$0xff] }
 0xb40   :  { %6672 = vmatpush2.msra.mxu1 %v4328_v38  ;;  %6602 = vmatprep.subr.mxu0 %v3801_v39  ;;  %v9394_v11 = vpop.f32.mrf.mxu1  ;;  %v7269_v51 = vld [vmem:[%s10593_s16 + $0x1f8] sm:$0xff] }
 0xb41   :  { %6673 = vmatprep.subr.mxu1 %v4313_v56  ;;  %6603 = vmatpush2.msra.mxu0 %v3800_v31  ;;  %v7221_v56 = vld [vmem:[%s10593_s16 + $0x78] sm:$0xff] }
 0xb42   :  { %6674 = vmatpush2.msra.mxu1 %v4312_v57  ;;  %6604 = vmatprep.subr.mxu0 %v3785_v41  ;;  %v9396_v49 = vpop.f32.mrf.mxu1  ;;  %v7253_v31 = vld [vmem:[%s10593_s16 + $0x178] sm:$0xff]  ;;  %v7236_v57 = vld [vmem:[%s10593_s16 + $0xf0] sm:$0xff] }
 0xb43   :  { %6675 = vmatprep.subr.mxu1 %v4297_v42  ;;  %6605 = vmatpush2.msra.mxu0 %v3784_v63  ;;  %v7268_v41 = vld [vmem:[%s10593_s16 + $0x1f0] sm:$0xff] }
 0xb44   :  { %6676 = vmatpush2.msra.mxu1 %v4296_v2  ;;  %6606 = vmatprep.subr.mxu0 %v3769_v6  ;;  %v9402_v53 = vpop.f32.mrf.mxu1  ;;  %v7220_v63 = vld [vmem:[%s10593_s16 + $0x70] sm:$0xff]  ;;  %v7235_v6 = vld [vmem:[%s10593_s16 + $0xe8] sm:$0xff] }
 0xb45   :  { %6677 = vmatprep.subr.mxu1 %v4281_v8  ;;  %6607 = vmatpush2.msra.mxu0 %v3768_v45  ;;  %v7252_v2 = vld [vmem:[%s10593_s16 + $0x170] sm:$0xff]  ;;  %v7267_v8 = vld [vmem:[%s10593_s16 + $0x1e8] sm:$0xff] }
 0xb46   :  { %6678 = vmatpush2.msra.mxu1 %v4280_v10  ;;  %6608 = vmatprep.subr.mxu0 %v3753_v60  ;;  %v9404_v55 = vpop.f32.mrf.mxu1  ;;  %v7219_v10 = vld [vmem:[%s10593_s16 + $0x68] sm:$0xff] }
 0xb47   :  { %6679 = vmatprep.subr.mxu1 %v4265_v1  ;;  %6609 = vmatpush2.msra.mxu0 %v3752_v3  ;;  %v7251_v60 = vld [vmem:[%s10593_s16 + $0x168] sm:$0xff]  ;;  %v7234_v1 = vld [vmem:[%s10593_s16 + $0xe0] sm:$0xff] }
 0xb48   :  { %6680 = vmatpush2.msra.mxu1 %v4264_v5  ;;  %6610 = vmatprep.subr.mxu0 %v3737_v14  ;;  %v9410_v47 = vpop.f32.mrf.mxu1  ;;  %v7266_v3 = vld [vmem:[%s10593_s16 + $0x1e0] sm:$0xff] }
 0xb49   :  { %6681 = vmatprep.subr.mxu1 %v4249_v15  ;;  %6611 = vmatpush2.msra.mxu0 %v3736_v35  ;;  %v7218_v15 = vld [vmem:[%s10593_s16 + $0x60] sm:$0xff] }
 0xb4a   :  { %6682 = vmatpush2.msra.mxu1 %v4248_v40  ;;  %6612 = vmatprep.subr.mxu0 %v3721_v27  ;;  %v9418_v38 = vpop.f32.mrf.mxu1  ;;  %v7250_v35 = vld [vmem:[%s10593_s16 + $0x160] sm:$0xff]  ;;  %v4564_v40 = vadd.f32 %v4563_v43, %v4492_v61  ;;  %v7233_v27 = vld [vmem:[%s10593_s16 + $0xd8] sm:$0xff]  ;;  %v7215_v43 = vld [vmem:[%s10593_s16 + $0x48] sm:$0xff] }
 0xb4b   :  { %6683 = vmatprep.subr.mxu1 %v4233_v37  ;;  %6613 = vmatpush2.msra.mxu0 %v3720_v18  ;;  %v7265_v37 = vld [vmem:[%s10593_s16 + $0x1d8] sm:$0xff] }
 0xb4c   :  { %6684 = vmatpush2.msra.mxu1 %v4232_v59  ;;  %6614 = vmatprep.subr.mxu0 %v3705_v19  ;;  %v9448_v45 = vpop.f32.mrf.mxu1  ;;  %v7217_v59 = vld [vmem:[%s10593_s16 + $0x58] sm:$0xff] }
 0xb4d   :  { %6685 = vmatprep.subr.mxu1 %v4217_v20  ;;  %6615 = vmatpush2.msra.mxu0 %v3704_v21  ;;  %v7249_v19 = vld [vmem:[%s10593_s16 + $0x158] sm:$0xff]  ;;  %v4635_v20 = vadd.f32 %v9376_v48, %v4564_v40  ;;  %v7232_v21 = vld [vmem:[%s10593_s16 + $0xd0] sm:$0xff]  ;;  %v7243_v40 = vld [vmem:[%s10593_s16 + $0x128] sm:$0xff] }
 0xb4e   :  { %6686 = vmatpush2.msra.mxu1 %v4216_v22  ;;  %6616 = vmatprep.subr.mxu0 %v3689_v23  ;;  %v9462_v5 = vpop.f32.mrf.mxu1  ;;  %v7264_v22 = vld [vmem:[%s10593_s16 + $0x1d0] sm:$0xff]  ;;  %v4566_v23 = vadd.f32 %v9378_v7, %v9374_v46  ;;  %v7247_v46 = vld [vmem:[%s10593_s16 + $0x148] sm:$0xff]  ;;  %v7230_v7 = vld [vmem:[%s10593_s16 + $0xc0] sm:$0xff] }
 0xb4f   :  { %6687 = vmatprep.subr.mxu1 %v4201_v24  ;;  %6617 = vmatpush2.msra.mxu0 %v3688_v25  ;;  %v7216_v25 = vld [vmem:[%s10593_s16 + $0x50] sm:$0xff]  ;;  %v9521_v48 = vadd.f32 %v9380_v34, %v4635_v20  ;;  %v7246_v34 = vld [vmem:[%s10593_s16 + $0x140] sm:$0xff] }
 0xb50   :  { %6688 = vmatpush2.msra.mxu1 %v4200_v28  ;;  %6618 = vmatprep.subr.mxu0 %v3673_v29  ;;  %v9495_v24 = vpop.f32.mrf.mxu1  ;;  %v7248_v28 = vld [vmem:[%s10593_s16 + $0x150] sm:$0xff]  ;;  %v7231_v29 = vld [vmem:[%s10593_s16 + $0xc8] sm:$0xff] }
 0xb51   :  { %6689 = vmatprep.subr.mxu1 %v4185_v36  ;;  %6619 = vmatpush2.msra.mxu0 %v3672_v4  ;;  %v7263_v36 = vld [vmem:[%s10593_s16 + $0x1c8] sm:$0xff]  ;;  %v4637_v4 = vadd.f32 %v9382_v12, %v4566_v23  ;;  %10617 = vst [vmem:[#allocation44_spill] sm:$0xff] %v9521_v48  ;;  %v7262_v12 = vld [vmem:[%s10593_s16 + $0x1c0] sm:$0xff]  ;;  %v7225_v23 = vld [vmem:[%s10593_s16 + $0x98] sm:$0xff] }
 0xb52   :  { %6690 = vmatpush2.msra.mxu1 %v4184_v62  ;;  %6621 = vmatmul.mubr.f32.vlgmr.msra.gmra.mxu0 %v9311_v26  ;;  %v9390_v26 = vpop.f32.mrf.mxu0  ;;  %v9510_v62 = vpop.f32.mrf.mxu1 }
 0xb53   :  { %6692 = vmatmul.mubr.f32.vlgmr.msra.gmra.mxu1 %v9315_v32  ;;  %8103 = vmatprep.subr.mxu0 %v7237_v30 }
 0xb54   :  { %v9392_v32 = vpop.f32.mrf.mxu0  ;;  %8138 = vmatprep.subr.mxu1 %v7269_v51  ;;  %8104 = vmatpush3.msra.mxu0 %v7221_v56  ;;  %v7214_v51 = vld [vmem:[%s10593_s16 + $0x40] sm:$0xff]  ;;  %v7229_v56 = vld [vmem:[%s10593_s16 + $0xb8] sm:$0xff] }
 0xb55   :  { %8139 = vmatpush3.msra.mxu1 %v7253_v31  ;;  %8105 = vmatprep.subr.mxu0 %v7236_v57  ;;  %v4848_v31 = vadd.f32 %v9388_v44, %v9384_v9  ;;  %v7261_v57 = vld [vmem:[%s10593_s16 + $0x1b8] sm:$0xff]  ;;  %v9556_v44 = vpop.f32.mrf.mxu1 }
 0xb56   :  { %v9398_v50 = vpop.f32.mrf.mxu0  ;;  %8140 = vmatprep.subr.mxu1 %v7268_v41  ;;  %8106 = vmatpush3.msra.mxu0 %v7220_v63  ;;  %v7213_v41 = vld [vmem:[%s10593_s16 + $0x38] sm:$0xff] }
 0xb57   :  { %8141 = vmatpush3.msra.mxu1 %v7252_v2  ;;  %8107 = vmatprep.subr.mxu0 %v7235_v6  ;;  %v7245_v63 = vld [vmem:[%s10593_s16 + $0x138] sm:$0xff]  ;;  %v9552_v2 = vadd.f32 %v9386_v54, %v4637_v4  ;;  %v7228_v6 = vld [vmem:[%s10593_s16 + $0xb0] sm:$0xff] }
 0xb58   :  { %v9400_v52 = vpop.f32.mrf.mxu0  ;;  %8142 = vmatprep.subr.mxu1 %v7267_v8  ;;  %8108 = vmatpush3.msra.mxu0 %v7219_v10  ;;  %v7260_v8 = vld [vmem:[%s10593_s16 + $0x1b0] sm:$0xff]  ;;  %v6698_v10 = vsel %vm354_vm3, %v9521_v48, 0.0  ;;  %v7241_v4 = vld [vmem:[%s10593_s16 + $0x118] sm:$0xff] }
 0xb59   :  { %8143 = vmatpush3.msra.mxu1 %v7251_v60  ;;  %8109 = vmatprep.subr.mxu0 %v7234_v1  ;;  %10618 = vst [vmem:[#allocation45_spill] sm:$0xff] %v9552_v2  ;;  %v5132_v9 = vadd.f32 %v9404_v55, %v9400_v52  ;;  %v7212_v54 = vld [vmem:[%s10593_s16 + $0x30] sm:$0xff]  ;;  %v4850_v52 = vadd.f32 %v9394_v11, %v9390_v26  ;;  %v7227_v1 = vld [vmem:[%s10593_s16 + $0xa8] sm:$0xff] }
 0xb5a   :  { %v9406_v33 = vpop.f32.mrf.mxu0  ;;  %8144 = vmatprep.subr.mxu1 %v7266_v3  ;;  %8110 = vmatpush3.msra.mxu0 %v7218_v15  ;;  %v4919_v55 = vadd.f32 %v9392_v32, %v4848_v31  ;;  %v7244_v60 = vld [vmem:[%s10593_s16 + $0x130] sm:$0xff]  ;;  %v7259_v3 = vld [vmem:[%s10593_s16 + $0x1a8] sm:$0xff]  ;;  %v6810_v15 = vmul.f32 %v9521_v48, %v9521_v48  ;;  %v9584_v32 = vpop.f32.mrf.mxu1 }
 0xb5b   :  { %8145 = vmatpush3.msra.mxu1 %v7250_v35  ;;  %8111 = vmatprep.subr.mxu0 %v7233_v27  ;;  %v7211_v35 = vld [vmem:[%s10593_s16 + $0x28] sm:$0xff]  ;;  %v4921_v27 = vadd.f32 %v9398_v50, %v4850_v52  ;;  %v7210_v50 = vld [vmem:[%s10593_s16 + $0x20] sm:$0xff] }
 0xb5c   :  { %v9408_v17 = vpop.f32.mrf.mxu0  ;;  %8146 = vmatprep.subr.mxu1 %v7265_v37  ;;  %8112 = vmatpush3.msra.mxu0 %v7217_v59  ;;  %v7258_v37 = vld [vmem:[%s10593_s16 + $0x1a0] sm:$0xff]  ;;  %v6699_v59 = vrot.slane %v6698_v10, 4 }
 0xb5d   :  { %8147 = vmatpush3.msra.mxu1 %v7249_v19  ;;  %8113 = vmatprep.subr.mxu0 %v7232_v21  ;;  %v5203_v26 = vadd.f32 %v9408_v17, %v5132_v9  ;;  %v7226_v17 = vld [vmem:[%s10593_s16 + $0xa0] sm:$0xff]  ;;  %v6811_v19 = vmul.f32 %v9552_v2, %v9552_v2  ;;  %v7223_v9 = vld [vmem:[%s10593_s16 + $0x88] sm:$0xff] }
 0xb5e   :  { %v9420_v39 = vpop.f32.mrf.mxu0  ;;  %8148 = vmatprep.subr.mxu1 %v7264_v22  ;;  %8114 = vmatpush3.msra.mxu0 %v7216_v25  ;;  %v7242_v21 = vld [vmem:[%s10593_s16 + $0x120] sm:$0xff]  ;;  %v9612_v22 = vadd.f32 %v9396_v49, %v4919_v55  ;;  %v7257_v25 = vld [vmem:[%s10593_s16 + $0x198] sm:$0xff] }
 0xb5f   :  { %8149 = vmatpush3.msra.mxu1 %v7248_v28  ;;  %8115 = vmatprep.subr.mxu0 %v7231_v29  ;;  %v6826_v28 = vsel %vm354_vm3, %v6810_v15, 0.0  ;;  %v9622_v29 = vadd.f32 %v9418_v38, %v5203_v26  ;;  %v7209_v49 = vld [vmem:[%s10593_s16 + $0x18] sm:$0xff]  ;;  %v7224_v38 = vld [vmem:[%s10593_s16 + $0x90] sm:$0xff]  ;;  %v7254_v15 = vld [vmem:[%s10593_s16 + $0x180] sm:$0xff] }
 0xb60   :  { %v9434_v42 = vpop.f32.mrf.mxu0  ;;  %8150 = vmatprep.subr.mxu1 %v7263_v36  ;;  %8116 = vmatpush3.msra.mxu0 %v7215_v43  ;;  %10619 = vst [vmem:[#allocation46_spill] sm:$0xff] %v9612_v22  ;;  %v9624_v36 = vpop.f32.mrf.mxu1  ;;  %v9633_v43 = vadd.f32 %v9402_v53, %v4921_v27  ;;  %v6833_v53 = vsel %vm354_vm3, %v6811_v19, 0.0  ;;  %v6827_v31 = vrot.slane %v6826_v28, 4  ;;  %v7206_v27 = vld [vmem:[%s10593_s16] sm:$0xff] }
 0xb61   :  { %8151 = vmatpush3.msra.mxu1 %v7247_v46  ;;  %8117 = vmatprep.subr.mxu0 %v7230_v7  ;;  %10620 = vst [vmem:[#allocation47_spill] sm:$0xff] %v9622_v29  ;;  %v5134_v46 = vadd.f32 %v9410_v47, %v9406_v33  ;;  %v7256_v7 = vld [vmem:[%s10593_s16 + $0x190] sm:$0xff]  ;;  %v6834_v55 = vrot.slane %v6833_v53, 4 }
 0xb62   :  { %v9464_v14 = vpop.f32.mrf.mxu0  ;;  %8152 = vmatprep.subr.mxu1 %v7262_v12  ;;  %8118 = vmatpush3.msra.mxu0 %v7214_v51  ;;  %10621 = vst [vmem:[#allocation48_spill] sm:$0xff] %v9633_v43  ;;  %v6700_v12 = vadd.f32 %v6699_v59, %v6698_v10  ;;  %v6705_v51 = vsel %vm354_vm3, %v9552_v2, 0.0  ;;  %v7208_v33 = vld [vmem:[%s10593_s16 + $0x10] sm:$0xff]  ;;  %v7239_v10 = vld [vmem:[%s10593_s16 + $0x108] sm:$0xff] }
 0xb63   :  { %8153 = vmatpush3.msra.mxu1 %v7246_v34  ;;  %8119 = vmatprep.subr.mxu0 %v7229_v56  ;;  %v9646_v34 = vpop.f32.mrf.mxu1  ;;  %v7240_v47 = vld [vmem:[%s10593_s16 + $0x110] sm:$0xff]  ;;  %v6706_v52 = vrot.slane %v6705_v51, 4 }
 0xb64   :  { %v9478_v18 = vpop.f32.mrf.mxu0  ;;  %8154 = vmatprep.subr.mxu1 %v7261_v57  ;;  %8120 = vmatpush3.msra.mxu0 %v7213_v41  ;;  %v6712_v57 = vsel %vm354_vm3, %v9612_v22, 0.0  ;;  %v6812_v41 = vmul.f32 %v9612_v22, %v9612_v22  ;;  %v6701_v26 = vrot.slane %v6700_v12, 2 }
 0xb65   :  { %8155 = vmatpush3.msra.mxu1 %v7245_v63  ;;  %8121 = vmatprep.subr.mxu0 %v7228_v6  ;;  %v5205_v63 = vadd.f32 %v9420_v39, %v5134_v46  ;;  %v7255_v6 = vld [vmem:[%s10593_s16 + $0x188] sm:$0xff] }
 0xb66   :  { %v9512_v61 = vpop.f32.mrf.mxu0  ;;  %8156 = vmatprep.subr.mxu1 %v7260_v8  ;;  %8122 = vmatpush3.msra.mxu0 %v7212_v54  ;;  %v6814_v8 = vmul.f32 %v9622_v29, %v9622_v29  ;;  %v7207_v39 = vld [vmem:[%s10593_s16 + $0x8] sm:$0xff]  ;;  %v6840_v59 = vsel %vm354_vm3, %v6812_v41, 0.0 }
 0xb67   :  { %8157 = vmatpush3.msra.mxu1 %v7244_v60  ;;  %8123 = vmatprep.subr.mxu0 %v7227_v1  ;;  %v6813_v60 = vmul.f32 %v9633_v43, %v9633_v43  ;;  %v6726_v1 = vsel %vm354_vm3, %v9622_v29, 0.0  ;;  %v9697_v19 = vadd.f32 %v9448_v45, %v5205_v63  ;;  %v7301_v45 = vld [vmem:[%s10593_s16 + $0x2f8] sm:$0xff] }
 0xb68   :  { %v9529_v30 = vpop.f32.mrf.mxu0  ;;  %8158 = vmatprep.subr.mxu1 %v7259_v3  ;;  %8124 = vmatpush3.msra.mxu0 %v7211_v35  ;;  %v7222_v3 = vld [vmem:[%s10593_s16 + $0x80] sm:$0xff]  ;;  %v6713_v35 = vrot.slane %v6712_v57, 4 }
 0xb69   :  { %8159 = vmatpush3.msra.mxu1 %v7243_v40  ;;  %8125 = vmatprep.subr.mxu0 %v7226_v17  ;;  %v9687_v40 = vpop.f32.mrf.mxu1  ;;  %v7238_v17 = vld [vmem:[%s10593_s16 + $0x100] sm:$0xff]  ;;  %10622 = vst [vmem:[#allocation49_spill] sm:$0xff] %v9697_v19  ;;  %v6847_v46 = vsel %vm354_vm3, %v6813_v60, 0.0  ;;  %v6733_v41 = vsel %vm354_vm3, %v9697_v19, 0.0  ;;  %v6815_v63 = vmul.f32 %v9697_v19, %v9697_v19  ;;  %v5416_v60 = vadd.f32 %v9462_v5, %v9434_v42 }
 0xb6a   :  { %v9586_v11 = vpop.f32.mrf.mxu0  ;;  %8160 = vmatprep.subr.mxu1 %v7258_v37  ;;  %8126 = vmatpush3.msra.mxu0 %v7210_v50  ;;  %v6828_v37 = vadd.f32 %v6827_v31, %v6826_v28  ;;  %v6727_v50 = vrot.slane %v6726_v1, 4  ;;  %v6719_v28 = vsel %vm354_vm3, %v9633_v43, 0.0 }
 0xb6b   :  { %8161 = vmatpush3.msra.mxu1 %v7242_v21  ;;  %8127 = vmatprep.subr.mxu0 %v7225_v23  ;;  %v6854_v21 = vsel %vm354_vm3, %v6814_v8, 0.0  ;;  %v9700_v23 = vpop.f32.mrf.mxu1 }
 0xb6c   :  { %v9603_v20 = vpop.f32.mrf.mxu0  ;;  %8162 = vmatprep.subr.mxu1 %v7257_v25  ;;  %8128 = vmatpush3.msra.mxu0 %v7209_v49  ;;  %v6707_v49 = vadd.f32 %v6706_v52, %v6705_v51  ;;  %v6855_v31 = vrot.slane %v6854_v21, 4  ;;  %v6728_v8 = vadd.f32 %v6727_v50, %v6726_v1 }
 0xb6d   :  { %8163 = vmatpush3.msra.mxu1 %v7241_v4  ;;  %8129 = vmatprep.subr.mxu0 %v7224_v38  ;;  %v6835_v4 = vadd.f32 %v6834_v55, %v6833_v53  ;;  %v7333_v38 = vld [vmem:[%s10593_s16 + $0x3f8] sm:$0xff]  ;;  %v6829_v53 = vrot.slane %v6828_v37, 2  ;;  %v6734_v55 = vrot.slane %v6733_v41, 4 }
 0xb6e   :  { %v9648_v56 = vpop.f32.mrf.mxu0  ;;  %8164 = vmatprep.subr.mxu1 %v7256_v7  ;;  %8130 = vmatpush3.msra.mxu0 %v7208_v33  ;;  %v6702_v7 = vadd.f32 %v6701_v26, %v6700_v12  ;;  %v6714_v33 = vadd.f32 %v6713_v35, %v6712_v57  ;;  %v6708_v12 = vrot.slane %v6707_v49, 2 }
 0xb6f   :  { %8165 = vmatpush3.msra.mxu1 %v7240_v47  ;;  %8131 = vmatprep.subr.mxu0 %v7223_v9  ;;  %v6841_v47 = vrot.slane %v6840_v59, 4  ;;  %v6720_v9 = vrot.slane %v6719_v28, 4  ;;  %v6836_v57 = vrot.slane %v6835_v4, 2  ;;  %v6830_v35 = vadd.f32 %v6829_v53, %v6828_v37 }
 0xb70   :  { %v9669_v54 = vpop.f32.mrf.mxu0  ;;  %8166 = vmatprep.subr.mxu1 %v7255_v6  ;;  %8132 = vmatpush3.msra.mxu0 %v7207_v39  ;;  %v6848_v6 = vrot.slane %v6847_v46, 4  ;;  %v9719_v39 = vpop.f32.mrf.mxu1  ;;  %v6703_v26 = vrot.slane %v6702_v7, 1  ;;  %v6735_v42 = vadd.f32 %v6734_v55, %v6733_v41 }
 0xb71   :  { %8167 = vmatpush3.msra.mxu1 %v7239_v10  ;;  %8133 = vmatprep.subr.mxu0 %v7222_v3  ;;  %v6715_v10 = vrot.slane %v6714_v33, 2  ;;  %v6842_v52 = vadd.f32 %v6841_v47, %v6840_v59  ;;  %v6721_v1 = vadd.f32 %v6720_v9, %v6719_v28  ;;  %v6709_v59 = vadd.f32 %v6708_v12, %v6707_v49 }
 0xb72   :  { %v9702_v25 = vpop.f32.mrf.mxu0  ;;  %8168 = vmatprep.subr.mxu1 %v7254_v15  ;;  %8134 = vmatpush3.msra.mxu0 %v7206_v27  ;;  %v9723_v3 = vpop.f32.mrf.mxu1  ;;  %v6856_v27 = vadd.f32 %v6855_v31, %v6854_v21  ;;  %v6849_v50 = vadd.f32 %v6848_v6, %v6847_v46  ;;  %v6837_v47 = vadd.f32 %v6836_v57, %v6835_v4  ;;  %v6831_v2 = vrot.slane %v6830_v35, 1 }
 0xb73   :  { %8169 = vmatpush3.msra.mxu1 %v7238_v17  ;;  %8173 = vmatprep.subr.mxu0 %v7301_v45  ;;  %v6861_v17 = vsel %vm354_vm3, %v6815_v63, 0.0  ;;  %v6729_v45 = vrot.slane %v6728_v8, 2  ;;  %v6716_v19 = vadd.f32 %v6715_v10, %v6714_v33  ;;  %v6843_v22 = vrot.slane %v6842_v52, 2 }
 0xb74   :  { %v9713_v51 = vpop.f32.mrf.mxu0  ;;  %8208 = vmatprep.subr.mxu1 %v7333_v38  ;;  %v5487_v38 = vadd.f32 %v9478_v18, %v5416_v60  ;;  %v6862_v5 = vrot.slane %v6861_v17, 4  ;;  %v9729_v48 = vpop.f32.mrf.mxu1  ;;  %v6704_v43 = vadd.f32 %v6703_v26, %v6702_v7  ;;  %v6857_v37 = vrot.slane %v6856_v27, 2 }
 0xb75   :  { %v5418_v21 = vadd.f32 %v9495_v24, %v9464_v14  ;;  %v6722_v28 = vrot.slane %v6721_v1, 2  ;;  %v6850_v46 = vrot.slane %v6849_v50, 2  ;;  %v6730_v53 = vadd.f32 %v6729_v45, %v6728_v8 }
 0xb76   :  { %v9725_v15 = vpop.f32.mrf.mxu0  ;;  %v9734_v18 = vadd.f32 %v9510_v62, %v5487_v38  ;;  %v6267_v49 = vpop.f32.mrf.mxu1  ;;  %v6710_v33 = vrot.slane %v6709_v59, 1  ;;  %v6838_v31 = vrot.slane %v6837_v47, 1  ;;  %v5700_v7 = vadd.f32 %v9584_v32, %v9529_v30 }
 0xb77   :  { %v5489_v41 = vadd.f32 %v9512_v61, %v5418_v21  ;;  %v6717_v63 = vrot.slane %v6716_v19, 1  ;;  %v6844_v9 = vadd.f32 %v6843_v22, %v6842_v52  ;;  %v6736_v6 = vrot.slane %v6735_v42, 2 }
 0xb78   :  { %v6196_v29 = vpop.f32.mrf.mxu0  ;;  %v6863_v12 = vadd.f32 %v6862_v5, %v6861_v17  ;;  %v6832_v24 = vadd.f32 %v6831_v2, %v6830_v35  ;;  %v6858_v57 = vadd.f32 %v6857_v37, %v6856_v27  ;;  %v5702_v62 = vadd.f32 %v9624_v36, %v9586_v11  ;;  %v6269_v26 = vpop.f32.mrf.mxu1 }
 0xb79   :  { %v5771_v8 = vadd.f32 %v9603_v20, %v5700_v7  ;;  %v6723_v10 = vadd.f32 %v6722_v28, %v6721_v1  ;;  %v6851_v55 = vadd.f32 %v6850_v46, %v6849_v50  ;;  %v6731_v60 = vrot.slane %v6730_v53, 1 }
 0xb7a   :  { %v6198_v4 = vpop.f32.mrf.mxu0  ;;  %v6816_v61 = vmul.f32 %v9734_v18, %v9734_v18  ;;  %v9744_v30 = vadd.f32 %v6710_v33, %v6709_v59  ;;  %v9746_v32 = vadd.f32 %v6838_v31, %v6837_v47  ;;  %v9749_v22 = vadd.f32 %v9556_v44, %v5489_v41 }
 0xb7b   :  { %v5773_v2 = vadd.f32 %v9648_v56, %v5702_v62  ;;  %v9752_v52 = vadd.f32 %v6717_v63, %v6716_v19  ;;  %v6845_v11 = vrot.slane %v6844_v9, 1  ;;  %v6737_v20 = vadd.f32 %v6736_v6, %v6735_v42 }
 0xb7c   :  { %v6864_v36 = vrot.slane %v6863_v12, 2  ;;  %v6859_v27 = vrot.slane %v6858_v57, 1  ;;  %v6740_v17 = vsel %vm354_vm3, %v9734_v18, 0.0  ;;  %v9757_v1 = vadd.f32 %v9646_v34, %v5771_v8 }
 0xb7d   :  { %v6270_v50 = vadd.f32 %v6269_v26, %v6198_v4  ;;  %v6724_v45 = vrot.slane %v6723_v10, 1  ;;  %v6852_v38 = vrot.slane %v6851_v55, 1  ;;  %v6732_v44 = vadd.f32 %v6731_v60, %v6730_v53 }
 0xb7e   :  { %v6868_v59 = vsel %vm354_vm3, %v6816_v61, 0.0  ;;  %v6817_v19 = vmul.f32 %v9749_v22, %v9749_v22  ;;  %v9763_v47 = vadd.f32 %v9687_v40, %v5773_v2  ;;  %v6268_v42 = vadd.f32 %v6267_v49, %v6196_v29 }
 0xb7f   :  { %v9765_v37 = vadd.f32 %v6845_v11, %v6844_v9  ;;  %v6738_v21 = vrot.slane %v6737_v20, 1  ;;  %v6865_v34 = vadd.f32 %v6864_v36, %v6863_v12  ;;  %v6741_v28 = vrot.slane %v6740_v17, 4 }
 0xb80   :  { %v6860_v46 = vadd.f32 %v6859_v27, %v6858_v57  ;;  %v6747_v53 = vsel %vm354_vm3, %v9749_v22, 0.0  ;;  %v6818_v4 = vmul.f32 %v9757_v1, %v9757_v1  ;;  %v9771_v31 = vadd.f32 %v6724_v45, %v6723_v10 }
 0xb81   :  { %v9773_v41 = vadd.f32 %v6852_v38, %v6851_v55  ;;  %v9775_v40 = vadd.f32 %v6732_v44, %v6704_v43  ;;  %v6869_v29 = vrot.slane %v6868_v59, 4  ;;  %v6875_v7 = vsel %vm354_vm3, %v6817_v19, 0.0 }
 0xb82   :  { %v6754_v63 = vsel %vm354_vm3, %v9757_v1, 0.0  ;;  %v6819_v9 = vmul.f32 %v9763_v47, %v9763_v47  ;;  %v6739_v12 = vadd.f32 %v6738_v21, %v6737_v20  ;;  %v6742_v57 = vadd.f32 %v6741_v28, %v6740_v17 }
 0xb83   :  { %v6748_v62 = vrot.slane %v6747_v53, 4  ;;  %v9784_v8 = vadd.f32 %v6860_v46, %v6832_v24  ;;  %v6882_v43 = vsel %vm354_vm3, %v6818_v4, 0.0  ;;  %v5984_v10 = vadd.f32 %v9700_v23, %v9669_v54 }
 0xb84   :  { %v6870_v60 = vadd.f32 %v6869_v29, %v6868_v59  ;;  %v6876_v61 = vrot.slane %v6875_v7, 4  ;;  %v6755_v26 = vrot.slane %v6754_v63, 4  ;;  %v6761_v2 = vsel %vm354_vm3, %v9763_v47, 0.0 }
 0xb85   :  { %v6889_v11 = vsel %vm354_vm3, %v6819_v9, 0.0  ;;  %v5986_v20 = vadd.f32 %v9719_v39, %v9702_v25  ;;  %v6055_v24 = vadd.f32 %v9713_v51, %v5984_v10  ;;  %v6749_v54 = vadd.f32 %v6748_v62, %v6747_v53 }
 0xb86   :  { %v6883_v23 = vrot.slane %v6882_v43, 4  ;;  %v6871_v44 = vrot.slane %v6870_v60, 2  ;;  %v6877_v25 = vadd.f32 %v6876_v61, %v6875_v7  ;;  %v6890_v39 = vrot.slane %v6889_v11, 4 }
 0xb87   :  { %v6057_v45 = vadd.f32 %v9725_v15, %v5986_v20  ;;  %v6756_v59 = vadd.f32 %v6755_v26, %v6754_v63  ;;  %v6750_v21 = vrot.slane %v6749_v54, 2 }
 0xb88   :  { %v6878_v29 = vrot.slane %v6877_v25, 2 }
 0xb89   :  { %v9814_v46 = vadd.f32 %v9729_v48, %v6057_v45  ;;  %v6757_v63 = vrot.slane %v6756_v59, 2 }
 0xb8b   :  { %v6821_v10 = vmul.f32 %v9814_v46, %v9814_v46 }
 0xb8d   :  { %v6903_v45 = vsel %vm354_vm3, %v6821_v10, 0.0 }
 0xb8e   :  { %v6338_v14 = vpop.f32.mrf.mxu0 }
 0xb8f   :  { %v6409_v56 = vpop.f32.mrf.mxu1  ;;  %v6339_v33 = vadd.f32 %v6338_v14, %v6268_v42  ;;  %v6866_v14 = vrot.slane %v6865_v34, 1 }
 0xb90   :  { %v6340_v35 = vpop.f32.mrf.mxu0 }
 0xb91   :  { %v6341_v5 = vadd.f32 %v6340_v35, %v6270_v50  ;;  %v6411_v49 = vpop.f32.mrf.mxu1  ;;  %v9789_v55 = vadd.f32 %v6409_v56, %v6339_v33  ;;  %v6743_v35 = vrot.slane %v6742_v57, 2  ;;  %v6867_v17 = vadd.f32 %v6866_v14, %v6865_v34 }
 0xb92   :  { %v6762_v50 = vrot.slane %v6761_v2, 4  ;;  %v9807_v56 = vadd.f32 %v9723_v3, %v6055_v24  ;;  %v6884_v34 = vadd.f32 %v6883_v23, %v6882_v43  ;;  %v6872_v33 = vadd.f32 %v6871_v44, %v6870_v60 }
 0xb93   :  { %v9782_v6 = vadd.f32 %v6411_v49, %v6341_v5  ;;  %v6822_v38 = vmul.f32 %v9789_v55, %v9789_v55  ;;  %v6782_v51 = vsel %vm354_vm3, %v9789_v55, 0.0  ;;  %v9811_v5 = vadd.f32 %v6739_v12, %v9744_v30 }
 0xb94   :  { %v6744_v15 = vadd.f32 %v6743_v35, %v6742_v57  ;;  %v6763_v28 = vadd.f32 %v6762_v50, %v6761_v2  ;;  %v6783_v53 = vrot.slane %v6782_v51, 4  ;;  %v6891_v3 = vadd.f32 %v6890_v39, %v6889_v11 }
 0xb95   :  { %v6823_v36 = vmul.f32 %v9782_v6, %v9782_v6  ;;  %v6789_v27 = vsel %vm354_vm3, %v9782_v6, 0.0  ;;  %v6910_v4 = vsel %vm354_vm3, %v6822_v38, 0.0  ;;  %v9818_v7 = vadd.f32 %v6867_v17, %v9746_v32 }
 0xb96   :  { %v6790_v19 = vrot.slane %v6789_v27, 4  ;;  %v6820_v30 = vmul.f32 %v9807_v56, %v9807_v56  ;;  %v6745_v12 = vrot.slane %v6744_v15, 1  ;;  %v6751_v14 = vadd.f32 %v6750_v21, %v6749_v54 }
 0xb97   :  { %v6917_v42 = vsel %vm354_vm3, %v6823_v36, 0.0  ;;  %v6885_v57 = vrot.slane %v6884_v34, 2  ;;  %v6911_v48 = vrot.slane %v6910_v4, 4  ;;  %v6764_v62 = vrot.slane %v6763_v28, 2 }
 0xb98   :  { %v6918_v49 = vrot.slane %v6917_v42, 4  ;;  %v6791_v9 = vadd.f32 %v6790_v19, %v6789_v27  ;;  %v6768_v43 = vsel %vm354_vm3, %v9807_v56, 0.0  ;;  %v6784_v60 = vadd.f32 %v6783_v53, %v6782_v51 }
 0xb99   :  { %v6873_v61 = vrot.slane %v6872_v33, 1  ;;  %v6879_v32 = vadd.f32 %v6878_v29, %v6877_v25  ;;  %v6892_v26 = vrot.slane %v6891_v3, 2  ;;  %v6758_v11 = vadd.f32 %v6757_v63, %v6756_v59 }
 0xb9a   :  { %v6919_v2 = vadd.f32 %v6918_v49, %v6917_v42  ;;  %v6896_v20 = vsel %vm354_vm3, %v6820_v30, 0.0  ;;  %v6775_v24 = vsel %vm354_vm3, %v9814_v46, 0.0  ;;  %v6792_v36 = vrot.slane %v6791_v9, 2 }
 0xb9b   :  { %v6746_v35 = vadd.f32 %v6745_v12, %v6744_v15  ;;  %v6886_v54 = vadd.f32 %v6885_v57, %v6884_v34  ;;  %v6769_v23 = vrot.slane %v6768_v43, 4  ;;  %v6912_v27 = vadd.f32 %v6911_v48, %v6910_v4 }
 0xb9c   :  { %v6752_v17 = vrot.slane %v6751_v14, 1  ;;  %v6765_v50 = vadd.f32 %v6764_v62, %v6763_v28  ;;  %v6785_v38 = vrot.slane %v6784_v60, 2  ;;  %v6893_v44 = vadd.f32 %v6892_v26, %v6891_v3 }
 0xb9d   :  { %v6897_v25 = vrot.slane %v6896_v20, 4  ;;  %v6776_v39 = vrot.slane %v6775_v24, 4  ;;  %v6920_v51 = vrot.slane %v6919_v2, 2  ;;  %v6874_v59 = vadd.f32 %v6873_v61, %v6872_v33 }
 0xb9e   :  { %v6880_v19 = vrot.slane %v6879_v32, 1  ;;  %v6759_v42 = vrot.slane %v6758_v11, 1  ;;  %v6793_v21 = vadd.f32 %v6792_v36, %v6791_v9  ;;  %v6887_v53 = vrot.slane %v6886_v54, 1 }
 0xb9f   :  { %v6770_v29 = vadd.f32 %v6769_v23, %v6768_v43  ;;  %v6904_v49 = vrot.slane %v6903_v45, 4  ;;  %v6913_v15 = vrot.slane %v6912_v27, 2  ;;  %v9831_v4 = vadd.f32 %v6746_v35, %v9752_v52 }
 0xba0   :  { %v6753_v28 = vadd.f32 %v6752_v17, %v6751_v14  ;;  %v6766_v30 = vrot.slane %v6765_v50, 1  ;;  %v6786_v12 = vadd.f32 %v6785_v38, %v6784_v60  ;;  %v6894_v3 = vrot.slane %v6893_v44, 1 }
 0xba1   :  { %v6898_v57 = vadd.f32 %v6897_v25, %v6896_v20  ;;  %v6777_v48 = vadd.f32 %v6776_v39, %v6775_v24  ;;  %v6921_v62 = vadd.f32 %v6920_v51, %v6919_v2  ;;  %v9834_v33 = vadd.f32 %v6874_v59, %v9765_v37 }
 0xba2   :  { %v9836_v9 = vadd.f32 %v6880_v19, %v6879_v32  ;;  %v6760_v43 = vadd.f32 %v6759_v42, %v6758_v11  ;;  %v6794_v10 = vrot.slane %v6793_v21, 1  ;;  %v6888_v61 = vadd.f32 %v6887_v53, %v6886_v54 }
 0xba3   :  { %v6771_v26 = vrot.slane %v6770_v29, 2  ;;  %v6905_v36 = vadd.f32 %v6904_v49, %v6903_v45  ;;  %v6914_v23 = vadd.f32 %v6913_v15, %v6912_v27  ;;  %v9839_v14 = vadd.f32 %v6753_v28, %v9771_v31 }
 0xba4   :  { %v6767_v60 = vadd.f32 %v6766_v30, %v6765_v50  ;;  %v6787_v20 = vrot.slane %v6786_v12, 1  ;;  %v6895_v2 = vadd.f32 %v6894_v3, %v6893_v44  ;;  %v6899_v17 = vrot.slane %v6898_v57, 2 }
 0xba5   :  { %v6778_v37 = vrot.slane %v6777_v48, 2  ;;  %v6922_v38 = vrot.slane %v6921_v62, 1  ;;  %v6942_v11 = vadd.f32 %v9775_v40, %v6760_v43  ;;  %v6795_v25 = vadd.f32 %v6794_v10, %v6793_v21 }
 0xba6   :  { %v6954_v27 = vadd.f32 %v9784_v8, %v6888_v61  ;;  %v6772_v51 = vadd.f32 %v6771_v26, %v6770_v29  ;;  %v6906_v59 = vrot.slane %v6905_v36, 2  ;;  %v6915_v31 = vrot.slane %v6914_v23, 1 }
 0xba7   :  { %v6943_v50 = vadd.f32 %v9811_v5, %v6767_v60  ;;  %v6788_v42 = vadd.f32 %v6787_v20, %v6786_v12  ;;  %v6955_v49 = vadd.f32 %v9818_v7, %v6895_v2  ;;  %v6900_v15 = vadd.f32 %v6899_v17, %v6898_v57 }
 0xba8   :  { %v6779_v40 = vadd.f32 %v6778_v37, %v6777_v48  ;;  %v6923_v21 = vadd.f32 %v6922_v38, %v6921_v62  ;;  %v6773_v5 = vrot.slane %v6772_v51, 1  ;;  %v6907_v30 = vadd.f32 %v6906_v59, %v6905_v36 }
 0xba9   :  { %v6916_v12 = vadd.f32 %v6915_v31, %v6914_v23  ;;  %v6946_v43 = vadd.f32 %v6942_v11, %v6788_v42  ;;  %v6901_v62 = vrot.slane %v6900_v15, 1 }
 0xbaa   :  { %v6774_v17 = vadd.f32 %v6773_v5, %v6772_v51  ;;  %v6908_v37 = vrot.slane %v6907_v30, 1 }
 0xbab   :  { %v6958_v38 = vadd.f32 %v6954_v27, %v6916_v12 }
 0xbac   :  { %v6944_v51 = vadd.f32 %v9831_v4, %v6774_v17 }
 0xbad   :  { %v6966_v27 = vmul.f32 0.125, %v6958_v38 }
 0xbd0   :  { %v6480_v34 = vpop.f32.mrf.mxu0 }
 0xbd1   :  { %v6551_v63 = vpop.f32.mrf.mxu1 }
 0xbd2   :  { %v6482_v52 = vpop.f32.mrf.mxu0  ;;  %v6552_v24 = vadd.f32 %v6551_v63, %v6480_v34  ;;  %v6947_v63 = vadd.f32 %v6943_v50, %v6795_v25 }
 0xbd3   :  { %v6553_v35 = vpop.f32.mrf.mxu1 }
 0xbd4   :  { %v6554_v54 = vadd.f32 %v6553_v35, %v6482_v52  ;;  %v6780_v52 = vrot.slane %v6779_v40, 1  ;;  %v6959_v35 = vadd.f32 %v6955_v49, %v6923_v21  ;;  %v9858_v60 = vmul.f32 0.125, %v6947_v63 }
 0xbd5   :  { %v6909_v21 = vadd.f32 %v6908_v37, %v6907_v30 }
 0xbd6   :  { %v6781_v59 = vadd.f32 %v6780_v52, %v6779_v40  ;;  %v6967_v31 = vmul.f32 0.125, %v6959_v35  ;;  %v6953_v40 = vadd.f32 %v9836_v9, %v9773_v41 }
 0xbd8   :  { %v6945_v12 = vadd.f32 %v9839_v14, %v6781_v59 }
 0xc12   :  { %v6622_v32 = vpop.f32.mrf.mxu0 }
 0xc13   :  { %v6623_v39 = vadd.f32 %v6622_v32, %v6552_v24  ;;  %v6693_v45 = vpop.f32.mrf.mxu1  ;;  %v9861_v32 = vmul.f32 0.125, %v6946_v43 }
 0xc14   :  { %v6624_v19 = vpop.f32.mrf.mxu0 }
 0xc15   :  { %v9844_v44 = vadd.f32 %v6693_v45, %v6623_v39  ;;  %v6625_v53 = vadd.f32 %v6624_v19, %v6554_v54  ;;  %v6695_v34 = vpop.f32.mrf.mxu1  ;;  %v6902_v45 = vadd.f32 %v6901_v62, %v6900_v15  ;;  %v6971_v19 = vmul.f32 %v9858_v60, %v9858_v60 }
 0xc17   :  { %v6796_v8 = vsel %vm354_vm3, %v9844_v44, 0.0  ;;  %v6824_v29 = vmul.f32 %v9844_v44, %v9844_v44  ;;  %v9851_v28 = vadd.f32 %v6695_v34, %v6625_v53  ;;  %v6970_v34 = vmul.f32 %v9861_v32, %v9861_v32 }
 0xc18   :  { %v6797_v3 = vrot.slane %v6796_v8, 4  ;;  %v6956_v5 = vadd.f32 %v9834_v33, %v6902_v45 }
 0xc19   :  { %v6924_v7 = vsel %vm354_vm3, %v6824_v29, 0.0  ;;  %v6803_v57 = vsel %vm354_vm3, %v9851_v28, 0.0  ;;  %v6825_v48 = vmul.f32 %v9851_v28, %v9851_v28 }
 0xc1a   :  { %v6798_v10 = vadd.f32 %v6797_v3, %v6796_v8  ;;  %v6925_v61 = vrot.slane %v6924_v7, 4  ;;  %v6804_v26 = vrot.slane %v6803_v57, 4  ;;  %v6975_v3 = vsub.f32 %v6967_v31, %v6971_v19  ;;  %v6978_v19 = vld [vmem:[#allocation23] sm:$0xf] }
 0xc1b   :  { %v6931_v36 = vsel %vm354_vm3, %v6825_v48, 0.0  ;;  %v6974_v48 = vsub.f32 %v6966_v27, %v6970_v34 }
 0xc1c   :  { %v6799_v23 = vrot.slane %v6798_v10, 2  ;;  %v6926_v20 = vadd.f32 %v6925_v61, %v6924_v7  ;;  %v6805_v24 = vadd.f32 %v6804_v26, %v6803_v57  ;;  %v6932_v2 = vrot.slane %v6931_v36, 4 }
 0xc1d   :  { %v6957_v57 = vadd.f32 %v6953_v40, %v6909_v21  ;;  %v6980_v52 = vadd.f32 1e-05, %v6975_v3  ;;  %v6979_v9 = vadd.f32 1e-05, %v6974_v48 }
 0xc1e   :  { %v6800_v11 = vadd.f32 %v6799_v23, %v6798_v10  ;;  %v6927_v25 = vrot.slane %v6926_v20, 2  ;;  %v6806_v54 = vrot.slane %v6805_v24, 2  ;;  %v6933_v39 = vadd.f32 %v6932_v2, %v6931_v36 }
 0xc1f   :  { %8434 = vrsqrt.f32 %v6980_v52  ;;  %v10623_v52 = vld [vmem:[#allocation45_spill] sm:$0xff] }
 0xc20   :  { %v6801_v50 = vrot.slane %v6800_v11, 1  ;;  %v6928_v42 = vadd.f32 %v6927_v25, %v6926_v20  ;;  %v6807_v53 = vadd.f32 %v6806_v54, %v6805_v24  ;;  %v6934_v49 = vrot.slane %v6933_v39, 2 }
 0xc21   :  { %8436 = vrsqrt.f32 %v6979_v9 }
 0xc22   :  { %v6802_v63 = vadd.f32 %v6801_v50, %v6800_v11  ;;  %v6929_v8 = vrot.slane %v6928_v42, 1  ;;  %v6808_v29 = vrot.slane %v6807_v53, 1  ;;  %v6935_v15 = vadd.f32 %v6934_v49, %v6933_v39 }
 0xc24   :  { %v6930_v43 = vadd.f32 %v6929_v8, %v6928_v42  ;;  %v6948_v7 = vadd.f32 %v6944_v51, %v6802_v63  ;;  %v6809_v4 = vadd.f32 %v6808_v29, %v6807_v53  ;;  %v6936_v30 = vrot.slane %v6935_v15, 1 }
 0xc25   :  { %v7029_v42 = vsub.s32 2, %v9082_v58  ;;  %v7033_v53 = vsub.s32 3, %v9082_v58 }
 0xc26   :  { %v6960_v62 = vadd.f32 %v6956_v5, %v6930_v43  ;;  %v6964_v10 = vmul.f32 0.125, %v6948_v7  ;;  %v6937_v61 = vadd.f32 %v6936_v30, %v6935_v15  ;;  %v6949_v26 = vadd.f32 %v6945_v12, %v6809_v4  ;;  %v7017_v30 = vld [vmem:[#allocation25] sm:$0xf] }
 0xc28   :  { %v6968_v35 = vmul.f32 0.125, %v6960_v62  ;;  %v6972_v36 = vmul.f32 %v6964_v10, %v6964_v10  ;;  %v6961_v23 = vadd.f32 %v6957_v57, %v6937_v61  ;;  %v6965_v41 = vmul.f32 0.125, %v6949_v26 }
 0xc2a   :  { %v6976_v33 = vsub.f32 %v6968_v35, %v6972_v36  ;;  %v6969_v20 = vmul.f32 0.125, %v6961_v23  ;;  %v6973_v14 = vmul.f32 %v6965_v41, %v6965_v41  ;;  %v10624_v35 = vld [vmem:[#allocation48_spill] sm:$0xff] }
 0xc2c   :  { %v6981_v24 = vadd.f32 1e-05, %v6976_v33  ;;  %v6977_v2 = vsub.f32 %v6969_v20, %v6973_v14  ;;  %v8435_v37 = vpop.eup %8434 }
 0xc2e   :  { %v6982_v17 = vadd.f32 1e-05, %v6977_v2  ;;  %8438 = vrsqrt.f32 %v6981_v24  ;;  %v8437_v38 = vpop.eup %8436  ;;  %v10627_v24 = vld [vmem:[#allocation49_spill] sm:$0xff] }
 0xc2f   :  { %v6991_v25 = vcombine.low %v8437_v38, %v8435_v37 }
 0xc30   :  { %8440 = vrsqrt.f32 %v6982_v17 }
 0xc31   :  { %v6999_v45 = vrot.slane %v6991_v25, %v9259_v13 }
 0xc3b   :  { %v8439_v11 = vpop.eup %8438 }
 0xc3d   :  { %v8441_v54 = vpop.eup %8440 }
 0xc3e   :  { %v6992_v39 = vcombine.low %v8439_v11, %v8441_v54 }
 0xc40   :  { %v7006_v59 = vrot.slane %v6992_v39, %v9259_v13 }
 0xc42   :  { %v7007_v31 = vcombine.low %v6999_v45, %v7006_v59 }
 0xc44   :  { %v7014_v50 = vrot.slane %v7007_v31, %v9259_v13 }
 0xc46   :  { %v7016_v49 = vmul.f32 %v7014_v50, %v6978_v19  ;;  %v7285_v50 = vld [vmem:[%s10593_s16 + $0x278] sm:$0xff] }
 0xc48   :  { %v7030_v51 = vrot.slane %v7016_v49, %v7029_v42  ;;  %v7034_v21 = vrot.slane %v7016_v49, %v7033_v53  ;;  %v7022_v27 = vrot.slane %v7016_v49, %v9085_v0  ;;  %v7026_v34 = vrot.slane %v7016_v49, %v9264_v16 }
 0xc4a   :  { %v7041_v63 = vmul.f32 %v7030_v51, %v6964_v10  ;;  %v7042_v8 = vmul.f32 %v7034_v21, %v6965_v41  ;;  %v9880_v29 = vrot.slane %v7034_v21, %v9085_v0  ;;  %v7039_v15 = vmul.f32 %v7022_v27, %v9861_v32  ;;  %v10626_v41 = vld [vmem:[#allocation46_spill] sm:$0xff]  ;;  %v7300_v21 = vld [vmem:[%s10593_s16 + $0x2f0] sm:$0xff] }
 0xc4b   :  { %v7040_v40 = vmul.f32 %v7026_v34, %v9858_v60  ;;  %v9889_v12 = vrot.slane %v7030_v51, %v9085_v0  ;;  %v9899_v57 = vrot.slane %v7026_v34, %v9085_v0  ;;  %v7332_v34 = vld [vmem:[%s10593_s16 + $0x3f0] sm:$0xff] }
 0xc4c   :  { %v7048_v5 = vcombine.low %v7041_v63, %v7042_v8  ;;  %v9886_v58 = vmul.f32 %v9880_v29, %v9851_v28  ;;  %v9902_v28 = vrot.slane %v7022_v27, %v9085_v0  ;;  %v7113_v36 = vmul.f32 %v9880_v29, %v10624_v35 }
 0xc4d   :  { %v7047_v3 = vcombine.low %v7039_v15, %v7040_v40  ;;  %v9895_v4 = vmul.f32 %v9889_v12, %v9844_v44  ;;  %v7111_v44 = vmul.f32 %v9899_v57, %v10623_v52  ;;  %v7112_v9 = vmul.f32 %v9889_v12, %v10626_v41  ;;  %v7284_v40 = vld [vmem:[%s10593_s16 + $0x270] sm:$0xff] }
 0xc4e   :  { %v7062_v43 = vrot.slane %v7048_v5, %v9259_v13  ;;  %v7115_v2 = vmul.f32 %v9899_v57, %v10627_v24  ;;  %v7117_v17 = vmul.f32 %v9880_v29, %v9749_v22  ;;  %v7118_v63 = vmul.f32 %v9902_v28, %v9757_v1  ;;  %v7316_v5 = vld [vmem:[%s10593_s16 + $0x370] sm:$0xff]  ;;  %v7299_v1 = vld [vmem:[%s10593_s16 + $0x2e8] sm:$0xff] }
 0xc4f   :  { %v7055_v7 = vrot.slane %v7047_v3, %v9259_v13  ;;  %v7120_v8 = vmul.f32 %v9889_v12, %v9807_v56  ;;  %v7331_v56 = vld [vmem:[%s10593_s16 + $0x3e8] sm:$0xff]  ;;  %v7312_v24 = vld [vmem:[%s10593_s16 + $0x350] sm:$0xff] }
 0xc51   :  { %v7063_v32 = vcombine.low %v7055_v7, %v7062_v43 }
 0xc53   :  { %v7070_v60 = vrot.slane %v7063_v32, %v9259_v13  ;;  %v10625_v13 = vld [vmem:[#allocation44_spill] sm:$0xff]  ;;  %v7283_v32 = vld [vmem:[%s10593_s16 + $0x268] sm:$0xff] }
 0xc54   :  { %v7110_v23 = vmul.f32 %v9902_v28, %v10625_v13  ;;  %v7296_v13 = vld [vmem:[%s10593_s16 + $0x2d0] sm:$0xff] }
 0xc55   :  { %v7072_v48 = vsub.f32 %v7017_v30, %v7070_v60  ;;  %v7315_v30 = vld [vmem:[%s10593_s16 + $0x368] sm:$0xff]  ;;  %v7123_v60 = vmul.f32 %v9899_v57, %v9782_v6  ;;  %v7314_v6 = vld [vmem:[%s10593_s16 + $0x360] sm:$0xff] }
 0xc57   :  { %v7081_v62 = vrot.slane %v7072_v48, %v9264_v16  ;;  %v7089_v10 = vrot.slane %v7072_v48, %v7033_v53  ;;  %v7077_v61 = vrot.slane %v7072_v48, %v9085_v0  ;;  %v7085_v26 = vrot.slane %v7072_v48, %v7029_v42  ;;  %v7317_v42 = vld [vmem:[%s10593_s16 + $0x378] sm:$0xff]  ;;  %v7298_v48 = vld [vmem:[%s10593_s16 + $0x2e0] sm:$0xff] }
 0xc59   :  { %v9915_v33 = vrot.slane %v7081_v62, %v9085_v0  ;;  %v9918_v16 = vrot.slane %v7089_v10, %v9085_v0  ;;  %v9921_v20 = vrot.slane %v7077_v61, %v9085_v0  ;;  %v9924_v14 = vrot.slane %v7085_v26, %v9085_v0  ;;  %v7330_v62 = vld [vmem:[%s10593_s16 + $0x3e0] sm:$0xff] }
 0xc5a   :  { %v7122_v10 = vmul.f32 %v9902_v28, %v9789_v55  ;;  %v7282_v61 = vld [vmem:[%s10593_s16 + $0x260] sm:$0xff]  ;;  %v7297_v55 = vld [vmem:[%s10593_s16 + $0x2d8] sm:$0xff] }
 0xc5b   :  { %v7143_v37 = vadd.f32 %v9915_v33, %v7111_v44  ;;  %v7145_v38 = vadd.f32 %v9918_v16, %v7113_v36  ;;  %v7142_v11 = vadd.f32 %v9921_v20, %v7110_v23  ;;  %v7144_v25 = vadd.f32 %v9924_v14, %v7112_v9  ;;  %v7329_v44 = vld [vmem:[%s10593_s16 + $0x3d8] sm:$0xff]  ;;  %v7328_v23 = vld [vmem:[%s10593_s16 + $0x3d0] sm:$0xff] }
 0xc5c   :  { %v7147_v54 = vadd.f32 %v9915_v33, %v7115_v2  ;;  %v7149_v39 = vadd.f32 %v9918_v16, %v7117_v17  ;;  %v9966_v43 = vadd.f32 %v9921_v20, %v7118_v63  ;;  %v9969_v7 = vadd.f32 %v9924_v14, %v7120_v8  ;;  %v7313_v36 = vld [vmem:[%s10593_s16 + $0x358] sm:$0xff]  ;;  %v7280_v9 = vld [vmem:[%s10593_s16 + $0x250] sm:$0xff]  ;;  %v7295_v2 = vld [vmem:[%s10593_s16 + $0x2c8] sm:$0xff] }
 0xc5d   :  { %vm7159_vm3 = vcmp.ge.f32.partialorder %v7143_v37, 0.0  ;;  %v7175_v0 = vmul.f32 0.01, %v7143_v37  ;;  %vm7161_vm7 = vcmp.ge.f32.partialorder %v7145_v38, 0.0  ;;  %v7177_v45 = vmul.f32 0.01, %v7145_v38 }
 0xc5e   :  { %vm7158_vm8 = vcmp.ge.f32.partialorder %v7142_v11, 0.0  ;;  %v7174_v59 = vmul.f32 0.01, %v7142_v11  ;;  %vm7160_vm9 = vcmp.ge.f32.partialorder %v7144_v25, 0.0  ;;  %v7176_v22 = vmul.f32 0.01, %v7144_v25 }
 0xc5f   :  { %v7191_v31 = vsel %vm7159_vm3, %v7143_v37, %v7175_v0  ;;  %v7193_v19 = vsel %vm7161_vm7, %v7145_v38, %v7177_v45  ;;  %vm7163_vm10 = vcmp.ge.f32.partialorder %v7147_v54, 0.0  ;;  %v7179_v53 = vmul.f32 0.01, %v7147_v54  ;;  %v7279_v17 = vld [vmem:[%s10593_s16 + $0x248] sm:$0xff]  ;;  %v7294_v38 = vld [vmem:[%s10593_s16 + $0x2c0] sm:$0xff]  ;;  %v7325_v0 = vld [vmem:[%s10593_s16 + $0x3b8] sm:$0xff] }
 0xc60   :  { %7533 = vmatprep.mubr.f32.mxu0 %v7191_v31  ;;  %7603 = vmatprep.mubr.f32.mxu1 %v7193_v19  ;;  %v7190_v49 = vsel %vm7158_vm8, %v7142_v11, %v7174_v59  ;;  %v7192_v51 = vsel %vm7160_vm9, %v7144_v25, %v7176_v22  ;;  %vm7165_vm11 = vcmp.ge.f32.partialorder %v7149_v39, 0.0  ;;  %v7181_v27 = vmul.f32 0.01, %v7149_v39  ;;  %v7311_v37 = vld [vmem:[%s10593_s16 + $0x348] sm:$0xff]  ;;  %v7326_v11 = vld [vmem:[%s10593_s16 + $0x3c0] sm:$0xff]  ;;  %v7277_v45 = vld [vmem:[%s10593_s16 + $0x238] sm:$0xff] }
 0xc61   :  { %7534 = vmatmul.mubr.f32.vlgmr.msra.gmra.mxu0 %v7190_v49  ;;  %7604 = vmatmul.mubr.f32.vlgmr.msra.gmra.mxu1 %v7192_v51  ;;  %v7195_v15 = vsel %vm7163_vm10, %v7147_v54, %v7179_v53  ;;  %v9994_v26 = vadd.f32 %v9915_v33, %v7123_v60  ;;  %v9998_v52 = vadd.f32 %v9918_v16, %v9886_v58  ;;  %v7281_v58 = vld [vmem:[%s10593_s16 + $0x258] sm:$0xff]  ;;  %v7278_v25 = vld [vmem:[%s10593_s16 + $0x240] sm:$0xff]  ;;  %v7292_v22 = vld [vmem:[%s10593_s16 + $0x2b0] sm:$0xff]  ;;  %vm7166_vm0 = vcmp.ge.f32.partialorder %v9966_v43, 0.0 }
 0xc62   :  { %8174 = vmatpush3.msra.mxu0 %v7285_v50  ;;  %8209 = vmatpush3.msra.mxu1 %v7317_v42  ;;  %v7197_v3 = vsel %vm7165_vm11, %v7149_v39, %v7181_v27  ;;  %v10007_v35 = vadd.f32 %v9921_v20, %v7122_v10  ;;  %v10023_v41 = vadd.f32 %v9924_v14, %v9895_v4  ;;  %v7327_v4 = vld [vmem:[%s10593_s16 + $0x3c8] sm:$0xff]  ;;  %v7310_v54 = vld [vmem:[%s10593_s16 + $0x340] sm:$0xff]  ;;  %v7293_v39 = vld [vmem:[%s10593_s16 + $0x2b8] sm:$0xff]  ;;  %vm7168_vm1 = vcmp.ge.f32.partialorder %v9969_v7, 0.0 }
 0xc63   :  { %8175 = vmatprep.subr.mxu0 %v7300_v21  ;;  %7673 = vmatprep.mubr.f32.mxu0 %v7195_v15  ;;  %v7309_v59 = vld [vmem:[%s10593_s16 + $0x338] sm:$0xff]  ;;  %v7324_v31 = vld [vmem:[%s10593_s16 + $0x3b0] sm:$0xff]  ;;  %v7291_v42 = vld [vmem:[%s10593_s16 + $0x2a8] sm:$0xff]  ;;  %vm7171_vm2 = vcmp.ge.f32.partialorder %v9994_v26, 0.0  ;;  %vm7173_vm4 = vcmp.ge.f32.partialorder %v9998_v52, 0.0  ;;  %vm8039_vm3 = vcmask 123904  }
 0xc64   :  { %8210 = vmatprep.subr.mxu1 %v7332_v34  ;;  %7743 = vmatprep.mubr.f32.mxu1 %v7197_v3  ;;  %v7276_v19 = vld [vmem:[%s10593_s16 + $0x230] sm:$0xff]  ;;  %v7323_v53 = vld [vmem:[%s10593_s16 + $0x3a8] sm:$0xff]  ;;  %v7290_v21 = vld [vmem:[%s10593_s16 + $0x2a0] sm:$0xff]  ;;  %v7116_v3 = vmul.f32 %v9889_v12, %v9734_v18  ;;  %vm7170_vm5 = vcmp.ge.f32.partialorder %v10007_v35, 0.0  ;;  %vm7172_vm6 = vcmp.ge.f32.partialorder %v10023_v41, 0.0 }
 0xc65   :  { %8176 = vmatpush3.msra.mxu0 %v7284_v40  ;;  %8211 = vmatpush3.msra.mxu1 %v7316_v5  ;;  %v7308_v50 = vld [vmem:[%s10593_s16 + $0x330] sm:$0xff]  ;;  %v7275_v49 = vld [vmem:[%s10593_s16 + $0x228] sm:$0xff]  ;;  %v7322_v27 = vld [vmem:[%s10593_s16 + $0x3a0] sm:$0xff] }
 0xc66   :  { %8177 = vmatprep.subr.mxu0 %v7299_v1  ;;  %8212 = vmatprep.subr.mxu1 %v7331_v56  ;;  %v7307_v51 = vld [vmem:[%s10593_s16 + $0x328] sm:$0xff]  ;;  %v7274_v34 = vld [vmem:[%s10593_s16 + $0x220] sm:$0xff]  ;;  %v7289_v8 = vld [vmem:[%s10593_s16 + $0x298] sm:$0xff] }
 0xc67   :  { %8178 = vmatpush3.msra.mxu0 %v7283_v32  ;;  %8213 = vmatpush3.msra.mxu1 %v7315_v30  ;;  %v7306_v63 = vld [vmem:[%s10593_s16 + $0x320] sm:$0xff]  ;;  %v7321_v15 = vld [vmem:[%s10593_s16 + $0x398] sm:$0xff]  ;;  %v10628_v40 = vld [vmem:[#allocation47_spill] sm:$0xff]  ;;  %v7119_v30 = vmul.f32 %v9899_v57, %v9763_v47 }
 0xc68   :  { %8179 = vmatprep.subr.mxu0 %v7298_v48  ;;  %8214 = vmatprep.subr.mxu1 %v7330_v62  ;;  %v7114_v5 = vmul.f32 %v9902_v28, %v10628_v40  ;;  %v7273_v1 = vld [vmem:[%s10593_s16 + $0x218] sm:$0xff]  ;;  %v7288_v32 = vld [vmem:[%s10593_s16 + $0x290] sm:$0xff]  ;;  %v7148_v28 = vadd.f32 %v9924_v14, %v7116_v3  ;;  %v7121_v62 = vmul.f32 %v9880_v29, %v9814_v46  ;;  %v7319_v47 = vld [vmem:[%s10593_s16 + $0x388] sm:$0xff] }
 0xc69   :  { %8180 = vmatpush3.msra.mxu0 %v7282_v61  ;;  %8215 = vmatpush3.msra.mxu1 %v7314_v6  ;;  %v7305_v56 = vld [vmem:[%s10593_s16 + $0x318] sm:$0xff]  ;;  %v7320_v18 = vld [vmem:[%s10593_s16 + $0x390] sm:$0xff]  ;;  %v7151_v57 = vadd.f32 %v9915_v33, %v7119_v30  ;;  %v7271_v14 = vld [vmem:[%s10593_s16 + $0x208] sm:$0xff] }
 0xc6a   :  { %8181 = vmatprep.subr.mxu0 %v7297_v55  ;;  %8216 = vmatprep.subr.mxu1 %v7329_v44  ;;  %v7146_v12 = vadd.f32 %v9921_v20, %v7114_v5  ;;  %v7272_v60 = vld [vmem:[%s10593_s16 + $0x210] sm:$0xff]  ;;  %v7287_v20 = vld [vmem:[%s10593_s16 + $0x288] sm:$0xff]  ;;  %v7153_v29 = vadd.f32 %v9918_v16, %v7121_v62  ;;  %v7286_v10 = vld [vmem:[%s10593_s16 + $0x280] sm:$0xff]  ;;  %v7180_v6 = vmul.f32 0.01, %v7148_v28  ;;  %vm7164_vm13 = vcmp.ge.f32.partialorder %v7148_v28, 0.0 }
 0xc6b   :  { %8182 = vmatpush3.msra.mxu0 %v7281_v58  ;;  %8217 = vmatpush3.msra.mxu1 %v7313_v36  ;;  %v7304_v48 = vld [vmem:[%s10593_s16 + $0x310] sm:$0xff]  ;;  %v7303_v46 = vld [vmem:[%s10593_s16 + $0x308] sm:$0xff]  ;;  %v7318_v33 = vld [vmem:[%s10593_s16 + $0x380] sm:$0xff]  ;;  %v7183_v44 = vmul.f32 0.01, %v7151_v57  ;;  %vm7167_vm14 = vcmp.ge.f32.partialorder %v7151_v57, 0.0 }
 0xc6c   :  { %8183 = vmatprep.subr.mxu0 %v7296_v13  ;;  %8218 = vmatprep.subr.mxu1 %v7328_v23  ;;  %v7178_v61 = vmul.f32 0.01, %v7146_v12  ;;  %v7270_v55 = vld [vmem:[%s10593_s16 + $0x200] sm:$0xff]  ;;  %vm7162_vm12 = vcmp.ge.f32.partialorder %v7146_v12, 0.0  ;;  %v7365_v58 = vld [vmem:[%s10593_s16 + $0x4f8] sm:$0xff]  ;;  %vm7169_vm15 = vcmp.ge.f32.partialorder %v7153_v29, 0.0 }
 0xc6d   :  { %8184 = vmatpush3.msra.mxu0 %v7280_v9  ;;  %8219 = vmatpush3.msra.mxu1 %v7312_v24  ;;  %v7302_v16 = vld [vmem:[%s10593_s16 + $0x300] sm:$0xff]  ;;  %v7397_v36 = vld [vmem:[%s10593_s16 + $0x5f8] sm:$0xff]  ;;  %v7185_v13 = vmul.f32 0.01, %v7153_v29  ;;  %v7196_v9 = vsel %vm7164_vm13, %v7148_v28, %v7180_v6  ;;  %v7375_v40 = vld [vmem:[%s10593_s16 + $0x548] sm:$0xff] }
 0xc6e   :  { %8185 = vmatprep.subr.mxu0 %v7295_v2  ;;  %8220 = vmatprep.subr.mxu1 %v7327_v4  ;;  %v7194_v23 = vsel %vm7162_vm12, %v7146_v12, %v7178_v61  ;;  %v7349_v24 = vld [vmem:[%s10593_s16 + $0x478] sm:$0xff]  ;;  %v7199_v4 = vsel %vm7167_vm14, %v7151_v57, %v7183_v44  ;;  %v7358_v5 = vld [vmem:[%s10593_s16 + $0x4c0] sm:$0xff]  ;;  %v7356_v30 = vld [vmem:[%s10593_s16 + $0x4b0] sm:$0xff] }
 0xc6f   :  { %8186 = vmatpush3.msra.mxu0 %v7279_v17  ;;  %8221 = vmatpush3.msra.mxu1 %v7311_v37  ;;  %v7381_v2 = vld [vmem:[%s10593_s16 + $0x578] sm:$0xff]  ;;  %v7364_v17 = vld [vmem:[%s10593_s16 + $0x4f0] sm:$0xff]  ;;  %v7390_v3 = vld [vmem:[%s10593_s16 + $0x5c0] sm:$0xff] }
 0xc70   :  { %8187 = vmatprep.subr.mxu0 %v7294_v38  ;;  %8222 = vmatprep.subr.mxu1 %v7326_v11  ;;  %v7396_v37 = vld [vmem:[%s10593_s16 + $0x5f0] sm:$0xff]  ;;  %v7201_v38 = vsel %vm7169_vm15, %v7153_v29, %v7185_v13  ;;  %v7341_v12 = vld [vmem:[%s10593_s16 + $0x438] sm:$0xff]  ;;  %v7339_v57 = vld [vmem:[%s10593_s16 + $0x428] sm:$0xff] }
 0xc71   :  { %8188 = vmatpush3.msra.mxu0 %v7278_v25  ;;  %8223 = vmatpush3.msra.mxu1 %v7310_v54  ;;  %v7348_v11 = vld [vmem:[%s10593_s16 + $0x470] sm:$0xff]  ;;  %v7363_v54 = vld [vmem:[%s10593_s16 + $0x4e8] sm:$0xff]  ;;  %v7373_v28 = vld [vmem:[%s10593_s16 + $0x538] sm:$0xff] }
 0xc72   :  { %8189 = vmatprep.subr.mxu0 %v7293_v39  ;;  %8224 = vmatprep.subr.mxu1 %v7325_v0  ;;  %v7380_v25 = vld [vmem:[%s10593_s16 + $0x570] sm:$0xff]  ;;  %v7395_v39 = vld [vmem:[%s10593_s16 + $0x5e8] sm:$0xff]  ;;  %v7386_v29 = vld [vmem:[%s10593_s16 + $0x5a0] sm:$0xff] }
 0xc73   :  { %8190 = vmatpush3.msra.mxu0 %v7277_v45  ;;  %8225 = vmatpush3.msra.mxu1 %v7309_v59  ;;  %v7347_v0 = vld [vmem:[%s10593_s16 + $0x468] sm:$0xff]  ;;  %v7362_v59 = vld [vmem:[%s10593_s16 + $0x4e0] sm:$0xff]  ;;  %v7372_v62 = vld [vmem:[%s10593_s16 + $0x530] sm:$0xff] }
 0xc74   :  { %8191 = vmatprep.subr.mxu0 %v7292_v22  ;;  %8226 = vmatprep.subr.mxu1 %v7324_v31  ;;  %v7379_v45 = vld [vmem:[%s10593_s16 + $0x568] sm:$0xff]  ;;  %v7394_v22 = vld [vmem:[%s10593_s16 + $0x5e0] sm:$0xff]  ;;  %v7353_v61 = vld [vmem:[%s10593_s16 + $0x498] sm:$0xff] }
 0xc75   :  { %8192 = vmatpush3.msra.mxu0 %v7276_v19  ;;  %8227 = vmatpush3.msra.mxu1 %v7308_v50  ;;  %v7346_v31 = vld [vmem:[%s10593_s16 + $0x460] sm:$0xff]  ;;  %v7361_v50 = vld [vmem:[%s10593_s16 + $0x4d8] sm:$0xff]  ;;  %v7352_v44 = vld [vmem:[%s10593_s16 + $0x490] sm:$0xff] }
 0xc76   :  { %8193 = vmatprep.subr.mxu0 %v7291_v42  ;;  %8228 = vmatprep.subr.mxu1 %v7323_v53  ;;  %v7378_v19 = vld [vmem:[%s10593_s16 + $0x560] sm:$0xff]  ;;  %v7393_v42 = vld [vmem:[%s10593_s16 + $0x5d8] sm:$0xff]  ;;  %v7368_v13 = vld [vmem:[%s10593_s16 + $0x510] sm:$0xff] }
 0xc77   :  { %8194 = vmatpush3.msra.mxu0 %v7275_v49  ;;  %8229 = vmatpush3.msra.mxu1 %v7307_v51  ;;  %v7345_v53 = vld [vmem:[%s10593_s16 + $0x458] sm:$0xff]  ;;  %v7360_v51 = vld [vmem:[%s10593_s16 + $0x4d0] sm:$0xff] }
 0xc78   :  { %8195 = vmatprep.subr.mxu0 %v7290_v21  ;;  %8230 = vmatprep.subr.mxu1 %v7322_v27  ;;  %v7377_v49 = vld [vmem:[%s10593_s16 + $0x558] sm:$0xff]  ;;  %v7392_v21 = vld [vmem:[%s10593_s16 + $0x5d0] sm:$0xff] }
 0xc79   :  { %8196 = vmatpush3.msra.mxu0 %v7274_v34  ;;  %8231 = vmatpush3.msra.mxu1 %v7306_v63  ;;  %v7344_v27 = vld [vmem:[%s10593_s16 + $0x450] sm:$0xff]  ;;  %v7359_v63 = vld [vmem:[%s10593_s16 + $0x4c8] sm:$0xff]  ;;  %v7385_v6 = vld [vmem:[%s10593_s16 + $0x598] sm:$0xff] }
 0xc7a   :  { %8197 = vmatprep.subr.mxu0 %v7289_v8  ;;  %8232 = vmatprep.subr.mxu1 %v7321_v15  ;;  %v7376_v34 = vld [vmem:[%s10593_s16 + $0x550] sm:$0xff]  ;;  %v7391_v8 = vld [vmem:[%s10593_s16 + $0x5c8] sm:$0xff] }
 0xc7b   :  { %8198 = vmatpush3.msra.mxu0 %v7273_v1  ;;  %8233 = vmatpush3.msra.mxu1 %v7305_v56  ;;  %v7343_v15 = vld [vmem:[%s10593_s16 + $0x448] sm:$0xff]  ;;  %v7342_v1 = vld [vmem:[%s10593_s16 + $0x440] sm:$0xff] }
 0xc7c   :  { %8199 = vmatprep.subr.mxu0 %v7288_v32  ;;  %8234 = vmatprep.subr.mxu1 %v7320_v18  ;;  %v7374_v56 = vld [vmem:[%s10593_s16 + $0x540] sm:$0xff]  ;;  %v7357_v32 = vld [vmem:[%s10593_s16 + $0x4b8] sm:$0xff] }
 0xc7d   :  { %8200 = vmatpush3.msra.mxu0 %v7272_v60  ;;  %8235 = vmatpush3.msra.mxu1 %v7304_v48  ;;  %v7389_v18 = vld [vmem:[%s10593_s16 + $0x5b8] sm:$0xff]  ;;  %v7388_v60 = vld [vmem:[%s10593_s16 + $0x5b0] sm:$0xff] }
 0xc7e   :  { %8201 = vmatprep.subr.mxu0 %v7287_v20  ;;  %8236 = vmatprep.subr.mxu1 %v7319_v47  ;;  %v7340_v48 = vld [vmem:[%s10593_s16 + $0x430] sm:$0xff]  ;;  %v7355_v20 = vld [vmem:[%s10593_s16 + $0x4a8] sm:$0xff] }
 0xc7f   :  { %8202 = vmatpush3.msra.mxu0 %v7271_v14  ;;  %8237 = vmatpush3.msra.mxu1 %v7303_v46  ;;  %v7387_v47 = vld [vmem:[%s10593_s16 + $0x5a8] sm:$0xff]  ;;  %v7354_v46 = vld [vmem:[%s10593_s16 + $0x4a0] sm:$0xff] }
 0xc80   :  { %8203 = vmatprep.subr.mxu0 %v7286_v10  ;;  %8238 = vmatprep.subr.mxu1 %v7318_v33  ;;  %v7371_v14 = vld [vmem:[%s10593_s16 + $0x528] sm:$0xff]  ;;  %v7338_v10 = vld [vmem:[%s10593_s16 + $0x420] sm:$0xff] }
 0xc81   :  { %8204 = vmatpush3.msra.mxu0 %v7270_v55  ;;  %8239 = vmatpush3.msra.mxu1 %v7302_v16  ;;  %v7370_v33 = vld [vmem:[%s10593_s16 + $0x520] sm:$0xff]  ;;  %v7337_v55 = vld [vmem:[%s10593_s16 + $0x418] sm:$0xff] }
 0xc82   :  { %7674 = vmatmul.mubr.f32.vlgmr.msra.gmra.mxu0 %v7194_v23  ;;  %7744 = vmatmul.mubr.f32.vlgmr.msra.gmra.mxu1 %v7196_v9  ;;  %v7369_v16 = vld [vmem:[%s10593_s16 + $0x518] sm:$0xff]  ;;  %v7351_v23 = vld [vmem:[%s10593_s16 + $0x488] sm:$0xff] }
 0xc83   :  { %8243 = vmatprep.subr.mxu0 %v7365_v58  ;;  %8278 = vmatprep.subr.mxu1 %v7397_v36  ;;  %v7384_v58 = vld [vmem:[%s10593_s16 + $0x590] sm:$0xff]  ;;  %v7383_v9 = vld [vmem:[%s10593_s16 + $0x588] sm:$0xff] }
 0xc84   :  { %8244 = vmatpush3.msra.mxu0 %v7349_v24  ;;  %7813 = vmatprep.mubr.f32.mxu0 %v7199_v4  ;;  %v7336_v36 = vld [vmem:[%s10593_s16 + $0x410] sm:$0xff]  ;;  %v7335_v24 = vld [vmem:[%s10593_s16 + $0x408] sm:$0xff]  ;;  %v7350_v4 = vld [vmem:[%s10593_s16 + $0x480] sm:$0xff] }
 0xc85   :  { %8279 = vmatpush3.msra.mxu1 %v7381_v2  ;;  %7883 = vmatprep.mubr.f32.mxu1 %v7201_v38  ;;  %v7367_v2 = vld [vmem:[%s10593_s16 + $0x508] sm:$0xff]  ;;  %v7184_v38 = vmul.f32 0.01, %v9969_v7 }
 0xc86   :  { %8245 = vmatprep.subr.mxu0 %v7364_v17  ;;  %8280 = vmatprep.subr.mxu1 %v7396_v37  ;;  %v7382_v17 = vld [vmem:[%s10593_s16 + $0x580] sm:$0xff]  ;;  %v7182_v37 = vmul.f32 0.01, %v9966_v43 }
 0xc87   :  { %8246 = vmatpush3.msra.mxu0 %v7348_v11  ;;  %8281 = vmatpush3.msra.mxu1 %v7380_v25  ;;  %v7334_v11 = vld [vmem:[%s10593_s16 + $0x400] sm:$0xff] }
 0xc88   :  { %8247 = vmatprep.subr.mxu0 %v7363_v54  ;;  %8282 = vmatprep.subr.mxu1 %v7395_v39  ;;  %v7366_v25 = vld [vmem:[%s10593_s16 + $0x500] sm:$0xff]  ;;  %v7187_v54 = vmul.f32 0.01, %v9994_v26  ;;  %v7429_v39 = vld [vmem:[%s10593_s16 + $0x6f8] sm:$0xff] }
 0xc89   :  { %8248 = vmatpush3.msra.mxu0 %v7347_v0  ;;  %8283 = vmatpush3.msra.mxu1 %v7379_v45  ;;  %v7461_v0 = vld [vmem:[%s10593_s16 + $0x7f8] sm:$0xff]  ;;  %v7189_v45 = vmul.f32 0.01, %v9998_v52 }
 0xc8a   :  { %8249 = vmatprep.subr.mxu0 %v7362_v59  ;;  %8284 = vmatprep.subr.mxu1 %v7394_v22  ;;  %v7198_v59 = vsel %vm7166_vm0, %v9966_v43, %v7182_v37  ;;  %v7200_v22 = vsel %vm7168_vm1, %v9969_v7, %v7184_v38  ;;  %v7428_v43 = vld [vmem:[%s10593_s16 + $0x6f0] sm:$0xff] }
 0xc8b   :  { %8250 = vmatpush3.msra.mxu0 %v7346_v31  ;;  %8285 = vmatpush3.msra.mxu1 %v7378_v19  ;;  %v7413_v31 = vld [vmem:[%s10593_s16 + $0x678] sm:$0xff]  ;;  %v7460_v7 = vld [vmem:[%s10593_s16 + $0x7f0] sm:$0xff] }
 0xc8c   :  { %8251 = vmatprep.subr.mxu0 %v7361_v50  ;;  %8286 = vmatprep.subr.mxu1 %v7393_v42  ;;  %v7445_v19 = vld [vmem:[%s10593_s16 + $0x778] sm:$0xff]  ;;  %v7203_v50 = vsel %vm7171_vm2, %v9994_v26, %v7187_v54  ;;  %v7205_v42 = vsel %vm7173_vm4, %v9998_v52, %v7189_v45  ;;  %v7444_v26 = vld [vmem:[%s10593_s16 + $0x770] sm:$0xff]  ;;  %v7411_v52 = vld [vmem:[%s10593_s16 + $0x668] sm:$0xff] }
 0xc8d   :  { %8252 = vmatpush3.msra.mxu0 %v7345_v53  ;;  %8287 = vmatpush3.msra.mxu1 %v7377_v49  ;;  %v7412_v53 = vld [vmem:[%s10593_s16 + $0x670] sm:$0xff]  ;;  %v7427_v49 = vld [vmem:[%s10593_s16 + $0x6e8] sm:$0xff] }
 0xc8e   :  { %8253 = vmatprep.subr.mxu0 %v7360_v51  ;;  %8288 = vmatprep.subr.mxu1 %v7392_v21  ;;  %v7459_v51 = vld [vmem:[%s10593_s16 + $0x7e8] sm:$0xff]  ;;  %v7416_v37 = vld [vmem:[%s10593_s16 + $0x690] sm:$0xff] }
 0xc8f   :  { %8254 = vmatpush3.msra.mxu0 %v7344_v27  ;;  %8289 = vmatpush3.msra.mxu1 %v7376_v34  ;;  %v7443_v21 = vld [vmem:[%s10593_s16 + $0x768] sm:$0xff]  ;;  %v7426_v27 = vld [vmem:[%s10593_s16 + $0x6e0] sm:$0xff]  ;;  %v7448_v38 = vld [vmem:[%s10593_s16 + $0x790] sm:$0xff] }
 0xc90   :  { %8255 = vmatprep.subr.mxu0 %v7359_v63  ;;  %8290 = vmatprep.subr.mxu1 %v7391_v8  ;;  %v7458_v34 = vld [vmem:[%s10593_s16 + $0x7e0] sm:$0xff]  ;;  %v7415_v54 = vld [vmem:[%s10593_s16 + $0x688] sm:$0xff] }
 0xc91   :  { %8256 = vmatpush3.msra.mxu0 %v7343_v15  ;;  %8291 = vmatpush3.msra.mxu1 %v7375_v40  ;;  %v7410_v63 = vld [vmem:[%s10593_s16 + $0x660] sm:$0xff]  ;;  %v7425_v15 = vld [vmem:[%s10593_s16 + $0x6d8] sm:$0xff]  ;;  %v7431_v45 = vld [vmem:[%s10593_s16 + $0x708] sm:$0xff] }
 0xc92   :  { %8257 = vmatprep.subr.mxu0 %v7358_v5  ;;  %8292 = vmatprep.subr.mxu1 %v7390_v3  ;;  %v7442_v8 = vld [vmem:[%s10593_s16 + $0x760] sm:$0xff]  ;;  %v7457_v40 = vld [vmem:[%s10593_s16 + $0x7d8] sm:$0xff] }
 0xc93   :  { %8258 = vmatpush3.msra.mxu0 %v7342_v1  ;;  %8293 = vmatpush3.msra.mxu1 %v7374_v56  ;;  %v7409_v5 = vld [vmem:[%s10593_s16 + $0x658] sm:$0xff]  ;;  %v7424_v1 = vld [vmem:[%s10593_s16 + $0x6d0] sm:$0xff] }
 0xc94   :  { %8259 = vmatprep.subr.mxu0 %v7357_v32  ;;  %8294 = vmatprep.subr.mxu1 %v7389_v18  ;;  %v7441_v3 = vld [vmem:[%s10593_s16 + $0x758] sm:$0xff]  ;;  %v7456_v56 = vld [vmem:[%s10593_s16 + $0x7d0] sm:$0xff] }
 0xc95   :  { %8260 = vmatpush3.msra.mxu0 %v7341_v12  ;;  %8295 = vmatpush3.msra.mxu1 %v7373_v28  ;;  %v7408_v32 = vld [vmem:[%s10593_s16 + $0x650] sm:$0xff]  ;;  %v7423_v12 = vld [vmem:[%s10593_s16 + $0x6c8] sm:$0xff] }
 0xc96   :  { %8261 = vmatprep.subr.mxu0 %v7356_v30  ;;  %8296 = vmatprep.subr.mxu1 %v7388_v60  ;;  %v7440_v18 = vld [vmem:[%s10593_s16 + $0x750] sm:$0xff]  ;;  %v7455_v28 = vld [vmem:[%s10593_s16 + $0x7c8] sm:$0xff] }
 0xc97   :  { %8262 = vmatpush3.msra.mxu0 %v7340_v48  ;;  %8297 = vmatpush3.msra.mxu1 %v7372_v62  ;;  %v7407_v30 = vld [vmem:[%s10593_s16 + $0x648] sm:$0xff]  ;;  %v7422_v48 = vld [vmem:[%s10593_s16 + $0x6c0] sm:$0xff] }
 0xc98   :  { %8263 = vmatprep.subr.mxu0 %v7355_v20  ;;  %8298 = vmatprep.subr.mxu1 %v7387_v47  ;;  %v7439_v60 = vld [vmem:[%s10593_s16 + $0x748] sm:$0xff]  ;;  %v7454_v62 = vld [vmem:[%s10593_s16 + $0x7c0] sm:$0xff] }
 0xc99   :  { %8264 = vmatpush3.msra.mxu0 %v7339_v57  ;;  %8299 = vmatpush3.msra.mxu1 %v7371_v14  ;;  %v7406_v20 = vld [vmem:[%s10593_s16 + $0x640] sm:$0xff]  ;;  %v7421_v57 = vld [vmem:[%s10593_s16 + $0x6b8] sm:$0xff] }
 0xc9a   :  { %8265 = vmatprep.subr.mxu0 %v7354_v46  ;;  %8300 = vmatprep.subr.mxu1 %v7386_v29  ;;  %v7438_v47 = vld [vmem:[%s10593_s16 + $0x740] sm:$0xff]  ;;  %v7453_v14 = vld [vmem:[%s10593_s16 + $0x7b8] sm:$0xff] }
 0xc9b   :  { %8266 = vmatpush3.msra.mxu0 %v7338_v10  ;;  %8301 = vmatpush3.msra.mxu1 %v7370_v33  ;;  %v7405_v46 = vld [vmem:[%s10593_s16 + $0x638] sm:$0xff]  ;;  %v7420_v10 = vld [vmem:[%s10593_s16 + $0x6b0] sm:$0xff] }
 0xc9c   :  { %8267 = vmatprep.subr.mxu0 %v7353_v61  ;;  %8302 = vmatprep.subr.mxu1 %v7385_v6  ;;  %v7437_v29 = vld [vmem:[%s10593_s16 + $0x738] sm:$0xff]  ;;  %v7452_v33 = vld [vmem:[%s10593_s16 + $0x7b0] sm:$0xff] }
 0xc9d   :  { %8268 = vmatpush3.msra.mxu0 %v7337_v55  ;;  %8303 = vmatpush3.msra.mxu1 %v7369_v16  ;;  %v7404_v61 = vld [vmem:[%s10593_s16 + $0x630] sm:$0xff]  ;;  %v7419_v55 = vld [vmem:[%s10593_s16 + $0x6a8] sm:$0xff] }
 0xc9e   :  { %8269 = vmatprep.subr.mxu0 %v7352_v44  ;;  %8304 = vmatprep.subr.mxu1 %v7384_v58  ;;  %v7436_v6 = vld [vmem:[%s10593_s16 + $0x730] sm:$0xff]  ;;  %v7451_v16 = vld [vmem:[%s10593_s16 + $0x7a8] sm:$0xff] }
 0xc9f   :  { %8270 = vmatpush3.msra.mxu0 %v7336_v36  ;;  %8305 = vmatpush3.msra.mxu1 %v7368_v13  ;;  %v7403_v44 = vld [vmem:[%s10593_s16 + $0x628] sm:$0xff]  ;;  %v7418_v36 = vld [vmem:[%s10593_s16 + $0x6a0] sm:$0xff] }
 0xca0   :  { %8271 = vmatprep.subr.mxu0 %v7351_v23  ;;  %8306 = vmatprep.subr.mxu1 %v7383_v9  ;;  %v7435_v58 = vld [vmem:[%s10593_s16 + $0x728] sm:$0xff]  ;;  %v7450_v13 = vld [vmem:[%s10593_s16 + $0x7a0] sm:$0xff] }
 0xca1   :  { %8272 = vmatpush3.msra.mxu0 %v7335_v24  ;;  %8307 = vmatpush3.msra.mxu1 %v7367_v2  ;;  %v7402_v23 = vld [vmem:[%s10593_s16 + $0x620] sm:$0xff]  ;;  %v7417_v24 = vld [vmem:[%s10593_s16 + $0x698] sm:$0xff] }
 0xca2   :  { %8273 = vmatprep.subr.mxu0 %v7350_v4  ;;  %8308 = vmatprep.subr.mxu1 %v7382_v17  ;;  %v7434_v9 = vld [vmem:[%s10593_s16 + $0x720] sm:$0xff]  ;;  %v7449_v2 = vld [vmem:[%s10593_s16 + $0x798] sm:$0xff] }
 0xca3   :  { %8274 = vmatpush3.msra.mxu0 %v7334_v11  ;;  %8309 = vmatpush3.msra.mxu1 %v7366_v25  ;;  %v7401_v4 = vld [vmem:[%s10593_s16 + $0x618] sm:$0xff]  ;;  %v7400_v11 = vld [vmem:[%s10593_s16 + $0x610] sm:$0xff] }
 0xca4   :  { %7814 = vmatmul.mubr.f32.vlgmr.msra.gmra.mxu0 %v7198_v59  ;;  %7884 = vmatmul.mubr.f32.vlgmr.msra.gmra.mxu1 %v7200_v22  ;;  %v7433_v17 = vld [vmem:[%s10593_s16 + $0x718] sm:$0xff]  ;;  %v7432_v25 = vld [vmem:[%s10593_s16 + $0x710] sm:$0xff]  ;;  %v7414_v59 = vld [vmem:[%s10593_s16 + $0x680] sm:$0xff] }
 0xca5   :  { %8313 = vmatprep.subr.mxu0 %v7429_v39  ;;  %8348 = vmatprep.subr.mxu1 %v7461_v0  ;;  %v7447_v39 = vld [vmem:[%s10593_s16 + $0x788] sm:$0xff]  ;;  %v7446_v22 = vld [vmem:[%s10593_s16 + $0x780] sm:$0xff] }
 0xca6   :  { %8314 = vmatpush3.msra.mxu0 %v7413_v31  ;;  %7953 = vmatprep.mubr.f32.mxu0 %v7203_v50  ;;  %v7399_v0 = vld [vmem:[%s10593_s16 + $0x608] sm:$0xff]  ;;  %v7186_v31 = vmul.f32 0.01, %v10007_v35  ;;  %v7398_v50 = vld [vmem:[%s10593_s16 + $0x600] sm:$0xff] }
 0xca7   :  { %8349 = vmatpush3.msra.mxu1 %v7445_v19  ;;  %8023 = vmatprep.mubr.f32.mxu1 %v7205_v42  ;;  %v7188_v19 = vmul.f32 0.01, %v10023_v41 }
 0xca8   :  { %8315 = vmatprep.subr.mxu0 %v7428_v43  ;;  %8350 = vmatprep.subr.mxu1 %v7460_v7  ;;  %v7430_v43 = vld [vmem:[%s10593_s16 + $0x700] sm:$0xff]  ;;  %v7202_v7 = vsel %vm7170_vm5, %v10007_v35, %v7186_v31  ;;  %s8896_s16 = smov 112  }
 0xca9   :  { %8316 = vmatpush3.msra.mxu0 %v7412_v53  ;;  %8351 = vmatpush3.msra.mxu1 %v7444_v26  ;;  %v7204_v42 = vsel %vm7172_vm6, %v10023_v41, %v7188_v19 }
 0xcaa   :  { %8317 = vmatprep.subr.mxu0 %v7427_v49  ;;  %8352 = vmatprep.subr.mxu1 %v7459_v51 }
 0xcab   :  { %8318 = vmatpush3.msra.mxu0 %v7411_v52  ;;  %8353 = vmatpush3.msra.mxu1 %v7443_v21  ;;  %v8099_v21 = vld [vmem:[#allocation26] ss:$0 sm:$0xff] }
 0xcac   :  { %8319 = vmatprep.subr.mxu0 %v7426_v27  ;;  %8354 = vmatprep.subr.mxu1 %v7458_v34 }
 0xcad   :  { %8320 = vmatpush3.msra.mxu0 %v7410_v63  ;;  %8355 = vmatpush3.msra.mxu1 %v7442_v8 }
 0xcae   :  { %8321 = vmatprep.subr.mxu0 %v7425_v15  ;;  %8356 = vmatprep.subr.mxu1 %v7457_v40 }
 0xcaf   :  { %8322 = vmatpush3.msra.mxu0 %v7409_v5  ;;  %8357 = vmatpush3.msra.mxu1 %v7441_v3 }
 0xcb0   :  { %8323 = vmatprep.subr.mxu0 %v7424_v1  ;;  %8358 = vmatprep.subr.mxu1 %v7456_v56 }
 0xcb1   :  { %8324 = vmatpush3.msra.mxu0 %v7408_v32  ;;  %8359 = vmatpush3.msra.mxu1 %v7440_v18 }
 0xcb2   :  { %8325 = vmatprep.subr.mxu0 %v7423_v12  ;;  %8360 = vmatprep.subr.mxu1 %v7455_v28 }
 0xcb3   :  { %8326 = vmatpush3.msra.mxu0 %v7407_v30  ;;  %8361 = vmatpush3.msra.mxu1 %v7439_v60 }
 0xcb4   :  { %8327 = vmatprep.subr.mxu0 %v7422_v48  ;;  %8362 = vmatprep.subr.mxu1 %v7454_v62 }
 0xcb5   :  { %8328 = vmatpush3.msra.mxu0 %v7406_v20  ;;  %8363 = vmatpush3.msra.mxu1 %v7438_v47 }
 0xcb6   :  { %8329 = vmatprep.subr.mxu0 %v7421_v57  ;;  %8364 = vmatprep.subr.mxu1 %v7453_v14 }
 0xcb7   :  { %8330 = vmatpush3.msra.mxu0 %v7405_v46  ;;  %8365 = vmatpush3.msra.mxu1 %v7437_v29 }
 0xcb8   :  { %8331 = vmatprep.subr.mxu0 %v7420_v10  ;;  %8366 = vmatprep.subr.mxu1 %v7452_v33 }
 0xcb9   :  { %8332 = vmatpush3.msra.mxu0 %v7404_v61  ;;  %8367 = vmatpush3.msra.mxu1 %v7436_v6 }
 0xcba   :  { %8333 = vmatprep.subr.mxu0 %v7419_v55  ;;  %8368 = vmatprep.subr.mxu1 %v7451_v16 }
 0xcbb   :  { %8334 = vmatpush3.msra.mxu0 %v7403_v44  ;;  %8369 = vmatpush3.msra.mxu1 %v7435_v58 }
 0xcbc   :  { %8335 = vmatprep.subr.mxu0 %v7418_v36  ;;  %8370 = vmatprep.subr.mxu1 %v7450_v13 }
 0xcbd   :  { %8336 = vmatpush3.msra.mxu0 %v7402_v23  ;;  %8371 = vmatpush3.msra.mxu1 %v7434_v9 }
 0xcbe   :  { %8337 = vmatprep.subr.mxu0 %v7417_v24  ;;  %8372 = vmatprep.subr.mxu1 %v7449_v2 }
 0xcbf   :  { %8338 = vmatpush3.msra.mxu0 %v7401_v4  ;;  %8373 = vmatpush3.msra.mxu1 %v7433_v17 }
 0xcc0   :  { %8339 = vmatprep.subr.mxu0 %v7416_v37  ;;  %8374 = vmatprep.subr.mxu1 %v7448_v38 }
 0xcc1   :  { %8340 = vmatpush3.msra.mxu0 %v7400_v11  ;;  %8375 = vmatpush3.msra.mxu1 %v7432_v25 }
 0xcc2   :  { %8341 = vmatprep.subr.mxu0 %v7415_v54  ;;  %8376 = vmatprep.subr.mxu1 %v7447_v39 }
 0xcc3   :  { %8342 = vmatpush3.msra.mxu0 %v7399_v0  ;;  %8377 = vmatpush3.msra.mxu1 %v7431_v45 }
 0xcc4   :  { %8343 = vmatprep.subr.mxu0 %v7414_v59  ;;  %8378 = vmatprep.subr.mxu1 %v7446_v22 }
 0xcc5   :  { %8344 = vmatpush3.msra.mxu0 %v7398_v50  ;;  %8379 = vmatpush3.msra.mxu1 %v7430_v43 }
 0xcc6   :  { %7954 = vmatmul.mubr.f32.vlgmr.msra.gmra.mxu0 %v7202_v7  ;;  %8024 = vmatmul.mubr.f32.vlgmr.msra.gmra.mxu1 %v7204_v42 }
 0xd21   :  { %v8135_v53 = vpop.f32.mrf.mxu0  ;;  %v8170_v49 = vpop.f32.mrf.mxu1 }
 0xd23   :  { %v8136_v26 = vpop.f32.mrf.mxu0  ;;  %v8171_v27 = vpop.f32.mrf.mxu1 }
 0xd24   :  { %v8137_v52 = vadd.f32 %v8136_v26, %v8135_v53  ;;  %v8172_v40 = vadd.f32 %v8171_v27, %v8170_v49 }
 0xd26   :  { %v7536_v63 = vadd.f32 %v8137_v52, %v8099_v21 }
 0xd28   :  { %v7606_v3 = vadd.f32 %v8172_v40, %v7536_v63 }
 0xd42   :  { %v8205_v51 = vpop.f32.mrf.mxu0  ;;  %v8240_v8 = vpop.f32.mrf.mxu1 }
 0xd44   :  { %v8206_v34 = vpop.f32.mrf.mxu0  ;;  %v8241_v1 = vpop.f32.mrf.mxu1 }
 0xd45   :  { %v8207_v5 = vadd.f32 %v8206_v34, %v8205_v51  ;;  %v8242_v32 = vadd.f32 %v8241_v1, %v8240_v8 }
 0xd47   :  { %v7676_v56 = vadd.f32 %v8207_v5, %v7606_v3 }
 0xd49   :  { %v7746_v12 = vadd.f32 %v8242_v32, %v7676_v56 }
 0xd64   :  { %v8275_v15 = vpop.f32.mrf.mxu0  ;;  %v8310_v41 = vpop.f32.mrf.mxu1 }
 0xd66   :  { %v8276_v35 = vpop.f32.mrf.mxu0  ;;  %v8311_v28 = vpop.f32.mrf.mxu1 }
 0xd67   :  { %v8277_v18 = vadd.f32 %v8276_v35, %v8275_v15  ;;  %v8312_v62 = vadd.f32 %v8311_v28, %v8310_v41 }
 0xd69   :  { %v7816_v30 = vadd.f32 %v8277_v18, %v7746_v12 }
 0xd6b   :  { %v7886_v57 = vadd.f32 %v8312_v62, %v7816_v30 }
 0xd86   :  { %v8345_v60 = vpop.f32.mrf.mxu0  ;;  %v8380_v48 = vpop.f32.mrf.mxu1 }
 0xd88   :  { %v8346_v20 = vpop.f32.mrf.mxu0  ;;  %v8381_v47 = vpop.f32.mrf.mxu1 }
 0xd89   :  { %v8347_v14 = vadd.f32 %v8346_v20, %v8345_v60  ;;  %v8382_v29 = vadd.f32 %v8381_v47, %v8380_v48 }
 0xd8b   :  { %v7956_v46 = vadd.f32 %v8347_v14, %v7886_v57 }
 0xd8d   :  { %v8026_v10 = vadd.f32 %v8382_v29, %v7956_v46 }
 0xd8f   :  { %v8030_v33 = vmul.f32 0.5, %v8026_v10  ;;  %8042 = vrot.lane.b32.xlu1 %v8026_v10, %s8896_s16  ;;  %8040 = vst.msk [vmem:[#allocation29] sm:$0x3] %vm8039_vm3, %v8026_v10 }
 0xd91   :  { %v8031_v61 = vmul.f32 1.442695, %v8030_v33 }
 0xd93   :  { %8442 = vpow2.f32 %v8031_v61 }
 0xd94   :  { %8795 = shalt.err (!%p8792_p5)
}
 0xd95   :  { %8056 = dma.vmem_to_hbm [thread:$0]  %s8054_s2, 32, %s10596_s19, [#allocation4]  }
 0xd96   :  { %s8898_s24 = smov [#allocation30]  }
 0xd97   :  { %s8063_s7 = sshll.u32 %s8898_s24, 4  ;;  %s8064_s7 = int_to_ptr.vmem [resolvable:$true] %s8063_s7 }
 0xd98   :  { %s8804_s12 = scalar_lea.vmem %s8064_s7, 32  ;;  %p8809_p7 = scmp.lt.s32.totalorder %s8064_s7, %s8064_s7 }
 0xd99   :  { %p8805_p6 = scmp.ne.s32.totalorder %s8064_s7, %s8804_s12  ;;  %p8810_p8 = scmp.lt.s32.totalorder %s8804_s12, %s8804_s12 }
 0xd9b   :  { %p8811_p9 = por %p8810_p8, %p8809_p7 }
 0xd9d   :  { %p8812_p10 = pnand %p8811_p9, %p8805_p6 }
 0xda0   :  { %v8443_v6 = vpop.eup %8442 }
 0xda1   :  { %8034 = vrot.lane.b32.xlu0 %v8443_v6, %s8896_s16 }
 0xe01   :  { %v8043_v55 = vpop.permute.xlu1 %8042 }
 0xe02   :  { %8045 = vst.msk [vmem:[#allocation30] sm:$0x3] %vm8039_vm3, %v8043_v55 }
 0xe03   :  { %8815 = shalt.err (!%p8812_p10)
}
 0xe04   :  { %8066 = dma.vmem_to_hbm [thread:$0]  %s8064_s7, 32, %s10597_s20, [#allocation31]   ;;  %v8029_v16 = vld [vmem:[#allocation28] sm:$0x3] }
 0xe05   :  { %s8899_s19 = smov [#allocation32]  }
 0xe06   :  { %s8073_s25 = sshll.u32 %s8899_s19, 4  ;;  %s8074_s25 = int_to_ptr.vmem [resolvable:$true] %s8073_s25 }
 0xe07   :  { %s8824_s29 = scalar_lea.vmem %s8074_s25, 32  ;;  %p8829_p12 = scmp.lt.s32.totalorder %s8074_s25, %s8074_s25 }
 0xe08   :  { %p8825_p11 = scmp.ne.s32.totalorder %s8074_s25, %s8824_s29  ;;  %p8830_p13 = scmp.lt.s32.totalorder %s8824_s29, %s8824_s29 }
 0xe0a   :  { %p8831_p0 = por %p8830_p13, %p8829_p12 }
 0xe0c   :  { %p8832_p1 = pnand %p8831_p0, %p8825_p11 }
 0xe13   :  { %v8035_v44 = vpop.permute.xlu0 %8034 }
 0xe14   :  { %v8037_v58 = vmul.f32 %v8035_v44, %v8029_v16 }
 0xe16   :  { %v8038_v36 = vadd.f32 %v8037_v58, %v8026_v10 }
 0xe18   :  { %8046 = vst.msk [vmem:[#allocation32] sm:$0x3] %vm8039_vm3, %v8038_v36 }
 0xe19   :  { %8835 = shalt.err (!%p8832_p1)
}
 0xe1a   :  { %8076 = dma.vmem_to_hbm [thread:$0]  %s8074_s25, 32, %s10598_s21, [#allocation31]  }
 0xe1b   :  { %8862 = dma.done.wait [#allocation4], 32  }
 0xe1c   :  { %8863 = vsyncadd [#allocation4], 4294967264 }
 0xe1d   :  { %8864 = dma.done.wait [#allocation31], 64  }
 0xe1e   :  { %8865 = vsyncadd [#allocation31], 4294967232 }
 0xe1f   :  { %8086 = vsyncpa [#allocation3], 1 }
 0xe20   :  { %8087 = vsyncpa [#allocation6], 1 }
 0xe21   :  { %8088 = vsyncpa [#allocation9], 1 }
 0xe22   :  { %8089 = vsyncpa [#allocation12], 1 }
 0xe23   :  { %8090 = vsyncpa [#allocation15], 1 }
 0xe24   :  { %8091 = vsyncpa [#allocation18], 1 }
 0xe25   :  { %8092 = vsyncpa [#allocation21], 1 }
 0xe26   :  { %8093 = vsyncpa [#allocation24], 1 }
 0xe27   :  { %8094 = vsyncpa [#allocation27], 1 }
 0xe28   :  { %8095 = vsyncpa [#allocation4], 1 }
 0xe29   :  { %8096 = vsyncpa [#allocation31], 1 }

</bundles_post_ra>
